<compile_context>
chip_gen: v5e
topology: v5e:2x2
jax: 0.10.0
libtpu: 0.0.40
codegen_flags: <defaults>
</compile_context>

<pallas_src>
import functools

import numpy as np
import jax
import jax.numpy as jnp
from jax.experimental import pallas as pl
from jax.experimental.pallas import tpu as pltpu

NGF = 16          # small ngf for the demo (original uses 64; same structure)
NC = 3
NUM_LABEL = 16    # int(np.max(salinas_gt)) == 16 classes
LRELU_SLOPE = 0.2
BN_EPS = 1e-5


# ---------------------------------------------------------------------------
# Pallas kernels
# ---------------------------------------------------------------------------
def _conv_s2d_kernel(*refs, Ws, M, apply_lrelu, with_stats):
    """Fused 4x4/stride-2 conv on a space-to-depth input (one image per step).

    x_ref:   (1, R, 4*Cin) bf16, R = (Ho+2)*Ws flattened s2d rows (with guard).
    w_ref:   (4, 4*Cin, Cout) bf16, one slab per 2x2 tap.
    out_ref: (1, M, Cout) f32, M = Ho*Ws (rows with column index Ws-1 are
             overrun garbage and are cropped by the wrapper).
    For BN layers additionally: mask (M,1) of valid rows, per-image channel
    sum and sum-of-squares outputs (1,1,Cout) each.
    """
    if with_stats:
        x_ref, w_ref, mask_ref, out_ref, sum_ref, ssq_ref = refs
    else:
        x_ref, w_ref, out_ref = refs

    x = x_ref[0]                                    # (R, 4*Cin) bf16, aligned load
    cout = w_ref.shape[-1]
    acc = jnp.zeros((M, cout), jnp.float32)
    # The original 4x4 stride-2 conv == 2x2 stride-1 conv on the s2d tensor.
    # Compute each tap as a full-block bf16 matmul and shift the f32 result.
    for t, (a, b) in enumerate(((0, 0), (0, 1), (1, 0), (1, 1))):
        y = jnp.dot(x, w_ref[t], preferred_element_type=jnp.float32)   # (R, Cout)
        off = a * Ws + b
        acc = acc + y[off:off + M, :]

    if apply_lrelu:                                 # layer 1 (no BN): fuse LeakyReLU
        acc = jnp.where(acc >= 0.0, acc, LRELU_SLOPE * acc)
    out_ref[0] = acc

    if with_stats:                                  # fused BN batch statistics
        valid = mask_ref[...]                       # (M, 1): 0 on garbage columns
        am = acc * valid
        sum_ref[0] = jnp.sum(am, axis=0, keepdims=True)
        ssq_ref[0] = jnp.sum(am * acc, axis=0, keepdims=True)


def conv_s2d(x_s2d, w_s2d, Ho, Ws, *, with_stats):
    """x_s2d: (N, R, 4*Cin) bf16, w_s2d: (4, 4*Cin, Cout) bf16."""
    N, R, C4 = x_s2d.shape
    Cout = w_s2d.shape[-1]
    M = Ho * Ws
    Wo = Ws - 1
    kern = functools.partial(_conv_s2d_kernel, Ws=Ws, M=M,
                             apply_lrelu=not with_stats, with_stats=with_stats)

    in_specs = [pl.BlockSpec((1, R, C4), lambda n: (n, 0, 0)),
                pl.BlockSpec((4, C4, Cout), lambda n: (0, 0, 0))]
    args = [x_s2d, w_s2d]
    if with_stats:
        mask = (np.arange(M) % Ws < Wo).astype(np.float32).reshape(M, 1)
        in_specs.append(pl.BlockSpec((M, 1), lambda n: (0, 0)))
        args.append(jnp.asarray(mask))
        out_shape = (jax.ShapeDtypeStruct((N, M, Cout), jnp.float32),
                     jax.ShapeDtypeStruct((N, 1, Cout), jnp.float32),
                     jax.ShapeDtypeStruct((N, 1, Cout), jnp.float32))
        out_specs = (pl.BlockSpec((1, M, Cout), lambda n: (n, 0, 0)),
                     pl.BlockSpec((1, 1, Cout), lambda n: (n, 0, 0)),
                     pl.BlockSpec((1, 1, Cout), lambda n: (n, 0, 0)))
    else:
        out_shape = jax.ShapeDtypeStruct((N, M, Cout), jnp.float32)
        out_specs = pl.BlockSpec((1, M, Cout), lambda n: (n, 0, 0))

    return pl.pallas_call(
        kern,
        out_shape=out_shape,
        grid=(N,),
        in_specs=in_specs,
        out_specs=out_specs,
        compiler_params=pltpu.CompilerParams(
            dimension_semantics=("parallel",)),
    )(*args)


def _tail_kernel(x_ref, sc_ref, sh_ref, w5_ref, w1_ref, b1_ref, w2_ref, b2_ref,
                 rorf_ref, cls_ref):
    """BN4 affine + LeakyReLU + conv5 (as a flat matmul with zeroed garbage
    rows) + Linear+Sigmoid + Linear+LogSoftmax, all in one launch."""
    y = x_ref[...] * sc_ref[...] + sh_ref[...]
    xact = jnp.where(y >= 0.0, y, LRELU_SLOPE * y)
    feat = jnp.dot(xact, w5_ref[...], preferred_element_type=jnp.float32)    # (N, ngf)
    # Real-or-fake head: Linear(ngf, 1) + Sigmoid
    l1 = jnp.dot(feat, w1_ref[...], preferred_element_type=jnp.float32) + b1_ref[...]
    rorf_ref[...] = 1.0 / (1.0 + jnp.exp(-l1))
    # Class head: Linear(ngf, numLabel) + LogSoftmax(dim=-1)
    l2 = jnp.dot(feat, w2_ref[...], preferred_element_type=jnp.float32) + b2_ref[...]
    m = jnp.max(l2, axis=-1, keepdims=True)
    z = l2 - m
    lse = jnp.log(jnp.sum(jnp.exp(z), axis=-1, keepdims=True))
    cls_ref[...] = z - lse


def pallas_tail(x4flat, scale_t, shift_t, w5_flat, lw1, lb1, lw2, lb2):
    N, F = x4flat.shape
    ngf = w5_flat.shape[1]
    L = lw2.shape[1]
    return pl.pallas_call(
        _tail_kernel,
        out_shape=(jax.ShapeDtypeStruct((N, 1), jnp.float32),
                   jax.ShapeDtypeStruct((N, L), jnp.float32)),
        grid=(1,),
        in_specs=[pl.BlockSpec((N, F), lambda i: (0, 0)),
                  pl.BlockSpec((1, F), lambda i: (0, 0)),
                  pl.BlockSpec((1, F), lambda i: (0, 0)),
                  pl.BlockSpec((F, ngf), lambda i: (0, 0)),
                  pl.BlockSpec((ngf, 1), lambda i: (0, 0)),
                  pl.BlockSpec((1, 1), lambda i: (0, 0)),
                  pl.BlockSpec((ngf, L), lambda i: (0, 0)),
                  pl.BlockSpec((1, L), lambda i: (0, 0))],
        out_specs=(pl.BlockSpec((N, 1), lambda i: (0, 0)),
                   pl.BlockSpec((N, L), lambda i: (0, 0))),
    )(x4flat, scale_t, shift_t, w5_flat, lw1, lb1, lw2, lb2)


# ---------------------------------------------------------------------------
# XLA-side layout plumbing (single fused pass per layer) + BN folding
# ---------------------------------------------------------------------------
def prep_s2d(x_nhwc, scale=None, shift=None):
    """(pending BN affine + LeakyReLU) -> zero-pad -> space-to-depth -> bf16.

    Pads H by (1, 3) (one extra guard s2d row so the flattened tap windows in
    the conv kernel stay in bounds) and W by (1, 1).
    Returns (x_s2d[N, Hs*Ws, 4*C] bf16, Ho, Ws) with Ho = H//2, Ws = W//2 + 1.
    """
    if scale is not None:
        y = x_nhwc * scale + shift
        x_nhwc = jnp.where(y >= 0.0, y, LRELU_SLOPE * y)
    xp = jnp.pad(x_nhwc, ((0, 0), (1, 3), (1, 1), (0, 0)))
    N, Hp, Wp, C = xp.shape
    Hs, Ws = Hp // 2, Wp // 2
    xs = xp.reshape(N, Hs, 2, Ws, 2, C).transpose(0, 1, 3, 2, 4, 5)
    xs = xs.reshape(N, Hs * Ws, 4 * C).astype(jnp.bfloat16)
    return xs, Hs - 2, Ws


def s2d_weight(w):
    """(KH=4, KW=4, Cin, Cout) -> (4 taps, 4*Cin, Cout) bf16 for the s2d conv.

    Tap t = 2*a + b, packed channel = r*2*Cin + s*Cin + c, with ki = 2a + r,
    kj = 2b + s (matches the (r, s, c) packing of prep_s2d).
    """
    cin, cout = w.shape[2], w.shape[3]
    w6 = w.reshape(2, 2, 2, 2, cin, cout)          # (a, r, b, s, cin, cout)
    w6 = jnp.transpose(w6, (0, 2, 1, 3, 4, 5))     # (a, b, r, s, cin, cout)
    return w6.reshape(4, 4 * cin, cout).astype(jnp.bfloat16)


def crop_valid(out2d, Ho, Ws):
    """(N, Ho*Ws, C) kernel output -> (N, Ho, Ws-1, C), dropping garbage cols."""
    N, _, C = out2d.shape
    return out2d.reshape(N, Ho, Ws, C)[:, :, :Ws - 1, :]


def bn_scale_shift(sum_n1c, ssq_n1c, count, gamma, beta):
    """Fold training-mode BatchNorm (batch stats, biased var) into scale/shift."""
    s = jnp.sum(sum_n1c, axis=(0, 1))
    ss = jnp.sum(ssq_n1c, axis=(0, 1))
    mean = s / count
    var = jnp.maximum(ss / count - mean * mean, 0.0)
    scale = gamma * jax.lax.rsqrt(var + BN_EPS)
    shift = beta - mean * scale
    return scale, shift


# ---------------------------------------------------------------------------
# Forward pass
# ---------------------------------------------------------------------------
def d_forward(params, g_nchw):
    x = jnp.transpose(g_nchw, (0, 2, 3, 1)).astype(jnp.float32)   # NCHW -> NHWC
    N = x.shape[0]

    # layer 1: Conv(nc->ngf, 4, s2, p1) + LeakyReLU, fully fused in one kernel
    xs, Ho, Ws = prep_s2d(x)
    out1 = conv_s2d(xs, s2d_weight(params['w1']), Ho, Ws, with_stats=False)
    h = crop_valid(out1, Ho, Ws)

    # layer 2: Conv + fused BN batch stats (affine+LeakyReLU deferred)
    xs, Ho, Ws = prep_s2d(h)
    out2, s2, q2 = conv_s2d(xs, s2d_weight(params['w2']), Ho, Ws, with_stats=True)
    sc, sh = bn_scale_shift(s2, q2, N * Ho * (Ws - 1), params['g2'], params['be2'])
    h = crop_valid(out2, Ho, Ws)

    # layer 3 (BN2 affine + LeakyReLU folded into the fused XLA s2d prep)
    xs, Ho, Ws = prep_s2d(h, sc, sh)
    out3, s3, q3 = conv_s2d(xs, s2d_weight(params['w3']), Ho, Ws, with_stats=True)
    sc, sh = bn_scale_shift(s3, q3, N * Ho * (Ws - 1), params['g3'], params['be3'])
    h = crop_valid(out3, Ho, Ws)

    # layer 4
    xs, Ho, Ws = prep_s2d(h, sc, sh)
    out4, s4, q4 = conv_s2d(xs, s2d_weight(params['w4']), Ho, Ws, with_stats=True)
    sc4, sh4 = bn_scale_shift(s4, q4, N * Ho * (Ws - 1), params['g4'], params['be4'])

    # tail: BN4 affine + LeakyReLU + conv5(4x4 valid -> 1x1) + both heads,
    # one Pallas kernel.  Garbage columns of out4 are neutralized by zero rows
    # in the flattened conv5 weight.
    M4, C8 = out4.shape[1], out4.shape[2]                 # (Ho*Ws, 8*ngf)
    x4flat = out4.reshape(N, M4 * C8)
    scale_t = jnp.tile(sc4, M4).reshape(1, M4 * C8)
    shift_t = jnp.tile(sh4, M4).reshape(1, M4 * C8)
    w5p = jnp.pad(params['w5'], ((0, 0), (0, Ws - 4), (0, 0), (0, 0)))
    w5_flat = w5p.reshape(M4 * C8, -1)
    rorf, classes = pallas_tail(
        x4flat, scale_t, shift_t, w5_flat,
        params['lw1'], params['lb1'].reshape(1, 1),
        params['lw2'], params['lb2'].reshape(1, -1))
    return rorf, classes


def init_params(key, ngf=NGF, nc=NC, num_label=NUM_LABEL):
    keys = jax.random.split(key, 8)

    def conv_w(k, cin, cout):
        # weight layout (KH, KW, Cin, Cout)
        return jax.random.normal(k, (4, 4, cin, cout), jnp.float32) * 0.05

    return {
        'w1': conv_w(keys[0], nc, ngf),
        'w2': conv_w(keys[1], ngf, ngf * 2),
        'w3': conv_w(keys[2], ngf * 2, ngf * 4),
        'w4': conv_w(keys[3], ngf * 4, ngf * 8),
        'w5': conv_w(keys[4], ngf * 8, ngf),
        # BatchNorm2d default init: gamma=1, beta=0
        'g2': jnp.ones((ngf * 2,), jnp.float32),
        'be2': jnp.zeros((ngf * 2,), jnp.float32),
        'g3': jnp.ones((ngf * 4,), jnp.float32),
        'be3': jnp.zeros((ngf * 4,), jnp.float32),
        'g4': jnp.ones((ngf * 8,), jnp.float32),
        'be4': jnp.zeros((ngf * 8,), jnp.float32),
        # Linear heads
        'lw1': jax.random.normal(keys[5], (ngf, 1), jnp.float32) * 0.1,
        'lb1': jnp.zeros((1,), jnp.float32),
        'lw2': jax.random.normal(keys[6], (ngf, num_label), jnp.float32) * 0.1,
        'lb2': jnp.zeros((num_label,), jnp.float32),
    }


if __name__ == "__main__":
    key = jax.random.PRNGKey(0)
    pkey, xkey = jax.random.split(key)
    params = init_params(pkey)

    # Architecture implies 64x64 spatial input (4 stride-2 convs -> 4x4, then
    # a 4x4 valid conv -> 1x1).  Batch=2, nc=3.
    g = jax.random.normal(xkey, (2, NC, 64, 64), jnp.float32)

    rorf, classes = jax.jit(d_forward)(params, g)
    jax.block_until_ready((rorf, classes))

    assert rorf.shape == (2, 1) and classes.shape == (2, NUM_LABEL)
    assert bool(jnp.all((rorf > 0) & (rorf < 1)))
    # log-softmax rows must exponentiate-and-sum to ~1
    assert bool(jnp.allclose(jnp.sum(jnp.exp(classes), axis=-1), 1.0, atol=1e-4))
    print("KERNEL_OK")
</pallas_src>

<mosaic_0001>
module attributes {stable_mosaic.version = 11 : i64} {
  func.func @_conv_s2d_kernel(%arg0: i32, %arg1: memref<1x1122x12xbf16, #tpu.memory_space<vmem>>, %arg2: memref<4x12x16xbf16, #tpu.memory_space<vmem>>, %arg3: memref<1x1056x16xf32, #tpu.memory_space<vmem>>) attributes {dimension_semantics = [#tpu.dimension_semantics<parallel>], iteration_bounds = array<i64: 2>, scalar_prefetch = 0 : i64, scratch_operands = 0 : i64, tpu.core_type = #tpu.core_type<tc>, window_params = [{transform_indices = @transform_0, window_bounds = array<i64: 1, 1122, 12>}, {pipeline_mode = #tpu.pipeline_mode<synchronous>, transform_indices = @transform_1, window_bounds = array<i64: 4, 12, 16>}, {transform_indices = @transform_2, window_bounds = array<i64: 1, 1056, 16>}]} {
    %c0 = arith.constant 0 : index
    %c0_0 = arith.constant 0 : index
    %c0_1 = arith.constant 0 : index
    %0 = vector.load %arg1[%c0, %c0_0, %c0_1] : memref<1x1122x12xbf16, #tpu.memory_space<vmem>>, vector<1x1122x12xbf16>
    %1 = vector.shape_cast %0 : vector<1x1122x12xbf16> to vector<1122x12xbf16>
    %cst = arith.constant 0.000000e+00 : f32
    %2 = vector.broadcast %cst : f32 to vector<1056x16xf32>
    %c0_2 = arith.constant 0 : index
    %c0_3 = arith.constant 0 : index
    %c0_4 = arith.constant 0 : index
    %3 = vector.load %arg2[%c0_2, %c0_3, %c0_4] : memref<4x12x16xbf16, #tpu.memory_space<vmem>>, vector<1x12x16xbf16>
    %4 = vector.shape_cast %3 : vector<1x12x16xbf16> to vector<12x16xbf16>
    %cst_5 = arith.constant dense<0.000000e+00> : vector<1122x16xf32>
    %5 = tpu.matmul %1, %4, %cst_5 {dimension_numbers = #tpu.dot_dimension_numbers<[1], [0], [0], [1], [0, 0, 1, 1], [], []>} : vector<1122x12xbf16>, vector<12x16xbf16>, vector<1122x16xf32> -> vector<1122x16xf32>
    %6 = vector.extract_strided_slice %5 {offsets = [0, 0], sizes = [1056, 16], strides = [1, 1]} : vector<1122x16xf32> to vector<1056x16xf32>
    %7 = arith.addf %2, %6 : vector<1056x16xf32>
    %c1 = arith.constant 1 : index
    %c0_6 = arith.constant 0 : index
    %c0_7 = arith.constant 0 : index
    %8 = vector.load %arg2[%c1, %c0_6, %c0_7] : memref<4x12x16xbf16, #tpu.memory_space<vmem>>, vector<1x12x16xbf16>
    %9 = vector.shape_cast %8 : vector<1x12x16xbf16> to vector<12x16xbf16>
    %cst_8 = arith.constant dense<0.000000e+00> : vector<1122x16xf32>
    %10 = tpu.matmul %1, %9, %cst_8 {dimension_numbers = #tpu.dot_dimension_numbers<[1], [0], [0], [1], [0, 0, 1, 1], [], []>} : vector<1122x12xbf16>, vector<12x16xbf16>, vector<1122x16xf32> -> vector<1122x16xf32>
    %11 = vector.extract_strided_slice %10 {offsets = [1, 0], sizes = [1056, 16], strides = [1, 1]} : vector<1122x16xf32> to vector<1056x16xf32>
    %12 = arith.addf %7, %11 : vector<1056x16xf32>
    %c2 = arith.constant 2 : index
    %c0_9 = arith.constant 0 : index
    %c0_10 = arith.constant 0 : index
    %13 = vector.load %arg2[%c2, %c0_9, %c0_10] : memref<4x12x16xbf16, #tpu.memory_space<vmem>>, vector<1x12x16xbf16>
    %14 = vector.shape_cast %13 : vector<1x12x16xbf16> to vector<12x16xbf16>
    %cst_11 = arith.constant dense<0.000000e+00> : vector<1122x16xf32>
    %15 = tpu.matmul %1, %14, %cst_11 {dimension_numbers = #tpu.dot_dimension_numbers<[1], [0], [0], [1], [0, 0, 1, 1], [], []>} : vector<1122x12xbf16>, vector<12x16xbf16>, vector<1122x16xf32> -> vector<1122x16xf32>
    %16 = vector.extract_strided_slice %15 {offsets = [33, 0], sizes = [1056, 16], strides = [1, 1]} : vector<1122x16xf32> to vector<1056x16xf32>
    %17 = arith.addf %12, %16 : vector<1056x16xf32>
    %c3 = arith.constant 3 : index
    %c0_12 = arith.constant 0 : index
    %c0_13 = arith.constant 0 : index
    %18 = vector.load %arg2[%c3, %c0_12, %c0_13] : memref<4x12x16xbf16, #tpu.memory_space<vmem>>, vector<1x12x16xbf16>
    %19 = vector.shape_cast %18 : vector<1x12x16xbf16> to vector<12x16xbf16>
    %cst_14 = arith.constant dense<0.000000e+00> : vector<1122x16xf32>
    %20 = tpu.matmul %1, %19, %cst_14 {dimension_numbers = #tpu.dot_dimension_numbers<[1], [0], [0], [1], [0, 0, 1, 1], [], []>} : vector<1122x12xbf16>, vector<12x16xbf16>, vector<1122x16xf32> -> vector<1122x16xf32>
    %21 = vector.extract_strided_slice %20 {offsets = [34, 0], sizes = [1056, 16], strides = [1, 1]} : vector<1122x16xf32> to vector<1056x16xf32>
    %22 = arith.addf %17, %21 : vector<1056x16xf32>
    %cst_15 = arith.constant 0.000000e+00 : f32
    %23 = vector.broadcast %cst_15 : f32 to vector<1056x16xf32>
    %24 = arith.cmpf oge, %22, %23 : vector<1056x16xf32>
    %cst_16 = arith.constant 2.000000e-01 : f32
    %25 = vector.broadcast %cst_16 : f32 to vector<1056x16xf32>
    %26 = arith.mulf %25, %22 : vector<1056x16xf32>
    %27 = arith.select %24, %22, %26 : vector<1056x16xi1>, vector<1056x16xf32>
    %c0_17 = arith.constant 0 : index
    %c0_18 = arith.constant 0 : index
    %c0_19 = arith.constant 0 : index
    %28 = vector.load %arg3[%c0_17, %c0_18, %c0_19] : memref<1x1056x16xf32, #tpu.memory_space<vmem>>, vector<1x1056x16xf32>
    %29 = vector.shape_cast %28 : vector<1x1056x16xf32> to vector<1056x16xf32>
    %30 = vector.shape_cast %27 : vector<1056x16xf32> to vector<1x1056x16xf32>
    tpu.vector_store %arg3[%c0_17, %c0_18, %c0_19], %30 {strides = array<i32>} : memref<1x1056x16xf32, #tpu.memory_space<vmem>>, vector<1x1056x16xf32>,
    return
  }
  func.func @transform_0(%arg0: i32) -> (i32, i32, i32) {
    %c0_i32 = arith.constant 0 : i32
    %c0_i32_0 = arith.constant 0 : i32
    %c0_i32_1 = arith.constant 0 : i32
    return %arg0, %c0_i32, %c0_i32_0 : i32, i32, i32
  }
  func.func @transform_1(%arg0: i32) -> (i32, i32, i32) {
    %c0_i32 = arith.constant 0 : i32
    %c0_i32_0 = arith.constant 0 : i32
    %c0_i32_1 = arith.constant 0 : i32
    %c0_i32_2 = arith.constant 0 : i32
    return %c0_i32, %c0_i32_0, %c0_i32_1 : i32, i32, i32
  }
  func.func @transform_2(%arg0: i32) -> (i32, i32, i32) {
    %c0_i32 = arith.constant 0 : i32
    %c0_i32_0 = arith.constant 0 : i32
    %c0_i32_1 = arith.constant 0 : i32
    return %arg0, %c0_i32, %c0_i32_0 : i32, i32, i32
  }
}

module attributes {stable_mosaic.version = 11 : i64} {
  func.func @_conv_s2d_kernel(%arg0: i32, %arg1: memref<1x306x64xbf16, #tpu.memory_space<vmem>>, %arg2: memref<4x64x32xbf16, #tpu.memory_space<vmem>>, %arg3: memref<272x1xf32, #tpu.memory_space<vmem>>, %arg4: memref<1x272x32xf32, #tpu.memory_space<vmem>>, %arg5: memref<1x1x32xf32, #tpu.memory_space<vmem>>, %arg6: memref<1x1x32xf32, #tpu.memory_space<vmem>>) attributes {dimension_semantics = [#tpu.dimension_semantics<parallel>], iteration_bounds = array<i64: 2>, scalar_prefetch = 0 : i64, scratch_operands = 0 : i64, tpu.core_type = #tpu.core_type<tc>, window_params = [{transform_indices = @transform_0, window_bounds = array<i64: 1, 306, 64>}, {pipeline_mode = #tpu.pipeline_mode<synchronous>, transform_indices = @transform_1, window_bounds = array<i64: 4, 64, 32>}, {pipeline_mode = #tpu.pipeline_mode<synchronous>, transform_indices = @transform_2, window_bounds = array<i64: 272, 1>}, {transform_indices = @transform_3, window_bounds = array<i64: 1, 272, 32>}, {transform_indices = @transform_4, window_bounds = array<i64: 1, 1, 32>}, {transform_indices = @transform_5, window_bounds = array<i64: 1, 1, 32>}]} {
    %c0 = arith.constant 0 : index
    %c0_0 = arith.constant 0 : index
    %c0_1 = arith.constant 0 : index
    %0 = vector.load %arg1[%c0, %c0_0, %c0_1] : memref<1x306x64xbf16, #tpu.memory_space<vmem>>, vector<1x306x64xbf16>
    %1 = vector.shape_cast %0 : vector<1x306x64xbf16> to vector<306x64xbf16>
    %cst = arith.constant 0.000000e+00 : f32
    %2 = vector.broadcast %cst : f32 to vector<272x32xf32>
    %c0_2 = arith.constant 0 : index
    %c0_3 = arith.constant 0 : index
    %c0_4 = arith.constant 0 : index
    %3 = vector.load %arg2[%c0_2, %c0_3, %c0_4] : memref<4x64x32xbf16, #tpu.memory_space<vmem>>, vector<1x64x32xbf16>
    %4 = vector.shape_cast %3 : vector<1x64x32xbf16> to vector<64x32xbf16>
    %cst_5 = arith.constant dense<0.000000e+00> : vector<306x32xf32>
    %5 = tpu.matmul %1, %4, %cst_5 {dimension_numbers = #tpu.dot_dimension_numbers<[1], [0], [0], [1], [0, 0, 1, 1], [], []>} : vector<306x64xbf16>, vector<64x32xbf16>, vector<306x32xf32> -> vector<306x32xf32>
    %6 = vector.extract_strided_slice %5 {offsets = [0, 0], sizes = [272, 32], strides = [1, 1]} : vector<306x32xf32> to vector<272x32xf32>
    %7 = arith.addf %2, %6 : vector<272x32xf32>
    %c1 = arith.constant 1 : index
    %c0_6 = arith.constant 0 : index
    %c0_7 = arith.constant 0 : index
    %8 = vector.load %arg2[%c1, %c0_6, %c0_7] : memref<4x64x32xbf16, #tpu.memory_space<vmem>>, vector<1x64x32xbf16>
    %9 = vector.shape_cast %8 : vector<1x64x32xbf16> to vector<64x32xbf16>
    %cst_8 = arith.constant dense<0.000000e+00> : vector<306x32xf32>
    %10 = tpu.matmul %1, %9, %cst_8 {dimension_numbers = #tpu.dot_dimension_numbers<[1], [0], [0], [1], [0, 0, 1, 1], [], []>} : vector<306x64xbf16>, vector<64x32xbf16>, vector<306x32xf32> -> vector<306x32xf32>
    %11 = vector.extract_strided_slice %10 {offsets = [1, 0], sizes = [272, 32], strides = [1, 1]} : vector<306x32xf32> to vector<272x32xf32>
    %12 = arith.addf %7, %11 : vector<272x32xf32>
    %c2 = arith.constant 2 : index
    %c0_9 = arith.constant 0 : index
    %c0_10 = arith.constant 0 : index
    %13 = vector.load %arg2[%c2, %c0_9, %c0_10] : memref<4x64x32xbf16, #tpu.memory_space<vmem>>, vector<1x64x32xbf16>
    %14 = vector.shape_cast %13 : vector<1x64x32xbf16> to vector<64x32xbf16>
    %cst_11 = arith.constant dense<0.000000e+00> : vector<306x32xf32>
    %15 = tpu.matmul %1, %14, %cst_11 {dimension_numbers = #tpu.dot_dimension_numbers<[1], [0], [0], [1], [0, 0, 1, 1], [], []>} : vector<306x64xbf16>, vector<64x32xbf16>, vector<306x32xf32> -> vector<306x32xf32>
    %16 = vector.extract_strided_slice %15 {offsets = [17, 0], sizes = [272, 32], strides = [1, 1]} : vector<306x32xf32> to vector<272x32xf32>
    %17 = arith.addf %12, %16 : vector<272x32xf32>
    %c3 = arith.constant 3 : index
    %c0_12 = arith.constant 0 : index
    %c0_13 = arith.constant 0 : index
    %18 = vector.load %arg2[%c3, %c0_12, %c0_13] : memref<4x64x32xbf16, #tpu.memory_space<vmem>>, vector<1x64x32xbf16>
    %19 = vector.shape_cast %18 : vector<1x64x32xbf16> to vector<64x32xbf16>
    %cst_14 = arith.constant dense<0.000000e+00> : vector<306x32xf32>
    %20 = tpu.matmul %1, %19, %cst_14 {dimension_numbers = #tpu.dot_dimension_numbers<[1], [0], [0], [1], [0, 0, 1, 1], [], []>} : vector<306x64xbf16>, vector<64x32xbf16>, vector<306x32xf32> -> vector<306x32xf32>
    %21 = vector.extract_strided_slice %20 {offsets = [18, 0], sizes = [272, 32], strides = [1, 1]} : vector<306x32xf32> to vector<272x32xf32>
    %22 = arith.addf %17, %21 : vector<272x32xf32>
    %c0_15 = arith.constant 0 : index
    %c0_16 = arith.constant 0 : index
    %c0_17 = arith.constant 0 : index
    %23 = vector.load %arg4[%c0_15, %c0_16, %c0_17] : memref<1x272x32xf32, #tpu.memory_space<vmem>>, vector<1x272x32xf32>
    %24 = vector.shape_cast %23 : vector<1x272x32xf32> to vector<272x32xf32>
    %25 = vector.shape_cast %22 : vector<272x32xf32> to vector<1x272x32xf32>
    tpu.vector_store %arg4[%c0_15, %c0_16, %c0_17], %25 {strides = array<i32>} : memref<1x272x32xf32, #tpu.memory_space<vmem>>, vector<1x272x32xf32>,
    %c0_18 = arith.constant 0 : index
    %c0_19 = arith.constant 0 : index
    %26 = vector.load %arg3[%c0_18, %c0_19] : memref<272x1xf32, #tpu.memory_space<vmem>>, vector<272x1xf32>
    %27 = vector.broadcast %26 : vector<272x1xf32> to vector<272x32xf32>
    %28 = arith.mulf %22, %27 : vector<272x32xf32>
    %cst_20 = arith.constant dense<0.000000e+00> : vector<32xf32>
    %29 = vector.multi_reduction <add>, %28, %cst_20 [0] : vector<272x32xf32> to vector<32xf32>
    %30 = vector.shape_cast %29 : vector<32xf32> to vector<1x32xf32>
    %c0_21 = arith.constant 0 : index
    %c0_22 = arith.constant 0 : index
    %c0_23 = arith.constant 0 : index
    %31 = vector.load %arg5[%c0_21, %c0_22, %c0_23] : memref<1x1x32xf32, #tpu.memory_space<vmem>>, vector<1x1x32xf32>
    %32 = vector.shape_cast %31 : vector<1x1x32xf32> to vector<1x32xf32>
    %33 = vector.shape_cast %30 : vector<1x32xf32> to vector<1x1x32xf32>
    tpu.vector_store %arg5[%c0_21, %c0_22, %c0_23], %33 {strides = array<i32>} : memref<1x1x32xf32, #tpu.memory_space<vmem>>, vector<1x1x32xf32>,
    %34 = arith.mulf %28, %22 : vector<272x32xf32>
    %cst_24 = arith.constant dense<0.000000e+00> : vector<32xf32>
    %35 = vector.multi_reduction <add>, %34, %cst_24 [0] : vector<272x32xf32> to vector<32xf32>
    %36 = vector.shape_cast %35 : vector<32xf32> to vector<1x32xf32>
    %c0_25 = arith.constant 0 : index
    %c0_26 = arith.constant 0 : index
    %c0_27 = arith.constant 0 : index
    %37 = vector.load %arg6[%c0_25, %c0_26, %c0_27] : memref<1x1x32xf32, #tpu.memory_space<vmem>>, vector<1x1x32xf32>
    %38 = vector.shape_cast %37 : vector<1x1x32xf32> to vector<1x32xf32>
    %39 = vector.shape_cast %36 : vector<1x32xf32> to vector<1x1x32xf32>
    tpu.vector_store %arg6[%c0_25, %c0_26, %c0_27], %39 {strides = array<i32>} : memref<1x1x32xf32, #tpu.memory_space<vmem>>, vector<1x1x32xf32>,
    return
  }
  func.func @transform_0(%arg0: i32) -> (i32, i32, i32) {
    %c0_i32 = arith.constant 0 : i32
    %c0_i32_0 = arith.constant 0 : i32
    %c0_i32_1 = arith.constant 0 : i32
    return %arg0, %c0_i32, %c0_i32_0 : i32, i32, i32
  }
  func.func @transform_1(%arg0: i32) -> (i32, i32, i32) {
    %c0_i32 = arith.constant 0 : i32
    %c0_i32_0 = arith.constant 0 : i32
    %c0_i32_1 = arith.constant 0 : i32
    %c0_i32_2 = arith.constant 0 : i32
    return %c0_i32, %c0_i32_0, %c0_i32_1 : i32, i32, i32
  }
  func.func @transform_2(%arg0: i32) -> (i32, i32) {
    %c0_i32 = arith.constant 0 : i32
    %c0_i32_0 = arith.constant 0 : i32
    %c0_i32_1 = arith.constant 0 : i32
    return %c0_i32, %c0_i32_0 : i32, i32
  }
  func.func @transform_3(%arg0: i32) -> (i32, i32, i32) {
    %c0_i32 = arith.constant 0 : i32
    %c0_i32_0 = arith.constant 0 : i32
    %c0_i32_1 = arith.constant 0 : i32
    return %arg0, %c0_i32, %c0_i32_0 : i32, i32, i32
  }
  func.func @transform_4(%arg0: i32) -> (i32, i32, i32) {
    %c0_i32 = arith.constant 0 : i32
    %c0_i32_0 = arith.constant 0 : i32
    %c0_i32_1 = arith.constant 0 : i32
    return %arg0, %c0_i32, %c0_i32_0 : i32, i32, i32
  }
  func.func @transform_5(%arg0: i32) -> (i32, i32, i32) {
    %c0_i32 = arith.constant 0 : i32
    %c0_i32_0 = arith.constant 0 : i32
    %c0_i32_1 = arith.constant 0 : i32
    return %arg0, %c0_i32, %c0_i32_0 : i32, i32, i32
  }
}

module attributes {stable_mosaic.version = 11 : i64} {
  func.func @_conv_s2d_kernel(%arg0: i32, %arg1: memref<1x90x128xbf16, #tpu.memory_space<vmem>>, %arg2: memref<4x128x64xbf16, #tpu.memory_space<vmem>>, %arg3: memref<72x1xf32, #tpu.memory_space<vmem>>, %arg4: memref<1x72x64xf32, #tpu.memory_space<vmem>>, %arg5: memref<1x1x64xf32, #tpu.memory_space<vmem>>, %arg6: memref<1x1x64xf32, #tpu.memory_space<vmem>>) attributes {dimension_semantics = [#tpu.dimension_semantics<parallel>], iteration_bounds = array<i64: 2>, scalar_prefetch = 0 : i64, scratch_operands = 0 : i64, tpu.core_type = #tpu.core_type<tc>, window_params = [{transform_indices = @transform_0, window_bounds = array<i64: 1, 90, 128>}, {pipeline_mode = #tpu.pipeline_mode<synchronous>, transform_indices = @transform_1, window_bounds = array<i64: 4, 128, 64>}, {pipeline_mode = #tpu.pipeline_mode<synchronous>, transform_indices = @transform_2, window_bounds = array<i64: 72, 1>}, {transform_indices = @transform_3, window_bounds = array<i64: 1, 72, 64>}, {transform_indices = @transform_4, window_bounds = array<i64: 1, 1, 64>}, {transform_indices = @transform_5, window_bounds = array<i64: 1, 1, 64>}]} {
    %c0 = arith.constant 0 : index
    %c0_0 = arith.constant 0 : index
    %c0_1 = arith.constant 0 : index
    %0 = vector.load %arg1[%c0, %c0_0, %c0_1] : memref<1x90x128xbf16, #tpu.memory_space<vmem>>, vector<1x90x128xbf16>
    %1 = vector.shape_cast %0 : vector<1x90x128xbf16> to vector<90x128xbf16>
    %cst = arith.constant 0.000000e+00 : f32
    %2 = vector.broadcast %cst : f32 to vector<72x64xf32>
    %c0_2 = arith.constant 0 : index
    %c0_3 = arith.constant 0 : index
    %c0_4 = arith.constant 0 : index
    %3 = vector.load %arg2[%c0_2, %c0_3, %c0_4] : memref<4x128x64xbf16, #tpu.memory_space<vmem>>, vector<1x128x64xbf16>
    %4 = vector.shape_cast %3 : vector<1x128x64xbf16> to vector<128x64xbf16>
    %cst_5 = arith.constant dense<0.000000e+00> : vector<90x64xf32>
    %5 = tpu.matmul %1, %4, %cst_5 {dimension_numbers = #tpu.dot_dimension_numbers<[1], [0], [0], [1], [0, 0, 1, 1], [], []>} : vector<90x128xbf16>, vector<128x64xbf16>, vector<90x64xf32> -> vector<90x64xf32>
    %6 = vector.extract_strided_slice %5 {offsets = [0, 0], sizes = [72, 64], strides = [1, 1]} : vector<90x64xf32> to vector<72x64xf32>
    %7 = arith.addf %2, %6 : vector<72x64xf32>
    %c1 = arith.constant 1 : index
    %c0_6 = arith.constant 0 : index
    %c0_7 = arith.constant 0 : index
    %8 = vector.load %arg2[%c1, %c0_6, %c0_7] : memref<4x128x64xbf16, #tpu.memory_space<vmem>>, vector<1x128x64xbf16>
    %9 = vector.shape_cast %8 : vector<1x128x64xbf16> to vector<128x64xbf16>
    %cst_8 = arith.constant dense<0.000000e+00> : vector<90x64xf32>
    %10 = tpu.matmul %1, %9, %cst_8 {dimension_numbers = #tpu.dot_dimension_numbers<[1], [0], [0], [1], [0, 0, 1, 1], [], []>} : vector<90x128xbf16>, vector<128x64xbf16>, vector<90x64xf32> -> vector<90x64xf32>
    %11 = vector.extract_strided_slice %10 {offsets = [1, 0], sizes = [72, 64], strides = [1, 1]} : vector<90x64xf32> to vector<72x64xf32>
    %12 = arith.addf %7, %11 : vector<72x64xf32>
    %c2 = arith.constant 2 : index
    %c0_9 = arith.constant 0 : index
    %c0_10 = arith.constant 0 : index
    %13 = vector.load %arg2[%c2, %c0_9, %c0_10] : memref<4x128x64xbf16, #tpu.memory_space<vmem>>, vector<1x128x64xbf16>
    %14 = vector.shape_cast %13 : vector<1x128x64xbf16> to vector<128x64xbf16>
    %cst_11 = arith.constant dense<0.000000e+00> : vector<90x64xf32>
    %15 = tpu.matmul %1, %14, %cst_11 {dimension_numbers = #tpu.dot_dimension_numbers<[1], [0], [0], [1], [0, 0, 1, 1], [], []>} : vector<90x128xbf16>, vector<128x64xbf16>, vector<90x64xf32> -> vector<90x64xf32>
    %16 = vector.extract_strided_slice %15 {offsets = [9, 0], sizes = [72, 64], strides = [1, 1]} : vector<90x64xf32> to vector<72x64xf32>
    %17 = arith.addf %12, %16 : vector<72x64xf32>
    %c3 = arith.constant 3 : index
    %c0_12 = arith.constant 0 : index
    %c0_13 = arith.constant 0 : index
    %18 = vector.load %arg2[%c3, %c0_12, %c0_13] : memref<4x128x64xbf16, #tpu.memory_space<vmem>>, vector<1x128x64xbf16>
    %19 = vector.shape_cast %18 : vector<1x128x64xbf16> to vector<128x64xbf16>
    %cst_14 = arith.constant dense<0.000000e+00> : vector<90x64xf32>
    %20 = tpu.matmul %1, %19, %cst_14 {dimension_numbers = #tpu.dot_dimension_numbers<[1], [0], [0], [1], [0, 0, 1, 1], [], []>} : vector<90x128xbf16>, vector<128x64xbf16>, vector<90x64xf32> -> vector<90x64xf32>
    %21 = vector.extract_strided_slice %20 {offsets = [10, 0], sizes = [72, 64], strides = [1, 1]} : vector<90x64xf32> to vector<72x64xf32>
    %22 = arith.addf %17, %21 : vector<72x64xf32>
    %c0_15 = arith.constant 0 : index
    %c0_16 = arith.constant 0 : index
    %c0_17 = arith.constant 0 : index
    %23 = vector.load %arg4[%c0_15, %c0_16, %c0_17] : memref<1x72x64xf32, #tpu.memory_space<vmem>>, vector<1x72x64xf32>
    %24 = vector.shape_cast %23 : vector<1x72x64xf32> to vector<72x64xf32>
    %25 = vector.shape_cast %22 : vector<72x64xf32> to vector<1x72x64xf32>
    tpu.vector_store %arg4[%c0_15, %c0_16, %c0_17], %25 {strides = array<i32>} : memref<1x72x64xf32, #tpu.memory_space<vmem>>, vector<1x72x64xf32>,
    %c0_18 = arith.constant 0 : index
    %c0_19 = arith.constant 0 : index
    %26 = vector.load %arg3[%c0_18, %c0_19] : memref<72x1xf32, #tpu.memory_space<vmem>>, vector<72x1xf32>
    %27 = vector.broadcast %26 : vector<72x1xf32> to vector<72x64xf32>
    %28 = arith.mulf %22, %27 : vector<72x64xf32>
    %cst_20 = arith.constant dense<0.000000e+00> : vector<64xf32>
    %29 = vector.multi_reduction <add>, %28, %cst_20 [0] : vector<72x64xf32> to vector<64xf32>
    %30 = vector.shape_cast %29 : vector<64xf32> to vector<1x64xf32>
    %c0_21 = arith.constant 0 : index
    %c0_22 = arith.constant 0 : index
    %c0_23 = arith.constant 0 : index
    %31 = vector.load %arg5[%c0_21, %c0_22, %c0_23] : memref<1x1x64xf32, #tpu.memory_space<vmem>>, vector<1x1x64xf32>
    %32 = vector.shape_cast %31 : vector<1x1x64xf32> to vector<1x64xf32>
    %33 = vector.shape_cast %30 : vector<1x64xf32> to vector<1x1x64xf32>
    tpu.vector_store %arg5[%c0_21, %c0_22, %c0_23], %33 {strides = array<i32>} : memref<1x1x64xf32, #tpu.memory_space<vmem>>, vector<1x1x64xf32>,
    %34 = arith.mulf %28, %22 : vector<72x64xf32>
    %cst_24 = arith.constant dense<0.000000e+00> : vector<64xf32>
    %35 = vector.multi_reduction <add>, %34, %cst_24 [0] : vector<72x64xf32> to vector<64xf32>
    %36 = vector.shape_cast %35 : vector<64xf32> to vector<1x64xf32>
    %c0_25 = arith.constant 0 : index
    %c0_26 = arith.constant 0 : index
    %c0_27 = arith.constant 0 : index
    %37 = vector.load %arg6[%c0_25, %c0_26, %c0_27] : memref<1x1x64xf32, #tpu.memory_space<vmem>>, vector<1x1x64xf32>
    %38 = vector.shape_cast %37 : vector<1x1x64xf32> to vector<1x64xf32>
    %39 = vector.shape_cast %36 : vector<1x64xf32> to vector<1x1x64xf32>
    tpu.vector_store %arg6[%c0_25, %c0_26, %c0_27], %39 {strides = array<i32>} : memref<1x1x64xf32, #tpu.memory_space<vmem>>, vector<1x1x64xf32>,
    return
  }
  func.func @transform_0(%arg0: i32) -> (i32, i32, i32) {
    %c0_i32 = arith.constant 0 : i32
    %c0_i32_0 = arith.constant 0 : i32
    %c0_i32_1 = arith.constant 0 : i32
    return %arg0, %c0_i32, %c0_i32_0 : i32, i32, i32
  }
  func.func @transform_1(%arg0: i32) -> (i32, i32, i32) {
    %c0_i32 = arith.constant 0 : i32
    %c0_i32_0 = arith.constant 0 : i32
    %c0_i32_1 = arith.constant 0 : i32
    %c0_i32_2 = arith.constant 0 : i32
    return %c0_i32, %c0_i32_0, %c0_i32_1 : i32, i32, i32
  }
  func.func @transform_2(%arg0: i32) -> (i32, i32) {
    %c0_i32 = arith.constant 0 : i32
    %c0_i32_0 = arith.constant 0 : i32
    %c0_i32_1 = arith.constant 0 : i32
    return %c0_i32, %c0_i32_0 : i32, i32
  }
  func.func @transform_3(%arg0: i32) -> (i32, i32, i32) {
    %c0_i32 = arith.constant 0 : i32
    %c0_i32_0 = arith.constant 0 : i32
    %c0_i32_1 = arith.constant 0 : i32
    return %arg0, %c0_i32, %c0_i32_0 : i32, i32, i32
  }
  func.func @transform_4(%arg0: i32) -> (i32, i32, i32) {
    %c0_i32 = arith.constant 0 : i32
    %c0_i32_0 = arith.constant 0 : i32
    %c0_i32_1 = arith.constant 0 : i32
    return %arg0, %c0_i32, %c0_i32_0 : i32, i32, i32
  }
  func.func @transform_5(%arg0: i32) -> (i32, i32, i32) {
    %c0_i32 = arith.constant 0 : i32
    %c0_i32_0 = arith.constant 0 : i32
    %c0_i32_1 = arith.constant 0 : i32
    return %arg0, %c0_i32, %c0_i32_0 : i32, i32, i32
  }
}

module attributes {stable_mosaic.version = 11 : i64} {
  func.func @_conv_s2d_kernel(%arg0: i32, %arg1: memref<1x30x256xbf16, #tpu.memory_space<vmem>>, %arg2: memref<4x256x128xbf16, #tpu.memory_space<vmem>>, %arg3: memref<20x1xf32, #tpu.memory_space<vmem>>, %arg4: memref<1x20x128xf32, #tpu.memory_space<vmem>>, %arg5: memref<1x1x128xf32, #tpu.memory_space<vmem>>, %arg6: memref<1x1x128xf32, #tpu.memory_space<vmem>>) attributes {dimension_semantics = [#tpu.dimension_semantics<parallel>], iteration_bounds = array<i64: 2>, scalar_prefetch = 0 : i64, scratch_operands = 0 : i64, tpu.core_type = #tpu.core_type<tc>, window_params = [{transform_indices = @transform_0, window_bounds = array<i64: 1, 30, 256>}, {pipeline_mode = #tpu.pipeline_mode<synchronous>, transform_indices = @transform_1, window_bounds = array<i64: 4, 256, 128>}, {pipeline_mode = #tpu.pipeline_mode<synchronous>, transform_indices = @transform_2, window_bounds = array<i64: 20, 1>}, {transform_indices = @transform_3, window_bounds = array<i64: 1, 20, 128>}, {transform_indices = @transform_4, window_bounds = array<i64: 1, 1, 128>}, {transform_indices = @transform_5, window_bounds = array<i64: 1, 1, 128>}]} {
    %c0 = arith.constant 0 : index
    %c0_0 = arith.constant 0 : index
    %c0_1 = arith.constant 0 : index
    %0 = vector.load %arg1[%c0, %c0_0, %c0_1] : memref<1x30x256xbf16, #tpu.memory_space<vmem>>, vector<1x30x256xbf16>
    %1 = vector.shape_cast %0 : vector<1x30x256xbf16> to vector<30x256xbf16>
    %cst = arith.constant 0.000000e+00 : f32
    %2 = vector.broadcast %cst : f32 to vector<20x128xf32>
    %c0_2 = arith.constant 0 : index
    %c0_3 = arith.constant 0 : index
    %c0_4 = arith.constant 0 : index
    %3 = vector.load %arg2[%c0_2, %c0_3, %c0_4] : memref<4x256x128xbf16, #tpu.memory_space<vmem>>, vector<1x256x128xbf16>
    %4 = vector.shape_cast %3 : vector<1x256x128xbf16> to vector<256x128xbf16>
    %cst_5 = arith.constant dense<0.000000e+00> : vector<30x128xf32>
    %5 = tpu.matmul %1, %4, %cst_5 {dimension_numbers = #tpu.dot_dimension_numbers<[1], [0], [0], [1], [0, 0, 1, 1], [], []>} : vector<30x256xbf16>, vector<256x128xbf16>, vector<30x128xf32> -> vector<30x128xf32>
    %6 = vector.extract_strided_slice %5 {offsets = [0, 0], sizes = [20, 128], strides = [1, 1]} : vector<30x128xf32> to vector<20x128xf32>
    %7 = arith.addf %2, %6 : vector<20x128xf32>
    %c1 = arith.constant 1 : index
    %c0_6 = arith.constant 0 : index
    %c0_7 = arith.constant 0 : index
    %8 = vector.load %arg2[%c1, %c0_6, %c0_7] : memref<4x256x128xbf16, #tpu.memory_space<vmem>>, vector<1x256x128xbf16>
    %9 = vector.shape_cast %8 : vector<1x256x128xbf16> to vector<256x128xbf16>
    %cst_8 = arith.constant dense<0.000000e+00> : vector<30x128xf32>
    %10 = tpu.matmul %1, %9, %cst_8 {dimension_numbers = #tpu.dot_dimension_numbers<[1], [0], [0], [1], [0, 0, 1, 1], [], []>} : vector<30x256xbf16>, vector<256x128xbf16>, vector<30x128xf32> -> vector<30x128xf32>
    %11 = vector.extract_strided_slice %10 {offsets = [1, 0], sizes = [20, 128], strides = [1, 1]} : vector<30x128xf32> to vector<20x128xf32>
    %12 = arith.addf %7, %11 : vector<20x128xf32>
    %c2 = arith.constant 2 : index
    %c0_9 = arith.constant 0 : index
    %c0_10 = arith.constant 0 : index
    %13 = vector.load %arg2[%c2, %c0_9, %c0_10] : memref<4x256x128xbf16, #tpu.memory_space<vmem>>, vector<1x256x128xbf16>
    %14 = vector.shape_cast %13 : vector<1x256x128xbf16> to vector<256x128xbf16>
    %cst_11 = arith.constant dense<0.000000e+00> : vector<30x128xf32>
    %15 = tpu.matmul %1, %14, %cst_11 {dimension_numbers = #tpu.dot_dimension_numbers<[1], [0], [0], [1], [0, 0, 1, 1], [], []>} : vector<30x256xbf16>, vector<256x128xbf16>, vector<30x128xf32> -> vector<30x128xf32>
    %16 = vector.extract_strided_slice %15 {offsets = [5, 0], sizes = [20, 128], strides = [1, 1]} : vector<30x128xf32> to vector<20x128xf32>
    %17 = arith.addf %12, %16 : vector<20x128xf32>
    %c3 = arith.constant 3 : index
    %c0_12 = arith.constant 0 : index
    %c0_13 = arith.constant 0 : index
    %18 = vector.load %arg2[%c3, %c0_12, %c0_13] : memref<4x256x128xbf16, #tpu.memory_space<vmem>>, vector<1x256x128xbf16>
    %19 = vector.shape_cast %18 : vector<1x256x128xbf16> to vector<256x128xbf16>
    %cst_14 = arith.constant dense<0.000000e+00> : vector<30x128xf32>
    %20 = tpu.matmul %1, %19, %cst_14 {dimension_numbers = #tpu.dot_dimension_numbers<[1], [0], [0], [1], [0, 0, 1, 1], [], []>} : vector<30x256xbf16>, vector<256x128xbf16>, vector<30x128xf32> -> vector<30x128xf32>
    %21 = vector.extract_strided_slice %20 {offsets = [6, 0], sizes = [20, 128], strides = [1, 1]} : vector<30x128xf32> to vector<20x128xf32>
    %22 = arith.addf %17, %21 : vector<20x128xf32>
    %c0_15 = arith.constant 0 : index
    %c0_16 = arith.constant 0 : index
    %c0_17 = arith.constant 0 : index
    %23 = vector.load %arg4[%c0_15, %c0_16, %c0_17] : memref<1x20x128xf32, #tpu.memory_space<vmem>>, vector<1x20x128xf32>
    %24 = vector.shape_cast %23 : vector<1x20x128xf32> to vector<20x128xf32>
    %25 = vector.shape_cast %22 : vector<20x128xf32> to vector<1x20x128xf32>
    tpu.vector_store %arg4[%c0_15, %c0_16, %c0_17], %25 {strides = array<i32>} : memref<1x20x128xf32, #tpu.memory_space<vmem>>, vector<1x20x128xf32>,
    %c0_18 = arith.constant 0 : index
    %c0_19 = arith.constant 0 : index
    %26 = vector.load %arg3[%c0_18, %c0_19] : memref<20x1xf32, #tpu.memory_space<vmem>>, vector<20x1xf32>
    %27 = vector.broadcast %26 : vector<20x1xf32> to vector<20x128xf32>
    %28 = arith.mulf %22, %27 : vector<20x128xf32>
    %cst_20 = arith.constant dense<0.000000e+00> : vector<128xf32>
    %29 = vector.multi_reduction <add>, %28, %cst_20 [0] : vector<20x128xf32> to vector<128xf32>
    %30 = vector.shape_cast %29 : vector<128xf32> to vector<1x128xf32>
    %c0_21 = arith.constant 0 : index
    %c0_22 = arith.constant 0 : index
    %c0_23 = arith.constant 0 : index
    %31 = vector.load %arg5[%c0_21, %c0_22, %c0_23] : memref<1x1x128xf32, #tpu.memory_space<vmem>>, vector<1x1x128xf32>
    %32 = vector.shape_cast %31 : vector<1x1x128xf32> to vector<1x128xf32>
    %33 = vector.shape_cast %30 : vector<1x128xf32> to vector<1x1x128xf32>
    tpu.vector_store %arg5[%c0_21, %c0_22, %c0_23], %33 {strides = array<i32>} : memref<1x1x128xf32, #tpu.memory_space<vmem>>, vector<1x1x128xf32>,
    %34 = arith.mulf %28, %22 : vector<20x128xf32>
    %cst_24 = arith.constant dense<0.000000e+00> : vector<128xf32>
    %35 = vector.multi_reduction <add>, %34, %cst_24 [0] : vector<20x128xf32> to vector<128xf32>
    %36 = vector.shape_cast %35 : vector<128xf32> to vector<1x128xf32>
    %c0_25 = arith.constant 0 : index
    %c0_26 = arith.constant 0 : index
    %c0_27 = arith.constant 0 : index
    %37 = vector.load %arg6[%c0_25, %c0_26, %c0_27] : memref<1x1x128xf32, #tpu.memory_space<vmem>>, vector<1x1x128xf32>
    %38 = vector.shape_cast %37 : vector<1x1x128xf32> to vector<1x128xf32>
    %39 = vector.shape_cast %36 : vector<1x128xf32> to vector<1x1x128xf32>
    tpu.vector_store %arg6[%c0_25, %c0_26, %c0_27], %39 {strides = array<i32>} : memref<1x1x128xf32, #tpu.memory_space<vmem>>, vector<1x1x128xf32>,
    return
  }
  func.func @transform_0(%arg0: i32) -> (i32, i32, i32) {
    %c0_i32 = arith.constant 0 : i32
    %c0_i32_0 = arith.constant 0 : i32
    %c0_i32_1 = arith.constant 0 : i32
    return %arg0, %c0_i32, %c0_i32_0 : i32, i32, i32
  }
  func.func @transform_1(%arg0: i32) -> (i32, i32, i32) {
    %c0_i32 = arith.constant 0 : i32
    %c0_i32_0 = arith.constant 0 : i32
    %c0_i32_1 = arith.constant 0 : i32
    %c0_i32_2 = arith.constant 0 : i32
    return %c0_i32, %c0_i32_0, %c0_i32_1 : i32, i32, i32
  }
  func.func @transform_2(%arg0: i32) -> (i32, i32) {
    %c0_i32 = arith.constant 0 : i32
    %c0_i32_0 = arith.constant 0 : i32
    %c0_i32_1 = arith.constant 0 : i32
    return %c0_i32, %c0_i32_0 : i32, i32
  }
  func.func @transform_3(%arg0: i32) -> (i32, i32, i32) {
    %c0_i32 = arith.constant 0 : i32
    %c0_i32_0 = arith.constant 0 : i32
    %c0_i32_1 = arith.constant 0 : i32
    return %arg0, %c0_i32, %c0_i32_0 : i32, i32, i32
  }
  func.func @transform_4(%arg0: i32) -> (i32, i32, i32) {
    %c0_i32 = arith.constant 0 : i32
    %c0_i32_0 = arith.constant 0 : i32
    %c0_i32_1 = arith.constant 0 : i32
    return %arg0, %c0_i32, %c0_i32_0 : i32, i32, i32
  }
  func.func @transform_5(%arg0: i32) -> (i32, i32, i32) {
    %c0_i32 = arith.constant 0 : i32
    %c0_i32_0 = arith.constant 0 : i32
    %c0_i32_1 = arith.constant 0 : i32
    return %arg0, %c0_i32, %c0_i32_0 : i32, i32, i32
  }
}

module attributes {stable_mosaic.version = 11 : i64} {
  func.func @_tail_kernel(%arg0: i32, %arg1: memref<2x2560xf32, #tpu.memory_space<vmem>>, %arg2: memref<1x2560xf32, #tpu.memory_space<vmem>>, %arg3: memref<1x2560xf32, #tpu.memory_space<vmem>>, %arg4: memref<2560x16xf32, #tpu.memory_space<vmem>>, %arg5: memref<16x1xf32, #tpu.memory_space<vmem>>, %arg6: memref<1x1xf32, #tpu.memory_space<vmem>>, %arg7: memref<16x16xf32, #tpu.memory_space<vmem>>, %arg8: memref<1x16xf32, #tpu.memory_space<vmem>>, %arg9: memref<2x1xf32, #tpu.memory_space<vmem>>, %arg10: memref<2x16xf32, #tpu.memory_space<vmem>>) attributes {dimension_semantics = [#tpu.dimension_semantics<arbitrary>], iteration_bounds = array<i64: 1>, scalar_prefetch = 0 : i64, scratch_operands = 0 : i64, tpu.core_type = #tpu.core_type<tc>, window_params = [{pipeline_mode = #tpu.pipeline_mode<synchronous>, transform_indices = @transform_0, window_bounds = array<i64: 2, 2560>}, {pipeline_mode = #tpu.pipeline_mode<synchronous>, transform_indices = @transform_1, window_bounds = array<i64: 1, 2560>}, {pipeline_mode = #tpu.pipeline_mode<synchronous>, transform_indices = @transform_2, window_bounds = array<i64: 1, 2560>}, {pipeline_mode = #tpu.pipeline_mode<synchronous>, transform_indices = @transform_3, window_bounds = array<i64: 2560, 16>}, {pipeline_mode = #tpu.pipeline_mode<synchronous>, transform_indices = @transform_4, window_bounds = array<i64: 16, 1>}, {pipeline_mode = #tpu.pipeline_mode<synchronous>, transform_indices = @transform_5, window_bounds = array<i64: 1, 1>}, {pipeline_mode = #tpu.pipeline_mode<synchronous>, transform_indices = @transform_6, window_bounds = array<i64: 16, 16>}, {pipeline_mode = #tpu.pipeline_mode<synchronous>, transform_indices = @transform_7, window_bounds = array<i64: 1, 16>}, {pipeline_mode = #tpu.pipeline_mode<synchronous>, transform_indices = @transform_8, window_bounds = array<i64: 2, 1>}, {pipeline_mode = #tpu.pipeline_mode<synchronous>, transform_indices = @transform_9, window_bounds = array<i64: 2, 16>}]} {
    %c0 = arith.constant 0 : index
    %c0_0 = arith.constant 0 : index
    %0 = vector.load %arg1[%c0, %c0_0] : memref<2x2560xf32, #tpu.memory_space<vmem>>, vector<2x2560xf32>
    %c0_1 = arith.constant 0 : index
    %c0_2 = arith.constant 0 : index
    %1 = vector.load %arg2[%c0_1, %c0_2] : memref<1x2560xf32, #tpu.memory_space<vmem>>, vector<1x2560xf32>
    %2 = vector.broadcast %1 : vector<1x2560xf32> to vector<2x2560xf32>
    %3 = arith.mulf %0, %2 : vector<2x2560xf32>
    %c0_3 = arith.constant 0 : index
    %c0_4 = arith.constant 0 : index
    %4 = vector.load %arg3[%c0_3, %c0_4] : memref<1x2560xf32, #tpu.memory_space<vmem>>, vector<1x2560xf32>
    %5 = vector.broadcast %4 : vector<1x2560xf32> to vector<2x2560xf32>
    %6 = arith.addf %3, %5 : vector<2x2560xf32>
    %cst = arith.constant 0.000000e+00 : f32
    %7 = vector.broadcast %cst : f32 to vector<2x2560xf32>
    %8 = arith.cmpf oge, %6, %7 : vector<2x2560xf32>
    %cst_5 = arith.constant 2.000000e-01 : f32
    %9 = vector.broadcast %cst_5 : f32 to vector<2x2560xf32>
    %10 = arith.mulf %9, %6 : vector<2x2560xf32>
    %11 = arith.select %8, %6, %10 : vector<2x2560xi1>, vector<2x2560xf32>
    %c0_6 = arith.constant 0 : index
    %c0_7 = arith.constant 0 : index
    %12 = vector.load %arg4[%c0_6, %c0_7] : memref<2560x16xf32, #tpu.memory_space<vmem>>, vector<2560x16xf32>
    %cst_8 = arith.constant dense<0.000000e+00> : vector<2x16xf32>
    %13 = tpu.matmul %11, %12, %cst_8 {dimension_numbers = #tpu.dot_dimension_numbers<[1], [0], [0], [1], [0, 0, 1, 1], [], []>} : vector<2x2560xf32>, vector<2560x16xf32>, vector<2x16xf32> -> vector<2x16xf32>
    %c0_9 = arith.constant 0 : index
    %c0_10 = arith.constant 0 : index
    %14 = vector.load %arg5[%c0_9, %c0_10] : memref<16x1xf32, #tpu.memory_space<vmem>>, vector<16x1xf32>
    %cst_11 = arith.constant dense<0.000000e+00> : vector<2x1xf32>
    %15 = tpu.matmul %13, %14, %cst_11 {dimension_numbers = #tpu.dot_dimension_numbers<[1], [0], [0], [1], [0, 0, 1, 1], [], []>} : vector<2x16xf32>, vector<16x1xf32>, vector<2x1xf32> -> vector<2x1xf32>
    %c0_12 = arith.constant 0 : index
    %c0_13 = arith.constant 0 : index
    %16 = vector.load %arg6[%c0_12, %c0_13] : memref<1x1xf32, #tpu.memory_space<vmem>>, vector<1x1xf32>
    %17 = vector.broadcast %16 : vector<1x1xf32> to vector<2x1xf32>
    %18 = arith.addf %15, %17 : vector<2x1xf32>
    %cst_14 = arith.constant 0.000000e+00 : f32
    %19 = vector.broadcast %cst_14 : f32 to vector<2x1xf32>
    %20 = arith.subf %19, %18 : vector<2x1xf32>
    %21 = math.exp %20 : vector<2x1xf32>
    %cst_15 = arith.constant 1.000000e+00 : f32
    %22 = vector.broadcast %cst_15 : f32 to vector<2x1xf32>
    %23 = arith.addf %22, %21 : vector<2x1xf32>
    %cst_16 = arith.constant 1.000000e+00 : f32
    %24 = vector.broadcast %cst_16 : f32 to vector<2x1xf32>
    %25 = arith.divf %24, %23 : vector<2x1xf32>
    %c0_17 = arith.constant 0 : index
    %c0_18 = arith.constant 0 : index
    %26 = vector.load %arg9[%c0_17, %c0_18] : memref<2x1xf32, #tpu.memory_space<vmem>>, vector<2x1xf32>
    tpu.vector_store %arg9[%c0_17, %c0_18], %25 {strides = array<i32>} : memref<2x1xf32, #tpu.memory_space<vmem>>, vector<2x1xf32>,
    %c0_19 = arith.constant 0 : index
    %c0_20 = arith.constant 0 : index
    %27 = vector.load %arg7[%c0_19, %c0_20] : memref<16x16xf32, #tpu.memory_space<vmem>>, vector<16x16xf32>
    %cst_21 = arith.constant dense<0.000000e+00> : vector<2x16xf32>
    %28 = tpu.matmul %13, %27, %cst_21 {dimension_numbers = #tpu.dot_dimension_numbers<[1], [0], [0], [1], [0, 0, 1, 1], [], []>} : vector<2x16xf32>, vector<16x16xf32>, vector<2x16xf32> -> vector<2x16xf32>
    %c0_22 = arith.constant 0 : index
    %c0_23 = arith.constant 0 : index
    %29 = vector.load %arg8[%c0_22, %c0_23] : memref<1x16xf32, #tpu.memory_space<vmem>>, vector<1x16xf32>
    %30 = vector.broadcast %29 : vector<1x16xf32> to vector<2x16xf32>
    %31 = arith.addf %28, %30 : vector<2x16xf32>
    %cst_24 = arith.constant dense<0xFF800000> : vector<2xf32>
    %32 = vector.multi_reduction <maximumf>, %31, %cst_24 [1] : vector<2x16xf32> to vector<2xf32>
    %33 = vector.shape_cast %32 : vector<2xf32> to vector<2x1xf32>
    %34 = vector.broadcast %33 : vector<2x1xf32> to vector<2x16xf32>
    %35 = arith.subf %31, %34 : vector<2x16xf32>
    %36 = math.exp %35 : vector<2x16xf32>
    %cst_25 = arith.constant dense<0.000000e+00> : vector<2xf32>
    %37 = vector.multi_reduction <add>, %36, %cst_25 [1] : vector<2x16xf32> to vector<2xf32>
    %38 = vector.shape_cast %37 : vector<2xf32> to vector<2x1xf32>
    %39 = math.log %38 : vector<2x1xf32>
    %40 = vector.broadcast %39 : vector<2x1xf32> to vector<2x16xf32>
    %41 = arith.subf %35, %40 : vector<2x16xf32>
    %c0_26 = arith.constant 0 : index
    %c0_27 = arith.constant 0 : index
    %42 = vector.load %arg10[%c0_26, %c0_27] : memref<2x16xf32, #tpu.memory_space<vmem>>, vector<2x16xf32>
    tpu.vector_store %arg10[%c0_26, %c0_27], %41 {strides = array<i32>} : memref<2x16xf32, #tpu.memory_space<vmem>>, vector<2x16xf32>,
    return
  }
  func.func @transform_0(%arg0: i32) -> (i32, i32) {
    %c0_i32 = arith.constant 0 : i32
    %c0_i32_0 = arith.constant 0 : i32
    %c0_i32_1 = arith.constant 0 : i32
    return %c0_i32, %c0_i32_0 : i32, i32
  }
  func.func @transform_1(%arg0: i32) -> (i32, i32) {
    %c0_i32 = arith.constant 0 : i32
    %c0_i32_0 = arith.constant 0 : i32
    %c0_i32_1 = arith.constant 0 : i32
    return %c0_i32, %c0_i32_0 : i32, i32
  }
  func.func @transform_2(%arg0: i32) -> (i32, i32) {
    %c0_i32 = arith.constant 0 : i32
    %c0_i32_0 = arith.constant 0 : i32
    %c0_i32_1 = arith.constant 0 : i32
    return %c0_i32, %c0_i32_0 : i32, i32
  }
  func.func @transform_3(%arg0: i32) -> (i32, i32) {
    %c0_i32 = arith.constant 0 : i32
    %c0_i32_0 = arith.constant 0 : i32
    %c0_i32_1 = arith.constant 0 : i32
    return %c0_i32, %c0_i32_0 : i32, i32
  }
  func.func @transform_4(%arg0: i32) -> (i32, i32) {
    %c0_i32 = arith.constant 0 : i32
    %c0_i32_0 = arith.constant 0 : i32
    %c0_i32_1 = arith.constant 0 : i32
    return %c0_i32, %c0_i32_0 : i32, i32
  }
  func.func @transform_5(%arg0: i32) -> (i32, i32) {
    %c0_i32 = arith.constant 0 : i32
    %c0_i32_0 = arith.constant 0 : i32
    %c0_i32_1 = arith.constant 0 : i32
    return %c0_i32, %c0_i32_0 : i32, i32
  }
  func.func @transform_6(%arg0: i32) -> (i32, i32) {
    %c0_i32 = arith.constant 0 : i32
    %c0_i32_0 = arith.constant 0 : i32
    %c0_i32_1 = arith.constant 0 : i32
    return %c0_i32, %c0_i32_0 : i32, i32
  }
  func.func @transform_7(%arg0: i32) -> (i32, i32) {
    %c0_i32 = arith.constant 0 : i32
    %c0_i32_0 = arith.constant 0 : i32
    %c0_i32_1 = arith.constant 0 : i32
    return %c0_i32, %c0_i32_0 : i32, i32
  }
  func.func @transform_8(%arg0: i32) -> (i32, i32) {
    %c0_i32 = arith.constant 0 : i32
    %c0_i32_0 = arith.constant 0 : i32
    %c0_i32_1 = arith.constant 0 : i32
    return %c0_i32, %c0_i32_0 : i32, i32
  }
  func.func @transform_9(%arg0: i32) -> (i32, i32) {
    %c0_i32 = arith.constant 0 : i32
    %c0_i32_0 = arith.constant 0 : i32
    %c0_i32_1 = arith.constant 0 : i32
    return %c0_i32, %c0_i32_0 : i32, i32
  }
}

</mosaic_0001>

<bundles_post_ra>
// kernel: d_forward.5
= control target key start
LH: loop header
LB: loop body
LE: loop exit
PB: predicated region body
PF: predicated region fallthrough
CT: control target
= control target key end

     0   :  { %s5721_s9 = smov 0   ;;  %s7575_s0 = inlined_call_operand.vmem [shape: bf16[2,1122,12], index: 0, kind: input, shape index: {}]   ;;  %s7576_s1 = inlined_call_operand.vmem [shape: bf16[4,12,16], index: 1, kind: input, shape index: {}]   ;;  %s7577_s2 = inlined_call_operand.vmem [shape: f32[2,1056,16], index: 2, kind: output, shape index: {}]  }
   0x1 LB: > { %s5019_s10 = sadd.s32 4294967295, %s5704_s9   ;;  %p5023_p0 = scmp.ge.s32.totalorder %s5704_s9, 1  ;;  %s5704_s9 = sphi %s5721_s9, %s12_s9  }
   0x2   : > { %p112_p1 = scmp.lt.s32.totalorder %s5704_s9, 3 }
   0x4   : > { %p113_p2 = pnand %p5023_p0, %p112_p1 }
   0x5   : > { %p134_p3 = scmp.lt.s32.totalorder (!%p113_p2), %s5019_s10, 1 }
   0x6   : > { %116 = sbr.rel (%p113_p2) target bundleno = 1280 (0x500), region = 28 }
   0xb   : > { %v5308_v0 = vld [vmem:[%s7576_s1] sm:$0xf]  ;;  %v5684_v1 = vld [vmem:[%s7576_s1] sm:$0x30]  ;;  %vm860_vm0 = vcmask 1045504   ;;  %s7579_s10 = smov (!%p134_p3, %s5019_s10), 1 }
   0xc   : > { %v5309_v2 = vor.u32 %v5684_v1, %v5308_v0  ;;  %v5385_v3 = vld [vmem:[%s7576_s1 + $0x8] sm:$0xf]  ;;  %v5685_v4 = vld [vmem:[%s7576_s1 + $0x8] sm:$0x30]  ;;  %v5462_v5 = vld [vmem:[%s7576_s1 + $0x10] sm:$0xf] }
   0xd   : > { %v5386_v6 = vor.u32 %v5685_v4, %v5385_v3  ;;  %v5686_v7 = vld [vmem:[%s7576_s1 + $0x10] sm:$0x30]  ;;  %v5539_v8 = vld [vmem:[%s7576_s1 + $0x18] sm:$0xf]  ;;  %v5687_v9 = vld [vmem:[%s7576_s1 + $0x18] sm:$0x30] }
   0xe   : > { %v862_v10 = vsel %vm860_vm0, %v5309_v2, 0  ;;  %v5463_v11 = vor.u32 %v5686_v7, %v5462_v5  ;;  %v5540_v12 = vor.u32 %v5687_v9, %v5539_v8  ;;  %s5688_s27 = smul.u32 564, %s7579_s10  ;;  %vm646_vm1 = vcmask 97280  }
   0xf   : > { %871 = vmatpush.bf16.msra.mxu0 %v862_v10  ;;  %v1359_v13 = vsel %vm860_vm0, %v5386_v6, 0  ;;  %vm1849_vm2 = vcmask 1046528   ;;  %s5689_s3 = smul.u32 1056, %s7579_s10  ;;  %vm4831_vm4 = vcmask 130048  }
  0x10   : > { %1368 = vmatpush.bf16.msra.mxu1 %v1359_v13  ;;  %v2388_v14 = vsel %vm860_vm0, %v5463_v11, 0  ;;  %v3416_v15 = vsel %vm860_vm0, %v5540_v12, 0  ;;  %s5763_s30 = scalar_lea.vmem %s7575_s0, %s5688_s27 }
  0x11   : > { %2397 = vmatpush.bf16.msra.mxu2 %v2388_v14  ;;  %3425 = vmatpush.bf16.msra.mxu3 %v3416_v15  ;;  %v5614_v16 = vld [vmem:[%s5763_s30] sm:$0xff]  ;;  %v5615_v17 = vld [vmem:[%s5763_s30 + $0x8] sm:$0xff]  ;;  %v5616_v18 = vld [vmem:[%s5763_s30 + $0x10] sm:$0xff]  ;;  %s5856_s6 = scalar_lea.vmem %s7577_s2, %s5689_s3 }
  0x12   : > { %5310 = vmatmul.msk.bf16.vlgmr.msra.gmra.mxu0 %vm646_vm1, %v5614_v16  ;;  %v5617_v19 = vld [vmem:[%s5763_s30 + $0x18] sm:$0xff]  ;;  %v5618_v20 = vld [vmem:[%s5763_s30 + $0x20] sm:$0xff]  ;;  %v5619_v21 = vld [vmem:[%s5763_s30 + $0x28] sm:$0xff] }
  0x13   : > { %5387 = vmatmul.msk.bf16.vlgmr.msra.gmra.mxu1 %vm646_vm1, %v5614_v16  ;;  %v5620_v22 = vld [vmem:[%s5763_s30 + $0x30] sm:$0xff]  ;;  %v5621_v23 = vld [vmem:[%s5763_s30 + $0x38] sm:$0xff]  ;;  %v5622_v24 = vld [vmem:[%s5763_s30 + $0x40] sm:$0xff] }
  0x14   : > { %5464 = vmatmul.msk.bf16.vlgmr.msra.gmra.mxu2 %vm646_vm1, %v5614_v16  ;;  %5541 = vmatmul.msk.bf16.vlgmr.msra.gmra.mxu3 %vm646_vm1, %v5614_v16  ;;  %v5623_v33 = vld [vmem:[%s5763_s30 + $0x48] sm:$0xff]  ;;  %v5624_v42 = vld [vmem:[%s5763_s30 + $0x50] sm:$0xff]  ;;  %v5625_v54 = vld [vmem:[%s5763_s30 + $0x58] sm:$0xff] }
  0x22   : > { %5311 = vmatmul.msk.bf16.gmra.mxu0 %vm646_vm1, %v5615_v17 }
  0x23   : > { %5388 = vmatmul.msk.bf16.gmra.mxu1 %vm646_vm1, %v5615_v17 }
  0x24   : > { %5465 = vmatmul.msk.bf16.gmra.mxu2 %vm646_vm1, %v5615_v17  ;;  %5542 = vmatmul.msk.bf16.gmra.mxu3 %vm646_vm1, %v5615_v17 }
  0x32   : > { %5312 = vmatmul.msk.bf16.gmra.mxu0 %vm646_vm1, %v5616_v18 }
  0x33   : > { %5389 = vmatmul.msk.bf16.gmra.mxu1 %vm646_vm1, %v5616_v18 }
  0x34   : > { %5466 = vmatmul.msk.bf16.gmra.mxu2 %vm646_vm1, %v5616_v18  ;;  %5543 = vmatmul.msk.bf16.gmra.mxu3 %vm646_vm1, %v5616_v18 }
  0x42   : > { %5313 = vmatmul.msk.bf16.gmra.mxu0 %vm646_vm1, %v5617_v19 }
  0x43   : > { %5390 = vmatmul.msk.bf16.gmra.mxu1 %vm646_vm1, %v5617_v19 }
  0x44   : > { %5467 = vmatmul.msk.bf16.gmra.mxu2 %vm646_vm1, %v5617_v19  ;;  %5544 = vmatmul.msk.bf16.gmra.mxu3 %vm646_vm1, %v5617_v19 }
  0x52   : > { %5314 = vmatmul.msk.bf16.gmra.mxu0 %vm646_vm1, %v5618_v20 }
  0x53   : > { %5391 = vmatmul.msk.bf16.gmra.mxu1 %vm646_vm1, %v5618_v20 }
  0x54   : > { %5468 = vmatmul.msk.bf16.gmra.mxu2 %vm646_vm1, %v5618_v20  ;;  %5545 = vmatmul.msk.bf16.gmra.mxu3 %vm646_vm1, %v5618_v20 }
  0x62   : > { %5315 = vmatmul.msk.bf16.gmra.mxu0 %vm646_vm1, %v5619_v21 }
  0x63   : > { %5392 = vmatmul.msk.bf16.gmra.mxu1 %vm646_vm1, %v5619_v21 }
  0x64   : > { %5469 = vmatmul.msk.bf16.gmra.mxu2 %vm646_vm1, %v5619_v21  ;;  %5546 = vmatmul.msk.bf16.gmra.mxu3 %vm646_vm1, %v5619_v21 }
  0x72   : > { %5316 = vmatmul.msk.bf16.gmra.mxu0 %vm646_vm1, %v5620_v22 }
  0x73   : > { %5393 = vmatmul.msk.bf16.gmra.mxu1 %vm646_vm1, %v5620_v22 }
  0x74   : > { %5470 = vmatmul.msk.bf16.gmra.mxu2 %vm646_vm1, %v5620_v22  ;;  %5547 = vmatmul.msk.bf16.gmra.mxu3 %vm646_vm1, %v5620_v22  ;;  %v5626_v22 = vld [vmem:[%s5763_s30 + $0x60] sm:$0xff] }
  0x82   : > { %5317 = vmatmul.msk.bf16.gmra.mxu0 %vm646_vm1, %v5621_v23 }
  0x83   : > { %5394 = vmatmul.msk.bf16.gmra.mxu1 %vm646_vm1, %v5621_v23 }
  0x84   : > { %5471 = vmatmul.msk.bf16.gmra.mxu2 %vm646_vm1, %v5621_v23  ;;  %5548 = vmatmul.msk.bf16.gmra.mxu3 %vm646_vm1, %v5621_v23 }
  0x8f   : > { %v873_v25 = vpop.f32.mrf.mxu0 }
  0x90   : > { %v1370_v26 = vpop.f32.mrf.mxu1 }
  0x91   : > { %v1850_v50 = vrot.slane %v1370_v26, 1 }
  0x92   : > { %5318 = vmatmul.msk.bf16.gmra.mxu0 %vm646_vm1, %v5622_v24 }
  0x93   : > { %5395 = vmatmul.msk.bf16.gmra.mxu1 %vm646_vm1, %v5622_v24 }
  0x94   : > { %5472 = vmatmul.msk.bf16.gmra.mxu2 %vm646_vm1, %v5622_v24  ;;  %5549 = vmatmul.msk.bf16.gmra.mxu3 %vm646_vm1, %v5622_v24 }
  0x97   : > { %v2399_v27 = vpop.f32.mrf.mxu2  ;;  %v3427_v28 = vpop.f32.mrf.mxu3 }
  0x98   : > { %v5810_v29 = vpop.f32.mrf.mxu0  ;;  %v1372_v30 = vpop.f32.mrf.mxu1 }
  0x99   : > { %v1851_v49 = vrot.slane %v1372_v30, 1 }
  0x9b   : > { %v1852_v51 = vsel %vm1849_vm2, %v1850_v50, %v1851_v49 }
  0x9c   : > { %v2247_v60 = vadd.f32 %v1852_v51, %v873_v25 }
  0x9f   : > { %v2400_v31 = vpop.f32.mrf.mxu2  ;;  %v3428_v32 = vpop.f32.mrf.mxu3 }
  0xa0   : > { %v5813_v34 = vpop.f32.mrf.mxu0  ;;  %v5815_v35 = vpop.f32.mrf.mxu1 }
  0xa1   : > { %v1853_v61 = vrot.slane %v5815_v35, 1 }
  0xa2   : > { %5319 = vmatmul.msk.bf16.gmra.mxu0 %vm646_vm1, %v5623_v33 }
  0xa3   : > { %5396 = vmatmul.msk.bf16.gmra.mxu1 %vm646_vm1, %v5623_v33  ;;  %v1854_v3 = vsel %vm1849_vm2, %v1851_v49, %v1853_v61 }
  0xa4   : > { %5473 = vmatmul.msk.bf16.gmra.mxu2 %vm646_vm1, %v5623_v33  ;;  %5550 = vmatmul.msk.bf16.gmra.mxu3 %vm646_vm1, %v5623_v33  ;;  %v2248_v11 = vadd.f32 %v1854_v3, %v5810_v29 }
  0xa7   : > { %v2402_v36 = vpop.f32.mrf.mxu2  ;;  %v3430_v37 = vpop.f32.mrf.mxu3 }
  0xa8   : > { %v5821_v38 = vpop.f32.mrf.mxu0  ;;  %v5823_v39 = vpop.f32.mrf.mxu1 }
  0xa9   : > { %v1855_v13 = vrot.slane %v5823_v39, 1 }
  0xab   : > { %v1856_v18 = vsel %vm1849_vm2, %v1853_v61, %v1855_v13 }
  0xac   : > { %v2249_v27 = vadd.f32 %v1856_v18, %v5813_v34 }
  0xaf   : > { %v2403_v40 = vpop.f32.mrf.mxu2  ;;  %v3431_v41 = vpop.f32.mrf.mxu3 }
  0xb0   : > { %v5826_v43 = vpop.f32.mrf.mxu0  ;;  %v5828_v44 = vpop.f32.mrf.mxu1 }
  0xb1   : > { %v1857_v29 = vrot.slane %v5828_v44, 1 }
  0xb2   : > { %5320 = vmatmul.msk.bf16.gmra.mxu0 %vm646_vm1, %v5624_v42 }
  0xb3   : > { %5397 = vmatmul.msk.bf16.gmra.mxu1 %vm646_vm1, %v5624_v42  ;;  %v1858_v34 = vsel %vm1849_vm2, %v1855_v13, %v1857_v29 }
  0xb4   : > { %5474 = vmatmul.msk.bf16.gmra.mxu2 %vm646_vm1, %v5624_v42  ;;  %5551 = vmatmul.msk.bf16.gmra.mxu3 %vm646_vm1, %v5624_v42  ;;  %v2250_v44 = vadd.f32 %v1858_v34, %v5821_v38 }
  0xb7   : > { %v2405_v45 = vpop.f32.mrf.mxu2  ;;  %v3433_v46 = vpop.f32.mrf.mxu3 }
  0xb8   : > { %v5834_v47 = vpop.f32.mrf.mxu0  ;;  %v5836_v48 = vpop.f32.mrf.mxu1  ;;  %v2878_v55 = vrot.slane %v2405_v45, 1  ;;  %v3906_v62 = vrot.slane %v3433_v46, 2 }
  0xb9   : > { %v1859_v46 = vrot.slane %v5836_v48, 1 }
  0xbf   : > { %v2407_v52 = vpop.f32.mrf.mxu2  ;;  %v3435_v53 = vpop.f32.mrf.mxu3 }
  0xc0   : > { %v2879_v56 = vrot.slane %v2407_v52, 1  ;;  %v3907_v57 = vrot.slane %v3435_v53, 2  ;;  %v5840_v58 = vpop.f32.mrf.mxu0  ;;  %v5842_v59 = vpop.f32.mrf.mxu1  ;;  %v1860_v53 = vsel %vm1849_vm2, %v1857_v29, %v1859_v46 }
  0xc2   : > { %v2880_v63 = vsel %vm1849_vm2, %v2878_v55, %v2879_v56  ;;  %5321 = vmatmul.msk.bf16.gmra.mxu0 %vm646_vm1, %v5625_v54  ;;  %v3908_v1 = vsel %vm860_vm0, %v3906_v62, %v3907_v57  ;;  %v2251_v62 = vadd.f32 %v1860_v53, %v5826_v43 }
  0xc3   : > { %v3275_v0 = vadd.f32 %v2880_v63, %v2247_v60  ;;  %5398 = vmatmul.msk.bf16.gmra.mxu1 %vm646_vm1, %v5625_v54 }
  0xc4   : > { %5475 = vmatmul.msk.bf16.gmra.mxu2 %vm646_vm1, %v5625_v54  ;;  %5552 = vmatmul.msk.bf16.gmra.mxu3 %vm646_vm1, %v5625_v54 }
  0xc5   : > { %v4303_v2 = vadd.f32 %v3908_v1, %v3275_v0  ;;  %v1861_v0 = vrot.slane %v5842_v59, 1 }
  0xc7   : > { %vm4435_vm3 = vcmp.ge.f32.partialorder %v4303_v2, 0.0  ;;  %v4567_v4 = vmul.f32 0.2, %v4303_v2  ;;  %v2410_v5 = vpop.f32.mrf.mxu2  ;;  %v3438_v6 = vpop.f32.mrf.mxu3 }
  0xc8   : > { %v2881_v7 = vrot.slane %v2410_v5, 1  ;;  %v3909_v8 = vrot.slane %v3438_v6, 2  ;;  %v5858_v9 = vpop.f32.mrf.mxu0  ;;  %v5860_v10 = vpop.f32.mrf.mxu1 }
  0xc9   : > { %v4699_v12 = vsel %vm4435_vm3, %v4303_v2, %v4567_v4  ;;  %v1862_v4 = vsel %vm1849_vm2, %v1859_v46, %v1861_v0 }
  0xca   : > { %4832 = vst.msk [vmem:[%s5856_s6] sm:$0xff] %vm4831_vm4, %v4699_v12  ;;  %v2882_v14 = vsel %vm1849_vm2, %v2879_v56, %v2881_v7  ;;  %v3910_v16 = vsel %vm860_vm0, %v3907_v57, %v3909_v8  ;;  %v5627_v57 = vld [vmem:[%s5763_s30 + $0x68] sm:$0xff]  ;;  %v2252_v13 = vadd.f32 %v1862_v4, %v5834_v47 }
  0xcb   : > { %v3276_v15 = vadd.f32 %v2882_v14, %v2248_v11 }
  0xcd   : > { %v4304_v17 = vadd.f32 %v3910_v16, %v3276_v15  ;;  %v1863_v15 = vrot.slane %v5860_v10, 1 }
  0xcf   : > { %vm4436_vm5 = vcmp.ge.f32.partialorder %v4304_v17, 0.0  ;;  %v4568_v19 = vmul.f32 0.2, %v4304_v17  ;;  %v2412_v20 = vpop.f32.mrf.mxu2  ;;  %v3440_v21 = vpop.f32.mrf.mxu3 }
  0xd0   : > { %v2883_v23 = vrot.slane %v2412_v20, 1  ;;  %v3911_v24 = vrot.slane %v3440_v21, 2  ;;  %v5870_v25 = vpop.f32.mrf.mxu0  ;;  %v5872_v26 = vpop.f32.mrf.mxu1  ;;  %v1864_v20 = vsel %vm1849_vm2, %v1861_v0, %v1863_v15 }
  0xd1   : > { %v4700_v28 = vsel %vm4436_vm5, %v4304_v17, %v4568_v19  ;;  %v2253_v29 = vadd.f32 %v1864_v20, %v5840_v58 }
  0xd2   : > { %4833 = vst.msk [vmem:[%s5856_s6 + $0x8] sm:$0xff] %vm4831_vm4, %v4700_v28  ;;  %v2884_v30 = vsel %vm1849_vm2, %v2881_v7, %v2883_v23  ;;  %5322 = vmatmul.msk.bf16.gmra.mxu0 %vm646_vm1, %v5626_v22  ;;  %v3912_v32 = vsel %vm860_vm0, %v3909_v8, %v3911_v24 }
  0xd3   : > { %v3277_v31 = vadd.f32 %v2884_v30, %v2249_v27  ;;  %5399 = vmatmul.msk.bf16.gmra.mxu1 %vm646_vm1, %v5626_v22 }
  0xd4   : > { %5476 = vmatmul.msk.bf16.gmra.mxu2 %vm646_vm1, %v5626_v22  ;;  %5553 = vmatmul.msk.bf16.gmra.mxu3 %vm646_vm1, %v5626_v22 }
  0xd5   : > { %v4305_v33 = vadd.f32 %v3912_v32, %v3277_v31  ;;  %v1865_v31 = vrot.slane %v5872_v26, 1 }
  0xd7   : > { %vm4437_vm6 = vcmp.ge.f32.partialorder %v4305_v33, 0.0  ;;  %v4569_v35 = vmul.f32 0.2, %v4305_v33  ;;  %v2415_v36 = vpop.f32.mrf.mxu2  ;;  %v3443_v37 = vpop.f32.mrf.mxu3 }
  0xd8   : > { %v2885_v39 = vrot.slane %v2415_v36, 1  ;;  %v3913_v40 = vrot.slane %v3443_v37, 2  ;;  %v5885_v41 = vpop.f32.mrf.mxu0  ;;  %v5887_v42 = vpop.f32.mrf.mxu1 }
  0xd9   : > { %v4701_v45 = vsel %vm4437_vm6, %v4305_v33, %v4569_v35  ;;  %v1866_v35 = vsel %vm1849_vm2, %v1863_v15, %v1865_v31 }
  0xda   : > { %4834 = vst.msk [vmem:[%s5856_s6 + $0x10] sm:$0xff] %vm4831_vm4, %v4701_v45  ;;  %v2886_v49 = vsel %vm1849_vm2, %v2883_v23, %v2885_v39  ;;  %v3914_v51 = vsel %vm860_vm0, %v3911_v24, %v3913_v40  ;;  %v5628_v24 = vld [vmem:[%s5763_s30 + $0x70] sm:$0xff]  ;;  %v2254_v46 = vadd.f32 %v1866_v35, %v5858_v9 }
  0xdb   : > { %v3278_v50 = vadd.f32 %v2886_v49, %v2250_v44 }
  0xdd   : > { %v4306_v52 = vadd.f32 %v3914_v51, %v3278_v50  ;;  %v1867_v50 = vrot.slane %v5887_v42, 1 }
  0xdf   : > { %vm4438_vm7 = vcmp.ge.f32.partialorder %v4306_v52, 0.0  ;;  %v4570_v54 = vmul.f32 0.2, %v4306_v52  ;;  %v2417_v55 = vpop.f32.mrf.mxu2  ;;  %v3445_v56 = vpop.f32.mrf.mxu3 }
  0xe0   : > { %v2887_v38 = vrot.slane %v2417_v55, 1  ;;  %v3915_v60 = vrot.slane %v3445_v56, 2  ;;  %v5897_v61 = vpop.f32.mrf.mxu0  ;;  %v5899_v48 = vpop.f32.mrf.mxu1  ;;  %v1868_v55 = vsel %vm1849_vm2, %v1865_v31, %v1867_v50 }
  0xe1   : > { %v4702_v63 = vsel %vm4438_vm7, %v4306_v52, %v4570_v54  ;;  %v2255_v0 = vadd.f32 %v1868_v55, %v5870_v25 }
  0xe2   : > { %4835 = vst.msk [vmem:[%s5856_s6 + $0x18] sm:$0xff] %vm4831_vm4, %v4702_v63  ;;  %v2888_v1 = vsel %vm1849_vm2, %v2885_v39, %v2887_v38  ;;  %5323 = vmatmul.msk.bf16.gmra.mxu0 %vm646_vm1, %v5627_v57  ;;  %v3916_v3 = vsel %vm860_vm0, %v3913_v40, %v3915_v60 }
  0xe3   : > { %v3279_v2 = vadd.f32 %v2888_v1, %v2251_v62  ;;  %5400 = vmatmul.msk.bf16.gmra.mxu1 %vm646_vm1, %v5627_v57 }
  0xe4   : > { %5477 = vmatmul.msk.bf16.gmra.mxu2 %vm646_vm1, %v5627_v57  ;;  %5554 = vmatmul.msk.bf16.gmra.mxu3 %vm646_vm1, %v5627_v57 }
  0xe5   : > { %v4307_v43 = vadd.f32 %v3916_v3, %v3279_v2  ;;  %v1869_v2 = vrot.slane %v5899_v48, 1 }
  0xe7   : > { %vm4439_vm8 = vcmp.ge.f32.partialorder %v4307_v43, 0.0  ;;  %v4571_v59 = vmul.f32 0.2, %v4307_v43  ;;  %v2420_v5 = vpop.f32.mrf.mxu2  ;;  %v3448_v6 = vpop.f32.mrf.mxu3 }
  0xe8   : > { %v2889_v7 = vrot.slane %v2420_v5, 1  ;;  %v3917_v8 = vrot.slane %v3448_v6, 2  ;;  %v5912_v11 = vpop.f32.mrf.mxu0  ;;  %v5914_v12 = vpop.f32.mrf.mxu1 }
  0xe9   : > { %v4703_v14 = vsel %vm4439_vm8, %v4307_v43, %v4571_v59  ;;  %v1870_v59 = vsel %vm1849_vm2, %v1867_v50, %v1869_v2 }
  0xea   : > { %4836 = vst.msk [vmem:[%s5856_s6 + $0x20] sm:$0xff] %vm4831_vm4, %v4703_v14  ;;  %v2890_v16 = vsel %vm1849_vm2, %v2887_v38, %v2889_v7  ;;  %v3918_v18 = vsel %vm860_vm0, %v3915_v60, %v3917_v8  ;;  %v5629_v60 = vld [vmem:[%s5763_s30 + $0x78] sm:$0xff]  ;;  %v2256_v15 = vadd.f32 %v1870_v59, %v5885_v41 }
  0xeb   : > { %v3280_v17 = vadd.f32 %v2890_v16, %v2252_v13 }
  0xed   : > { %v4308_v19 = vadd.f32 %v3918_v18, %v3280_v17  ;;  %v1871_v17 = vrot.slane %v5914_v12, 1 }
  0xef   : > { %vm4440_vm9 = vcmp.ge.f32.partialorder %v4308_v19, 0.0  ;;  %v4572_v21 = vmul.f32 0.2, %v4308_v19  ;;  %v2422_v22 = vpop.f32.mrf.mxu2  ;;  %v3450_v23 = vpop.f32.mrf.mxu3 }
  0xf0   : > { %v2891_v47 = vrot.slane %v2422_v22, 1  ;;  %v3919_v27 = vrot.slane %v3450_v23, 2  ;;  %v5924_v28 = vpop.f32.mrf.mxu0  ;;  %v5926_v10 = vpop.f32.mrf.mxu1  ;;  %v1872_v22 = vsel %vm1849_vm2, %v1869_v2, %v1871_v17 }
  0xf1   : > { %v4704_v30 = vsel %vm4440_vm9, %v4308_v19, %v4572_v21  ;;  %v2257_v31 = vadd.f32 %v1872_v22, %v5897_v61 }
  0xf2   : > { %4837 = vst.msk [vmem:[%s5856_s6 + $0x28] sm:$0xff] %vm4831_vm4, %v4704_v30  ;;  %v2892_v32 = vsel %vm1849_vm2, %v2889_v7, %v2891_v47  ;;  %5324 = vmatmul.msk.bf16.gmra.mxu0 %vm646_vm1, %v5628_v24  ;;  %v3920_v34 = vsel %vm860_vm0, %v3917_v8, %v3919_v27 }
  0xf3   : > { %v3281_v33 = vadd.f32 %v2892_v32, %v2253_v29  ;;  %5401 = vmatmul.msk.bf16.gmra.mxu1 %vm646_vm1, %v5628_v24 }
  0xf4   : > { %5478 = vmatmul.msk.bf16.gmra.mxu2 %vm646_vm1, %v5628_v24  ;;  %5555 = vmatmul.msk.bf16.gmra.mxu3 %vm646_vm1, %v5628_v24 }
  0xf5   : > { %v4309_v58 = vadd.f32 %v3920_v34, %v3281_v33  ;;  %v1873_v33 = vrot.slane %v5926_v10, 1 }
  0xf7   : > { %vm4441_vm10 = vcmp.ge.f32.partialorder %v4309_v58, 0.0  ;;  %v4573_v26 = vmul.f32 0.2, %v4309_v58  ;;  %v2425_v36 = vpop.f32.mrf.mxu2  ;;  %v3453_v37 = vpop.f32.mrf.mxu3 }
  0xf8   : > { %v2893_v39 = vrot.slane %v2425_v36, 1  ;;  %v3921_v40 = vrot.slane %v3453_v37, 2  ;;  %v5939_v44 = vpop.f32.mrf.mxu0  ;;  %v5941_v45 = vpop.f32.mrf.mxu1 }
  0xf9   : > { %v4705_v49 = vsel %vm4441_vm10, %v4309_v58, %v4573_v26  ;;  %v1874_v26 = vsel %vm1849_vm2, %v1871_v17, %v1873_v33 }
  0xfa   : > { %4838 = vst.msk [vmem:[%s5856_s6 + $0x30] sm:$0xff] %vm4831_vm4, %v4705_v49  ;;  %v2894_v51 = vsel %vm1849_vm2, %v2891_v47, %v2893_v39  ;;  %v3922_v53 = vsel %vm860_vm0, %v3919_v27, %v3921_v40  ;;  %v5630_v27 = vld [vmem:[%s5763_s30 + $0x80] sm:$0xff]  ;;  %v2258_v50 = vadd.f32 %v1874_v26, %v5912_v11 }
  0xfb   : > { %v3282_v52 = vadd.f32 %v2894_v51, %v2254_v46 }
  0xfd   : > { %v4310_v54 = vadd.f32 %v3922_v53, %v3282_v52  ;;  %v1875_v52 = vrot.slane %v5941_v45, 1 }
  0xff   : > { %vm4442_vm11 = vcmp.ge.f32.partialorder %v4310_v54, 0.0  ;;  %v4574_v56 = vmul.f32 0.2, %v4310_v54  ;;  %v2427_v57 = vpop.f32.mrf.mxu2  ;;  %v3455_v38 = vpop.f32.mrf.mxu3 }
 0x100   : > { %v2895_v9 = vrot.slane %v2427_v57, 1  ;;  %v3923_v62 = vrot.slane %v3455_v38, 2  ;;  %v5951_v63 = vpop.f32.mrf.mxu0  ;;  %v5953_v42 = vpop.f32.mrf.mxu1  ;;  %v1876_v57 = vsel %vm1849_vm2, %v1873_v33, %v1875_v52 }
 0x101   : > { %v4706_v1 = vsel %vm4442_vm11, %v4310_v54, %v4574_v56  ;;  %v2259_v2 = vadd.f32 %v1876_v57, %v5924_v28 }
 0x102   : > { %4839 = vst.msk [vmem:[%s5856_s6 + $0x38] sm:$0xff] %vm4831_vm4, %v4706_v1  ;;  %v2896_v3 = vsel %vm1849_vm2, %v2893_v39, %v2895_v9  ;;  %5325 = vmatmul.msk.bf16.gmra.mxu0 %vm646_vm1, %v5629_v60  ;;  %v3924_v4 = vsel %vm860_vm0, %v3921_v40, %v3923_v62 }
 0x103   : > { %v3283_v43 = vadd.f32 %v2896_v3, %v2255_v0  ;;  %5402 = vmatmul.msk.bf16.gmra.mxu1 %vm646_vm1, %v5629_v60 }
 0x104   : > { %5479 = vmatmul.msk.bf16.gmra.mxu2 %vm646_vm1, %v5629_v60  ;;  %5556 = vmatmul.msk.bf16.gmra.mxu3 %vm646_vm1, %v5629_v60 }
 0x105   : > { %v4311_v25 = vadd.f32 %v3924_v4, %v3283_v43  ;;  %v1877_v43 = vrot.slane %v5953_v42, 1 }
 0x107   : > { %vm4443_vm12 = vcmp.ge.f32.partialorder %v4311_v25, 0.0  ;;  %v4575_v48 = vmul.f32 0.2, %v4311_v25  ;;  %v2430_v5 = vpop.f32.mrf.mxu2  ;;  %v3458_v6 = vpop.f32.mrf.mxu3 }
 0x108   : > { %v2897_v7 = vrot.slane %v2430_v5, 1  ;;  %v3925_v8 = vrot.slane %v3458_v6, 2  ;;  %v5966_v13 = vpop.f32.mrf.mxu0  ;;  %v5968_v14 = vpop.f32.mrf.mxu1 }
 0x109   : > { %v4707_v16 = vsel %vm4443_vm12, %v4311_v25, %v4575_v48  ;;  %v1878_v48 = vsel %vm1849_vm2, %v1875_v52, %v1877_v43 }
 0x10a   : > { %4840 = vst.msk [vmem:[%s5856_s6 + $0x40] sm:$0xff] %vm4831_vm4, %v4707_v16  ;;  %v2898_v18 = vsel %vm1849_vm2, %v2895_v9, %v2897_v7  ;;  %v3926_v20 = vsel %vm860_vm0, %v3923_v62, %v3925_v8  ;;  %v5631_v62 = vld [vmem:[%s5763_s30 + $0x88] sm:$0xff]  ;;  %v2260_v17 = vadd.f32 %v1878_v48, %v5939_v44 }
 0x10b   : > { %v3284_v19 = vadd.f32 %v2898_v18, %v2256_v15 }
 0x10d   : > { %v4312_v21 = vadd.f32 %v3926_v20, %v3284_v19  ;;  %v1879_v19 = vrot.slane %v5968_v14, 1 }
 0x10f   : > { %vm4444_vm13 = vcmp.ge.f32.partialorder %v4312_v21, 0.0  ;;  %v4576_v23 = vmul.f32 0.2, %v4312_v21  ;;  %v2432_v24 = vpop.f32.mrf.mxu2  ;;  %v3460_v47 = vpop.f32.mrf.mxu3 }
 0x110   : > { %v2899_v41 = vrot.slane %v2432_v24, 1  ;;  %v3927_v29 = vrot.slane %v3460_v47, 2  ;;  %v5978_v30 = vpop.f32.mrf.mxu0  ;;  %v5980_v12 = vpop.f32.mrf.mxu1  ;;  %v1880_v24 = vsel %vm1849_vm2, %v1877_v43, %v1879_v19 }
 0x111   : > { %v4708_v32 = vsel %vm4444_vm13, %v4312_v21, %v4576_v23  ;;  %v2261_v33 = vadd.f32 %v1880_v24, %v5951_v63 }
 0x112   : > { %4841 = vst.msk [vmem:[%s5856_s6 + $0x48] sm:$0xff] %vm4831_vm4, %v4708_v32  ;;  %v2900_v34 = vsel %vm1849_vm2, %v2897_v7, %v2899_v41  ;;  %5326 = vmatmul.msk.bf16.gmra.mxu0 %vm646_vm1, %v5630_v27  ;;  %v3928_v35 = vsel %vm860_vm0, %v3925_v8, %v3927_v29 }
 0x113   : > { %v3285_v58 = vadd.f32 %v2900_v34, %v2257_v31  ;;  %5403 = vmatmul.msk.bf16.gmra.mxu1 %vm646_vm1, %v5630_v27 }
 0x114   : > { %5480 = vmatmul.msk.bf16.gmra.mxu2 %vm646_vm1, %v5630_v27  ;;  %5557 = vmatmul.msk.bf16.gmra.mxu3 %vm646_vm1, %v5630_v27 }
 0x115   : > { %v4313_v61 = vadd.f32 %v3928_v35, %v3285_v58  ;;  %v1881_v58 = vrot.slane %v5980_v12, 1 }
 0x117   : > { %vm4445_vm14 = vcmp.ge.f32.partialorder %v4313_v61, 0.0  ;;  %v4577_v10 = vmul.f32 0.2, %v4313_v61  ;;  %v2435_v36 = vpop.f32.mrf.mxu2  ;;  %v3463_v37 = vpop.f32.mrf.mxu3 }
 0x118   : > { %v2901_v39 = vrot.slane %v2435_v36, 1  ;;  %v3929_v40 = vrot.slane %v3463_v37, 2  ;;  %v5993_v46 = vpop.f32.mrf.mxu0  ;;  %v5995_v49 = vpop.f32.mrf.mxu1 }
 0x119   : > { %v4709_v51 = vsel %vm4445_vm14, %v4313_v61, %v4577_v10  ;;  %v1882_v10 = vsel %vm1849_vm2, %v1879_v19, %v1881_v58 }
 0x11a   : > { %4842 = vst.msk [vmem:[%s5856_s6 + $0x50] sm:$0xff] %vm4831_vm4, %v4709_v51  ;;  %v2902_v53 = vsel %vm1849_vm2, %v2899_v41, %v2901_v39  ;;  %v3930_v55 = vsel %vm860_vm0, %v3927_v29, %v3929_v40  ;;  %v5632_v29 = vld [vmem:[%s5763_s30 + $0x90] sm:$0xff]  ;;  %v2262_v52 = vadd.f32 %v1882_v10, %v5966_v13 }
 0x11b   : > { %v3286_v54 = vadd.f32 %v2902_v53, %v2258_v50 }
 0x11d   : > { %v4314_v56 = vadd.f32 %v3930_v55, %v3286_v54  ;;  %v1883_v54 = vrot.slane %v5995_v49, 1 }
 0x11f   : > { %vm4446_vm15 = vcmp.ge.f32.partialorder %v4314_v56, 0.0  ;;  %v4578_v38 = vmul.f32 0.2, %v4314_v56  ;;  %v2437_v60 = vpop.f32.mrf.mxu2  ;;  %v3465_v9 = vpop.f32.mrf.mxu3 }
 0x120   : > { %v2903_v11 = vrot.slane %v2437_v60, 1  ;;  %v3931_v0 = vrot.slane %v3465_v9, 2  ;;  %v6005_v1 = vpop.f32.mrf.mxu0  ;;  %v6007_v45 = vpop.f32.mrf.mxu1  ;;  %v1884_v60 = vsel %vm1849_vm2, %v1881_v58, %v1883_v54 }
 0x121   : > { %v4710_v3 = vsel %vm4446_vm15, %v4314_v56, %v4578_v38  ;;  %v2263_v43 = vadd.f32 %v1884_v60, %v5978_v30 }
 0x122   : > { %4843 = vst.msk [vmem:[%s5856_s6 + $0x58] sm:$0xff] %vm4831_vm4, %v4710_v3  ;;  %v2904_v4 = vsel %vm1849_vm2, %v2901_v39, %v2903_v11  ;;  %5327 = vmatmul.msk.bf16.gmra.mxu0 %vm646_vm1, %v5631_v62  ;;  %v3932_v59 = vsel %vm860_vm0, %v3929_v40, %v3931_v0 }
 0x123   : > { %v3287_v25 = vadd.f32 %v2904_v4, %v2259_v2  ;;  %5404 = vmatmul.msk.bf16.gmra.mxu1 %vm646_vm1, %v5631_v62 }
 0x124   : > { %5481 = vmatmul.msk.bf16.gmra.mxu2 %vm646_vm1, %v5631_v62  ;;  %5558 = vmatmul.msk.bf16.gmra.mxu3 %vm646_vm1, %v5631_v62 }
 0x125   : > { %v4315_v28 = vadd.f32 %v3932_v59, %v3287_v25  ;;  %v1885_v25 = vrot.slane %v6007_v45, 1 }
 0x127   : > { %vm4447_vm3 = vcmp.ge.f32.partialorder %v4315_v28, 0.0  ;;  %v4579_v42 = vmul.f32 0.2, %v4315_v28  ;;  %v2440_v5 = vpop.f32.mrf.mxu2  ;;  %v3468_v6 = vpop.f32.mrf.mxu3 }
 0x128   : > { %v2905_v7 = vrot.slane %v2440_v5, 1  ;;  %v3933_v8 = vrot.slane %v3468_v6, 2  ;;  %v6020_v15 = vpop.f32.mrf.mxu0  ;;  %v6022_v16 = vpop.f32.mrf.mxu1 }
 0x129   : > { %v4711_v18 = vsel %vm4447_vm3, %v4315_v28, %v4579_v42  ;;  %v1886_v42 = vsel %vm1849_vm2, %v1883_v54, %v1885_v25 }
 0x12a   : > { %4844 = vst.msk [vmem:[%s5856_s6 + $0x60] sm:$0xff] %vm4831_vm4, %v4711_v18  ;;  %v2906_v20 = vsel %vm1849_vm2, %v2903_v11, %v2905_v7  ;;  %v3934_v22 = vsel %vm860_vm0, %v3931_v0, %v3933_v8  ;;  %v5633_v0 = vld [vmem:[%s5763_s30 + $0x98] sm:$0xff]  ;;  %v2264_v19 = vadd.f32 %v1886_v42, %v5993_v46 }
 0x12b   : > { %v3288_v21 = vadd.f32 %v2906_v20, %v2260_v17 }
 0x12d   : > { %v4316_v23 = vadd.f32 %v3934_v22, %v3288_v21  ;;  %v1887_v21 = vrot.slane %v6022_v16, 1 }
 0x12f   : > { %vm4448_vm5 = vcmp.ge.f32.partialorder %v4316_v23, 0.0  ;;  %v4580_v47 = vmul.f32 0.2, %v4316_v23  ;;  %v2442_v27 = vpop.f32.mrf.mxu2  ;;  %v3470_v41 = vpop.f32.mrf.mxu3 }
 0x130   : > { %v2907_v44 = vrot.slane %v2442_v27, 1  ;;  %v3935_v31 = vrot.slane %v3470_v41, 2  ;;  %v6032_v32 = vpop.f32.mrf.mxu0  ;;  %v6034_v14 = vpop.f32.mrf.mxu1  ;;  %v1888_v27 = vsel %vm1849_vm2, %v1885_v25, %v1887_v21 }
 0x131   : > { %v4712_v34 = vsel %vm4448_vm5, %v4316_v23, %v4580_v47  ;;  %v2265_v58 = vadd.f32 %v1888_v27, %v6005_v1 }
 0x132   : > { %4845 = vst.msk [vmem:[%s5856_s6 + $0x68] sm:$0xff] %vm4831_vm4, %v4712_v34  ;;  %v2908_v35 = vsel %vm1849_vm2, %v2905_v7, %v2907_v44  ;;  %5328 = vmatmul.msk.bf16.gmra.mxu0 %vm646_vm1, %v5632_v29  ;;  %v3936_v26 = vsel %vm860_vm0, %v3933_v8, %v3935_v31 }
 0x133   : > { %v3289_v61 = vadd.f32 %v2908_v35, %v2261_v33  ;;  %5405 = vmatmul.msk.bf16.gmra.mxu1 %vm646_vm1, %v5632_v29 }
 0x134   : > { %5482 = vmatmul.msk.bf16.gmra.mxu2 %vm646_vm1, %v5632_v29  ;;  %5559 = vmatmul.msk.bf16.gmra.mxu3 %vm646_vm1, %v5632_v29 }
 0x135   : > { %v4317_v63 = vadd.f32 %v3936_v26, %v3289_v61  ;;  %v1889_v61 = vrot.slane %v6034_v14, 1 }
 0x137   : > { %vm4449_vm6 = vcmp.ge.f32.partialorder %v4317_v63, 0.0  ;;  %v4581_v12 = vmul.f32 0.2, %v4317_v63  ;;  %v2445_v36 = vpop.f32.mrf.mxu2  ;;  %v3473_v37 = vpop.f32.mrf.mxu3 }
 0x138   : > { %v2909_v39 = vrot.slane %v2445_v36, 1  ;;  %v3937_v40 = vrot.slane %v3473_v37, 2  ;;  %v6047_v50 = vpop.f32.mrf.mxu0  ;;  %v6049_v51 = vpop.f32.mrf.mxu1 }
 0x139   : > { %v4713_v53 = vsel %vm4449_vm6, %v4317_v63, %v4581_v12  ;;  %v1890_v12 = vsel %vm1849_vm2, %v1887_v21, %v1889_v61 }
 0x13a   : > { %4846 = vst.msk [vmem:[%s5856_s6 + $0x70] sm:$0xff] %vm4831_vm4, %v4713_v53  ;;  %v2910_v55 = vsel %vm1849_vm2, %v2907_v44, %v2909_v39  ;;  %v3938_v57 = vsel %vm860_vm0, %v3935_v31, %v3937_v40  ;;  %v5634_v31 = vld [vmem:[%s5763_s30 + $0xa0] sm:$0xff]  ;;  %v2266_v54 = vadd.f32 %v1890_v12, %v6020_v15 }
 0x13b   : > { %v3290_v56 = vadd.f32 %v2910_v55, %v2262_v52 }
 0x13d   : > { %v4318_v38 = vadd.f32 %v3938_v57, %v3290_v56  ;;  %v1891_v56 = vrot.slane %v6049_v51, 1 }
 0x13f   : > { %vm4450_vm7 = vcmp.ge.f32.partialorder %v4318_v38, 0.0  ;;  %v4582_v9 = vmul.f32 0.2, %v4318_v38  ;;  %v2447_v62 = vpop.f32.mrf.mxu2  ;;  %v3475_v11 = vpop.f32.mrf.mxu3 }
 0x140   : > { %v2911_v13 = vrot.slane %v2447_v62, 1  ;;  %v3939_v2 = vrot.slane %v3475_v11, 2  ;;  %v6059_v3 = vpop.f32.mrf.mxu0  ;;  %v6061_v49 = vpop.f32.mrf.mxu1  ;;  %v1892_v62 = vsel %vm1849_vm2, %v1889_v61, %v1891_v56 }
 0x141   : > { %v4714_v4 = vsel %vm4450_vm7, %v4318_v38, %v4582_v9  ;;  %v2267_v25 = vadd.f32 %v1892_v62, %v6032_v32 }
 0x142   : > { %4847 = vst.msk [vmem:[%s5856_s6 + $0x78] sm:$0xff] %vm4831_vm4, %v4714_v4  ;;  %v2912_v59 = vsel %vm1849_vm2, %v2909_v39, %v2911_v13  ;;  %5329 = vmatmul.msk.bf16.gmra.mxu0 %vm646_vm1, %v5633_v0  ;;  %v3940_v48 = vsel %vm860_vm0, %v3937_v40, %v3939_v2 }
 0x143   : > { %v3291_v28 = vadd.f32 %v2912_v59, %v2263_v43  ;;  %5406 = vmatmul.msk.bf16.gmra.mxu1 %vm646_vm1, %v5633_v0 }
 0x144   : > { %5483 = vmatmul.msk.bf16.gmra.mxu2 %vm646_vm1, %v5633_v0  ;;  %5560 = vmatmul.msk.bf16.gmra.mxu3 %vm646_vm1, %v5633_v0 }
 0x145   : > { %v4319_v30 = vadd.f32 %v3940_v48, %v3291_v28  ;;  %v1893_v28 = vrot.slane %v6061_v49, 1 }
 0x147   : > { %vm4451_vm8 = vcmp.ge.f32.partialorder %v4319_v30, 0.0  ;;  %v4583_v45 = vmul.f32 0.2, %v4319_v30  ;;  %v2450_v5 = vpop.f32.mrf.mxu2  ;;  %v3478_v6 = vpop.f32.mrf.mxu3 }
 0x148   : > { %v2913_v7 = vrot.slane %v2450_v5, 1  ;;  %v3941_v8 = vrot.slane %v3478_v6, 2  ;;  %v6074_v17 = vpop.f32.mrf.mxu0  ;;  %v6076_v18 = vpop.f32.mrf.mxu1 }
 0x149   : > { %v4715_v20 = vsel %vm4451_vm8, %v4319_v30, %v4583_v45  ;;  %v1894_v45 = vsel %vm1849_vm2, %v1891_v56, %v1893_v28 }
 0x14a   : > { %4848 = vst.msk [vmem:[%s5856_s6 + $0x80] sm:$0xff] %vm4831_vm4, %v4715_v20  ;;  %v2914_v22 = vsel %vm1849_vm2, %v2911_v13, %v2913_v7  ;;  %v3942_v24 = vsel %vm860_vm0, %v3939_v2, %v3941_v8  ;;  %v5635_v2 = vld [vmem:[%s5763_s30 + $0xa8] sm:$0xff]  ;;  %v2268_v21 = vadd.f32 %v1894_v45, %v6047_v50 }
 0x14b   : > { %v3292_v23 = vadd.f32 %v2914_v22, %v2264_v19 }
 0x14d   : > { %v4320_v47 = vadd.f32 %v3942_v24, %v3292_v23  ;;  %v1895_v23 = vrot.slane %v6076_v18, 1 }
 0x14f   : > { %vm4452_vm9 = vcmp.ge.f32.partialorder %v4320_v47, 0.0  ;;  %v4584_v41 = vmul.f32 0.2, %v4320_v47  ;;  %v2452_v29 = vpop.f32.mrf.mxu2  ;;  %v3480_v44 = vpop.f32.mrf.mxu3 }
 0x150   : > { %v2915_v46 = vrot.slane %v2452_v29, 1  ;;  %v3943_v33 = vrot.slane %v3480_v44, 2  ;;  %v6086_v34 = vpop.f32.mrf.mxu0  ;;  %v6088_v16 = vpop.f32.mrf.mxu1  ;;  %v1896_v29 = vsel %vm1849_vm2, %v1893_v28, %v1895_v23 }
 0x151   : > { %v4716_v35 = vsel %vm4452_vm9, %v4320_v47, %v4584_v41  ;;  %v2269_v61 = vadd.f32 %v1896_v29, %v6059_v3 }
 0x152   : > { %4849 = vst.msk [vmem:[%s5856_s6 + $0x88] sm:$0xff] %vm4831_vm4, %v4716_v35  ;;  %v2916_v26 = vsel %vm1849_vm2, %v2913_v7, %v2915_v46  ;;  %5330 = vmatmul.msk.bf16.gmra.mxu0 %vm646_vm1, %v5634_v31  ;;  %v3944_v10 = vsel %vm860_vm0, %v3941_v8, %v3943_v33 }
 0x153   : > { %v3293_v63 = vadd.f32 %v2916_v26, %v2265_v58  ;;  %5407 = vmatmul.msk.bf16.gmra.mxu1 %vm646_vm1, %v5634_v31 }
 0x154   : > { %5484 = vmatmul.msk.bf16.gmra.mxu2 %vm646_vm1, %v5634_v31  ;;  %5561 = vmatmul.msk.bf16.gmra.mxu3 %vm646_vm1, %v5634_v31 }
 0x155   : > { %v4321_v1 = vadd.f32 %v3944_v10, %v3293_v63  ;;  %v1897_v63 = vrot.slane %v6088_v16, 1 }
 0x157   : > { %vm4453_vm10 = vcmp.ge.f32.partialorder %v4321_v1, 0.0  ;;  %v4585_v14 = vmul.f32 0.2, %v4321_v1  ;;  %v2455_v36 = vpop.f32.mrf.mxu2  ;;  %v3483_v37 = vpop.f32.mrf.mxu3 }
 0x158   : > { %v2917_v39 = vrot.slane %v2455_v36, 1  ;;  %v3945_v40 = vrot.slane %v3483_v37, 2  ;;  %v6101_v52 = vpop.f32.mrf.mxu0  ;;  %v6103_v53 = vpop.f32.mrf.mxu1 }
 0x159   : > { %v4717_v55 = vsel %vm4453_vm10, %v4321_v1, %v4585_v14  ;;  %v1898_v14 = vsel %vm1849_vm2, %v1895_v23, %v1897_v63 }
 0x15a   : > { %4850 = vst.msk [vmem:[%s5856_s6 + $0x90] sm:$0xff] %vm4831_vm4, %v4717_v55  ;;  %v2918_v57 = vsel %vm1849_vm2, %v2915_v46, %v2917_v39  ;;  %v3946_v60 = vsel %vm860_vm0, %v3943_v33, %v3945_v40  ;;  %v5636_v33 = vld [vmem:[%s5763_s30 + $0xb0] sm:$0xff]  ;;  %v2270_v56 = vadd.f32 %v1898_v14, %v6074_v17 }
 0x15b   : > { %v3294_v38 = vadd.f32 %v2918_v57, %v2266_v54 }
 0x15d   : > { %v4322_v9 = vadd.f32 %v3946_v60, %v3294_v38  ;;  %v1899_v38 = vrot.slane %v6103_v53, 1 }
 0x15f   : > { %vm4454_vm11 = vcmp.ge.f32.partialorder %v4322_v9, 0.0  ;;  %v4586_v11 = vmul.f32 0.2, %v4322_v9  ;;  %v2457_v0 = vpop.f32.mrf.mxu2  ;;  %v3485_v13 = vpop.f32.mrf.mxu3 }
 0x160   : > { %v2919_v15 = vrot.slane %v2457_v0, 1  ;;  %v3947_v43 = vrot.slane %v3485_v13, 2  ;;  %v6113_v4 = vpop.f32.mrf.mxu0  ;;  %v6115_v51 = vpop.f32.mrf.mxu1  ;;  %v1900_v0 = vsel %vm1849_vm2, %v1897_v63, %v1899_v38 }
 0x161   : > { %v4718_v59 = vsel %vm4454_vm11, %v4322_v9, %v4586_v11  ;;  %v2271_v28 = vadd.f32 %v1900_v0, %v6086_v34 }
 0x162   : > { %4851 = vst.msk [vmem:[%s5856_s6 + $0x98] sm:$0xff] %vm4831_vm4, %v4718_v59  ;;  %v2920_v48 = vsel %vm1849_vm2, %v2917_v39, %v2919_v15  ;;  %5331 = vmatmul.msk.bf16.gmra.mxu0 %vm646_vm1, %v5635_v2  ;;  %v3948_v42 = vsel %vm860_vm0, %v3945_v40, %v3947_v43 }
 0x163   : > { %v3295_v30 = vadd.f32 %v2920_v48, %v2267_v25  ;;  %5408 = vmatmul.msk.bf16.gmra.mxu1 %vm646_vm1, %v5635_v2 }
 0x164   : > { %5485 = vmatmul.msk.bf16.gmra.mxu2 %vm646_vm1, %v5635_v2  ;;  %5562 = vmatmul.msk.bf16.gmra.mxu3 %vm646_vm1, %v5635_v2 }
 0x165   : > { %v4323_v32 = vadd.f32 %v3948_v42, %v3295_v30  ;;  %v1901_v30 = vrot.slane %v6115_v51, 1 }
 0x167   : > { %vm4455_vm12 = vcmp.ge.f32.partialorder %v4323_v32, 0.0  ;;  %v4587_v49 = vmul.f32 0.2, %v4323_v32  ;;  %v2460_v5 = vpop.f32.mrf.mxu2  ;;  %v3488_v6 = vpop.f32.mrf.mxu3 }
 0x168   : > { %v2921_v7 = vrot.slane %v2460_v5, 1  ;;  %v3949_v8 = vrot.slane %v3488_v6, 2  ;;  %v6128_v19 = vpop.f32.mrf.mxu0  ;;  %v6130_v20 = vpop.f32.mrf.mxu1 }
 0x169   : > { %v4719_v22 = vsel %vm4455_vm12, %v4323_v32, %v4587_v49  ;;  %v1902_v49 = vsel %vm1849_vm2, %v1899_v38, %v1901_v30 }
 0x16a   : > { %4852 = vst.msk [vmem:[%s5856_s6 + $0xa0] sm:$0xff] %vm4831_vm4, %v4719_v22  ;;  %v2922_v24 = vsel %vm1849_vm2, %v2919_v15, %v2921_v7  ;;  %v3950_v27 = vsel %vm860_vm0, %v3947_v43, %v3949_v8  ;;  %v5637_v43 = vld [vmem:[%s5763_s30 + $0xb8] sm:$0xff]  ;;  %v2272_v23 = vadd.f32 %v1902_v49, %v6101_v52 }
 0x16b   : > { %v3296_v47 = vadd.f32 %v2922_v24, %v2268_v21 }
 0x16d   : > { %v4324_v41 = vadd.f32 %v3950_v27, %v3296_v47  ;;  %v1903_v47 = vrot.slane %v6130_v20, 1 }
 0x16f   : > { %vm4456_vm13 = vcmp.ge.f32.partialorder %v4324_v41, 0.0  ;;  %v4588_v44 = vmul.f32 0.2, %v4324_v41  ;;  %v2462_v31 = vpop.f32.mrf.mxu2  ;;  %v3490_v46 = vpop.f32.mrf.mxu3 }
 0x170   : > { %v2923_v50 = vrot.slane %v2462_v31, 1  ;;  %v3951_v58 = vrot.slane %v3490_v46, 2  ;;  %v6140_v35 = vpop.f32.mrf.mxu0  ;;  %v6142_v18 = vpop.f32.mrf.mxu1  ;;  %v1904_v31 = vsel %vm1849_vm2, %v1901_v30, %v1903_v47 }
 0x171   : > { %v4720_v26 = vsel %vm4456_vm13, %v4324_v41, %v4588_v44  ;;  %v2273_v63 = vadd.f32 %v1904_v31, %v6113_v4 }
 0x172   : > { %4853 = vst.msk [vmem:[%s5856_s6 + $0xa8] sm:$0xff] %vm4831_vm4, %v4720_v26  ;;  %v2924_v10 = vsel %vm1849_vm2, %v2921_v7, %v2923_v50  ;;  %5332 = vmatmul.msk.bf16.gmra.mxu0 %vm646_vm1, %v5636_v33  ;;  %v3952_v12 = vsel %vm860_vm0, %v3949_v8, %v3951_v58 }
 0x173   : > { %v3297_v1 = vadd.f32 %v2924_v10, %v2269_v61  ;;  %5409 = vmatmul.msk.bf16.gmra.mxu1 %vm646_vm1, %v5636_v33 }
 0x174   : > { %5486 = vmatmul.msk.bf16.gmra.mxu2 %vm646_vm1, %v5636_v33  ;;  %5563 = vmatmul.msk.bf16.gmra.mxu3 %vm646_vm1, %v5636_v33 }
 0x175   : > { %v4325_v3 = vadd.f32 %v3952_v12, %v3297_v1  ;;  %v1905_v1 = vrot.slane %v6142_v18, 1 }
 0x177   : > { %vm4457_vm14 = vcmp.ge.f32.partialorder %v4325_v3, 0.0  ;;  %v4589_v16 = vmul.f32 0.2, %v4325_v3  ;;  %v2465_v36 = vpop.f32.mrf.mxu2  ;;  %v3493_v37 = vpop.f32.mrf.mxu3 }
 0x178   : > { %v2925_v39 = vrot.slane %v2465_v36, 1  ;;  %v3953_v40 = vrot.slane %v3493_v37, 2  ;;  %v6155_v54 = vpop.f32.mrf.mxu0  ;;  %v6157_v55 = vpop.f32.mrf.mxu1 }
 0x179   : > { %v4721_v57 = vsel %vm4457_vm14, %v4325_v3, %v4589_v16  ;;  %v1906_v16 = vsel %vm1849_vm2, %v1903_v47, %v1905_v1 }
 0x17a   : > { %4854 = vst.msk [vmem:[%s5856_s6 + $0xb0] sm:$0xff] %vm4831_vm4, %v4721_v57  ;;  %v2926_v60 = vsel %vm1849_vm2, %v2923_v50, %v2925_v39  ;;  %v3954_v62 = vsel %vm860_vm0, %v3951_v58, %v3953_v40  ;;  %v5638_v58 = vld [vmem:[%s5763_s30 + $0xc0] sm:$0xff]  ;;  %v2274_v38 = vadd.f32 %v1906_v16, %v6128_v19 }
 0x17b   : > { %v3298_v9 = vadd.f32 %v2926_v60, %v2270_v56 }
 0x17d   : > { %v4326_v11 = vadd.f32 %v3954_v62, %v3298_v9  ;;  %v1907_v9 = vrot.slane %v6157_v55, 1 }
 0x17f   : > { %vm4458_vm15 = vcmp.ge.f32.partialorder %v4326_v11, 0.0  ;;  %v4590_v13 = vmul.f32 0.2, %v4326_v11  ;;  %v2467_v2 = vpop.f32.mrf.mxu2  ;;  %v3495_v15 = vpop.f32.mrf.mxu3 }
 0x180   : > { %v2927_v17 = vrot.slane %v2467_v2, 1  ;;  %v3955_v25 = vrot.slane %v3495_v15, 2  ;;  %v6167_v59 = vpop.f32.mrf.mxu0  ;;  %v6169_v53 = vpop.f32.mrf.mxu1  ;;  %v1908_v2 = vsel %vm1849_vm2, %v1905_v1, %v1907_v9 }
 0x181   : > { %v4722_v48 = vsel %vm4458_vm15, %v4326_v11, %v4590_v13  ;;  %v2275_v30 = vadd.f32 %v1908_v2, %v6140_v35 }
 0x182   : > { %4855 = vst.msk [vmem:[%s5856_s6 + $0xb8] sm:$0xff] %vm4831_vm4, %v4722_v48  ;;  %v2928_v42 = vsel %vm1849_vm2, %v2925_v39, %v2927_v17  ;;  %5333 = vmatmul.msk.bf16.gmra.mxu0 %vm646_vm1, %v5637_v43  ;;  %v3956_v45 = vsel %vm860_vm0, %v3953_v40, %v3955_v25 }
 0x183   : > { %v3299_v32 = vadd.f32 %v2928_v42, %v2271_v28  ;;  %5410 = vmatmul.msk.bf16.gmra.mxu1 %vm646_vm1, %v5637_v43 }
 0x184   : > { %5487 = vmatmul.msk.bf16.gmra.mxu2 %vm646_vm1, %v5637_v43  ;;  %5564 = vmatmul.msk.bf16.gmra.mxu3 %vm646_vm1, %v5637_v43 }
 0x185   : > { %v4327_v34 = vadd.f32 %v3956_v45, %v3299_v32  ;;  %v1909_v32 = vrot.slane %v6169_v53, 1 }
 0x187   : > { %vm4459_vm3 = vcmp.ge.f32.partialorder %v4327_v34, 0.0  ;;  %v4591_v51 = vmul.f32 0.2, %v4327_v34  ;;  %v2470_v5 = vpop.f32.mrf.mxu2  ;;  %v3498_v6 = vpop.f32.mrf.mxu3 }
 0x188   : > { %v2929_v7 = vrot.slane %v2470_v5, 1  ;;  %v3957_v8 = vrot.slane %v3498_v6, 2  ;;  %v6182_v21 = vpop.f32.mrf.mxu0  ;;  %v6184_v22 = vpop.f32.mrf.mxu1 }
 0x189   : > { %v4723_v24 = vsel %vm4459_vm3, %v4327_v34, %v4591_v51  ;;  %v1910_v51 = vsel %vm1849_vm2, %v1907_v9, %v1909_v32 }
 0x18a   : > { %4856 = vst.msk [vmem:[%s5856_s6 + $0xc0] sm:$0xff] %vm4831_vm4, %v4723_v24  ;;  %v2930_v27 = vsel %vm1849_vm2, %v2927_v17, %v2929_v7  ;;  %v3958_v29 = vsel %vm860_vm0, %v3955_v25, %v3957_v8  ;;  %v5639_v25 = vld [vmem:[%s5763_s30 + $0xc8] sm:$0xff]  ;;  %v2276_v47 = vadd.f32 %v1910_v51, %v6155_v54 }
 0x18b   : > { %v3300_v41 = vadd.f32 %v2930_v27, %v2272_v23 }
 0x18d   : > { %v4328_v44 = vadd.f32 %v3958_v29, %v3300_v41  ;;  %v1911_v41 = vrot.slane %v6184_v22, 1 }
 0x18f   : > { %vm4460_vm5 = vcmp.ge.f32.partialorder %v4328_v44, 0.0  ;;  %v4592_v46 = vmul.f32 0.2, %v4328_v44  ;;  %v2472_v33 = vpop.f32.mrf.mxu2  ;;  %v3500_v50 = vpop.f32.mrf.mxu3 }
 0x190   : > { %v2931_v52 = vrot.slane %v2472_v33, 1  ;;  %v3959_v61 = vrot.slane %v3500_v50, 2  ;;  %v6194_v26 = vpop.f32.mrf.mxu0  ;;  %v6196_v20 = vpop.f32.mrf.mxu1  ;;  %v1912_v33 = vsel %vm1849_vm2, %v1909_v32, %v1911_v41 }
 0x191   : > { %v4724_v10 = vsel %vm4460_vm5, %v4328_v44, %v4592_v46  ;;  %v2277_v1 = vadd.f32 %v1912_v33, %v6167_v59 }
 0x192   : > { %4857 = vst.msk [vmem:[%s5856_s6 + $0xc8] sm:$0xff] %vm4831_vm4, %v4724_v10  ;;  %v2932_v12 = vsel %vm1849_vm2, %v2929_v7, %v2931_v52  ;;  %5334 = vmatmul.msk.bf16.gmra.mxu0 %vm646_vm1, %v5638_v58  ;;  %v3960_v14 = vsel %vm860_vm0, %v3957_v8, %v3959_v61 }
 0x193   : > { %v3301_v3 = vadd.f32 %v2932_v12, %v2273_v63  ;;  %5411 = vmatmul.msk.bf16.gmra.mxu1 %vm646_vm1, %v5638_v58 }
 0x194   : > { %5488 = vmatmul.msk.bf16.gmra.mxu2 %vm646_vm1, %v5638_v58  ;;  %5565 = vmatmul.msk.bf16.gmra.mxu3 %vm646_vm1, %v5638_v58 }
 0x195   : > { %v4329_v4 = vadd.f32 %v3960_v14, %v3301_v3  ;;  %v1913_v3 = vrot.slane %v6196_v20, 1 }
 0x197   : > { %vm4461_vm6 = vcmp.ge.f32.partialorder %v4329_v4, 0.0  ;;  %v4593_v18 = vmul.f32 0.2, %v4329_v4  ;;  %v2475_v36 = vpop.f32.mrf.mxu2  ;;  %v3503_v37 = vpop.f32.mrf.mxu3 }
 0x198   : > { %v2933_v39 = vrot.slane %v2475_v36, 1  ;;  %v3961_v40 = vrot.slane %v3503_v37, 2  ;;  %v6209_v56 = vpop.f32.mrf.mxu0  ;;  %v6211_v57 = vpop.f32.mrf.mxu1 }
 0x199   : > { %v4725_v60 = vsel %vm4461_vm6, %v4329_v4, %v4593_v18  ;;  %v1914_v18 = vsel %vm1849_vm2, %v1911_v41, %v1913_v3 }
 0x19a   : > { %4858 = vst.msk [vmem:[%s5856_s6 + $0xd0] sm:$0xff] %vm4831_vm4, %v4725_v60  ;;  %v2934_v62 = vsel %vm1849_vm2, %v2931_v52, %v2933_v39  ;;  %v3962_v0 = vsel %vm860_vm0, %v3959_v61, %v3961_v40  ;;  %v5640_v61 = vld [vmem:[%s5763_s30 + $0xd0] sm:$0xff]  ;;  %v2278_v9 = vadd.f32 %v1914_v18, %v6182_v21 }
 0x19b   : > { %v3302_v11 = vadd.f32 %v2934_v62, %v2274_v38 }
 0x19d   : > { %v4330_v13 = vadd.f32 %v3962_v0, %v3302_v11  ;;  %v1915_v11 = vrot.slane %v6211_v57, 1 }
 0x19f   : > { %vm4462_vm7 = vcmp.ge.f32.partialorder %v4330_v13, 0.0  ;;  %v4594_v15 = vmul.f32 0.2, %v4330_v13  ;;  %v2477_v43 = vpop.f32.mrf.mxu2  ;;  %v3505_v17 = vpop.f32.mrf.mxu3 }
 0x1a0   : > { %v2935_v19 = vrot.slane %v2477_v43, 1  ;;  %v3963_v28 = vrot.slane %v3505_v17, 2  ;;  %v6221_v48 = vpop.f32.mrf.mxu0  ;;  %v6223_v55 = vpop.f32.mrf.mxu1  ;;  %v1916_v43 = vsel %vm1849_vm2, %v1913_v3, %v1915_v11 }
 0x1a1   : > { %v4726_v42 = vsel %vm4462_vm7, %v4330_v13, %v4594_v15  ;;  %v2279_v32 = vadd.f32 %v1916_v43, %v6194_v26 }
 0x1a2   : > { %4859 = vst.msk [vmem:[%s5856_s6 + $0xd8] sm:$0xff] %vm4831_vm4, %v4726_v42  ;;  %v2936_v45 = vsel %vm1849_vm2, %v2933_v39, %v2935_v19  ;;  %5335 = vmatmul.msk.bf16.gmra.mxu0 %vm646_vm1, %v5639_v25  ;;  %v3964_v49 = vsel %vm860_vm0, %v3961_v40, %v3963_v28 }
 0x1a3   : > { %v3303_v34 = vadd.f32 %v2936_v45, %v2275_v30  ;;  %5412 = vmatmul.msk.bf16.gmra.mxu1 %vm646_vm1, %v5639_v25 }
 0x1a4   : > { %5489 = vmatmul.msk.bf16.gmra.mxu2 %vm646_vm1, %v5639_v25  ;;  %5566 = vmatmul.msk.bf16.gmra.mxu3 %vm646_vm1, %v5639_v25 }
 0x1a5   : > { %v4331_v35 = vadd.f32 %v3964_v49, %v3303_v34  ;;  %v1917_v34 = vrot.slane %v6223_v55, 1 }
 0x1a7   : > { %vm4463_vm8 = vcmp.ge.f32.partialorder %v4331_v35, 0.0  ;;  %v4595_v53 = vmul.f32 0.2, %v4331_v35  ;;  %v2480_v5 = vpop.f32.mrf.mxu2  ;;  %v3508_v6 = vpop.f32.mrf.mxu3 }
 0x1a8   : > { %v2937_v7 = vrot.slane %v2480_v5, 1  ;;  %v3965_v8 = vrot.slane %v3508_v6, 2  ;;  %v6236_v23 = vpop.f32.mrf.mxu0  ;;  %v6238_v24 = vpop.f32.mrf.mxu1 }
 0x1a9   : > { %v4727_v27 = vsel %vm4463_vm8, %v4331_v35, %v4595_v53  ;;  %v1918_v53 = vsel %vm1849_vm2, %v1915_v11, %v1917_v34 }
 0x1aa   : > { %4860 = vst.msk [vmem:[%s5856_s6 + $0xe0] sm:$0xff] %vm4831_vm4, %v4727_v27  ;;  %v2938_v29 = vsel %vm1849_vm2, %v2935_v19, %v2937_v7  ;;  %v3966_v31 = vsel %vm860_vm0, %v3963_v28, %v3965_v8  ;;  %v5641_v28 = vld [vmem:[%s5763_s30 + $0xd8] sm:$0xff]  ;;  %v2280_v41 = vadd.f32 %v1918_v53, %v6209_v56 }
 0x1ab   : > { %v3304_v44 = vadd.f32 %v2938_v29, %v2276_v47 }
 0x1ad   : > { %v4332_v46 = vadd.f32 %v3966_v31, %v3304_v44  ;;  %v1919_v44 = vrot.slane %v6238_v24, 1 }
 0x1af   : > { %vm4464_vm9 = vcmp.ge.f32.partialorder %v4332_v46, 0.0  ;;  %v4596_v50 = vmul.f32 0.2, %v4332_v46  ;;  %v2482_v58 = vpop.f32.mrf.mxu2  ;;  %v3510_v52 = vpop.f32.mrf.mxu3 }
 0x1b0   : > { %v2939_v54 = vrot.slane %v2482_v58, 1  ;;  %v3967_v63 = vrot.slane %v3510_v52, 2  ;;  %v6248_v10 = vpop.f32.mrf.mxu0  ;;  %v6250_v22 = vpop.f32.mrf.mxu1  ;;  %v1920_v58 = vsel %vm1849_vm2, %v1917_v34, %v1919_v44 }
 0x1b1   : > { %v4728_v12 = vsel %vm4464_vm9, %v4332_v46, %v4596_v50  ;;  %v2281_v3 = vadd.f32 %v1920_v58, %v6221_v48 }
 0x1b2   : > { %4861 = vst.msk [vmem:[%s5856_s6 + $0xe8] sm:$0xff] %vm4831_vm4, %v4728_v12  ;;  %v2940_v14 = vsel %vm1849_vm2, %v2937_v7, %v2939_v54  ;;  %5336 = vmatmul.msk.bf16.gmra.mxu0 %vm646_vm1, %v5640_v61  ;;  %v3968_v16 = vsel %vm860_vm0, %v3965_v8, %v3967_v63 }
 0x1b3   : > { %v3305_v4 = vadd.f32 %v2940_v14, %v2277_v1  ;;  %5413 = vmatmul.msk.bf16.gmra.mxu1 %vm646_vm1, %v5640_v61 }
 0x1b4   : > { %5490 = vmatmul.msk.bf16.gmra.mxu2 %vm646_vm1, %v5640_v61  ;;  %5567 = vmatmul.msk.bf16.gmra.mxu3 %vm646_vm1, %v5640_v61 }
 0x1b5   : > { %v4333_v59 = vadd.f32 %v3968_v16, %v3305_v4  ;;  %v1921_v4 = vrot.slane %v6250_v22, 1 }
 0x1b7   : > { %vm4465_vm10 = vcmp.ge.f32.partialorder %v4333_v59, 0.0  ;;  %v4597_v20 = vmul.f32 0.2, %v4333_v59  ;;  %v2485_v36 = vpop.f32.mrf.mxu2  ;;  %v3513_v37 = vpop.f32.mrf.mxu3 }
 0x1b8   : > { %v2941_v39 = vrot.slane %v2485_v36, 1  ;;  %v3969_v40 = vrot.slane %v3513_v37, 2  ;;  %v6263_v38 = vpop.f32.mrf.mxu0  ;;  %v6265_v60 = vpop.f32.mrf.mxu1 }
 0x1b9   : > { %v4729_v62 = vsel %vm4465_vm10, %v4333_v59, %v4597_v20  ;;  %v1922_v20 = vsel %vm1849_vm2, %v1919_v44, %v1921_v4 }
 0x1ba   : > { %4862 = vst.msk [vmem:[%s5856_s6 + $0xf0] sm:$0xff] %vm4831_vm4, %v4729_v62  ;;  %v2942_v0 = vsel %vm1849_vm2, %v2939_v54, %v2941_v39  ;;  %v3970_v2 = vsel %vm860_vm0, %v3967_v63, %v3969_v40  ;;  %v5642_v63 = vld [vmem:[%s5763_s30 + $0xe0] sm:$0xff]  ;;  %v2282_v11 = vadd.f32 %v1922_v20, %v6236_v23 }
 0x1bb   : > { %v3306_v13 = vadd.f32 %v2942_v0, %v2278_v9 }
 0x1bd   : > { %v4334_v15 = vadd.f32 %v3970_v2, %v3306_v13  ;;  %v1923_v13 = vrot.slane %v6265_v60, 1 }
 0x1bf   : > { %vm4466_vm11 = vcmp.ge.f32.partialorder %v4334_v15, 0.0  ;;  %v4598_v17 = vmul.f32 0.2, %v4334_v15  ;;  %v2487_v25 = vpop.f32.mrf.mxu2  ;;  %v3515_v19 = vpop.f32.mrf.mxu3 }
 0x1c0   : > { %v2943_v21 = vrot.slane %v2487_v25, 1  ;;  %v3971_v30 = vrot.slane %v3515_v19, 2  ;;  %v6275_v42 = vpop.f32.mrf.mxu0  ;;  %v6277_v57 = vpop.f32.mrf.mxu1  ;;  %v1924_v25 = vsel %vm1849_vm2, %v1921_v4, %v1923_v13 }
 0x1c1   : > { %v4730_v45 = vsel %vm4466_vm11, %v4334_v15, %v4598_v17  ;;  %v2283_v34 = vadd.f32 %v1924_v25, %v6248_v10 }
 0x1c2   : > { %4863 = vst.msk [vmem:[%s5856_s6 + $0xf8] sm:$0xff] %vm4831_vm4, %v4730_v45  ;;  %v2944_v49 = vsel %vm1849_vm2, %v2941_v39, %v2943_v21  ;;  %5337 = vmatmul.msk.bf16.gmra.mxu0 %vm646_vm1, %v5641_v28  ;;  %v3972_v51 = vsel %vm860_vm0, %v3969_v40, %v3971_v30 }
 0x1c3   : > { %v3307_v35 = vadd.f32 %v2944_v49, %v2279_v32  ;;  %5414 = vmatmul.msk.bf16.gmra.mxu1 %vm646_vm1, %v5641_v28 }
 0x1c4   : > { %5491 = vmatmul.msk.bf16.gmra.mxu2 %vm646_vm1, %v5641_v28  ;;  %5568 = vmatmul.msk.bf16.gmra.mxu3 %vm646_vm1, %v5641_v28 }
 0x1c5   : > { %v4335_v26 = vadd.f32 %v3972_v51, %v3307_v35  ;;  %v1925_v35 = vrot.slane %v6277_v57, 1 }
 0x1c7   : > { %vm4467_vm12 = vcmp.ge.f32.partialorder %v4335_v26, 0.0  ;;  %v4599_v55 = vmul.f32 0.2, %v4335_v26  ;;  %v2490_v5 = vpop.f32.mrf.mxu2  ;;  %v3518_v6 = vpop.f32.mrf.mxu3 }
 0x1c8   : > { %v2945_v7 = vrot.slane %v2490_v5, 1  ;;  %v3973_v8 = vrot.slane %v3518_v6, 2  ;;  %v6290_v47 = vpop.f32.mrf.mxu0  ;;  %v6292_v27 = vpop.f32.mrf.mxu1 }
 0x1c9   : > { %v4731_v29 = vsel %vm4467_vm12, %v4335_v26, %v4599_v55  ;;  %v1926_v55 = vsel %vm1849_vm2, %v1923_v13, %v1925_v35 }
 0x1ca   : > { %4864 = vst.msk [vmem:[%s5856_s6 + $0x100] sm:$0xff] %vm4831_vm4, %v4731_v29  ;;  %v2946_v31 = vsel %vm1849_vm2, %v2943_v21, %v2945_v7  ;;  %v3974_v33 = vsel %vm860_vm0, %v3971_v30, %v3973_v8  ;;  %v5643_v30 = vld [vmem:[%s5763_s30 + $0xe8] sm:$0xff]  ;;  %v2284_v44 = vadd.f32 %v1926_v55, %v6263_v38 }
 0x1cb   : > { %v3308_v46 = vadd.f32 %v2946_v31, %v2280_v41 }
 0x1cd   : > { %v4336_v50 = vadd.f32 %v3974_v33, %v3308_v46  ;;  %v1927_v46 = vrot.slane %v6292_v27, 1 }
 0x1cf   : > { %vm4468_vm13 = vcmp.ge.f32.partialorder %v4336_v50, 0.0  ;;  %v4600_v52 = vmul.f32 0.2, %v4336_v50  ;;  %v2492_v61 = vpop.f32.mrf.mxu2  ;;  %v3520_v54 = vpop.f32.mrf.mxu3 }
 0x1d0   : > { %v2947_v56 = vrot.slane %v2492_v61, 1  ;;  %v3975_v1 = vrot.slane %v3520_v54, 2  ;;  %v6302_v12 = vpop.f32.mrf.mxu0  ;;  %v6304_v24 = vpop.f32.mrf.mxu1  ;;  %v1928_v61 = vsel %vm1849_vm2, %v1925_v35, %v1927_v46 }
 0x1d1   : > { %v4732_v14 = vsel %vm4468_vm13, %v4336_v50, %v4600_v52  ;;  %v2285_v4 = vadd.f32 %v1928_v61, %v6275_v42 }
 0x1d2   : > { %4865 = vst.msk [vmem:[%s5856_s6 + $0x108] sm:$0xff] %vm4831_vm4, %v4732_v14  ;;  %v2948_v16 = vsel %vm1849_vm2, %v2945_v7, %v2947_v56  ;;  %5338 = vmatmul.msk.bf16.gmra.mxu0 %vm646_vm1, %v5642_v63  ;;  %v3976_v18 = vsel %vm860_vm0, %v3973_v8, %v3975_v1 }
 0x1d3   : > { %v3309_v59 = vadd.f32 %v2948_v16, %v2281_v3  ;;  %5415 = vmatmul.msk.bf16.gmra.mxu1 %vm646_vm1, %v5642_v63 }
 0x1d4   : > { %5492 = vmatmul.msk.bf16.gmra.mxu2 %vm646_vm1, %v5642_v63  ;;  %5569 = vmatmul.msk.bf16.gmra.mxu3 %vm646_vm1, %v5642_v63 }
 0x1d5   : > { %v4337_v48 = vadd.f32 %v3976_v18, %v3309_v59  ;;  %v1929_v59 = vrot.slane %v6304_v24, 1 }
 0x1d7   : > { %vm4469_vm14 = vcmp.ge.f32.partialorder %v4337_v48, 0.0  ;;  %v4601_v22 = vmul.f32 0.2, %v4337_v48  ;;  %v2495_v36 = vpop.f32.mrf.mxu2  ;;  %v3523_v37 = vpop.f32.mrf.mxu3 }
 0x1d8   : > { %v2949_v39 = vrot.slane %v2495_v36, 1  ;;  %v3977_v40 = vrot.slane %v3523_v37, 2  ;;  %v6317_v9 = vpop.f32.mrf.mxu0  ;;  %v6319_v62 = vpop.f32.mrf.mxu1 }
 0x1d9   : > { %v4733_v0 = vsel %vm4469_vm14, %v4337_v48, %v4601_v22  ;;  %v1930_v22 = vsel %vm1849_vm2, %v1927_v46, %v1929_v59 }
 0x1da   : > { %4866 = vst.msk [vmem:[%s5856_s6 + $0x110] sm:$0xff] %vm4831_vm4, %v4733_v0  ;;  %v2950_v2 = vsel %vm1849_vm2, %v2947_v56, %v2949_v39  ;;  %v3978_v43 = vsel %vm860_vm0, %v3975_v1, %v3977_v40  ;;  %v5644_v1 = vld [vmem:[%s5763_s30 + $0xf0] sm:$0xff]  ;;  %v2286_v13 = vadd.f32 %v1930_v22, %v6290_v47 }
 0x1db   : > { %v3310_v15 = vadd.f32 %v2950_v2, %v2282_v11 }
 0x1dd   : > { %v4338_v17 = vadd.f32 %v3978_v43, %v3310_v15  ;;  %v1931_v15 = vrot.slane %v6319_v62, 1 }
 0x1df   : > { %vm4470_vm15 = vcmp.ge.f32.partialorder %v4338_v17, 0.0  ;;  %v4602_v19 = vmul.f32 0.2, %v4338_v17  ;;  %v2497_v28 = vpop.f32.mrf.mxu2  ;;  %v3525_v21 = vpop.f32.mrf.mxu3 }
 0x1e0   : > { %v2951_v23 = vrot.slane %v2497_v28, 1  ;;  %v3979_v32 = vrot.slane %v3525_v21, 2  ;;  %v6329_v45 = vpop.f32.mrf.mxu0  ;;  %v6331_v60 = vpop.f32.mrf.mxu1  ;;  %v1932_v28 = vsel %vm1849_vm2, %v1929_v59, %v1931_v15 }
 0x1e1   : > { %v4734_v49 = vsel %vm4470_vm15, %v4338_v17, %v4602_v19  ;;  %v2287_v35 = vadd.f32 %v1932_v28, %v6302_v12 }
 0x1e2   : > { %4867 = vst.msk [vmem:[%s5856_s6 + $0x118] sm:$0xff] %vm4831_vm4, %v4734_v49  ;;  %v2952_v51 = vsel %vm1849_vm2, %v2949_v39, %v2951_v23  ;;  %5339 = vmatmul.msk.bf16.gmra.mxu0 %vm646_vm1, %v5643_v30  ;;  %v3980_v53 = vsel %vm860_vm0, %v3977_v40, %v3979_v32 }
 0x1e3   : > { %v3311_v26 = vadd.f32 %v2952_v51, %v2283_v34  ;;  %5416 = vmatmul.msk.bf16.gmra.mxu1 %vm646_vm1, %v5643_v30 }
 0x1e4   : > { %5493 = vmatmul.msk.bf16.gmra.mxu2 %vm646_vm1, %v5643_v30  ;;  %5570 = vmatmul.msk.bf16.gmra.mxu3 %vm646_vm1, %v5643_v30 }
 0x1e5   : > { %v4339_v10 = vadd.f32 %v3980_v53, %v3311_v26  ;;  %v1933_v26 = vrot.slane %v6331_v60, 1 }
 0x1e7   : > { %vm4471_vm3 = vcmp.ge.f32.partialorder %v4339_v10, 0.0  ;;  %v4603_v57 = vmul.f32 0.2, %v4339_v10  ;;  %v2500_v5 = vpop.f32.mrf.mxu2  ;;  %v3528_v6 = vpop.f32.mrf.mxu3 }
 0x1e8   : > { %v2953_v7 = vrot.slane %v2500_v5, 1  ;;  %v3981_v8 = vrot.slane %v3528_v6, 2  ;;  %v6344_v41 = vpop.f32.mrf.mxu0  ;;  %v6346_v29 = vpop.f32.mrf.mxu1 }
 0x1e9   : > { %v4735_v31 = vsel %vm4471_vm3, %v4339_v10, %v4603_v57  ;;  %v1934_v57 = vsel %vm1849_vm2, %v1931_v15, %v1933_v26 }
 0x1ea   : > { %4868 = vst.msk [vmem:[%s5856_s6 + $0x120] sm:$0xff] %vm4831_vm4, %v4735_v31  ;;  %v2954_v33 = vsel %vm1849_vm2, %v2951_v23, %v2953_v7  ;;  %v3982_v58 = vsel %vm860_vm0, %v3979_v32, %v3981_v8  ;;  %v5645_v32 = vld [vmem:[%s5763_s30 + $0xf8] sm:$0xff]  ;;  %v2288_v46 = vadd.f32 %v1934_v57, %v6317_v9 }
 0x1eb   : > { %v3312_v50 = vadd.f32 %v2954_v33, %v2284_v44 }
 0x1ed   : > { %v4340_v52 = vadd.f32 %v3982_v58, %v3312_v50  ;;  %v1935_v50 = vrot.slane %v6346_v29, 1 }
 0x1ef   : > { %vm4472_vm5 = vcmp.ge.f32.partialorder %v4340_v52, 0.0  ;;  %v4604_v54 = vmul.f32 0.2, %v4340_v52  ;;  %v2502_v63 = vpop.f32.mrf.mxu2  ;;  %v3530_v56 = vpop.f32.mrf.mxu3 }
 0x1f0   : > { %v2955_v38 = vrot.slane %v2502_v63, 1  ;;  %v3983_v3 = vrot.slane %v3530_v56, 2  ;;  %v6356_v14 = vpop.f32.mrf.mxu0  ;;  %v6358_v27 = vpop.f32.mrf.mxu1  ;;  %v1936_v63 = vsel %vm1849_vm2, %v1933_v26, %v1935_v50 }
 0x1f1   : > { %v4736_v16 = vsel %vm4472_vm5, %v4340_v52, %v4604_v54  ;;  %v2289_v59 = vadd.f32 %v1936_v63, %v6329_v45 }
 0x1f2   : > { %4869 = vst.msk [vmem:[%s5856_s6 + $0x128] sm:$0xff] %vm4831_vm4, %v4736_v16  ;;  %v2956_v18 = vsel %vm1849_vm2, %v2953_v7, %v2955_v38  ;;  %5340 = vmatmul.msk.bf16.gmra.mxu0 %vm646_vm1, %v5644_v1  ;;  %v3984_v20 = vsel %vm860_vm0, %v3981_v8, %v3983_v3 }
 0x1f3   : > { %v3313_v48 = vadd.f32 %v2956_v18, %v2285_v4  ;;  %5417 = vmatmul.msk.bf16.gmra.mxu1 %vm646_vm1, %v5644_v1 }
 0x1f4   : > { %5494 = vmatmul.msk.bf16.gmra.mxu2 %vm646_vm1, %v5644_v1  ;;  %5571 = vmatmul.msk.bf16.gmra.mxu3 %vm646_vm1, %v5644_v1 }
 0x1f5   : > { %v4341_v42 = vadd.f32 %v3984_v20, %v3313_v48  ;;  %v1937_v48 = vrot.slane %v6358_v27, 1 }
 0x1f7   : > { %vm4473_vm6 = vcmp.ge.f32.partialorder %v4341_v42, 0.0  ;;  %v4605_v24 = vmul.f32 0.2, %v4341_v42  ;;  %v2505_v36 = vpop.f32.mrf.mxu2  ;;  %v3533_v37 = vpop.f32.mrf.mxu3 }
 0x1f8   : > { %v2957_v39 = vrot.slane %v2505_v36, 1  ;;  %v3985_v40 = vrot.slane %v3533_v37, 2  ;;  %v6371_v11 = vpop.f32.mrf.mxu0  ;;  %v6373_v0 = vpop.f32.mrf.mxu1 }
 0x1f9   : > { %v4737_v2 = vsel %vm4473_vm6, %v4341_v42, %v4605_v24  ;;  %v1938_v24 = vsel %vm1849_vm2, %v1935_v50, %v1937_v48 }
 0x1fa   : > { %4870 = vst.msk [vmem:[%s5856_s6 + $0x130] sm:$0xff] %vm4831_vm4, %v4737_v2  ;;  %v2958_v43 = vsel %vm1849_vm2, %v2955_v38, %v2957_v39  ;;  %v3986_v25 = vsel %vm860_vm0, %v3983_v3, %v3985_v40  ;;  %v5646_v3 = vld [vmem:[%s5763_s30 + $0x100] sm:$0xff]  ;;  %v2290_v15 = vadd.f32 %v1938_v24, %v6344_v41 }
 0x1fb   : > { %v3314_v17 = vadd.f32 %v2958_v43, %v2286_v13 }
 0x1fd   : > { %v4342_v19 = vadd.f32 %v3986_v25, %v3314_v17  ;;  %v1939_v17 = vrot.slane %v6373_v0, 1 }
 0x1ff   : > { %vm4474_vm7 = vcmp.ge.f32.partialorder %v4342_v19, 0.0  ;;  %v4606_v21 = vmul.f32 0.2, %v4342_v19  ;;  %v2507_v30 = vpop.f32.mrf.mxu2  ;;  %v3535_v23 = vpop.f32.mrf.mxu3 }
 0x200   : > { %v2959_v47 = vrot.slane %v2507_v30, 1  ;;  %v3987_v34 = vrot.slane %v3535_v23, 2  ;;  %v6383_v49 = vpop.f32.mrf.mxu0  ;;  %v6385_v62 = vpop.f32.mrf.mxu1  ;;  %v1940_v30 = vsel %vm1849_vm2, %v1937_v48, %v1939_v17 }
 0x201   : > { %v4738_v51 = vsel %vm4474_vm7, %v4342_v19, %v4606_v21  ;;  %v2291_v26 = vadd.f32 %v1940_v30, %v6356_v14 }
 0x202   : > { %4871 = vst.msk [vmem:[%s5856_s6 + $0x138] sm:$0xff] %vm4831_vm4, %v4738_v51  ;;  %v2960_v53 = vsel %vm1849_vm2, %v2957_v39, %v2959_v47  ;;  %5341 = vmatmul.msk.bf16.gmra.mxu0 %vm646_vm1, %v5645_v32  ;;  %v3988_v55 = vsel %vm860_vm0, %v3985_v40, %v3987_v34 }
 0x203   : > { %v3315_v10 = vadd.f32 %v2960_v53, %v2287_v35  ;;  %5418 = vmatmul.msk.bf16.gmra.mxu1 %vm646_vm1, %v5645_v32 }
 0x204   : > { %5495 = vmatmul.msk.bf16.gmra.mxu2 %vm646_vm1, %v5645_v32  ;;  %5572 = vmatmul.msk.bf16.gmra.mxu3 %vm646_vm1, %v5645_v32 }
 0x205   : > { %v4343_v12 = vadd.f32 %v3988_v55, %v3315_v10  ;;  %v1941_v10 = vrot.slane %v6385_v62, 1 }
 0x207   : > { %vm4475_vm8 = vcmp.ge.f32.partialorder %v4343_v12, 0.0  ;;  %v4607_v60 = vmul.f32 0.2, %v4343_v12  ;;  %v2510_v5 = vpop.f32.mrf.mxu2  ;;  %v3538_v6 = vpop.f32.mrf.mxu3 }
 0x208   : > { %v2961_v7 = vrot.slane %v2510_v5, 1  ;;  %v3989_v8 = vrot.slane %v3538_v6, 2  ;;  %v6398_v44 = vpop.f32.mrf.mxu0  ;;  %v6400_v31 = vpop.f32.mrf.mxu1 }
 0x209   : > { %v4739_v33 = vsel %vm4475_vm8, %v4343_v12, %v4607_v60  ;;  %v1942_v60 = vsel %vm1849_vm2, %v1939_v17, %v1941_v10 }
 0x20a   : > { %4872 = vst.msk [vmem:[%s5856_s6 + $0x140] sm:$0xff] %vm4831_vm4, %v4739_v33  ;;  %v2962_v58 = vsel %vm1849_vm2, %v2959_v47, %v2961_v7  ;;  %v3990_v61 = vsel %vm860_vm0, %v3987_v34, %v3989_v8  ;;  %v5647_v34 = vld [vmem:[%s5763_s30 + $0x108] sm:$0xff]  ;;  %v2292_v50 = vadd.f32 %v1942_v60, %v6371_v11 }
 0x20b   : > { %v3316_v52 = vadd.f32 %v2962_v58, %v2288_v46 }
 0x20d   : > { %v4344_v54 = vadd.f32 %v3990_v61, %v3316_v52  ;;  %v1943_v52 = vrot.slane %v6400_v31, 1 }
 0x20f   : > { %vm4476_vm9 = vcmp.ge.f32.partialorder %v4344_v54, 0.0  ;;  %v4608_v56 = vmul.f32 0.2, %v4344_v54  ;;  %v2512_v1 = vpop.f32.mrf.mxu2  ;;  %v3540_v38 = vpop.f32.mrf.mxu3 }
 0x210   : > { %v2963_v9 = vrot.slane %v2512_v1, 1  ;;  %v3991_v4 = vrot.slane %v3540_v38, 2  ;;  %v6410_v16 = vpop.f32.mrf.mxu0  ;;  %v6412_v29 = vpop.f32.mrf.mxu1  ;;  %v1944_v1 = vsel %vm1849_vm2, %v1941_v10, %v1943_v52 }
 0x211   : > { %v4740_v18 = vsel %vm4476_vm9, %v4344_v54, %v4608_v56  ;;  %v2293_v48 = vadd.f32 %v1944_v1, %v6383_v49 }
 0x212   : > { %4873 = vst.msk [vmem:[%s5856_s6 + $0x148] sm:$0xff] %vm4831_vm4, %v4740_v18  ;;  %v2964_v20 = vsel %vm1849_vm2, %v2961_v7, %v2963_v9  ;;  %5342 = vmatmul.msk.bf16.gmra.mxu0 %vm646_vm1, %v5646_v3  ;;  %v3992_v22 = vsel %vm860_vm0, %v3989_v8, %v3991_v4 }
 0x213   : > { %v3317_v42 = vadd.f32 %v2964_v20, %v2289_v59  ;;  %5419 = vmatmul.msk.bf16.gmra.mxu1 %vm646_vm1, %v5646_v3 }
 0x214   : > { %5496 = vmatmul.msk.bf16.gmra.mxu2 %vm646_vm1, %v5646_v3  ;;  %5573 = vmatmul.msk.bf16.gmra.mxu3 %vm646_vm1, %v5646_v3 }
 0x215   : > { %v4345_v45 = vadd.f32 %v3992_v22, %v3317_v42  ;;  %v1945_v42 = vrot.slane %v6412_v29, 1 }
 0x217   : > { %vm4477_vm10 = vcmp.ge.f32.partialorder %v4345_v45, 0.0  ;;  %v4609_v27 = vmul.f32 0.2, %v4345_v45  ;;  %v2515_v36 = vpop.f32.mrf.mxu2  ;;  %v3543_v37 = vpop.f32.mrf.mxu3 }
 0x218   : > { %v2965_v39 = vrot.slane %v2515_v36, 1  ;;  %v3993_v40 = vrot.slane %v3543_v37, 2  ;;  %v6425_v13 = vpop.f32.mrf.mxu0  ;;  %v6427_v2 = vpop.f32.mrf.mxu1 }
 0x219   : > { %v4741_v43 = vsel %vm4477_vm10, %v4345_v45, %v4609_v27  ;;  %v1946_v27 = vsel %vm1849_vm2, %v1943_v52, %v1945_v42 }
 0x21a   : > { %4874 = vst.msk [vmem:[%s5856_s6 + $0x150] sm:$0xff] %vm4831_vm4, %v4741_v43  ;;  %v2966_v25 = vsel %vm1849_vm2, %v2963_v9, %v2965_v39  ;;  %v3994_v28 = vsel %vm860_vm0, %v3991_v4, %v3993_v40  ;;  %v5648_v4 = vld [vmem:[%s5763_s30 + $0x110] sm:$0xff]  ;;  %v2294_v17 = vadd.f32 %v1946_v27, %v6398_v44 }
 0x21b   : > { %v3318_v19 = vadd.f32 %v2966_v25, %v2290_v15 }
 0x21d   : > { %v4346_v21 = vadd.f32 %v3994_v28, %v3318_v19  ;;  %v1947_v19 = vrot.slane %v6427_v2, 1 }
 0x21f   : > { %vm4478_vm11 = vcmp.ge.f32.partialorder %v4346_v21, 0.0  ;;  %v4610_v23 = vmul.f32 0.2, %v4346_v21  ;;  %v2517_v32 = vpop.f32.mrf.mxu2  ;;  %v3545_v47 = vpop.f32.mrf.mxu3 }
 0x220   : > { %v2967_v41 = vrot.slane %v2517_v32, 1  ;;  %v3995_v35 = vrot.slane %v3545_v47, 2  ;;  %v6437_v51 = vpop.f32.mrf.mxu0  ;;  %v6439_v0 = vpop.f32.mrf.mxu1  ;;  %v1948_v32 = vsel %vm1849_vm2, %v1945_v42, %v1947_v19 }
 0x221   : > { %v4742_v53 = vsel %vm4478_vm11, %v4346_v21, %v4610_v23  ;;  %v2295_v10 = vadd.f32 %v1948_v32, %v6410_v16 }
 0x222   : > { %4875 = vst.msk [vmem:[%s5856_s6 + $0x158] sm:$0xff] %vm4831_vm4, %v4742_v53  ;;  %v2968_v55 = vsel %vm1849_vm2, %v2965_v39, %v2967_v41  ;;  %5343 = vmatmul.msk.bf16.gmra.mxu0 %vm646_vm1, %v5647_v34  ;;  %v3996_v57 = vsel %vm860_vm0, %v3993_v40, %v3995_v35 }
 0x223   : > { %v3319_v12 = vadd.f32 %v2968_v55, %v2291_v26  ;;  %5420 = vmatmul.msk.bf16.gmra.mxu1 %vm646_vm1, %v5647_v34 }
 0x224   : > { %5497 = vmatmul.msk.bf16.gmra.mxu2 %vm646_vm1, %v5647_v34  ;;  %5574 = vmatmul.msk.bf16.gmra.mxu3 %vm646_vm1, %v5647_v34 }
 0x225   : > { %v4347_v14 = vadd.f32 %v3996_v57, %v3319_v12  ;;  %v1949_v12 = vrot.slane %v6439_v0, 1 }
 0x227   : > { %vm4479_vm12 = vcmp.ge.f32.partialorder %v4347_v14, 0.0  ;;  %v4611_v62 = vmul.f32 0.2, %v4347_v14  ;;  %v2520_v5 = vpop.f32.mrf.mxu2  ;;  %v3548_v6 = vpop.f32.mrf.mxu3 }
 0x228   : > { %v2969_v7 = vrot.slane %v2520_v5, 1  ;;  %v3997_v8 = vrot.slane %v3548_v6, 2  ;;  %v6452_v46 = vpop.f32.mrf.mxu0  ;;  %v6454_v33 = vpop.f32.mrf.mxu1 }
 0x229   : > { %v4743_v58 = vsel %vm4479_vm12, %v4347_v14, %v4611_v62  ;;  %v1950_v62 = vsel %vm1849_vm2, %v1947_v19, %v1949_v12 }
 0x22a   : > { %4876 = vst.msk [vmem:[%s5856_s6 + $0x160] sm:$0xff] %vm4831_vm4, %v4743_v58  ;;  %v2970_v61 = vsel %vm1849_vm2, %v2967_v41, %v2969_v7  ;;  %v3998_v63 = vsel %vm860_vm0, %v3995_v35, %v3997_v8  ;;  %v5649_v35 = vld [vmem:[%s5763_s30 + $0x118] sm:$0xff]  ;;  %v2296_v52 = vadd.f32 %v1950_v62, %v6425_v13 }
 0x22b   : > { %v3320_v54 = vadd.f32 %v2970_v61, %v2292_v50 }
 0x22d   : > { %v4348_v56 = vadd.f32 %v3998_v63, %v3320_v54  ;;  %v1951_v54 = vrot.slane %v6454_v33, 1 }
 0x22f   : > { %vm4480_vm13 = vcmp.ge.f32.partialorder %v4348_v56, 0.0  ;;  %v4612_v38 = vmul.f32 0.2, %v4348_v56  ;;  %v2522_v3 = vpop.f32.mrf.mxu2  ;;  %v3550_v9 = vpop.f32.mrf.mxu3 }
 0x230   : > { %v2971_v11 = vrot.slane %v2522_v3, 1  ;;  %v3999_v59 = vrot.slane %v3550_v9, 2  ;;  %v6464_v18 = vpop.f32.mrf.mxu0  ;;  %v6466_v31 = vpop.f32.mrf.mxu1  ;;  %v1952_v3 = vsel %vm1849_vm2, %v1949_v12, %v1951_v54 }
 0x231   : > { %v4744_v20 = vsel %vm4480_vm13, %v4348_v56, %v4612_v38  ;;  %v2297_v42 = vadd.f32 %v1952_v3, %v6437_v51 }
 0x232   : > { %4877 = vst.msk [vmem:[%s5856_s6 + $0x168] sm:$0xff] %vm4831_vm4, %v4744_v20  ;;  %v2972_v22 = vsel %vm1849_vm2, %v2969_v7, %v2971_v11  ;;  %5344 = vmatmul.msk.bf16.gmra.mxu0 %vm646_vm1, %v5648_v4  ;;  %v4000_v24 = vsel %vm860_vm0, %v3997_v8, %v3999_v59 }
 0x233   : > { %v3321_v45 = vadd.f32 %v2972_v22, %v2293_v48  ;;  %5421 = vmatmul.msk.bf16.gmra.mxu1 %vm646_vm1, %v5648_v4 }
 0x234   : > { %5498 = vmatmul.msk.bf16.gmra.mxu2 %vm646_vm1, %v5648_v4  ;;  %5575 = vmatmul.msk.bf16.gmra.mxu3 %vm646_vm1, %v5648_v4 }
 0x235   : > { %v4349_v49 = vadd.f32 %v4000_v24, %v3321_v45  ;;  %v1953_v45 = vrot.slane %v6466_v31, 1 }
 0x237   : > { %vm4481_vm14 = vcmp.ge.f32.partialorder %v4349_v49, 0.0  ;;  %v4613_v29 = vmul.f32 0.2, %v4349_v49  ;;  %v2525_v36 = vpop.f32.mrf.mxu2  ;;  %v3553_v37 = vpop.f32.mrf.mxu3 }
 0x238   : > { %v2973_v39 = vrot.slane %v2525_v36, 1  ;;  %v4001_v40 = vrot.slane %v3553_v37, 2  ;;  %v6479_v15 = vpop.f32.mrf.mxu0  ;;  %v6481_v43 = vpop.f32.mrf.mxu1 }
 0x239   : > { %v4745_v25 = vsel %vm4481_vm14, %v4349_v49, %v4613_v29  ;;  %v1954_v29 = vsel %vm1849_vm2, %v1951_v54, %v1953_v45 }
 0x23a   : > { %4878 = vst.msk [vmem:[%s5856_s6 + $0x170] sm:$0xff] %vm4831_vm4, %v4745_v25  ;;  %v2974_v28 = vsel %vm1849_vm2, %v2971_v11, %v2973_v39  ;;  %v4002_v30 = vsel %vm860_vm0, %v3999_v59, %v4001_v40  ;;  %v5650_v59 = vld [vmem:[%s5763_s30 + $0x120] sm:$0xff]  ;;  %v2298_v19 = vadd.f32 %v1954_v29, %v6452_v46 }
 0x23b   : > { %v3322_v21 = vadd.f32 %v2974_v28, %v2294_v17 }
 0x23d   : > { %v4350_v23 = vadd.f32 %v4002_v30, %v3322_v21  ;;  %v1955_v21 = vrot.slane %v6481_v43, 1 }
 0x23f   : > { %vm4482_vm15 = vcmp.ge.f32.partialorder %v4350_v23, 0.0  ;;  %v4614_v47 = vmul.f32 0.2, %v4350_v23  ;;  %v2527_v34 = vpop.f32.mrf.mxu2  ;;  %v3555_v41 = vpop.f32.mrf.mxu3 }
 0x240   : > { %v2975_v44 = vrot.slane %v2527_v34, 1  ;;  %v4003_v26 = vrot.slane %v3555_v41, 2  ;;  %v6491_v53 = vpop.f32.mrf.mxu0  ;;  %v6493_v2 = vpop.f32.mrf.mxu1  ;;  %v1956_v34 = vsel %vm1849_vm2, %v1953_v45, %v1955_v21 }
 0x241   : > { %v4746_v55 = vsel %vm4482_vm15, %v4350_v23, %v4614_v47  ;;  %v2299_v12 = vadd.f32 %v1956_v34, %v6464_v18 }
 0x242   : > { %4879 = vst.msk [vmem:[%s5856_s6 + $0x178] sm:$0xff] %vm4831_vm4, %v4746_v55  ;;  %v2976_v57 = vsel %vm1849_vm2, %v2973_v39, %v2975_v44  ;;  %5345 = vmatmul.msk.bf16.gmra.mxu0 %vm646_vm1, %v5649_v35  ;;  %v4004_v60 = vsel %vm860_vm0, %v4001_v40, %v4003_v26 }
 0x243   : > { %v3323_v14 = vadd.f32 %v2976_v57, %v2295_v10  ;;  %5422 = vmatmul.msk.bf16.gmra.mxu1 %vm646_vm1, %v5649_v35 }
 0x244   : > { %5499 = vmatmul.msk.bf16.gmra.mxu2 %vm646_vm1, %v5649_v35  ;;  %5576 = vmatmul.msk.bf16.gmra.mxu3 %vm646_vm1, %v5649_v35 }
 0x245   : > { %v4351_v16 = vadd.f32 %v4004_v60, %v3323_v14  ;;  %v1957_v14 = vrot.slane %v6493_v2, 1 }
 0x247   : > { %vm4483_vm3 = vcmp.ge.f32.partialorder %v4351_v16, 0.0  ;;  %v4615_v0 = vmul.f32 0.2, %v4351_v16  ;;  %v2530_v5 = vpop.f32.mrf.mxu2  ;;  %v3558_v6 = vpop.f32.mrf.mxu3 }
 0x248   : > { %v2977_v7 = vrot.slane %v2530_v5, 1  ;;  %v4005_v8 = vrot.slane %v3558_v6, 2  ;;  %v6506_v50 = vpop.f32.mrf.mxu0  ;;  %v6508_v58 = vpop.f32.mrf.mxu1 }
 0x249   : > { %v4747_v61 = vsel %vm4483_vm3, %v4351_v16, %v4615_v0  ;;  %v1958_v0 = vsel %vm1849_vm2, %v1955_v21, %v1957_v14 }
 0x24a   : > { %4880 = vst.msk [vmem:[%s5856_s6 + $0x180] sm:$0xff] %vm4831_vm4, %v4747_v61  ;;  %v2978_v63 = vsel %vm1849_vm2, %v2975_v44, %v2977_v7  ;;  %v4006_v1 = vsel %vm860_vm0, %v4003_v26, %v4005_v8  ;;  %v5651_v26 = vld [vmem:[%s5763_s30 + $0x128] sm:$0xff]  ;;  %v2300_v54 = vadd.f32 %v1958_v0, %v6479_v15 }
 0x24b   : > { %v3324_v56 = vadd.f32 %v2978_v63, %v2296_v52 }
 0x24d   : > { %v4352_v38 = vadd.f32 %v4006_v1, %v3324_v56  ;;  %v1959_v56 = vrot.slane %v6508_v58, 1 }
 0x24f   : > { %vm4484_vm5 = vcmp.ge.f32.partialorder %v4352_v38, 0.0  ;;  %v4616_v9 = vmul.f32 0.2, %v4352_v38  ;;  %v2532_v4 = vpop.f32.mrf.mxu2  ;;  %v3560_v11 = vpop.f32.mrf.mxu3 }
 0x250   : > { %v2979_v13 = vrot.slane %v2532_v4, 1  ;;  %v4007_v48 = vrot.slane %v3560_v11, 2  ;;  %v6518_v20 = vpop.f32.mrf.mxu0  ;;  %v6520_v33 = vpop.f32.mrf.mxu1  ;;  %v1960_v4 = vsel %vm1849_vm2, %v1957_v14, %v1959_v56 }
 0x251   : > { %v4748_v22 = vsel %vm4484_vm5, %v4352_v38, %v4616_v9  ;;  %v2301_v45 = vadd.f32 %v1960_v4, %v6491_v53 }
 0x252   : > { %4881 = vst.msk [vmem:[%s5856_s6 + $0x188] sm:$0xff] %vm4831_vm4, %v4748_v22  ;;  %v2980_v24 = vsel %vm1849_vm2, %v2977_v7, %v2979_v13  ;;  %5346 = vmatmul.msk.bf16.gmra.mxu0 %vm646_vm1, %v5650_v59  ;;  %v4008_v27 = vsel %vm860_vm0, %v4005_v8, %v4007_v48 }
 0x253   : > { %v3325_v49 = vadd.f32 %v2980_v24, %v2297_v42  ;;  %5423 = vmatmul.msk.bf16.gmra.mxu1 %vm646_vm1, %v5650_v59 }
 0x254   : > { %5500 = vmatmul.msk.bf16.gmra.mxu2 %vm646_vm1, %v5650_v59  ;;  %5577 = vmatmul.msk.bf16.gmra.mxu3 %vm646_vm1, %v5650_v59 }
 0x255   : > { %v4353_v51 = vadd.f32 %v4008_v27, %v3325_v49  ;;  %v1961_v49 = vrot.slane %v6520_v33, 1 }
 0x257   : > { %vm4485_vm6 = vcmp.ge.f32.partialorder %v4353_v51, 0.0  ;;  %v4617_v31 = vmul.f32 0.2, %v4353_v51  ;;  %v2535_v36 = vpop.f32.mrf.mxu2  ;;  %v3563_v37 = vpop.f32.mrf.mxu3 }
 0x258   : > { %v2981_v39 = vrot.slane %v2535_v36, 1  ;;  %v4009_v40 = vrot.slane %v3563_v37, 2  ;;  %v6533_v17 = vpop.f32.mrf.mxu0  ;;  %v6535_v25 = vpop.f32.mrf.mxu1 }
 0x259   : > { %v4749_v28 = vsel %vm4485_vm6, %v4353_v51, %v4617_v31  ;;  %v1962_v31 = vsel %vm1849_vm2, %v1959_v56, %v1961_v49 }
 0x25a   : > { %4882 = vst.msk [vmem:[%s5856_s6 + $0x190] sm:$0xff] %vm4831_vm4, %v4749_v28  ;;  %v2982_v30 = vsel %vm1849_vm2, %v2979_v13, %v2981_v39  ;;  %v4010_v32 = vsel %vm860_vm0, %v4007_v48, %v4009_v40  ;;  %v5652_v48 = vld [vmem:[%s5763_s30 + $0x130] sm:$0xff]  ;;  %v2302_v21 = vadd.f32 %v1962_v31, %v6506_v50 }
 0x25b   : > { %v3326_v23 = vadd.f32 %v2982_v30, %v2298_v19 }
 0x25d   : > { %v4354_v47 = vadd.f32 %v4010_v32, %v3326_v23  ;;  %v1963_v23 = vrot.slane %v6535_v25, 1 }
 0x25f   : > { %vm4486_vm7 = vcmp.ge.f32.partialorder %v4354_v47, 0.0  ;;  %v4618_v41 = vmul.f32 0.2, %v4354_v47  ;;  %v2537_v35 = vpop.f32.mrf.mxu2  ;;  %v3565_v44 = vpop.f32.mrf.mxu3 }
 0x260   : > { %v2983_v46 = vrot.slane %v2537_v35, 1  ;;  %v4011_v10 = vrot.slane %v3565_v44, 2  ;;  %v6545_v55 = vpop.f32.mrf.mxu0  ;;  %v6547_v43 = vpop.f32.mrf.mxu1  ;;  %v1964_v35 = vsel %vm1849_vm2, %v1961_v49, %v1963_v23 }
 0x261   : > { %v4750_v57 = vsel %vm4486_vm7, %v4354_v47, %v4618_v41  ;;  %v2303_v14 = vadd.f32 %v1964_v35, %v6518_v20 }
 0x262   : > { %4883 = vst.msk [vmem:[%s5856_s6 + $0x198] sm:$0xff] %vm4831_vm4, %v4750_v57  ;;  %v2984_v60 = vsel %vm1849_vm2, %v2981_v39, %v2983_v46  ;;  %5347 = vmatmul.msk.bf16.gmra.mxu0 %vm646_vm1, %v5651_v26  ;;  %v4012_v62 = vsel %vm860_vm0, %v4009_v40, %v4011_v10 }
 0x263   : > { %v3327_v16 = vadd.f32 %v2984_v60, %v2299_v12  ;;  %5424 = vmatmul.msk.bf16.gmra.mxu1 %vm646_vm1, %v5651_v26 }
 0x264   : > { %5501 = vmatmul.msk.bf16.gmra.mxu2 %vm646_vm1, %v5651_v26  ;;  %5578 = vmatmul.msk.bf16.gmra.mxu3 %vm646_vm1, %v5651_v26 }
 0x265   : > { %v4355_v18 = vadd.f32 %v4012_v62, %v3327_v16  ;;  %v1965_v16 = vrot.slane %v6547_v43, 1 }
 0x267   : > { %vm4487_vm8 = vcmp.ge.f32.partialorder %v4355_v18, 0.0  ;;  %v4619_v2 = vmul.f32 0.2, %v4355_v18  ;;  %v2540_v5 = vpop.f32.mrf.mxu2  ;;  %v3568_v6 = vpop.f32.mrf.mxu3 }
 0x268   : > { %v2985_v7 = vrot.slane %v2540_v5, 1  ;;  %v4013_v8 = vrot.slane %v3568_v6, 2  ;;  %v6560_v52 = vpop.f32.mrf.mxu0  ;;  %v6562_v61 = vpop.f32.mrf.mxu1 }
 0x269   : > { %v4751_v63 = vsel %vm4487_vm8, %v4355_v18, %v4619_v2  ;;  %v1966_v2 = vsel %vm1849_vm2, %v1963_v23, %v1965_v16 }
 0x26a   : > { %4884 = vst.msk [vmem:[%s5856_s6 + $0x1a0] sm:$0xff] %vm4831_vm4, %v4751_v63  ;;  %v2986_v1 = vsel %vm1849_vm2, %v2983_v46, %v2985_v7  ;;  %v4014_v3 = vsel %vm860_vm0, %v4011_v10, %v4013_v8  ;;  %v5653_v10 = vld [vmem:[%s5763_s30 + $0x138] sm:$0xff]  ;;  %v2304_v56 = vadd.f32 %v1966_v2, %v6533_v17 }
 0x26b   : > { %v3328_v38 = vadd.f32 %v2986_v1, %v2300_v54 }
 0x26d   : > { %v4356_v9 = vadd.f32 %v4014_v3, %v3328_v38  ;;  %v1967_v38 = vrot.slane %v6562_v61, 1 }
 0x26f   : > { %vm4488_vm9 = vcmp.ge.f32.partialorder %v4356_v9, 0.0  ;;  %v4620_v11 = vmul.f32 0.2, %v4356_v9  ;;  %v2542_v59 = vpop.f32.mrf.mxu2  ;;  %v3570_v13 = vpop.f32.mrf.mxu3 }
 0x270   : > { %v2987_v15 = vrot.slane %v2542_v59, 1  ;;  %v4015_v42 = vrot.slane %v3570_v13, 2  ;;  %v6572_v22 = vpop.f32.mrf.mxu0  ;;  %v6574_v58 = vpop.f32.mrf.mxu1  ;;  %v1968_v59 = vsel %vm1849_vm2, %v1965_v16, %v1967_v38 }
 0x271   : > { %v4752_v24 = vsel %vm4488_vm9, %v4356_v9, %v4620_v11  ;;  %v2305_v49 = vadd.f32 %v1968_v59, %v6545_v55 }
 0x272   : > { %4885 = vst.msk [vmem:[%s5856_s6 + $0x1a8] sm:$0xff] %vm4831_vm4, %v4752_v24  ;;  %v2988_v27 = vsel %vm1849_vm2, %v2985_v7, %v2987_v15  ;;  %5348 = vmatmul.msk.bf16.gmra.mxu0 %vm646_vm1, %v5652_v48  ;;  %v4016_v29 = vsel %vm860_vm0, %v4013_v8, %v4015_v42 }
 0x273   : > { %v3329_v51 = vadd.f32 %v2988_v27, %v2301_v45  ;;  %5425 = vmatmul.msk.bf16.gmra.mxu1 %vm646_vm1, %v5652_v48 }
 0x274   : > { %5502 = vmatmul.msk.bf16.gmra.mxu2 %vm646_vm1, %v5652_v48  ;;  %5579 = vmatmul.msk.bf16.gmra.mxu3 %vm646_vm1, %v5652_v48 }
 0x275   : > { %v4357_v53 = vadd.f32 %v4016_v29, %v3329_v51  ;;  %v1969_v51 = vrot.slane %v6574_v58, 1 }
 0x277   : > { %vm4489_vm10 = vcmp.ge.f32.partialorder %v4357_v53, 0.0  ;;  %v4621_v33 = vmul.f32 0.2, %v4357_v53  ;;  %v2545_v36 = vpop.f32.mrf.mxu2  ;;  %v3573_v37 = vpop.f32.mrf.mxu3 }
 0x278   : > { %v2989_v39 = vrot.slane %v2545_v36, 1  ;;  %v4017_v40 = vrot.slane %v3573_v37, 2  ;;  %v6587_v19 = vpop.f32.mrf.mxu0  ;;  %v6589_v28 = vpop.f32.mrf.mxu1 }
 0x279   : > { %v4753_v30 = vsel %vm4489_vm10, %v4357_v53, %v4621_v33  ;;  %v1970_v33 = vsel %vm1849_vm2, %v1967_v38, %v1969_v51 }
 0x27a   : > { %4886 = vst.msk [vmem:[%s5856_s6 + $0x1b0] sm:$0xff] %vm4831_vm4, %v4753_v30  ;;  %v2990_v32 = vsel %vm1849_vm2, %v2987_v15, %v2989_v39  ;;  %v4018_v34 = vsel %vm860_vm0, %v4015_v42, %v4017_v40  ;;  %v5654_v42 = vld [vmem:[%s5763_s30 + $0x140] sm:$0xff]  ;;  %v2306_v23 = vadd.f32 %v1970_v33, %v6560_v52 }
 0x27b   : > { %v3330_v47 = vadd.f32 %v2990_v32, %v2302_v21 }
 0x27d   : > { %v4358_v41 = vadd.f32 %v4018_v34, %v3330_v47  ;;  %v1971_v47 = vrot.slane %v6589_v28, 1 }
 0x27f   : > { %vm4490_vm11 = vcmp.ge.f32.partialorder %v4358_v41, 0.0  ;;  %v4622_v44 = vmul.f32 0.2, %v4358_v41  ;;  %v2547_v26 = vpop.f32.mrf.mxu2  ;;  %v3575_v46 = vpop.f32.mrf.mxu3 }
 0x280   : > { %v2991_v50 = vrot.slane %v2547_v26, 1  ;;  %v4019_v12 = vrot.slane %v3575_v46, 2  ;;  %v6599_v57 = vpop.f32.mrf.mxu0  ;;  %v6601_v25 = vpop.f32.mrf.mxu1  ;;  %v1972_v26 = vsel %vm1849_vm2, %v1969_v51, %v1971_v47 }
 0x281   : > { %v4754_v60 = vsel %vm4490_vm11, %v4358_v41, %v4622_v44  ;;  %v2307_v16 = vadd.f32 %v1972_v26, %v6572_v22 }
 0x282   : > { %4887 = vst.msk [vmem:[%s5856_s6 + $0x1b8] sm:$0xff] %vm4831_vm4, %v4754_v60  ;;  %v2992_v62 = vsel %vm1849_vm2, %v2989_v39, %v2991_v50  ;;  %5349 = vmatmul.msk.bf16.gmra.mxu0 %vm646_vm1, %v5653_v10  ;;  %v4020_v0 = vsel %vm860_vm0, %v4017_v40, %v4019_v12 }
 0x283   : > { %v3331_v18 = vadd.f32 %v2992_v62, %v2303_v14  ;;  %5426 = vmatmul.msk.bf16.gmra.mxu1 %vm646_vm1, %v5653_v10 }
 0x284   : > { %5503 = vmatmul.msk.bf16.gmra.mxu2 %vm646_vm1, %v5653_v10  ;;  %5580 = vmatmul.msk.bf16.gmra.mxu3 %vm646_vm1, %v5653_v10 }
 0x285   : > { %v4359_v20 = vadd.f32 %v4020_v0, %v3331_v18  ;;  %v1973_v18 = vrot.slane %v6601_v25, 1 }
 0x287   : > { %vm4491_vm12 = vcmp.ge.f32.partialorder %v4359_v20, 0.0  ;;  %v4623_v43 = vmul.f32 0.2, %v4359_v20  ;;  %v2550_v5 = vpop.f32.mrf.mxu2  ;;  %v3578_v6 = vpop.f32.mrf.mxu3 }
 0x288   : > { %v2993_v7 = vrot.slane %v2550_v5, 1  ;;  %v4021_v8 = vrot.slane %v3578_v6, 2  ;;  %v6614_v54 = vpop.f32.mrf.mxu0  ;;  %v6616_v63 = vpop.f32.mrf.mxu1 }
 0x289   : > { %v4755_v1 = vsel %vm4491_vm12, %v4359_v20, %v4623_v43  ;;  %v1974_v43 = vsel %vm1849_vm2, %v1971_v47, %v1973_v18 }
 0x28a   : > { %4888 = vst.msk [vmem:[%s5856_s6 + $0x1c0] sm:$0xff] %vm4831_vm4, %v4755_v1  ;;  %v2994_v3 = vsel %vm1849_vm2, %v2991_v50, %v2993_v7  ;;  %v4022_v4 = vsel %vm860_vm0, %v4019_v12, %v4021_v8  ;;  %v5655_v12 = vld [vmem:[%s5763_s30 + $0x148] sm:$0xff]  ;;  %v2308_v38 = vadd.f32 %v1974_v43, %v6587_v19 }
 0x28b   : > { %v3332_v9 = vadd.f32 %v2994_v3, %v2304_v56 }
 0x28d   : > { %v4360_v11 = vadd.f32 %v4022_v4, %v3332_v9  ;;  %v1975_v9 = vrot.slane %v6616_v63, 1 }
 0x28f   : > { %vm4492_vm13 = vcmp.ge.f32.partialorder %v4360_v11, 0.0  ;;  %v4624_v13 = vmul.f32 0.2, %v4360_v11  ;;  %v2552_v48 = vpop.f32.mrf.mxu2  ;;  %v3580_v15 = vpop.f32.mrf.mxu3 }
 0x290   : > { %v2995_v17 = vrot.slane %v2552_v48, 1  ;;  %v4023_v45 = vrot.slane %v3580_v15, 2  ;;  %v6626_v24 = vpop.f32.mrf.mxu0  ;;  %v6628_v61 = vpop.f32.mrf.mxu1  ;;  %v1976_v48 = vsel %vm1849_vm2, %v1973_v18, %v1975_v9 }
 0x291   : > { %v4756_v27 = vsel %vm4492_vm13, %v4360_v11, %v4624_v13  ;;  %v2309_v51 = vadd.f32 %v1976_v48, %v6599_v57 }
 0x292   : > { %4889 = vst.msk [vmem:[%s5856_s6 + $0x1c8] sm:$0xff] %vm4831_vm4, %v4756_v27  ;;  %v2996_v29 = vsel %vm1849_vm2, %v2993_v7, %v2995_v17  ;;  %5350 = vmatmul.msk.bf16.gmra.mxu0 %vm646_vm1, %v5654_v42  ;;  %v4024_v31 = vsel %vm860_vm0, %v4021_v8, %v4023_v45 }
 0x293   : > { %v3333_v53 = vadd.f32 %v2996_v29, %v2305_v49  ;;  %5427 = vmatmul.msk.bf16.gmra.mxu1 %vm646_vm1, %v5654_v42 }
 0x294   : > { %5504 = vmatmul.msk.bf16.gmra.mxu2 %vm646_vm1, %v5654_v42  ;;  %5581 = vmatmul.msk.bf16.gmra.mxu3 %vm646_vm1, %v5654_v42 }
 0x295   : > { %v4361_v55 = vadd.f32 %v4024_v31, %v3333_v53  ;;  %v1977_v53 = vrot.slane %v6628_v61, 1 }
 0x297   : > { %vm4493_vm14 = vcmp.ge.f32.partialorder %v4361_v55, 0.0  ;;  %v4625_v58 = vmul.f32 0.2, %v4361_v55  ;;  %v2555_v36 = vpop.f32.mrf.mxu2  ;;  %v3583_v37 = vpop.f32.mrf.mxu3 }
 0x298   : > { %v2997_v39 = vrot.slane %v2555_v36, 1  ;;  %v4025_v40 = vrot.slane %v3583_v37, 2  ;;  %v6641_v21 = vpop.f32.mrf.mxu0  ;;  %v6643_v30 = vpop.f32.mrf.mxu1 }
 0x299   : > { %v4757_v32 = vsel %vm4493_vm14, %v4361_v55, %v4625_v58  ;;  %v1978_v58 = vsel %vm1849_vm2, %v1975_v9, %v1977_v53 }
 0x29a   : > { %4890 = vst.msk [vmem:[%s5856_s6 + $0x1d0] sm:$0xff] %vm4831_vm4, %v4757_v32  ;;  %v2998_v34 = vsel %vm1849_vm2, %v2995_v17, %v2997_v39  ;;  %v4026_v35 = vsel %vm860_vm0, %v4023_v45, %v4025_v40  ;;  %v5656_v45 = vld [vmem:[%s5763_s30 + $0x150] sm:$0xff]  ;;  %v2310_v47 = vadd.f32 %v1978_v58, %v6614_v54 }
 0x29b   : > { %v3334_v41 = vadd.f32 %v2998_v34, %v2306_v23 }
 0x29d   : > { %v4362_v44 = vadd.f32 %v4026_v35, %v3334_v41  ;;  %v1979_v41 = vrot.slane %v6643_v30, 1 }
 0x29f   : > { %vm4494_vm15 = vcmp.ge.f32.partialorder %v4362_v44, 0.0  ;;  %v4626_v46 = vmul.f32 0.2, %v4362_v44  ;;  %v2557_v10 = vpop.f32.mrf.mxu2  ;;  %v3585_v50 = vpop.f32.mrf.mxu3 }
 0x2a0   : > { %v2999_v52 = vrot.slane %v2557_v10, 1  ;;  %v4027_v14 = vrot.slane %v3585_v50, 2  ;;  %v6653_v60 = vpop.f32.mrf.mxu0  ;;  %v6655_v28 = vpop.f32.mrf.mxu1  ;;  %v1980_v10 = vsel %vm1849_vm2, %v1977_v53, %v1979_v41 }
 0x2a1   : > { %v4758_v62 = vsel %vm4494_vm15, %v4362_v44, %v4626_v46  ;;  %v2311_v18 = vadd.f32 %v1980_v10, %v6626_v24 }
 0x2a2   : > { %4891 = vst.msk [vmem:[%s5856_s6 + $0x1d8] sm:$0xff] %vm4831_vm4, %v4758_v62  ;;  %v3000_v0 = vsel %vm1849_vm2, %v2997_v39, %v2999_v52  ;;  %5351 = vmatmul.msk.bf16.gmra.mxu0 %vm646_vm1, %v5655_v12  ;;  %v4028_v2 = vsel %vm860_vm0, %v4025_v40, %v4027_v14 }
 0x2a3   : > { %v3335_v20 = vadd.f32 %v3000_v0, %v2307_v16  ;;  %5428 = vmatmul.msk.bf16.gmra.mxu1 %vm646_vm1, %v5655_v12 }
 0x2a4   : > { %5505 = vmatmul.msk.bf16.gmra.mxu2 %vm646_vm1, %v5655_v12  ;;  %5582 = vmatmul.msk.bf16.gmra.mxu3 %vm646_vm1, %v5655_v12 }
 0x2a5   : > { %v4363_v22 = vadd.f32 %v4028_v2, %v3335_v20  ;;  %v1981_v20 = vrot.slane %v6655_v28, 1 }
 0x2a7   : > { %vm4495_vm3 = vcmp.ge.f32.partialorder %v4363_v22, 0.0  ;;  %v4627_v25 = vmul.f32 0.2, %v4363_v22  ;;  %v2560_v5 = vpop.f32.mrf.mxu2  ;;  %v3588_v6 = vpop.f32.mrf.mxu3 }
 0x2a8   : > { %v3001_v7 = vrot.slane %v2560_v5, 1  ;;  %v4029_v8 = vrot.slane %v3588_v6, 2  ;;  %v6668_v56 = vpop.f32.mrf.mxu0  ;;  %v6670_v1 = vpop.f32.mrf.mxu1 }
 0x2a9   : > { %v4759_v3 = vsel %vm4495_vm3, %v4363_v22, %v4627_v25  ;;  %v1982_v25 = vsel %vm1849_vm2, %v1979_v41, %v1981_v20 }
 0x2aa   : > { %4892 = vst.msk [vmem:[%s5856_s6 + $0x1e0] sm:$0xff] %vm4831_vm4, %v4759_v3  ;;  %v3002_v4 = vsel %vm1849_vm2, %v2999_v52, %v3001_v7  ;;  %v4030_v59 = vsel %vm860_vm0, %v4027_v14, %v4029_v8  ;;  %v5657_v14 = vld [vmem:[%s5763_s30 + $0x158] sm:$0xff]  ;;  %v2312_v9 = vadd.f32 %v1982_v25, %v6641_v21 }
 0x2ab   : > { %v3336_v11 = vadd.f32 %v3002_v4, %v2308_v38 }
 0x2ad   : > { %v4364_v13 = vadd.f32 %v4030_v59, %v3336_v11  ;;  %v1983_v11 = vrot.slane %v6670_v1, 1 }
 0x2af   : > { %vm4496_vm5 = vcmp.ge.f32.partialorder %v4364_v13, 0.0  ;;  %v4628_v15 = vmul.f32 0.2, %v4364_v13  ;;  %v2562_v42 = vpop.f32.mrf.mxu2  ;;  %v3590_v17 = vpop.f32.mrf.mxu3 }
 0x2b0   : > { %v3003_v19 = vrot.slane %v2562_v42, 1  ;;  %v4031_v49 = vrot.slane %v3590_v17, 2  ;;  %v6680_v27 = vpop.f32.mrf.mxu0  ;;  %v6682_v63 = vpop.f32.mrf.mxu1  ;;  %v1984_v42 = vsel %vm1849_vm2, %v1981_v20, %v1983_v11 }
 0x2b1   : > { %v4760_v29 = vsel %vm4496_vm5, %v4364_v13, %v4628_v15  ;;  %v2313_v53 = vadd.f32 %v1984_v42, %v6653_v60 }
 0x2b2   : > { %4893 = vst.msk [vmem:[%s5856_s6 + $0x1e8] sm:$0xff] %vm4831_vm4, %v4760_v29  ;;  %v3004_v31 = vsel %vm1849_vm2, %v3001_v7, %v3003_v19  ;;  %5352 = vmatmul.msk.bf16.gmra.mxu0 %vm646_vm1, %v5656_v45  ;;  %v4032_v33 = vsel %vm860_vm0, %v4029_v8, %v4031_v49 }
 0x2b3   : > { %v3337_v55 = vadd.f32 %v3004_v31, %v2309_v51  ;;  %5429 = vmatmul.msk.bf16.gmra.mxu1 %vm646_vm1, %v5656_v45 }
 0x2b4   : > { %5506 = vmatmul.msk.bf16.gmra.mxu2 %vm646_vm1, %v5656_v45  ;;  %5583 = vmatmul.msk.bf16.gmra.mxu3 %vm646_vm1, %v5656_v45 }
 0x2b5   : > { %v4365_v57 = vadd.f32 %v4032_v33, %v3337_v55  ;;  %v1985_v55 = vrot.slane %v6682_v63, 1 }
 0x2b7   : > { %vm4497_vm6 = vcmp.ge.f32.partialorder %v4365_v57, 0.0  ;;  %v4629_v61 = vmul.f32 0.2, %v4365_v57  ;;  %v2565_v36 = vpop.f32.mrf.mxu2  ;;  %v3593_v37 = vpop.f32.mrf.mxu3 }
 0x2b8   : > { %v3005_v39 = vrot.slane %v2565_v36, 1  ;;  %v4033_v40 = vrot.slane %v3593_v37, 2  ;;  %v6695_v23 = vpop.f32.mrf.mxu0  ;;  %v6697_v32 = vpop.f32.mrf.mxu1 }
 0x2b9   : > { %v4761_v34 = vsel %vm4497_vm6, %v4365_v57, %v4629_v61  ;;  %v1986_v61 = vsel %vm1849_vm2, %v1983_v11, %v1985_v55 }
 0x2ba   : > { %4894 = vst.msk [vmem:[%s5856_s6 + $0x1f0] sm:$0xff] %vm4831_vm4, %v4761_v34  ;;  %v3006_v35 = vsel %vm1849_vm2, %v3003_v19, %v3005_v39  ;;  %v4034_v26 = vsel %vm860_vm0, %v4031_v49, %v4033_v40  ;;  %v5658_v49 = vld [vmem:[%s5763_s30 + $0x160] sm:$0xff]  ;;  %v2314_v41 = vadd.f32 %v1986_v61, %v6668_v56 }
 0x2bb   : > { %v3338_v44 = vadd.f32 %v3006_v35, %v2310_v47 }
 0x2bd   : > { %v4366_v46 = vadd.f32 %v4034_v26, %v3338_v44  ;;  %v1987_v44 = vrot.slane %v6697_v32, 1 }
 0x2bf   : > { %vm4498_vm7 = vcmp.ge.f32.partialorder %v4366_v46, 0.0  ;;  %v4630_v50 = vmul.f32 0.2, %v4366_v46  ;;  %v2567_v12 = vpop.f32.mrf.mxu2  ;;  %v3595_v52 = vpop.f32.mrf.mxu3 }
 0x2c0   : > { %v3007_v54 = vrot.slane %v2567_v12, 1  ;;  %v4035_v16 = vrot.slane %v3595_v52, 2  ;;  %v6707_v62 = vpop.f32.mrf.mxu0  ;;  %v6709_v30 = vpop.f32.mrf.mxu1  ;;  %v1988_v12 = vsel %vm1849_vm2, %v1985_v55, %v1987_v44 }
 0x2c1   : > { %v4762_v0 = vsel %vm4498_vm7, %v4366_v46, %v4630_v50  ;;  %v2315_v20 = vadd.f32 %v1988_v12, %v6680_v27 }
 0x2c2   : > { %4895 = vst.msk [vmem:[%s5856_s6 + $0x1f8] sm:$0xff] %vm4831_vm4, %v4762_v0  ;;  %v3008_v2 = vsel %vm1849_vm2, %v3005_v39, %v3007_v54  ;;  %5353 = vmatmul.msk.bf16.gmra.mxu0 %vm646_vm1, %v5657_v14  ;;  %v4036_v43 = vsel %vm860_vm0, %v4033_v40, %v4035_v16 }
 0x2c3   : > { %v3339_v22 = vadd.f32 %v3008_v2, %v2311_v18  ;;  %5430 = vmatmul.msk.bf16.gmra.mxu1 %vm646_vm1, %v5657_v14 }
 0x2c4   : > { %5507 = vmatmul.msk.bf16.gmra.mxu2 %vm646_vm1, %v5657_v14  ;;  %5584 = vmatmul.msk.bf16.gmra.mxu3 %vm646_vm1, %v5657_v14 }
 0x2c5   : > { %v4367_v24 = vadd.f32 %v4036_v43, %v3339_v22  ;;  %v1989_v22 = vrot.slane %v6709_v30, 1 }
 0x2c7   : > { %vm4499_vm8 = vcmp.ge.f32.partialorder %v4367_v24, 0.0  ;;  %v4631_v28 = vmul.f32 0.2, %v4367_v24  ;;  %v2570_v5 = vpop.f32.mrf.mxu2  ;;  %v3598_v6 = vpop.f32.mrf.mxu3 }
 0x2c8   : > { %v3009_v7 = vrot.slane %v2570_v5, 1  ;;  %v4037_v8 = vrot.slane %v3598_v6, 2  ;;  %v6722_v38 = vpop.f32.mrf.mxu0  ;;  %v6724_v3 = vpop.f32.mrf.mxu1 }
 0x2c9   : > { %v4763_v4 = vsel %vm4499_vm8, %v4367_v24, %v4631_v28  ;;  %v1990_v28 = vsel %vm1849_vm2, %v1987_v44, %v1989_v22 }
 0x2ca   : > { %4896 = vst.msk [vmem:[%s5856_s6 + $0x200] sm:$0xff] %vm4831_vm4, %v4763_v4  ;;  %v3010_v59 = vsel %vm1849_vm2, %v3007_v54, %v3009_v7  ;;  %v4038_v48 = vsel %vm860_vm0, %v4035_v16, %v4037_v8  ;;  %v5659_v16 = vld [vmem:[%s5763_s30 + $0x168] sm:$0xff]  ;;  %v2316_v11 = vadd.f32 %v1990_v28, %v6695_v23 }
 0x2cb   : > { %v3340_v13 = vadd.f32 %v3010_v59, %v2312_v9 }
 0x2cd   : > { %v4368_v15 = vadd.f32 %v4038_v48, %v3340_v13  ;;  %v1991_v13 = vrot.slane %v6724_v3, 1 }
 0x2cf   : > { %vm4500_vm9 = vcmp.ge.f32.partialorder %v4368_v15, 0.0  ;;  %v4632_v17 = vmul.f32 0.2, %v4368_v15  ;;  %v2572_v45 = vpop.f32.mrf.mxu2  ;;  %v3600_v19 = vpop.f32.mrf.mxu3 }
 0x2d0   : > { %v3011_v21 = vrot.slane %v2572_v45, 1  ;;  %v4039_v51 = vrot.slane %v3600_v19, 2  ;;  %v6734_v29 = vpop.f32.mrf.mxu0  ;;  %v6736_v1 = vpop.f32.mrf.mxu1  ;;  %v1992_v45 = vsel %vm1849_vm2, %v1989_v22, %v1991_v13 }
 0x2d1   : > { %v4764_v31 = vsel %vm4500_vm9, %v4368_v15, %v4632_v17  ;;  %v2317_v55 = vadd.f32 %v1992_v45, %v6707_v62 }
 0x2d2   : > { %4897 = vst.msk [vmem:[%s5856_s6 + $0x208] sm:$0xff] %vm4831_vm4, %v4764_v31  ;;  %v3012_v33 = vsel %vm1849_vm2, %v3009_v7, %v3011_v21  ;;  %5354 = vmatmul.msk.bf16.gmra.mxu0 %vm646_vm1, %v5658_v49  ;;  %v4040_v58 = vsel %vm860_vm0, %v4037_v8, %v4039_v51 }
 0x2d3   : > { %v3341_v57 = vadd.f32 %v3012_v33, %v2313_v53  ;;  %5431 = vmatmul.msk.bf16.gmra.mxu1 %vm646_vm1, %v5658_v49 }
 0x2d4   : > { %5508 = vmatmul.msk.bf16.gmra.mxu2 %vm646_vm1, %v5658_v49  ;;  %5585 = vmatmul.msk.bf16.gmra.mxu3 %vm646_vm1, %v5658_v49 }
 0x2d5   : > { %v4369_v60 = vadd.f32 %v4040_v58, %v3341_v57  ;;  %v1993_v57 = vrot.slane %v6736_v1, 1 }
 0x2d7   : > { %vm4501_vm10 = vcmp.ge.f32.partialorder %v4369_v60, 0.0  ;;  %v4633_v63 = vmul.f32 0.2, %v4369_v60  ;;  %v2575_v36 = vpop.f32.mrf.mxu2  ;;  %v3603_v37 = vpop.f32.mrf.mxu3 }
 0x2d8   : > { %v3013_v39 = vrot.slane %v2575_v36, 1  ;;  %v4041_v40 = vrot.slane %v3603_v37, 2  ;;  %v6749_v47 = vpop.f32.mrf.mxu0  ;;  %v6751_v34 = vpop.f32.mrf.mxu1 }
 0x2d9   : > { %v4765_v35 = vsel %vm4501_vm10, %v4369_v60, %v4633_v63  ;;  %v1994_v63 = vsel %vm1849_vm2, %v1991_v13, %v1993_v57 }
 0x2da   : > { %4898 = vst.msk [vmem:[%s5856_s6 + $0x210] sm:$0xff] %vm4831_vm4, %v4765_v35  ;;  %v3014_v26 = vsel %vm1849_vm2, %v3011_v21, %v3013_v39  ;;  %v4042_v10 = vsel %vm860_vm0, %v4039_v51, %v4041_v40  ;;  %v5660_v51 = vld [vmem:[%s5763_s30 + $0x170] sm:$0xff]  ;;  %v2318_v44 = vadd.f32 %v1994_v63, %v6722_v38 }
 0x2db   : > { %v3342_v46 = vadd.f32 %v3014_v26, %v2314_v41 }
 0x2dd   : > { %v4370_v50 = vadd.f32 %v4042_v10, %v3342_v46  ;;  %v1995_v46 = vrot.slane %v6751_v34, 1 }
 0x2df   : > { %vm4502_vm11 = vcmp.ge.f32.partialorder %v4370_v50, 0.0  ;;  %v4634_v52 = vmul.f32 0.2, %v4370_v50  ;;  %v2577_v14 = vpop.f32.mrf.mxu2  ;;  %v3605_v54 = vpop.f32.mrf.mxu3 }
 0x2e0   : > { %v3015_v56 = vrot.slane %v2577_v14, 1  ;;  %v4043_v18 = vrot.slane %v3605_v54, 2  ;;  %v6761_v0 = vpop.f32.mrf.mxu0  ;;  %v6763_v32 = vpop.f32.mrf.mxu1  ;;  %v1996_v14 = vsel %vm1849_vm2, %v1993_v57, %v1995_v46 }
 0x2e1   : > { %v4766_v2 = vsel %vm4502_vm11, %v4370_v50, %v4634_v52  ;;  %v2319_v22 = vadd.f32 %v1996_v14, %v6734_v29 }
 0x2e2   : > { %4899 = vst.msk [vmem:[%s5856_s6 + $0x218] sm:$0xff] %vm4831_vm4, %v4766_v2  ;;  %v3016_v43 = vsel %vm1849_vm2, %v3013_v39, %v3015_v56  ;;  %5355 = vmatmul.msk.bf16.gmra.mxu0 %vm646_vm1, %v5659_v16  ;;  %v4044_v25 = vsel %vm860_vm0, %v4041_v40, %v4043_v18 }
 0x2e3   : > { %v3343_v24 = vadd.f32 %v3016_v43, %v2315_v20  ;;  %5432 = vmatmul.msk.bf16.gmra.mxu1 %vm646_vm1, %v5659_v16 }
 0x2e4   : > { %5509 = vmatmul.msk.bf16.gmra.mxu2 %vm646_vm1, %v5659_v16  ;;  %5586 = vmatmul.msk.bf16.gmra.mxu3 %vm646_vm1, %v5659_v16 }
 0x2e5   : > { %v4371_v27 = vadd.f32 %v4044_v25, %v3343_v24  ;;  %v1997_v24 = vrot.slane %v6763_v32, 1 }
 0x2e7   : > { %vm4503_vm12 = vcmp.ge.f32.partialorder %v4371_v27, 0.0  ;;  %v4635_v30 = vmul.f32 0.2, %v4371_v27  ;;  %v2580_v5 = vpop.f32.mrf.mxu2  ;;  %v3608_v6 = vpop.f32.mrf.mxu3 }
 0x2e8   : > { %v3017_v7 = vrot.slane %v2580_v5, 1  ;;  %v4045_v8 = vrot.slane %v3608_v6, 2  ;;  %v6776_v9 = vpop.f32.mrf.mxu0  ;;  %v6778_v4 = vpop.f32.mrf.mxu1 }
 0x2e9   : > { %v4767_v59 = vsel %vm4503_vm12, %v4371_v27, %v4635_v30  ;;  %v1998_v30 = vsel %vm1849_vm2, %v1995_v46, %v1997_v24 }
 0x2ea   : > { %4900 = vst.msk [vmem:[%s5856_s6 + $0x220] sm:$0xff] %vm4831_vm4, %v4767_v59  ;;  %v3018_v48 = vsel %vm1849_vm2, %v3015_v56, %v3017_v7  ;;  %v4046_v42 = vsel %vm860_vm0, %v4043_v18, %v4045_v8  ;;  %v5661_v18 = vld [vmem:[%s5763_s30 + $0x178] sm:$0xff]  ;;  %v2320_v13 = vadd.f32 %v1998_v30, %v6749_v47 }
 0x2eb   : > { %v3344_v15 = vadd.f32 %v3018_v48, %v2316_v11 }
 0x2ed   : > { %v4372_v17 = vadd.f32 %v4046_v42, %v3344_v15  ;;  %v1999_v15 = vrot.slane %v6778_v4, 1 }
 0x2ef   : > { %vm4504_vm13 = vcmp.ge.f32.partialorder %v4372_v17, 0.0  ;;  %v4636_v19 = vmul.f32 0.2, %v4372_v17  ;;  %v2582_v49 = vpop.f32.mrf.mxu2  ;;  %v3610_v21 = vpop.f32.mrf.mxu3 }
 0x2f0   : > { %v3019_v23 = vrot.slane %v2582_v49, 1  ;;  %v4047_v53 = vrot.slane %v3610_v21, 2  ;;  %v6788_v31 = vpop.f32.mrf.mxu0  ;;  %v6790_v3 = vpop.f32.mrf.mxu1  ;;  %v2000_v49 = vsel %vm1849_vm2, %v1997_v24, %v1999_v15 }
 0x2f1   : > { %v4768_v33 = vsel %vm4504_vm13, %v4372_v17, %v4636_v19  ;;  %v2321_v57 = vadd.f32 %v2000_v49, %v6761_v0 }
 0x2f2   : > { %4901 = vst.msk [vmem:[%s5856_s6 + $0x228] sm:$0xff] %vm4831_vm4, %v4768_v33  ;;  %v3020_v58 = vsel %vm1849_vm2, %v3017_v7, %v3019_v23  ;;  %5356 = vmatmul.msk.bf16.gmra.mxu0 %vm646_vm1, %v5660_v51  ;;  %v4048_v61 = vsel %vm860_vm0, %v4045_v8, %v4047_v53 }
 0x2f3   : > { %v3345_v60 = vadd.f32 %v3020_v58, %v2317_v55  ;;  %5433 = vmatmul.msk.bf16.gmra.mxu1 %vm646_vm1, %v5660_v51 }
 0x2f4   : > { %5510 = vmatmul.msk.bf16.gmra.mxu2 %vm646_vm1, %v5660_v51  ;;  %5587 = vmatmul.msk.bf16.gmra.mxu3 %vm646_vm1, %v5660_v51 }
 0x2f5   : > { %v4373_v62 = vadd.f32 %v4048_v61, %v3345_v60  ;;  %v2001_v60 = vrot.slane %v6790_v3, 1 }
 0x2f7   : > { %vm4505_vm14 = vcmp.ge.f32.partialorder %v4373_v62, 0.0  ;;  %v4637_v1 = vmul.f32 0.2, %v4373_v62  ;;  %v2585_v36 = vpop.f32.mrf.mxu2  ;;  %v3613_v37 = vpop.f32.mrf.mxu3 }
 0x2f8   : > { %v3021_v39 = vrot.slane %v2585_v36, 1  ;;  %v4049_v40 = vrot.slane %v3613_v37, 2  ;;  %v6803_v41 = vpop.f32.mrf.mxu0  ;;  %v6805_v35 = vpop.f32.mrf.mxu1 }
 0x2f9   : > { %v4769_v26 = vsel %vm4505_vm14, %v4373_v62, %v4637_v1  ;;  %v2002_v1 = vsel %vm1849_vm2, %v1999_v15, %v2001_v60 }
 0x2fa   : > { %4902 = vst.msk [vmem:[%s5856_s6 + $0x230] sm:$0xff] %vm4831_vm4, %v4769_v26  ;;  %v3022_v10 = vsel %vm1849_vm2, %v3019_v23, %v3021_v39  ;;  %v4050_v12 = vsel %vm860_vm0, %v4047_v53, %v4049_v40  ;;  %v5662_v53 = vld [vmem:[%s5763_s30 + $0x180] sm:$0xff]  ;;  %v2322_v46 = vadd.f32 %v2002_v1, %v6776_v9 }
 0x2fb   : > { %v3346_v50 = vadd.f32 %v3022_v10, %v2318_v44 }
 0x2fd   : > { %v4374_v52 = vadd.f32 %v4050_v12, %v3346_v50  ;;  %v2003_v50 = vrot.slane %v6805_v35, 1 }
 0x2ff   : > { %vm4506_vm15 = vcmp.ge.f32.partialorder %v4374_v52, 0.0  ;;  %v4638_v54 = vmul.f32 0.2, %v4374_v52  ;;  %v2587_v16 = vpop.f32.mrf.mxu2  ;;  %v3615_v56 = vpop.f32.mrf.mxu3 }
 0x300   : > { %v3023_v38 = vrot.slane %v2587_v16, 1  ;;  %v4051_v20 = vrot.slane %v3615_v56, 2  ;;  %v6815_v2 = vpop.f32.mrf.mxu0  ;;  %v6817_v34 = vpop.f32.mrf.mxu1  ;;  %v2004_v16 = vsel %vm1849_vm2, %v2001_v60, %v2003_v50 }
 0x301   : > { %v4770_v43 = vsel %vm4506_vm15, %v4374_v52, %v4638_v54  ;;  %v2323_v24 = vadd.f32 %v2004_v16, %v6788_v31 }
 0x302   : > { %4903 = vst.msk [vmem:[%s5856_s6 + $0x238] sm:$0xff] %vm4831_vm4, %v4770_v43  ;;  %v3024_v25 = vsel %vm1849_vm2, %v3021_v39, %v3023_v38  ;;  %5357 = vmatmul.msk.bf16.gmra.mxu0 %vm646_vm1, %v5661_v18  ;;  %v4052_v28 = vsel %vm860_vm0, %v4049_v40, %v4051_v20 }
 0x303   : > { %v3347_v27 = vadd.f32 %v3024_v25, %v2319_v22  ;;  %5434 = vmatmul.msk.bf16.gmra.mxu1 %vm646_vm1, %v5661_v18 }
 0x304   : > { %5511 = vmatmul.msk.bf16.gmra.mxu2 %vm646_vm1, %v5661_v18  ;;  %5588 = vmatmul.msk.bf16.gmra.mxu3 %vm646_vm1, %v5661_v18 }
 0x305   : > { %v4375_v29 = vadd.f32 %v4052_v28, %v3347_v27  ;;  %v2005_v27 = vrot.slane %v6817_v34, 1 }
 0x307   : > { %vm4507_vm3 = vcmp.ge.f32.partialorder %v4375_v29, 0.0  ;;  %v4639_v32 = vmul.f32 0.2, %v4375_v29  ;;  %v2590_v5 = vpop.f32.mrf.mxu2  ;;  %v3618_v6 = vpop.f32.mrf.mxu3 }
 0x308   : > { %v3025_v7 = vrot.slane %v2590_v5, 1  ;;  %v4053_v8 = vrot.slane %v3618_v6, 2  ;;  %v6830_v11 = vpop.f32.mrf.mxu0  ;;  %v6832_v59 = vpop.f32.mrf.mxu1 }
 0x309   : > { %v4771_v48 = vsel %vm4507_vm3, %v4375_v29, %v4639_v32  ;;  %v2006_v32 = vsel %vm1849_vm2, %v2003_v50, %v2005_v27 }
 0x30a   : > { %4904 = vst.msk [vmem:[%s5856_s6 + $0x240] sm:$0xff] %vm4831_vm4, %v4771_v48  ;;  %v3026_v42 = vsel %vm1849_vm2, %v3023_v38, %v3025_v7  ;;  %v4054_v45 = vsel %vm860_vm0, %v4051_v20, %v4053_v8  ;;  %v5663_v20 = vld [vmem:[%s5763_s30 + $0x188] sm:$0xff]  ;;  %v2324_v15 = vadd.f32 %v2006_v32, %v6803_v41 }
 0x30b   : > { %v3348_v17 = vadd.f32 %v3026_v42, %v2320_v13 }
 0x30d   : > { %v4376_v19 = vadd.f32 %v4054_v45, %v3348_v17  ;;  %v2007_v17 = vrot.slane %v6832_v59, 1 }
 0x30f   : > { %vm4508_vm5 = vcmp.ge.f32.partialorder %v4376_v19, 0.0  ;;  %v4640_v21 = vmul.f32 0.2, %v4376_v19  ;;  %v2592_v51 = vpop.f32.mrf.mxu2  ;;  %v3620_v23 = vpop.f32.mrf.mxu3 }
 0x310   : > { %v3027_v47 = vrot.slane %v2592_v51, 1  ;;  %v4055_v55 = vrot.slane %v3620_v23, 2  ;;  %v6842_v33 = vpop.f32.mrf.mxu0  ;;  %v6844_v4 = vpop.f32.mrf.mxu1  ;;  %v2008_v51 = vsel %vm1849_vm2, %v2005_v27, %v2007_v17 }
 0x311   : > { %v4772_v58 = vsel %vm4508_vm5, %v4376_v19, %v4640_v21  ;;  %v2325_v60 = vadd.f32 %v2008_v51, %v6815_v2 }
 0x312   : > { %4905 = vst.msk [vmem:[%s5856_s6 + $0x248] sm:$0xff] %vm4831_vm4, %v4772_v58  ;;  %v3028_v61 = vsel %vm1849_vm2, %v3025_v7, %v3027_v47  ;;  %5358 = vmatmul.msk.bf16.gmra.mxu0 %vm646_vm1, %v5662_v53  ;;  %v4056_v63 = vsel %vm860_vm0, %v4053_v8, %v4055_v55 }
 0x313   : > { %v3349_v62 = vadd.f32 %v3028_v61, %v2321_v57  ;;  %5435 = vmatmul.msk.bf16.gmra.mxu1 %vm646_vm1, %v5662_v53 }
 0x314   : > { %5512 = vmatmul.msk.bf16.gmra.mxu2 %vm646_vm1, %v5662_v53  ;;  %5589 = vmatmul.msk.bf16.gmra.mxu3 %vm646_vm1, %v5662_v53 }
 0x315   : > { %v4377_v0 = vadd.f32 %v4056_v63, %v3349_v62  ;;  %v2009_v62 = vrot.slane %v6844_v4, 1 }
 0x317   : > { %vm4509_vm6 = vcmp.ge.f32.partialorder %v4377_v0, 0.0  ;;  %v4641_v3 = vmul.f32 0.2, %v4377_v0  ;;  %v2595_v36 = vpop.f32.mrf.mxu2  ;;  %v3623_v37 = vpop.f32.mrf.mxu3 }
 0x318   : > { %v3029_v39 = vrot.slane %v2595_v36, 1  ;;  %v4057_v40 = vrot.slane %v3623_v37, 2  ;;  %v6857_v44 = vpop.f32.mrf.mxu0  ;;  %v6859_v26 = vpop.f32.mrf.mxu1 }
 0x319   : > { %v4773_v10 = vsel %vm4509_vm6, %v4377_v0, %v4641_v3  ;;  %v2010_v3 = vsel %vm1849_vm2, %v2007_v17, %v2009_v62 }
 0x31a   : > { %4906 = vst.msk [vmem:[%s5856_s6 + $0x250] sm:$0xff] %vm4831_vm4, %v4773_v10  ;;  %v3030_v12 = vsel %vm1849_vm2, %v3027_v47, %v3029_v39  ;;  %v4058_v14 = vsel %vm860_vm0, %v4055_v55, %v4057_v40  ;;  %v5664_v55 = vld [vmem:[%s5763_s30 + $0x190] sm:$0xff]  ;;  %v2326_v50 = vadd.f32 %v2010_v3, %v6830_v11 }
 0x31b   : > { %v3350_v52 = vadd.f32 %v3030_v12, %v2322_v46 }
 0x31d   : > { %v4378_v54 = vadd.f32 %v4058_v14, %v3350_v52  ;;  %v2011_v52 = vrot.slane %v6859_v26, 1 }
 0x31f   : > { %vm4510_vm7 = vcmp.ge.f32.partialorder %v4378_v54, 0.0  ;;  %v4642_v56 = vmul.f32 0.2, %v4378_v54  ;;  %v2597_v18 = vpop.f32.mrf.mxu2  ;;  %v3625_v38 = vpop.f32.mrf.mxu3 }
 0x320   : > { %v3031_v9 = vrot.slane %v2597_v18, 1  ;;  %v4059_v22 = vrot.slane %v3625_v38, 2  ;;  %v6869_v43 = vpop.f32.mrf.mxu0  ;;  %v6871_v35 = vpop.f32.mrf.mxu1  ;;  %v2012_v18 = vsel %vm1849_vm2, %v2009_v62, %v2011_v52 }
 0x321   : > { %v4774_v25 = vsel %vm4510_vm7, %v4378_v54, %v4642_v56  ;;  %v2327_v27 = vadd.f32 %v2012_v18, %v6842_v33 }
 0x322   : > { %4907 = vst.msk [vmem:[%s5856_s6 + $0x258] sm:$0xff] %vm4831_vm4, %v4774_v25  ;;  %v3032_v28 = vsel %vm1849_vm2, %v3029_v39, %v3031_v9  ;;  %5359 = vmatmul.msk.bf16.gmra.mxu0 %vm646_vm1, %v5663_v20  ;;  %v4060_v30 = vsel %vm860_vm0, %v4057_v40, %v4059_v22 }
 0x323   : > { %v3351_v29 = vadd.f32 %v3032_v28, %v2323_v24  ;;  %5436 = vmatmul.msk.bf16.gmra.mxu1 %vm646_vm1, %v5663_v20 }
 0x324   : > { %5513 = vmatmul.msk.bf16.gmra.mxu2 %vm646_vm1, %v5663_v20  ;;  %5590 = vmatmul.msk.bf16.gmra.mxu3 %vm646_vm1, %v5663_v20 }
 0x325   : > { %v4379_v31 = vadd.f32 %v4060_v30, %v3351_v29  ;;  %v2013_v29 = vrot.slane %v6871_v35, 1 }
 0x327   : > { %vm4511_vm8 = vcmp.ge.f32.partialorder %v4379_v31, 0.0  ;;  %v4643_v34 = vmul.f32 0.2, %v4379_v31  ;;  %v2600_v5 = vpop.f32.mrf.mxu2  ;;  %v3628_v6 = vpop.f32.mrf.mxu3 }
 0x328   : > { %v3033_v7 = vrot.slane %v2600_v5, 1  ;;  %v4061_v8 = vrot.slane %v3628_v6, 2  ;;  %v6884_v13 = vpop.f32.mrf.mxu0  ;;  %v6886_v48 = vpop.f32.mrf.mxu1 }
 0x329   : > { %v4775_v42 = vsel %vm4511_vm8, %v4379_v31, %v4643_v34  ;;  %v2014_v34 = vsel %vm1849_vm2, %v2011_v52, %v2013_v29 }
 0x32a   : > { %4908 = vst.msk [vmem:[%s5856_s6 + $0x260] sm:$0xff] %vm4831_vm4, %v4775_v42  ;;  %v3034_v45 = vsel %vm1849_vm2, %v3031_v9, %v3033_v7  ;;  %v4062_v49 = vsel %vm860_vm0, %v4059_v22, %v4061_v8  ;;  %v5665_v22 = vld [vmem:[%s5763_s30 + $0x198] sm:$0xff]  ;;  %v2328_v17 = vadd.f32 %v2014_v34, %v6857_v44 }
 0x32b   : > { %v3352_v19 = vadd.f32 %v3034_v45, %v2324_v15 }
 0x32d   : > { %v4380_v21 = vadd.f32 %v4062_v49, %v3352_v19  ;;  %v2015_v19 = vrot.slane %v6886_v48, 1 }
 0x32f   : > { %vm4512_vm9 = vcmp.ge.f32.partialorder %v4380_v21, 0.0  ;;  %v4644_v23 = vmul.f32 0.2, %v4380_v21  ;;  %v2602_v53 = vpop.f32.mrf.mxu2  ;;  %v3630_v47 = vpop.f32.mrf.mxu3 }
 0x330   : > { %v3035_v41 = vrot.slane %v2602_v53, 1  ;;  %v4063_v57 = vrot.slane %v3630_v47, 2  ;;  %v6896_v58 = vpop.f32.mrf.mxu0  ;;  %v6898_v59 = vpop.f32.mrf.mxu1  ;;  %v2016_v53 = vsel %vm1849_vm2, %v2013_v29, %v2015_v19 }
 0x331   : > { %v4776_v61 = vsel %vm4512_vm9, %v4380_v21, %v4644_v23  ;;  %v2329_v62 = vadd.f32 %v2016_v53, %v6869_v43 }
 0x332   : > { %4909 = vst.msk [vmem:[%s5856_s6 + $0x268] sm:$0xff] %vm4831_vm4, %v4776_v61  ;;  %v3036_v63 = vsel %vm1849_vm2, %v3033_v7, %v3035_v41  ;;  %5360 = vmatmul.msk.bf16.gmra.mxu0 %vm646_vm1, %v5664_v55  ;;  %v4064_v1 = vsel %vm860_vm0, %v4061_v8, %v4063_v57 }
 0x333   : > { %v3353_v0 = vadd.f32 %v3036_v63, %v2325_v60  ;;  %5437 = vmatmul.msk.bf16.gmra.mxu1 %vm646_vm1, %v5664_v55 }
 0x334   : > { %5514 = vmatmul.msk.bf16.gmra.mxu2 %vm646_vm1, %v5664_v55  ;;  %5591 = vmatmul.msk.bf16.gmra.mxu3 %vm646_vm1, %v5664_v55 }
 0x335   : > { %v4381_v2 = vadd.f32 %v4064_v1, %v3353_v0  ;;  %v2017_v0 = vrot.slane %v6898_v59, 1 }
 0x337   : > { %vm4513_vm10 = vcmp.ge.f32.partialorder %v4381_v2, 0.0  ;;  %v4645_v4 = vmul.f32 0.2, %v4381_v2  ;;  %v2605_v36 = vpop.f32.mrf.mxu2  ;;  %v3633_v37 = vpop.f32.mrf.mxu3 }
 0x338   : > { %v3037_v39 = vrot.slane %v2605_v36, 1  ;;  %v4065_v40 = vrot.slane %v3633_v37, 2  ;;  %v6911_v46 = vpop.f32.mrf.mxu0  ;;  %v6913_v10 = vpop.f32.mrf.mxu1 }
 0x339   : > { %v4777_v12 = vsel %vm4513_vm10, %v4381_v2, %v4645_v4  ;;  %v2018_v4 = vsel %vm1849_vm2, %v2015_v19, %v2017_v0 }
 0x33a   : > { %4910 = vst.msk [vmem:[%s5856_s6 + $0x270] sm:$0xff] %vm4831_vm4, %v4777_v12  ;;  %v3038_v14 = vsel %vm1849_vm2, %v3035_v41, %v3037_v39  ;;  %v4066_v16 = vsel %vm860_vm0, %v4063_v57, %v4065_v40  ;;  %v5666_v57 = vld [vmem:[%s5763_s30 + $0x1a0] sm:$0xff]  ;;  %v2330_v52 = vadd.f32 %v2018_v4, %v6884_v13 }
 0x33b   : > { %v3354_v54 = vadd.f32 %v3038_v14, %v2326_v50 }
 0x33d   : > { %v4382_v56 = vadd.f32 %v4066_v16, %v3354_v54  ;;  %v2019_v54 = vrot.slane %v6913_v10, 1 }
 0x33f   : > { %vm4514_vm11 = vcmp.ge.f32.partialorder %v4382_v56, 0.0  ;;  %v4646_v38 = vmul.f32 0.2, %v4382_v56  ;;  %v2607_v20 = vpop.f32.mrf.mxu2  ;;  %v3635_v9 = vpop.f32.mrf.mxu3 }
 0x340   : > { %v3039_v11 = vrot.slane %v2607_v20, 1  ;;  %v4067_v24 = vrot.slane %v3635_v9, 2  ;;  %v6923_v25 = vpop.f32.mrf.mxu0  ;;  %v6925_v26 = vpop.f32.mrf.mxu1  ;;  %v2020_v20 = vsel %vm1849_vm2, %v2017_v0, %v2019_v54 }
 0x341   : > { %v4778_v28 = vsel %vm4514_vm11, %v4382_v56, %v4646_v38  ;;  %v2331_v29 = vadd.f32 %v2020_v20, %v6896_v58 }
 0x342   : > { %4911 = vst.msk [vmem:[%s5856_s6 + $0x278] sm:$0xff] %vm4831_vm4, %v4778_v28  ;;  %v3040_v30 = vsel %vm1849_vm2, %v3037_v39, %v3039_v11  ;;  %5361 = vmatmul.msk.bf16.gmra.mxu0 %vm646_vm1, %v5665_v22  ;;  %v4068_v32 = vsel %vm860_vm0, %v4065_v40, %v4067_v24 }
 0x343   : > { %v3355_v31 = vadd.f32 %v3040_v30, %v2327_v27  ;;  %5438 = vmatmul.msk.bf16.gmra.mxu1 %vm646_vm1, %v5665_v22 }
 0x344   : > { %5515 = vmatmul.msk.bf16.gmra.mxu2 %vm646_vm1, %v5665_v22  ;;  %5592 = vmatmul.msk.bf16.gmra.mxu3 %vm646_vm1, %v5665_v22 }
 0x345   : > { %v4383_v33 = vadd.f32 %v4068_v32, %v3355_v31  ;;  %v2021_v31 = vrot.slane %v6925_v26, 1 }
 0x347   : > { %vm4515_vm12 = vcmp.ge.f32.partialorder %v4383_v33, 0.0  ;;  %v4647_v35 = vmul.f32 0.2, %v4383_v33  ;;  %v2610_v5 = vpop.f32.mrf.mxu2  ;;  %v3638_v6 = vpop.f32.mrf.mxu3 }
 0x348   : > { %v3041_v7 = vrot.slane %v2610_v5, 1  ;;  %v4069_v8 = vrot.slane %v3638_v6, 2  ;;  %v6938_v15 = vpop.f32.mrf.mxu0  ;;  %v6940_v42 = vpop.f32.mrf.mxu1 }
 0x349   : > { %v4779_v45 = vsel %vm4515_vm12, %v4383_v33, %v4647_v35  ;;  %v2022_v35 = vsel %vm1849_vm2, %v2019_v54, %v2021_v31 }
 0x34a   : > { %4912 = vst.msk [vmem:[%s5856_s6 + $0x280] sm:$0xff] %vm4831_vm4, %v4779_v45  ;;  %v3042_v49 = vsel %vm1849_vm2, %v3039_v11, %v3041_v7  ;;  %v4070_v51 = vsel %vm860_vm0, %v4067_v24, %v4069_v8  ;;  %v5667_v24 = vld [vmem:[%s5763_s30 + $0x1a8] sm:$0xff]  ;;  %v2332_v19 = vadd.f32 %v2022_v35, %v6911_v46 }
 0x34b   : > { %v3356_v21 = vadd.f32 %v3042_v49, %v2328_v17 }
 0x34d   : > { %v4384_v23 = vadd.f32 %v4070_v51, %v3356_v21  ;;  %v2023_v21 = vrot.slane %v6940_v42, 1 }
 0x34f   : > { %vm4516_vm13 = vcmp.ge.f32.partialorder %v4384_v23, 0.0  ;;  %v4648_v47 = vmul.f32 0.2, %v4384_v23  ;;  %v2612_v55 = vpop.f32.mrf.mxu2  ;;  %v3640_v41 = vpop.f32.mrf.mxu3 }
 0x350   : > { %v3043_v44 = vrot.slane %v2612_v55, 1  ;;  %v4071_v60 = vrot.slane %v3640_v41, 2  ;;  %v6950_v61 = vpop.f32.mrf.mxu0  ;;  %v6952_v48 = vpop.f32.mrf.mxu1  ;;  %v2024_v55 = vsel %vm1849_vm2, %v2021_v31, %v2023_v21 }
 0x351   : > { %v4780_v63 = vsel %vm4516_vm13, %v4384_v23, %v4648_v47  ;;  %v2333_v0 = vadd.f32 %v2024_v55, %v6923_v25 }
 0x352   : > { %4913 = vst.msk [vmem:[%s5856_s6 + $0x288] sm:$0xff] %vm4831_vm4, %v4780_v63  ;;  %v3044_v1 = vsel %vm1849_vm2, %v3041_v7, %v3043_v44  ;;  %5362 = vmatmul.msk.bf16.gmra.mxu0 %vm646_vm1, %v5666_v57  ;;  %v4072_v3 = vsel %vm860_vm0, %v4069_v8, %v4071_v60 }
 0x353   : > { %v3357_v2 = vadd.f32 %v3044_v1, %v2329_v62  ;;  %5439 = vmatmul.msk.bf16.gmra.mxu1 %vm646_vm1, %v5666_v57 }
 0x354   : > { %5516 = vmatmul.msk.bf16.gmra.mxu2 %vm646_vm1, %v5666_v57  ;;  %5593 = vmatmul.msk.bf16.gmra.mxu3 %vm646_vm1, %v5666_v57 }
 0x355   : > { %v4385_v43 = vadd.f32 %v4072_v3, %v3357_v2  ;;  %v2025_v2 = vrot.slane %v6952_v48, 1 }
 0x357   : > { %vm4517_vm14 = vcmp.ge.f32.partialorder %v4385_v43, 0.0  ;;  %v4649_v59 = vmul.f32 0.2, %v4385_v43  ;;  %v2615_v36 = vpop.f32.mrf.mxu2  ;;  %v3643_v37 = vpop.f32.mrf.mxu3 }
 0x358   : > { %v3045_v39 = vrot.slane %v2615_v36, 1  ;;  %v4073_v40 = vrot.slane %v3643_v37, 2  ;;  %v6965_v50 = vpop.f32.mrf.mxu0  ;;  %v6967_v12 = vpop.f32.mrf.mxu1 }
 0x359   : > { %v4781_v14 = vsel %vm4517_vm14, %v4385_v43, %v4649_v59  ;;  %v2026_v59 = vsel %vm1849_vm2, %v2023_v21, %v2025_v2 }
 0x35a   : > { %4914 = vst.msk [vmem:[%s5856_s6 + $0x290] sm:$0xff] %vm4831_vm4, %v4781_v14  ;;  %v3046_v16 = vsel %vm1849_vm2, %v3043_v44, %v3045_v39  ;;  %v4074_v18 = vsel %vm860_vm0, %v4071_v60, %v4073_v40  ;;  %v5668_v60 = vld [vmem:[%s5763_s30 + $0x1b0] sm:$0xff]  ;;  %v2334_v54 = vadd.f32 %v2026_v59, %v6938_v15 }
 0x35b   : > { %v3358_v56 = vadd.f32 %v3046_v16, %v2330_v52 }
 0x35d   : > { %v4386_v38 = vadd.f32 %v4074_v18, %v3358_v56  ;;  %v2027_v56 = vrot.slane %v6967_v12, 1 }
 0x35f   : > { %vm4518_vm15 = vcmp.ge.f32.partialorder %v4386_v38, 0.0  ;;  %v4650_v9 = vmul.f32 0.2, %v4386_v38  ;;  %v2617_v22 = vpop.f32.mrf.mxu2  ;;  %v3645_v11 = vpop.f32.mrf.mxu3 }
 0x360   : > { %v3047_v13 = vrot.slane %v2617_v22, 1  ;;  %v4075_v27 = vrot.slane %v3645_v11, 2  ;;  %v6977_v28 = vpop.f32.mrf.mxu0  ;;  %v6979_v10 = vpop.f32.mrf.mxu1  ;;  %v2028_v22 = vsel %vm1849_vm2, %v2025_v2, %v2027_v56 }
 0x361   : > { %v4782_v30 = vsel %vm4518_vm15, %v4386_v38, %v4650_v9  ;;  %v2335_v31 = vadd.f32 %v2028_v22, %v6950_v61 }
 0x362   : > { %4915 = vst.msk [vmem:[%s5856_s6 + $0x298] sm:$0xff] %vm4831_vm4, %v4782_v30  ;;  %v3048_v32 = vsel %vm1849_vm2, %v3045_v39, %v3047_v13  ;;  %5363 = vmatmul.msk.bf16.gmra.mxu0 %vm646_vm1, %v5667_v24  ;;  %v4076_v34 = vsel %vm860_vm0, %v4073_v40, %v4075_v27 }
 0x363   : > { %v3359_v33 = vadd.f32 %v3048_v32, %v2331_v29  ;;  %5440 = vmatmul.msk.bf16.gmra.mxu1 %vm646_vm1, %v5667_v24 }
 0x364   : > { %5517 = vmatmul.msk.bf16.gmra.mxu2 %vm646_vm1, %v5667_v24  ;;  %5594 = vmatmul.msk.bf16.gmra.mxu3 %vm646_vm1, %v5667_v24 }
 0x365   : > { %v4387_v58 = vadd.f32 %v4076_v34, %v3359_v33  ;;  %v2029_v33 = vrot.slane %v6979_v10, 1 }
 0x367   : > { %vm4519_vm3 = vcmp.ge.f32.partialorder %v4387_v58, 0.0  ;;  %v4651_v26 = vmul.f32 0.2, %v4387_v58  ;;  %v2620_v5 = vpop.f32.mrf.mxu2  ;;  %v3648_v6 = vpop.f32.mrf.mxu3 }
 0x368   : > { %v3049_v7 = vrot.slane %v2620_v5, 1  ;;  %v4077_v8 = vrot.slane %v3648_v6, 2  ;;  %v6992_v17 = vpop.f32.mrf.mxu0  ;;  %v6994_v45 = vpop.f32.mrf.mxu1 }
 0x369   : > { %v4783_v49 = vsel %vm4519_vm3, %v4387_v58, %v4651_v26  ;;  %v2030_v26 = vsel %vm1849_vm2, %v2027_v56, %v2029_v33 }
 0x36a   : > { %4916 = vst.msk [vmem:[%s5856_s6 + $0x2a0] sm:$0xff] %vm4831_vm4, %v4783_v49  ;;  %v3050_v51 = vsel %vm1849_vm2, %v3047_v13, %v3049_v7  ;;  %v4078_v53 = vsel %vm860_vm0, %v4075_v27, %v4077_v8  ;;  %v5669_v27 = vld [vmem:[%s5763_s30 + $0x1b8] sm:$0xff]  ;;  %v2336_v21 = vadd.f32 %v2030_v26, %v6965_v50 }
 0x36b   : > { %v3360_v23 = vadd.f32 %v3050_v51, %v2332_v19 }
 0x36d   : > { %v4388_v47 = vadd.f32 %v4078_v53, %v3360_v23  ;;  %v2031_v23 = vrot.slane %v6994_v45, 1 }
 0x36f   : > { %vm4520_vm5 = vcmp.ge.f32.partialorder %v4388_v47, 0.0  ;;  %v4652_v41 = vmul.f32 0.2, %v4388_v47  ;;  %v2622_v57 = vpop.f32.mrf.mxu2  ;;  %v3650_v44 = vpop.f32.mrf.mxu3 }
 0x370   : > { %v3051_v46 = vrot.slane %v2622_v57, 1  ;;  %v4079_v62 = vrot.slane %v3650_v44, 2  ;;  %v7004_v63 = vpop.f32.mrf.mxu0  ;;  %v7006_v42 = vpop.f32.mrf.mxu1  ;;  %v2032_v57 = vsel %vm1849_vm2, %v2029_v33, %v2031_v23 }
 0x371   : > { %v4784_v1 = vsel %vm4520_vm5, %v4388_v47, %v4652_v41  ;;  %v2337_v2 = vadd.f32 %v2032_v57, %v6977_v28 }
 0x372   : > { %4917 = vst.msk [vmem:[%s5856_s6 + $0x2a8] sm:$0xff] %vm4831_vm4, %v4784_v1  ;;  %v3052_v3 = vsel %vm1849_vm2, %v3049_v7, %v3051_v46  ;;  %5364 = vmatmul.msk.bf16.gmra.mxu0 %vm646_vm1, %v5668_v60  ;;  %v4080_v4 = vsel %vm860_vm0, %v4077_v8, %v4079_v62 }
 0x373   : > { %v3361_v43 = vadd.f32 %v3052_v3, %v2333_v0  ;;  %5441 = vmatmul.msk.bf16.gmra.mxu1 %vm646_vm1, %v5668_v60 }
 0x374   : > { %5518 = vmatmul.msk.bf16.gmra.mxu2 %vm646_vm1, %v5668_v60  ;;  %5595 = vmatmul.msk.bf16.gmra.mxu3 %vm646_vm1, %v5668_v60 }
 0x375   : > { %v4389_v25 = vadd.f32 %v4080_v4, %v3361_v43  ;;  %v2033_v43 = vrot.slane %v7006_v42, 1 }
 0x377   : > { %vm4521_vm6 = vcmp.ge.f32.partialorder %v4389_v25, 0.0  ;;  %v4653_v48 = vmul.f32 0.2, %v4389_v25  ;;  %v2625_v36 = vpop.f32.mrf.mxu2  ;;  %v3653_v37 = vpop.f32.mrf.mxu3 }
 0x378   : > { %v3053_v39 = vrot.slane %v2625_v36, 1  ;;  %v4081_v40 = vrot.slane %v3653_v37, 2  ;;  %v7019_v52 = vpop.f32.mrf.mxu0  ;;  %v7021_v14 = vpop.f32.mrf.mxu1 }
 0x379   : > { %v4785_v16 = vsel %vm4521_vm6, %v4389_v25, %v4653_v48  ;;  %v2034_v48 = vsel %vm1849_vm2, %v2031_v23, %v2033_v43 }
 0x37a   : > { %4918 = vst.msk [vmem:[%s5856_s6 + $0x2b0] sm:$0xff] %vm4831_vm4, %v4785_v16  ;;  %v3054_v18 = vsel %vm1849_vm2, %v3051_v46, %v3053_v39  ;;  %v4082_v20 = vsel %vm860_vm0, %v4079_v62, %v4081_v40  ;;  %v5670_v62 = vld [vmem:[%s5763_s30 + $0x1c0] sm:$0xff]  ;;  %v2338_v56 = vadd.f32 %v2034_v48, %v6992_v17 }
 0x37b   : > { %v3362_v38 = vadd.f32 %v3054_v18, %v2334_v54 }
 0x37d   : > { %v4390_v9 = vadd.f32 %v4082_v20, %v3362_v38  ;;  %v2035_v38 = vrot.slane %v7021_v14, 1 }
 0x37f   : > { %vm4522_vm7 = vcmp.ge.f32.partialorder %v4390_v9, 0.0  ;;  %v4654_v11 = vmul.f32 0.2, %v4390_v9  ;;  %v2627_v24 = vpop.f32.mrf.mxu2  ;;  %v3655_v13 = vpop.f32.mrf.mxu3 }
 0x380   : > { %v3055_v15 = vrot.slane %v2627_v24, 1  ;;  %v4083_v29 = vrot.slane %v3655_v13, 2  ;;  %v7031_v30 = vpop.f32.mrf.mxu0  ;;  %v7033_v12 = vpop.f32.mrf.mxu1  ;;  %v2036_v24 = vsel %vm1849_vm2, %v2033_v43, %v2035_v38 }
 0x381   : > { %v4786_v32 = vsel %vm4522_vm7, %v4390_v9, %v4654_v11  ;;  %v2339_v33 = vadd.f32 %v2036_v24, %v7004_v63 }
 0x382   : > { %4919 = vst.msk [vmem:[%s5856_s6 + $0x2b8] sm:$0xff] %vm4831_vm4, %v4786_v32  ;;  %v3056_v34 = vsel %vm1849_vm2, %v3053_v39, %v3055_v15  ;;  %5365 = vmatmul.msk.bf16.gmra.mxu0 %vm646_vm1, %v5669_v27  ;;  %v4084_v35 = vsel %vm860_vm0, %v4081_v40, %v4083_v29 }
 0x383   : > { %v3363_v58 = vadd.f32 %v3056_v34, %v2335_v31  ;;  %5442 = vmatmul.msk.bf16.gmra.mxu1 %vm646_vm1, %v5669_v27 }
 0x384   : > { %5519 = vmatmul.msk.bf16.gmra.mxu2 %vm646_vm1, %v5669_v27  ;;  %5596 = vmatmul.msk.bf16.gmra.mxu3 %vm646_vm1, %v5669_v27 }
 0x385   : > { %v4391_v61 = vadd.f32 %v4084_v35, %v3363_v58  ;;  %v2037_v58 = vrot.slane %v7033_v12, 1 }
 0x387   : > { %vm4523_vm8 = vcmp.ge.f32.partialorder %v4391_v61, 0.0  ;;  %v4655_v10 = vmul.f32 0.2, %v4391_v61  ;;  %v2630_v5 = vpop.f32.mrf.mxu2  ;;  %v3658_v6 = vpop.f32.mrf.mxu3 }
 0x388   : > { %v3057_v7 = vrot.slane %v2630_v5, 1  ;;  %v4085_v8 = vrot.slane %v3658_v6, 2  ;;  %v7046_v19 = vpop.f32.mrf.mxu0  ;;  %v7048_v49 = vpop.f32.mrf.mxu1 }
 0x389   : > { %v4787_v51 = vsel %vm4523_vm8, %v4391_v61, %v4655_v10  ;;  %v2038_v10 = vsel %vm1849_vm2, %v2035_v38, %v2037_v58 }
 0x38a   : > { %4920 = vst.msk [vmem:[%s5856_s6 + $0x2c0] sm:$0xff] %vm4831_vm4, %v4787_v51  ;;  %v3058_v53 = vsel %vm1849_vm2, %v3055_v15, %v3057_v7  ;;  %v4086_v55 = vsel %vm860_vm0, %v4083_v29, %v4085_v8  ;;  %v5671_v29 = vld [vmem:[%s5763_s30 + $0x1c8] sm:$0xff]  ;;  %v2340_v23 = vadd.f32 %v2038_v10, %v7019_v52 }
 0x38b   : > { %v3364_v47 = vadd.f32 %v3058_v53, %v2336_v21 }
 0x38d   : > { %v4392_v41 = vadd.f32 %v4086_v55, %v3364_v47  ;;  %v2039_v47 = vrot.slane %v7048_v49, 1 }
 0x38f   : > { %vm4524_vm9 = vcmp.ge.f32.partialorder %v4392_v41, 0.0  ;;  %v4656_v44 = vmul.f32 0.2, %v4392_v41  ;;  %v2632_v60 = vpop.f32.mrf.mxu2  ;;  %v3660_v46 = vpop.f32.mrf.mxu3 }
 0x390   : > { %v3059_v50 = vrot.slane %v2632_v60, 1  ;;  %v4087_v0 = vrot.slane %v3660_v46, 2  ;;  %v7058_v1 = vpop.f32.mrf.mxu0  ;;  %v7060_v45 = vpop.f32.mrf.mxu1  ;;  %v2040_v60 = vsel %vm1849_vm2, %v2037_v58, %v2039_v47 }
 0x391   : > { %v4788_v3 = vsel %vm4524_vm9, %v4392_v41, %v4656_v44  ;;  %v2341_v43 = vadd.f32 %v2040_v60, %v7031_v30 }
 0x392   : > { %4921 = vst.msk [vmem:[%s5856_s6 + $0x2c8] sm:$0xff] %vm4831_vm4, %v4788_v3  ;;  %v3060_v4 = vsel %vm1849_vm2, %v3057_v7, %v3059_v50  ;;  %5366 = vmatmul.msk.bf16.gmra.mxu0 %vm646_vm1, %v5670_v62  ;;  %v4088_v59 = vsel %vm860_vm0, %v4085_v8, %v4087_v0 }
 0x393   : > { %v3365_v25 = vadd.f32 %v3060_v4, %v2337_v2  ;;  %5443 = vmatmul.msk.bf16.gmra.mxu1 %vm646_vm1, %v5670_v62 }
 0x394   : > { %5520 = vmatmul.msk.bf16.gmra.mxu2 %vm646_vm1, %v5670_v62  ;;  %5597 = vmatmul.msk.bf16.gmra.mxu3 %vm646_vm1, %v5670_v62 }
 0x395   : > { %v4393_v28 = vadd.f32 %v4088_v59, %v3365_v25  ;;  %v2041_v25 = vrot.slane %v7060_v45, 1 }
 0x397   : > { %vm4525_vm10 = vcmp.ge.f32.partialorder %v4393_v28, 0.0  ;;  %v4657_v42 = vmul.f32 0.2, %v4393_v28  ;;  %v2635_v36 = vpop.f32.mrf.mxu2  ;;  %v3663_v37 = vpop.f32.mrf.mxu3 }
 0x398   : > { %v3061_v39 = vrot.slane %v2635_v36, 1  ;;  %v4089_v40 = vrot.slane %v3663_v37, 2  ;;  %v7073_v54 = vpop.f32.mrf.mxu0  ;;  %v7075_v16 = vpop.f32.mrf.mxu1 }
 0x399   : > { %v4789_v18 = vsel %vm4525_vm10, %v4393_v28, %v4657_v42  ;;  %v2042_v42 = vsel %vm1849_vm2, %v2039_v47, %v2041_v25 }
 0x39a   : > { %4922 = vst.msk [vmem:[%s5856_s6 + $0x2d0] sm:$0xff] %vm4831_vm4, %v4789_v18  ;;  %v3062_v20 = vsel %vm1849_vm2, %v3059_v50, %v3061_v39  ;;  %v4090_v22 = vsel %vm860_vm0, %v4087_v0, %v4089_v40  ;;  %v5672_v0 = vld [vmem:[%s5763_s30 + $0x1d0] sm:$0xff]  ;;  %v2342_v38 = vadd.f32 %v2042_v42, %v7046_v19 }
 0x39b   : > { %v3366_v9 = vadd.f32 %v3062_v20, %v2338_v56 }
 0x39d   : > { %v4394_v11 = vadd.f32 %v4090_v22, %v3366_v9  ;;  %v2043_v9 = vrot.slane %v7075_v16, 1 }
 0x39f   : > { %vm4526_vm11 = vcmp.ge.f32.partialorder %v4394_v11, 0.0  ;;  %v4658_v13 = vmul.f32 0.2, %v4394_v11  ;;  %v2637_v27 = vpop.f32.mrf.mxu2  ;;  %v3665_v15 = vpop.f32.mrf.mxu3 }
 0x3a0   : > { %v3063_v17 = vrot.slane %v2637_v27, 1  ;;  %v4091_v31 = vrot.slane %v3665_v15, 2  ;;  %v7085_v32 = vpop.f32.mrf.mxu0  ;;  %v7087_v14 = vpop.f32.mrf.mxu1  ;;  %v2044_v27 = vsel %vm1849_vm2, %v2041_v25, %v2043_v9 }
 0x3a1   : > { %v4790_v34 = vsel %vm4526_vm11, %v4394_v11, %v4658_v13  ;;  %v2343_v58 = vadd.f32 %v2044_v27, %v7058_v1 }
 0x3a2   : > { %4923 = vst.msk [vmem:[%s5856_s6 + $0x2d8] sm:$0xff] %vm4831_vm4, %v4790_v34  ;;  %v3064_v35 = vsel %vm1849_vm2, %v3061_v39, %v3063_v17  ;;  %5367 = vmatmul.msk.bf16.gmra.mxu0 %vm646_vm1, %v5671_v29  ;;  %v4092_v26 = vsel %vm860_vm0, %v4089_v40, %v4091_v31 }
 0x3a3   : > { %v3367_v61 = vadd.f32 %v3064_v35, %v2339_v33  ;;  %5444 = vmatmul.msk.bf16.gmra.mxu1 %vm646_vm1, %v5671_v29 }
 0x3a4   : > { %5521 = vmatmul.msk.bf16.gmra.mxu2 %vm646_vm1, %v5671_v29  ;;  %5598 = vmatmul.msk.bf16.gmra.mxu3 %vm646_vm1, %v5671_v29 }
 0x3a5   : > { %v4395_v63 = vadd.f32 %v4092_v26, %v3367_v61  ;;  %v2045_v61 = vrot.slane %v7087_v14, 1 }
 0x3a7   : > { %vm4527_vm12 = vcmp.ge.f32.partialorder %v4395_v63, 0.0  ;;  %v4659_v12 = vmul.f32 0.2, %v4395_v63  ;;  %v2640_v5 = vpop.f32.mrf.mxu2  ;;  %v3668_v6 = vpop.f32.mrf.mxu3 }
 0x3a8   : > { %v3065_v7 = vrot.slane %v2640_v5, 1  ;;  %v4093_v8 = vrot.slane %v3668_v6, 2  ;;  %v7100_v21 = vpop.f32.mrf.mxu0  ;;  %v7102_v51 = vpop.f32.mrf.mxu1 }
 0x3a9   : > { %v4791_v53 = vsel %vm4527_vm12, %v4395_v63, %v4659_v12  ;;  %v2046_v12 = vsel %vm1849_vm2, %v2043_v9, %v2045_v61 }
 0x3aa   : > { %4924 = vst.msk [vmem:[%s5856_s6 + $0x2e0] sm:$0xff] %vm4831_vm4, %v4791_v53  ;;  %v3066_v55 = vsel %vm1849_vm2, %v3063_v17, %v3065_v7  ;;  %v4094_v57 = vsel %vm860_vm0, %v4091_v31, %v4093_v8  ;;  %v5673_v31 = vld [vmem:[%s5763_s30 + $0x1d8] sm:$0xff]  ;;  %v2344_v47 = vadd.f32 %v2046_v12, %v7073_v54 }
 0x3ab   : > { %v3368_v41 = vadd.f32 %v3066_v55, %v2340_v23 }
 0x3ad   : > { %v4396_v44 = vadd.f32 %v4094_v57, %v3368_v41  ;;  %v2047_v41 = vrot.slane %v7102_v51, 1 }
 0x3af   : > { %vm4528_vm13 = vcmp.ge.f32.partialorder %v4396_v44, 0.0  ;;  %v4660_v46 = vmul.f32 0.2, %v4396_v44  ;;  %v2642_v62 = vpop.f32.mrf.mxu2  ;;  %v3670_v50 = vpop.f32.mrf.mxu3 }
 0x3b0   : > { %v3067_v52 = vrot.slane %v2642_v62, 1  ;;  %v4095_v2 = vrot.slane %v3670_v50, 2  ;;  %v7112_v3 = vpop.f32.mrf.mxu0  ;;  %v7114_v49 = vpop.f32.mrf.mxu1  ;;  %v2048_v62 = vsel %vm1849_vm2, %v2045_v61, %v2047_v41 }
 0x3b1   : > { %v4792_v4 = vsel %vm4528_vm13, %v4396_v44, %v4660_v46  ;;  %v2345_v25 = vadd.f32 %v2048_v62, %v7085_v32 }
 0x3b2   : > { %4925 = vst.msk [vmem:[%s5856_s6 + $0x2e8] sm:$0xff] %vm4831_vm4, %v4792_v4  ;;  %v3068_v59 = vsel %vm1849_vm2, %v3065_v7, %v3067_v52  ;;  %5368 = vmatmul.msk.bf16.gmra.mxu0 %vm646_vm1, %v5672_v0  ;;  %v4096_v48 = vsel %vm860_vm0, %v4093_v8, %v4095_v2 }
 0x3b3   : > { %v3369_v28 = vadd.f32 %v3068_v59, %v2341_v43  ;;  %5445 = vmatmul.msk.bf16.gmra.mxu1 %vm646_vm1, %v5672_v0 }
 0x3b4   : > { %5522 = vmatmul.msk.bf16.gmra.mxu2 %vm646_vm1, %v5672_v0  ;;  %5599 = vmatmul.msk.bf16.gmra.mxu3 %vm646_vm1, %v5672_v0 }
 0x3b5   : > { %v4397_v30 = vadd.f32 %v4096_v48, %v3369_v28  ;;  %v2049_v28 = vrot.slane %v7114_v49, 1 }
 0x3b7   : > { %vm4529_vm14 = vcmp.ge.f32.partialorder %v4397_v30, 0.0  ;;  %v4661_v45 = vmul.f32 0.2, %v4397_v30  ;;  %v2645_v36 = vpop.f32.mrf.mxu2  ;;  %v3673_v37 = vpop.f32.mrf.mxu3 }
 0x3b8   : > { %v3069_v39 = vrot.slane %v2645_v36, 1  ;;  %v4097_v40 = vrot.slane %v3673_v37, 2  ;;  %v7127_v56 = vpop.f32.mrf.mxu0  ;;  %v7129_v18 = vpop.f32.mrf.mxu1 }
 0x3b9   : > { %v4793_v20 = vsel %vm4529_vm14, %v4397_v30, %v4661_v45  ;;  %v2050_v45 = vsel %vm1849_vm2, %v2047_v41, %v2049_v28 }
 0x3ba   : > { %4926 = vst.msk [vmem:[%s5856_s6 + $0x2f0] sm:$0xff] %vm4831_vm4, %v4793_v20  ;;  %v3070_v22 = vsel %vm1849_vm2, %v3067_v52, %v3069_v39  ;;  %v4098_v24 = vsel %vm860_vm0, %v4095_v2, %v4097_v40  ;;  %v5674_v2 = vld [vmem:[%s5763_s30 + $0x1e0] sm:$0xff]  ;;  %v2346_v9 = vadd.f32 %v2050_v45, %v7100_v21 }
 0x3bb   : > { %v3370_v11 = vadd.f32 %v3070_v22, %v2342_v38 }
 0x3bd   : > { %v4398_v13 = vadd.f32 %v4098_v24, %v3370_v11  ;;  %v2051_v11 = vrot.slane %v7129_v18, 1 }
 0x3bf   : > { %vm4530_vm15 = vcmp.ge.f32.partialorder %v4398_v13, 0.0  ;;  %v4662_v15 = vmul.f32 0.2, %v4398_v13  ;;  %v2647_v29 = vpop.f32.mrf.mxu2  ;;  %v3675_v17 = vpop.f32.mrf.mxu3 }
 0x3c0   : > { %v3071_v19 = vrot.slane %v2647_v29, 1  ;;  %v4099_v33 = vrot.slane %v3675_v17, 2  ;;  %v7139_v34 = vpop.f32.mrf.mxu0  ;;  %v7141_v16 = vpop.f32.mrf.mxu1  ;;  %v2052_v29 = vsel %vm1849_vm2, %v2049_v28, %v2051_v11 }
 0x3c1   : > { %v4794_v35 = vsel %vm4530_vm15, %v4398_v13, %v4662_v15  ;;  %v2347_v61 = vadd.f32 %v2052_v29, %v7112_v3 }
 0x3c2   : > { %4927 = vst.msk [vmem:[%s5856_s6 + $0x2f8] sm:$0xff] %vm4831_vm4, %v4794_v35  ;;  %v3072_v26 = vsel %vm1849_vm2, %v3069_v39, %v3071_v19  ;;  %5369 = vmatmul.msk.bf16.gmra.mxu0 %vm646_vm1, %v5673_v31  ;;  %v4100_v10 = vsel %vm860_vm0, %v4097_v40, %v4099_v33 }
 0x3c3   : > { %v3371_v63 = vadd.f32 %v3072_v26, %v2343_v58  ;;  %5446 = vmatmul.msk.bf16.gmra.mxu1 %vm646_vm1, %v5673_v31 }
 0x3c4   : > { %5523 = vmatmul.msk.bf16.gmra.mxu2 %vm646_vm1, %v5673_v31  ;;  %5600 = vmatmul.msk.bf16.gmra.mxu3 %vm646_vm1, %v5673_v31 }
 0x3c5   : > { %v4399_v1 = vadd.f32 %v4100_v10, %v3371_v63  ;;  %v2053_v63 = vrot.slane %v7141_v16, 1 }
 0x3c7   : > { %vm4531_vm3 = vcmp.ge.f32.partialorder %v4399_v1, 0.0  ;;  %v4663_v14 = vmul.f32 0.2, %v4399_v1  ;;  %v2650_v5 = vpop.f32.mrf.mxu2  ;;  %v3678_v6 = vpop.f32.mrf.mxu3 }
 0x3c8   : > { %v3073_v7 = vrot.slane %v2650_v5, 1  ;;  %v4101_v8 = vrot.slane %v3678_v6, 2  ;;  %v7154_v23 = vpop.f32.mrf.mxu0  ;;  %v7156_v53 = vpop.f32.mrf.mxu1 }
 0x3c9   : > { %v4795_v55 = vsel %vm4531_vm3, %v4399_v1, %v4663_v14  ;;  %v2054_v14 = vsel %vm1849_vm2, %v2051_v11, %v2053_v63 }
 0x3ca   : > { %4928 = vst.msk [vmem:[%s5856_s6 + $0x300] sm:$0xff] %vm4831_vm4, %v4795_v55  ;;  %v3074_v57 = vsel %vm1849_vm2, %v3071_v19, %v3073_v7  ;;  %v4102_v60 = vsel %vm860_vm0, %v4099_v33, %v4101_v8  ;;  %v5675_v33 = vld [vmem:[%s5763_s30 + $0x1e8] sm:$0xff]  ;;  %v2348_v41 = vadd.f32 %v2054_v14, %v7127_v56 }
 0x3cb   : > { %v3372_v44 = vadd.f32 %v3074_v57, %v2344_v47 }
 0x3cd   : > { %v4400_v46 = vadd.f32 %v4102_v60, %v3372_v44  ;;  %v2055_v44 = vrot.slane %v7156_v53, 1 }
 0x3cf   : > { %vm4532_vm5 = vcmp.ge.f32.partialorder %v4400_v46, 0.0  ;;  %v4664_v50 = vmul.f32 0.2, %v4400_v46  ;;  %v2652_v0 = vpop.f32.mrf.mxu2  ;;  %v3680_v52 = vpop.f32.mrf.mxu3 }
 0x3d0   : > { %v3075_v54 = vrot.slane %v2652_v0, 1  ;;  %v4103_v43 = vrot.slane %v3680_v52, 2  ;;  %v7166_v4 = vpop.f32.mrf.mxu0  ;;  %v7168_v51 = vpop.f32.mrf.mxu1  ;;  %v2056_v0 = vsel %vm1849_vm2, %v2053_v63, %v2055_v44 }
 0x3d1   : > { %v4796_v59 = vsel %vm4532_vm5, %v4400_v46, %v4664_v50  ;;  %v2349_v28 = vadd.f32 %v2056_v0, %v7139_v34 }
 0x3d2   : > { %4929 = vst.msk [vmem:[%s5856_s6 + $0x308] sm:$0xff] %vm4831_vm4, %v4796_v59  ;;  %v3076_v48 = vsel %vm1849_vm2, %v3073_v7, %v3075_v54  ;;  %5370 = vmatmul.msk.bf16.gmra.mxu0 %vm646_vm1, %v5674_v2  ;;  %v4104_v42 = vsel %vm860_vm0, %v4101_v8, %v4103_v43 }
 0x3d3   : > { %v3373_v30 = vadd.f32 %v3076_v48, %v2345_v25  ;;  %5447 = vmatmul.msk.bf16.gmra.mxu1 %vm646_vm1, %v5674_v2 }
 0x3d4   : > { %5524 = vmatmul.msk.bf16.gmra.mxu2 %vm646_vm1, %v5674_v2  ;;  %5601 = vmatmul.msk.bf16.gmra.mxu3 %vm646_vm1, %v5674_v2 }
 0x3d5   : > { %v4401_v32 = vadd.f32 %v4104_v42, %v3373_v30  ;;  %v2057_v30 = vrot.slane %v7168_v51, 1 }
 0x3d7   : > { %vm4533_vm6 = vcmp.ge.f32.partialorder %v4401_v32, 0.0  ;;  %v4665_v49 = vmul.f32 0.2, %v4401_v32  ;;  %v2655_v36 = vpop.f32.mrf.mxu2  ;;  %v3683_v37 = vpop.f32.mrf.mxu3 }
 0x3d8   : > { %v3077_v39 = vrot.slane %v2655_v36, 1  ;;  %v4105_v40 = vrot.slane %v3683_v37, 2  ;;  %v7181_v38 = vpop.f32.mrf.mxu0  ;;  %v7183_v20 = vpop.f32.mrf.mxu1 }
 0x3d9   : > { %v4797_v22 = vsel %vm4533_vm6, %v4401_v32, %v4665_v49  ;;  %v2058_v49 = vsel %vm1849_vm2, %v2055_v44, %v2057_v30 }
 0x3da   : > { %4930 = vst.msk [vmem:[%s5856_s6 + $0x310] sm:$0xff] %vm4831_vm4, %v4797_v22  ;;  %v3078_v24 = vsel %vm1849_vm2, %v3075_v54, %v3077_v39  ;;  %v4106_v27 = vsel %vm860_vm0, %v4103_v43, %v4105_v40  ;;  %v5676_v43 = vld [vmem:[%s5763_s30 + $0x1f0] sm:$0xff]  ;;  %v2350_v11 = vadd.f32 %v2058_v49, %v7154_v23 }
 0x3db   : > { %v3374_v13 = vadd.f32 %v3078_v24, %v2346_v9 }
 0x3dd   : > { %v4402_v15 = vadd.f32 %v4106_v27, %v3374_v13  ;;  %v2059_v13 = vrot.slane %v7183_v20, 1 }
 0x3df   : > { %vm4534_vm7 = vcmp.ge.f32.partialorder %v4402_v15, 0.0  ;;  %v4666_v17 = vmul.f32 0.2, %v4402_v15  ;;  %v2657_v31 = vpop.f32.mrf.mxu2  ;;  %v3685_v19 = vpop.f32.mrf.mxu3 }
 0x3e0   : > { %v3079_v21 = vrot.slane %v2657_v31, 1  ;;  %v4107_v58 = vrot.slane %v3685_v19, 2  ;;  %v7193_v35 = vpop.f32.mrf.mxu0  ;;  %v7195_v18 = vpop.f32.mrf.mxu1  ;;  %v2060_v31 = vsel %vm1849_vm2, %v2057_v30, %v2059_v13 }
 0x3e1   : > { %v4798_v26 = vsel %vm4534_vm7, %v4402_v15, %v4666_v17  ;;  %v2351_v63 = vadd.f32 %v2060_v31, %v7166_v4 }
 0x3e2   : > { %4931 = vst.msk [vmem:[%s5856_s6 + $0x318] sm:$0xff] %vm4831_vm4, %v4798_v26  ;;  %v3080_v10 = vsel %vm1849_vm2, %v3077_v39, %v3079_v21  ;;  %5371 = vmatmul.msk.bf16.gmra.mxu0 %vm646_vm1, %v5675_v33  ;;  %v4108_v12 = vsel %vm860_vm0, %v4105_v40, %v4107_v58 }
 0x3e3   : > { %v3375_v1 = vadd.f32 %v3080_v10, %v2347_v61  ;;  %5448 = vmatmul.msk.bf16.gmra.mxu1 %vm646_vm1, %v5675_v33 }
 0x3e4   : > { %5525 = vmatmul.msk.bf16.gmra.mxu2 %vm646_vm1, %v5675_v33  ;;  %5602 = vmatmul.msk.bf16.gmra.mxu3 %vm646_vm1, %v5675_v33 }
 0x3e5   : > { %v4403_v3 = vadd.f32 %v4108_v12, %v3375_v1  ;;  %v2061_v1 = vrot.slane %v7195_v18, 1 }
 0x3e7   : > { %vm4535_vm8 = vcmp.ge.f32.partialorder %v4403_v3, 0.0  ;;  %v4667_v16 = vmul.f32 0.2, %v4403_v3  ;;  %v2660_v5 = vpop.f32.mrf.mxu2  ;;  %v3688_v6 = vpop.f32.mrf.mxu3 }
 0x3e8   : > { %v3081_v7 = vrot.slane %v2660_v5, 1  ;;  %v4109_v8 = vrot.slane %v3688_v6, 2  ;;  %v7208_v47 = vpop.f32.mrf.mxu0  ;;  %v7210_v55 = vpop.f32.mrf.mxu1 }
 0x3e9   : > { %v4799_v57 = vsel %vm4535_vm8, %v4403_v3, %v4667_v16  ;;  %v2062_v16 = vsel %vm1849_vm2, %v2059_v13, %v2061_v1 }
 0x3ea   : > { %4932 = vst.msk [vmem:[%s5856_s6 + $0x320] sm:$0xff] %vm4831_vm4, %v4799_v57  ;;  %v3082_v60 = vsel %vm1849_vm2, %v3079_v21, %v3081_v7  ;;  %v4110_v62 = vsel %vm860_vm0, %v4107_v58, %v4109_v8  ;;  %v5677_v58 = vld [vmem:[%s5763_s30 + $0x1f8] sm:$0xff]  ;;  %v2352_v44 = vadd.f32 %v2062_v16, %v7181_v38 }
 0x3eb   : > { %v3376_v46 = vadd.f32 %v3082_v60, %v2348_v41 }
 0x3ed   : > { %v4404_v50 = vadd.f32 %v4110_v62, %v3376_v46  ;;  %v2063_v46 = vrot.slane %v7210_v55, 1 }
 0x3ef   : > { %vm4536_vm9 = vcmp.ge.f32.partialorder %v4404_v50, 0.0  ;;  %v4668_v52 = vmul.f32 0.2, %v4404_v50  ;;  %v2662_v2 = vpop.f32.mrf.mxu2  ;;  %v3690_v54 = vpop.f32.mrf.mxu3 }
 0x3f0   : > { %v3083_v56 = vrot.slane %v2662_v2, 1  ;;  %v4111_v25 = vrot.slane %v3690_v54, 2  ;;  %v7220_v59 = vpop.f32.mrf.mxu0  ;;  %v7222_v53 = vpop.f32.mrf.mxu1  ;;  %v2064_v2 = vsel %vm1849_vm2, %v2061_v1, %v2063_v46 }
 0x3f1   : > { %v4800_v48 = vsel %vm4536_vm9, %v4404_v50, %v4668_v52  ;;  %v2353_v30 = vadd.f32 %v2064_v2, %v7193_v35 }
 0x3f2   : > { %4933 = vst.msk [vmem:[%s5856_s6 + $0x328] sm:$0xff] %vm4831_vm4, %v4800_v48  ;;  %v3084_v42 = vsel %vm1849_vm2, %v3081_v7, %v3083_v56  ;;  %5372 = vmatmul.msk.bf16.gmra.mxu0 %vm646_vm1, %v5676_v43  ;;  %v4112_v45 = vsel %vm860_vm0, %v4109_v8, %v4111_v25 }
 0x3f3   : > { %v3377_v32 = vadd.f32 %v3084_v42, %v2349_v28  ;;  %5449 = vmatmul.msk.bf16.gmra.mxu1 %vm646_vm1, %v5676_v43 }
 0x3f4   : > { %5526 = vmatmul.msk.bf16.gmra.mxu2 %vm646_vm1, %v5676_v43  ;;  %5603 = vmatmul.msk.bf16.gmra.mxu3 %vm646_vm1, %v5676_v43 }
 0x3f5   : > { %v4405_v34 = vadd.f32 %v4112_v45, %v3377_v32  ;;  %v2065_v32 = vrot.slane %v7222_v53, 1 }
 0x3f7   : > { %vm4537_vm10 = vcmp.ge.f32.partialorder %v4405_v34, 0.0  ;;  %v4669_v51 = vmul.f32 0.2, %v4405_v34  ;;  %v2665_v36 = vpop.f32.mrf.mxu2  ;;  %v3693_v37 = vpop.f32.mrf.mxu3 }
 0x3f8   : > { %v3085_v39 = vrot.slane %v2665_v36, 1  ;;  %v4113_v40 = vrot.slane %v3693_v37, 2  ;;  %v7235_v9 = vpop.f32.mrf.mxu0  ;;  %v7237_v22 = vpop.f32.mrf.mxu1 }
 0x3f9   : > { %v4801_v24 = vsel %vm4537_vm10, %v4405_v34, %v4669_v51  ;;  %v2066_v51 = vsel %vm1849_vm2, %v2063_v46, %v2065_v32 }
 0x3fa   : > { %4934 = vst.msk [vmem:[%s5856_s6 + $0x330] sm:$0xff] %vm4831_vm4, %v4801_v24  ;;  %v3086_v27 = vsel %vm1849_vm2, %v3083_v56, %v3085_v39  ;;  %v4114_v29 = vsel %vm860_vm0, %v4111_v25, %v4113_v40  ;;  %v5678_v25 = vld [vmem:[%s5763_s30 + $0x200] sm:$0xff]  ;;  %v2354_v13 = vadd.f32 %v2066_v51, %v7208_v47 }
 0x3fb   : > { %v3378_v15 = vadd.f32 %v3086_v27, %v2350_v11 }
 0x3fd   : > { %v4406_v17 = vadd.f32 %v4114_v29, %v3378_v15  ;;  %v2067_v15 = vrot.slane %v7237_v22, 1 }
 0x3ff   : > { %vm4538_vm11 = vcmp.ge.f32.partialorder %v4406_v17, 0.0  ;;  %v4670_v19 = vmul.f32 0.2, %v4406_v17  ;;  %v2667_v33 = vpop.f32.mrf.mxu2  ;;  %v3695_v21 = vpop.f32.mrf.mxu3 }
 0x400   : > { %v3087_v23 = vrot.slane %v2667_v33, 1  ;;  %v4115_v61 = vrot.slane %v3695_v21, 2  ;;  %v7247_v26 = vpop.f32.mrf.mxu0  ;;  %v7249_v20 = vpop.f32.mrf.mxu1  ;;  %v2068_v33 = vsel %vm1849_vm2, %v2065_v32, %v2067_v15 }
 0x401   : > { %v4802_v10 = vsel %vm4538_vm11, %v4406_v17, %v4670_v19  ;;  %v2355_v1 = vadd.f32 %v2068_v33, %v7220_v59 }
 0x402   : > { %4935 = vst.msk [vmem:[%s5856_s6 + $0x338] sm:$0xff] %vm4831_vm4, %v4802_v10  ;;  %v3088_v12 = vsel %vm1849_vm2, %v3085_v39, %v3087_v23  ;;  %5373 = vmatmul.msk.bf16.gmra.mxu0 %vm646_vm1, %v5677_v58  ;;  %v4116_v14 = vsel %vm860_vm0, %v4113_v40, %v4115_v61 }
 0x403   : > { %v3379_v3 = vadd.f32 %v3088_v12, %v2351_v63  ;;  %5450 = vmatmul.msk.bf16.gmra.mxu1 %vm646_vm1, %v5677_v58 }
 0x404   : > { %5527 = vmatmul.msk.bf16.gmra.mxu2 %vm646_vm1, %v5677_v58  ;;  %5604 = vmatmul.msk.bf16.gmra.mxu3 %vm646_vm1, %v5677_v58 }
 0x405   : > { %v4407_v4 = vadd.f32 %v4116_v14, %v3379_v3  ;;  %v2069_v3 = vrot.slane %v7249_v20, 1 }
 0x407   : > { %vm4539_vm12 = vcmp.ge.f32.partialorder %v4407_v4, 0.0  ;;  %v4671_v18 = vmul.f32 0.2, %v4407_v4  ;;  %v2670_v5 = vpop.f32.mrf.mxu2  ;;  %v3698_v6 = vpop.f32.mrf.mxu3 }
 0x408   : > { %v3089_v7 = vrot.slane %v2670_v5, 1  ;;  %v4117_v8 = vrot.slane %v3698_v6, 2  ;;  %v7262_v41 = vpop.f32.mrf.mxu0  ;;  %v7264_v57 = vpop.f32.mrf.mxu1 }
 0x409   : > { %v4803_v60 = vsel %vm4539_vm12, %v4407_v4, %v4671_v18  ;;  %v2070_v18 = vsel %vm1849_vm2, %v2067_v15, %v2069_v3 }
 0x40a   : > { %4936 = vst.msk [vmem:[%s5856_s6 + $0x340] sm:$0xff] %vm4831_vm4, %v4803_v60  ;;  %v3090_v62 = vsel %vm1849_vm2, %v3087_v23, %v3089_v7  ;;  %v4118_v0 = vsel %vm860_vm0, %v4115_v61, %v4117_v8  ;;  %v5679_v61 = vld [vmem:[%s5763_s30 + $0x208] sm:$0xff]  ;;  %v2356_v46 = vadd.f32 %v2070_v18, %v7235_v9 }
 0x40b   : > { %v3380_v50 = vadd.f32 %v3090_v62, %v2352_v44 }
 0x40d   : > { %v4408_v52 = vadd.f32 %v4118_v0, %v3380_v50  ;;  %v2071_v50 = vrot.slane %v7264_v57, 1 }
 0x40f   : > { %vm4540_vm13 = vcmp.ge.f32.partialorder %v4408_v52, 0.0  ;;  %v4672_v54 = vmul.f32 0.2, %v4408_v52  ;;  %v2672_v43 = vpop.f32.mrf.mxu2  ;;  %v3700_v56 = vpop.f32.mrf.mxu3 }
 0x410   : > { %v3091_v38 = vrot.slane %v2672_v43, 1  ;;  %v4119_v28 = vrot.slane %v3700_v56, 2  ;;  %v7274_v48 = vpop.f32.mrf.mxu0  ;;  %v7276_v55 = vpop.f32.mrf.mxu1  ;;  %v2072_v43 = vsel %vm1849_vm2, %v2069_v3, %v2071_v50 }
 0x411   : > { %v4804_v42 = vsel %vm4540_vm13, %v4408_v52, %v4672_v54  ;;  %v2357_v32 = vadd.f32 %v2072_v43, %v7247_v26 }
 0x412   : > { %4937 = vst.msk [vmem:[%s5856_s6 + $0x348] sm:$0xff] %vm4831_vm4, %v4804_v42  ;;  %v3092_v45 = vsel %vm1849_vm2, %v3089_v7, %v3091_v38  ;;  %5374 = vmatmul.msk.bf16.gmra.mxu0 %vm646_vm1, %v5678_v25  ;;  %v4120_v49 = vsel %vm860_vm0, %v4117_v8, %v4119_v28 }
 0x413   : > { %v3381_v34 = vadd.f32 %v3092_v45, %v2353_v30  ;;  %5451 = vmatmul.msk.bf16.gmra.mxu1 %vm646_vm1, %v5678_v25 }
 0x414   : > { %5528 = vmatmul.msk.bf16.gmra.mxu2 %vm646_vm1, %v5678_v25  ;;  %5605 = vmatmul.msk.bf16.gmra.mxu3 %vm646_vm1, %v5678_v25 }
 0x415   : > { %v4409_v35 = vadd.f32 %v4120_v49, %v3381_v34  ;;  %v2073_v34 = vrot.slane %v7276_v55, 1 }
 0x417   : > { %vm4541_vm14 = vcmp.ge.f32.partialorder %v4409_v35, 0.0  ;;  %v4673_v53 = vmul.f32 0.2, %v4409_v35  ;;  %v2675_v36 = vpop.f32.mrf.mxu2  ;;  %v3703_v37 = vpop.f32.mrf.mxu3 }
 0x418   : > { %v3093_v39 = vrot.slane %v2675_v36, 1  ;;  %v4121_v40 = vrot.slane %v3703_v37, 2  ;;  %v7289_v11 = vpop.f32.mrf.mxu0  ;;  %v7291_v24 = vpop.f32.mrf.mxu1 }
 0x419   : > { %v4805_v27 = vsel %vm4541_vm14, %v4409_v35, %v4673_v53  ;;  %v2074_v53 = vsel %vm1849_vm2, %v2071_v50, %v2073_v34 }
 0x41a   : > { %4938 = vst.msk [vmem:[%s5856_s6 + $0x350] sm:$0xff] %vm4831_vm4, %v4805_v27  ;;  %v3094_v29 = vsel %vm1849_vm2, %v3091_v38, %v3093_v39  ;;  %v4122_v31 = vsel %vm860_vm0, %v4119_v28, %v4121_v40  ;;  %v5680_v28 = vld [vmem:[%s5763_s30 + $0x210] sm:$0xff]  ;;  %v2358_v15 = vadd.f32 %v2074_v53, %v7262_v41 }
 0x41b   : > { %v3382_v17 = vadd.f32 %v3094_v29, %v2354_v13 }
 0x41d   : > { %v4410_v19 = vadd.f32 %v4122_v31, %v3382_v17  ;;  %v2075_v17 = vrot.slane %v7291_v24, 1 }
 0x41f   : > { %vm4542_vm15 = vcmp.ge.f32.partialorder %v4410_v19, 0.0  ;;  %v4674_v21 = vmul.f32 0.2, %v4410_v19  ;;  %v2677_v58 = vpop.f32.mrf.mxu2  ;;  %v3705_v23 = vpop.f32.mrf.mxu3 }
 0x420   : > { %v3095_v47 = vrot.slane %v2677_v58, 1  ;;  %v4123_v63 = vrot.slane %v3705_v23, 2  ;;  %v7301_v10 = vpop.f32.mrf.mxu0  ;;  %v7303_v22 = vpop.f32.mrf.mxu1  ;;  %v2076_v58 = vsel %vm1849_vm2, %v2073_v34, %v2075_v17 }
 0x421   : > { %v4806_v12 = vsel %vm4542_vm15, %v4410_v19, %v4674_v21  ;;  %v2359_v3 = vadd.f32 %v2076_v58, %v7274_v48 }
 0x422   : > { %4939 = vst.msk [vmem:[%s5856_s6 + $0x358] sm:$0xff] %vm4831_vm4, %v4806_v12  ;;  %v3096_v14 = vsel %vm1849_vm2, %v3093_v39, %v3095_v47  ;;  %5375 = vmatmul.msk.bf16.gmra.mxu0 %vm646_vm1, %v5679_v61  ;;  %v4124_v16 = vsel %vm860_vm0, %v4121_v40, %v4123_v63 }
 0x423   : > { %v3383_v4 = vadd.f32 %v3096_v14, %v2355_v1  ;;  %5452 = vmatmul.msk.bf16.gmra.mxu1 %vm646_vm1, %v5679_v61 }
 0x424   : > { %5529 = vmatmul.msk.bf16.gmra.mxu2 %vm646_vm1, %v5679_v61  ;;  %5606 = vmatmul.msk.bf16.gmra.mxu3 %vm646_vm1, %v5679_v61 }
 0x425   : > { %v4411_v59 = vadd.f32 %v4124_v16, %v3383_v4  ;;  %v2077_v4 = vrot.slane %v7303_v22, 1 }
 0x427   : > { %vm4543_vm3 = vcmp.ge.f32.partialorder %v4411_v59, 0.0  ;;  %v4675_v20 = vmul.f32 0.2, %v4411_v59  ;;  %v2680_v5 = vpop.f32.mrf.mxu2  ;;  %v3708_v6 = vpop.f32.mrf.mxu3 }
 0x428   : > { %v3097_v7 = vrot.slane %v2680_v5, 1  ;;  %v4125_v8 = vrot.slane %v3708_v6, 2  ;;  %v7316_v44 = vpop.f32.mrf.mxu0  ;;  %v7318_v60 = vpop.f32.mrf.mxu1 }
 0x429   : > { %v4807_v62 = vsel %vm4543_vm3, %v4411_v59, %v4675_v20  ;;  %v2078_v20 = vsel %vm1849_vm2, %v2075_v17, %v2077_v4 }
 0x42a   : > { %4940 = vst.msk [vmem:[%s5856_s6 + $0x360] sm:$0xff] %vm4831_vm4, %v4807_v62  ;;  %v3098_v0 = vsel %vm1849_vm2, %v3095_v47, %v3097_v7  ;;  %v4126_v2 = vsel %vm860_vm0, %v4123_v63, %v4125_v8  ;;  %v5681_v63 = vld [vmem:[%s5763_s30 + $0x218] sm:$0xff]  ;;  %v2360_v50 = vadd.f32 %v2078_v20, %v7289_v11 }
 0x42b   : > { %v3384_v52 = vadd.f32 %v3098_v0, %v2356_v46 }
 0x42d   : > { %v4412_v54 = vadd.f32 %v4126_v2, %v3384_v52  ;;  %v2079_v52 = vrot.slane %v7318_v60, 1 }
 0x42f   : > { %vm4544_vm5 = vcmp.ge.f32.partialorder %v4412_v54, 0.0  ;;  %v4676_v56 = vmul.f32 0.2, %v4412_v54  ;;  %v2682_v25 = vpop.f32.mrf.mxu2  ;;  %v3710_v38 = vpop.f32.mrf.mxu3 }
 0x430   : > { %v3099_v9 = vrot.slane %v2682_v25, 1  ;;  %v4127_v30 = vrot.slane %v3710_v38, 2  ;;  %v7328_v42 = vpop.f32.mrf.mxu0  ;;  %v7330_v57 = vpop.f32.mrf.mxu1  ;;  %v2080_v25 = vsel %vm1849_vm2, %v2077_v4, %v2079_v52 }
 0x431   : > { %v4808_v45 = vsel %vm4544_vm5, %v4412_v54, %v4676_v56  ;;  %v2361_v34 = vadd.f32 %v2080_v25, %v7301_v10 }
 0x432   : > { %4941 = vst.msk [vmem:[%s5856_s6 + $0x368] sm:$0xff] %vm4831_vm4, %v4808_v45  ;;  %v3100_v49 = vsel %vm1849_vm2, %v3097_v7, %v3099_v9  ;;  %5376 = vmatmul.msk.bf16.gmra.mxu0 %vm646_vm1, %v5680_v28  ;;  %v4128_v51 = vsel %vm860_vm0, %v4125_v8, %v4127_v30 }
 0x433   : > { %v3385_v35 = vadd.f32 %v3100_v49, %v2357_v32  ;;  %5453 = vmatmul.msk.bf16.gmra.mxu1 %vm646_vm1, %v5680_v28 }
 0x434   : > { %5530 = vmatmul.msk.bf16.gmra.mxu2 %vm646_vm1, %v5680_v28  ;;  %5607 = vmatmul.msk.bf16.gmra.mxu3 %vm646_vm1, %v5680_v28 }
 0x435   : > { %v4413_v26 = vadd.f32 %v4128_v51, %v3385_v35  ;;  %v2081_v35 = vrot.slane %v7330_v57, 1 }
 0x437   : > { %vm4545_vm6 = vcmp.ge.f32.partialorder %v4413_v26, 0.0  ;;  %v4677_v55 = vmul.f32 0.2, %v4413_v26  ;;  %v2685_v36 = vpop.f32.mrf.mxu2  ;;  %v3713_v37 = vpop.f32.mrf.mxu3 }
 0x438   : > { %v3101_v39 = vrot.slane %v2685_v36, 1  ;;  %v4129_v40 = vrot.slane %v3713_v37, 2  ;;  %v7343_v13 = vpop.f32.mrf.mxu0  ;;  %v7345_v27 = vpop.f32.mrf.mxu1 }
 0x439   : > { %v4809_v29 = vsel %vm4545_vm6, %v4413_v26, %v4677_v55  ;;  %v2082_v55 = vsel %vm1849_vm2, %v2079_v52, %v2081_v35  ;;  %v285_v52 = vld [vmem:[%s5763_s30 + $0x230] sm:$0x1] }
 0x43a   : > { %4942 = vst.msk [vmem:[%s5856_s6 + $0x370] sm:$0xff] %vm4831_vm4, %v4809_v29  ;;  %v3102_v31 = vsel %vm1849_vm2, %v3099_v9, %v3101_v39  ;;  %v4130_v33 = vsel %vm860_vm0, %v4127_v30, %v4129_v40  ;;  %v5682_v30 = vld [vmem:[%s5763_s30 + $0x220] sm:$0xff]  ;;  %v2362_v17 = vadd.f32 %v2082_v55, %v7316_v44 }
 0x43b   : > { %v3386_v19 = vadd.f32 %v3102_v31, %v2358_v15 }
 0x43d   : > { %v4414_v21 = vadd.f32 %v4130_v33, %v3386_v19  ;;  %v2083_v19 = vrot.slane %v7345_v27, 1 }
 0x43f   : > { %vm4546_vm7 = vcmp.ge.f32.partialorder %v4414_v21, 0.0  ;;  %v4678_v23 = vmul.f32 0.2, %v4414_v21  ;;  %v2687_v61 = vpop.f32.mrf.mxu2  ;;  %v3715_v47 = vpop.f32.mrf.mxu3 }
 0x440   : > { %v3103_v41 = vrot.slane %v2687_v61, 1  ;;  %v4131_v1 = vrot.slane %v3715_v47, 2  ;;  %v7355_v12 = vpop.f32.mrf.mxu0  ;;  %v7357_v24 = vpop.f32.mrf.mxu1  ;;  %v2084_v61 = vsel %vm1849_vm2, %v2081_v35, %v2083_v19 }
 0x441   : > { %v4810_v14 = vsel %vm4546_vm7, %v4414_v21, %v4678_v23  ;;  %v2363_v4 = vadd.f32 %v2084_v61, %v7328_v42 }
 0x442   : > { %4943 = vst.msk [vmem:[%s5856_s6 + $0x378] sm:$0xff] %vm4831_vm4, %v4810_v14  ;;  %v3104_v16 = vsel %vm1849_vm2, %v3101_v39, %v3103_v41  ;;  %5377 = vmatmul.msk.bf16.gmra.mxu0 %vm646_vm1, %v5681_v63  ;;  %v4132_v18 = vsel %vm860_vm0, %v4129_v40, %v4131_v1 }
 0x443   : > { %v3387_v59 = vadd.f32 %v3104_v16, %v2359_v3  ;;  %5454 = vmatmul.msk.bf16.gmra.mxu1 %vm646_vm1, %v5681_v63 }
 0x444   : > { %5531 = vmatmul.msk.bf16.gmra.mxu2 %vm646_vm1, %v5681_v63  ;;  %5608 = vmatmul.msk.bf16.gmra.mxu3 %vm646_vm1, %v5681_v63 }
 0x445   : > { %v4415_v48 = vadd.f32 %v4132_v18, %v3387_v59  ;;  %v2085_v59 = vrot.slane %v7357_v24, 1 }
 0x447   : > { %vm4547_vm8 = vcmp.ge.f32.partialorder %v4415_v48, 0.0  ;;  %v4679_v22 = vmul.f32 0.2, %v4415_v48  ;;  %v2690_v5 = vpop.f32.mrf.mxu2  ;;  %v3718_v6 = vpop.f32.mrf.mxu3  ;;  %v2086_v24 = vsel %vm1849_vm2, %v2083_v19, %v2085_v59 }
 0x448   : > { %v3105_v7 = vrot.slane %v2690_v5, 1  ;;  %v4133_v8 = vrot.slane %v3718_v6, 2  ;;  %v7370_v46 = vpop.f32.mrf.mxu0  ;;  %v7372_v62 = vpop.f32.mrf.mxu1 }
 0x449   : > { %v4811_v0 = vsel %vm4547_vm8, %v4415_v48, %v4679_v22 }
 0x44a   : > { %4944 = vst.msk [vmem:[%s5856_s6 + $0x380] sm:$0xff] %vm4831_vm4, %v4811_v0  ;;  %v3106_v2 = vsel %vm1849_vm2, %v3103_v41, %v3105_v7  ;;  %v4134_v43 = vsel %vm860_vm0, %v4131_v1, %v4133_v8  ;;  %v5683_v1 = vld [vmem:[%s5763_s30 + $0x228] sm:$0xff] }
 0x44b   : > { %v3388_v54 = vadd.f32 %v3106_v2, %v2360_v50  ;;  %v2364_v2 = vadd.f32 %v2086_v24, %v7343_v13 }
 0x44d   : > { %v4416_v56 = vadd.f32 %v4134_v43, %v3388_v54  ;;  %v2087_v43 = vrot.slane %v7372_v62, 1 }
 0x44f   : > { %vm4548_vm9 = vcmp.ge.f32.partialorder %v4416_v56, 0.0  ;;  %v4680_v38 = vmul.f32 0.2, %v4416_v56  ;;  %v2692_v28 = vpop.f32.mrf.mxu2  ;;  %v3720_v9 = vpop.f32.mrf.mxu3 }
 0x450   : > { %v3107_v11 = vrot.slane %v2692_v28, 1  ;;  %v4135_v32 = vrot.slane %v3720_v9, 2  ;;  %v7382_v45 = vpop.f32.mrf.mxu0  ;;  %v7384_v60 = vpop.f32.mrf.mxu1 }
 0x451   : > { %v4812_v49 = vsel %vm4548_vm9, %v4416_v56, %v4680_v38  ;;  %v569_v38 = vunpack.c.l.b16 %v285_v52 }
 0x452   : > { %4945 = vst.msk [vmem:[%s5856_s6 + $0x388] sm:$0xff] %vm4831_vm4, %v4812_v49  ;;  %v3108_v51 = vsel %vm1849_vm2, %v3105_v7, %v3107_v11  ;;  %5378 = vmatmul.msk.bf16.gmra.mxu0 %vm646_vm1, %v5682_v30  ;;  %v4136_v53 = vsel %vm860_vm0, %v4133_v8, %v4135_v32 }
 0x453   : > { %v3389_v26 = vadd.f32 %v3108_v51, %v2361_v34  ;;  %5455 = vmatmul.msk.bf16.gmra.mxu1 %vm646_vm1, %v5682_v30  ;;  %v640_v13 = vpack.c.b16 %v569_v38, %v569_v38 }
 0x454   : > { %5532 = vmatmul.msk.bf16.gmra.mxu2 %vm646_vm1, %v5682_v30  ;;  %5609 = vmatmul.msk.bf16.gmra.mxu3 %vm646_vm1, %v5682_v30  ;;  %v2088_v30 = vsel %vm1849_vm2, %v2085_v59, %v2087_v43 }
 0x455   : > { %v4417_v10 = vadd.f32 %v4136_v53, %v3389_v26  ;;  %v2365_v26 = vadd.f32 %v2088_v30, %v7355_v12 }
 0x457   : > { %vm4549_vm10 = vcmp.ge.f32.partialorder %v4417_v10, 0.0  ;;  %v4681_v57 = vmul.f32 0.2, %v4417_v10  ;;  %v2695_v36 = vpop.f32.mrf.mxu2  ;;  %v3723_v37 = vpop.f32.mrf.mxu3 }
 0x458   : > { %v3109_v39 = vrot.slane %v2695_v36, 1  ;;  %v4137_v40 = vrot.slane %v3723_v37, 2  ;;  %v7397_v15 = vpop.f32.mrf.mxu0  ;;  %v7399_v29 = vpop.f32.mrf.mxu1 }
 0x459   : > { %v4813_v31 = vsel %vm4549_vm10, %v4417_v10, %v4681_v57  ;;  %v2089_v10 = vrot.slane %v7384_v60, 1 }
 0x45a   : > { %4946 = vst.msk [vmem:[%s5856_s6 + $0x390] sm:$0xff] %vm4831_vm4, %v4813_v31  ;;  %v3110_v33 = vsel %vm1849_vm2, %v3107_v11, %v3109_v39  ;;  %v4138_v58 = vsel %vm860_vm0, %v4135_v32, %v4137_v40 }
 0x45b   : > { %v3390_v21 = vadd.f32 %v3110_v33, %v2362_v17  ;;  %v2090_v37 = vsel %vm1849_vm2, %v2087_v43, %v2089_v10 }
 0x45d   : > { %v4418_v23 = vadd.f32 %v4138_v58, %v3390_v21  ;;  %v2366_v21 = vadd.f32 %v2090_v37, %v7370_v46 }
 0x45f   : > { %vm4550_vm11 = vcmp.ge.f32.partialorder %v4418_v23, 0.0  ;;  %v4682_v47 = vmul.f32 0.2, %v4418_v23  ;;  %v2697_v63 = vpop.f32.mrf.mxu2  ;;  %v3725_v41 = vpop.f32.mrf.mxu3 }
 0x460   : > { %v3111_v44 = vrot.slane %v2697_v63, 1  ;;  %v4139_v3 = vrot.slane %v3725_v41, 2  ;;  %v7409_v14 = vpop.f32.mrf.mxu0  ;;  %v7411_v27 = vpop.f32.mrf.mxu1 }
 0x461   : > { %v4814_v16 = vsel %vm4550_vm11, %v4418_v23, %v4682_v47  ;;  %v2091_v23 = vrot.slane %v7399_v29, 1 }
 0x462   : > { %4947 = vst.msk [vmem:[%s5856_s6 + $0x398] sm:$0xff] %vm4831_vm4, %v4814_v16  ;;  %v3112_v18 = vsel %vm1849_vm2, %v3109_v39, %v3111_v44  ;;  %5379 = vmatmul.msk.bf16.gmra.mxu0 %vm646_vm1, %v5683_v1  ;;  %v4140_v20 = vsel %vm860_vm0, %v4137_v40, %v4139_v3 }
 0x463   : > { %v3391_v48 = vadd.f32 %v3112_v18, %v2363_v4  ;;  %5456 = vmatmul.msk.bf16.gmra.mxu1 %vm646_vm1, %v5683_v1 }
 0x464   : > { %5533 = vmatmul.msk.bf16.gmra.mxu2 %vm646_vm1, %v5683_v1  ;;  %5610 = vmatmul.msk.bf16.gmra.mxu3 %vm646_vm1, %v5683_v1  ;;  %v2092_v1 = vsel %vm1849_vm2, %v2089_v10, %v2091_v23 }
 0x465   : > { %v4419_v42 = vadd.f32 %v4140_v20, %v3391_v48  ;;  %v2367_v18 = vadd.f32 %v2092_v1, %v7382_v45  ;;  %v2093_v20 = vrot.slane %v7411_v27, 1 }
 0x467   : > { %vm4551_vm12 = vcmp.ge.f32.partialorder %v4419_v42, 0.0  ;;  %v4683_v22 = vmul.f32 0.2, %v4419_v42  ;;  %v2700_v5 = vpop.f32.mrf.mxu2  ;;  %v3728_v6 = vpop.f32.mrf.mxu3 }
 0x468   : > { %v3113_v7 = vrot.slane %v2700_v5, 1  ;;  %v4141_v8 = vrot.slane %v3728_v6, 2  ;;  %v7424_v50 = vpop.f32.mrf.mxu0  ;;  %v7426_v0 = vpop.f32.mrf.mxu1  ;;  %v2094_v6 = vsel %vm1849_vm2, %v2091_v23, %v2093_v20 }
 0x469   : > { %v4815_v54 = vsel %vm4551_vm12, %v4419_v42, %v4683_v22  ;;  %v2368_v43 = vadd.f32 %v2094_v6, %v7397_v15 }
 0x46a   : > { %4948 = vst.msk [vmem:[%s5856_s6 + $0x3a0] sm:$0xff] %vm4831_vm4, %v4815_v54  ;;  %v3114_v56 = vsel %vm1849_vm2, %v3111_v44, %v3113_v7  ;;  %v4142_v28 = vsel %vm860_vm0, %v4139_v3, %v4141_v8 }
 0x46b   : > { %v3392_v25 = vadd.f32 %v3114_v56, %v2364_v2 }
 0x46d   : > { %v4420_v9 = vadd.f32 %v4142_v28, %v3392_v25  ;;  %v2095_v25 = vrot.slane %v7426_v0, 1 }
 0x46f   : > { %vm4552_vm13 = vcmp.ge.f32.partialorder %v4420_v9, 0.0  ;;  %v4684_v11 = vmul.f32 0.2, %v4420_v9  ;;  %v2702_v32 = vpop.f32.mrf.mxu2  ;;  %v3730_v34 = vpop.f32.mrf.mxu3 }
 0x470   : > { %v3115_v49 = vrot.slane %v2702_v32, 1  ;;  %v4143_v35 = vrot.slane %v3730_v34, 2  ;;  %v7436_v62 = vpop.f32.mrf.mxu0  ;;  %v7438_v51 = vpop.f32.mrf.mxu1 }
 0x471   : > { %v4816_v53 = vsel %vm4552_vm13, %v4420_v9, %v4684_v11  ;;  %v2096_v11 = vsel %vm1849_vm2, %v2093_v20, %v2095_v25  ;;  %v2097_v10 = vrot.slane %v7438_v51, 1 }
 0x472   : > { %4949 = vst.msk [vmem:[%s5856_s6 + $0x3a8] sm:$0xff] %vm4831_vm4, %v4816_v53  ;;  %v3116_v55 = vsel %vm1849_vm2, %v3113_v7, %v3115_v49  ;;  %5380 = vmatmul.msk.bf16.gmra.mxu0 %vm646_vm1, %v640_v13  ;;  %v4144_v36 = vsel %vm860_vm0, %v4141_v8, %v4143_v35 }
 0x473   : > { %v3393_v57 = vadd.f32 %v3116_v55, %v2365_v26  ;;  %5457 = vmatmul.msk.bf16.gmra.mxu1 %vm646_vm1, %v640_v13  ;;  %v2369_v26 = vadd.f32 %v2096_v11, %v7409_v14  ;;  %v2098_v37 = vsel %vm1849_vm2, %v2095_v25, %v2097_v10 }
 0x474   : > { %5534 = vmatmul.msk.bf16.gmra.mxu2 %vm646_vm1, %v640_v13  ;;  %5611 = vmatmul.msk.bf16.gmra.mxu3 %vm646_vm1, %v640_v13 }
 0x475   : > { %v4421_v12 = vadd.f32 %v4144_v36, %v3393_v57 }
 0x477   : > { %vm4553_vm14 = vcmp.ge.f32.partialorder %v4421_v12, 0.0  ;;  %v4685_v60 = vmul.f32 0.2, %v4421_v12  ;;  %v2705_v39 = vpop.f32.mrf.mxu2  ;;  %v3733_v40 = vpop.f32.mrf.mxu3 }
 0x478   : > { %v3117_v17 = vrot.slane %v2705_v39, 1  ;;  %v4145_v31 = vrot.slane %v3733_v40, 2  ;;  %v7451_v19 = vpop.f32.mrf.mxu0  ;;  %v7453_v33 = vpop.f32.mrf.mxu1 }
 0x479   : > { %v4817_v58 = vsel %vm4553_vm14, %v4421_v12, %v4685_v60  ;;  %v2099_v23 = vrot.slane %v7453_v33, 1 }
 0x47a   : > { %4950 = vst.msk [vmem:[%s5856_s6 + $0x3b0] sm:$0xff] %vm4831_vm4, %v4817_v58  ;;  %v3118_v61 = vsel %vm1849_vm2, %v3115_v49, %v3117_v17  ;;  %v4146_v63 = vsel %vm860_vm0, %v4143_v35, %v4145_v31 }
 0x47b   : > { %v3394_v47 = vadd.f32 %v3118_v61, %v2366_v21  ;;  %v2370_v21 = vadd.f32 %v2098_v37, %v7424_v50  ;;  %v2100_v1 = vsel %vm1849_vm2, %v2097_v10, %v2099_v23 }
 0x47d   : > { %v4422_v41 = vadd.f32 %v4146_v63, %v3394_v47 }
 0x47f   : > { %vm4554_vm1 = vcmp.ge.f32.partialorder %v4422_v41, 0.0  ;;  %v4686_v44 = vmul.f32 0.2, %v4422_v41  ;;  %v2707_v3 = vpop.f32.mrf.mxu2  ;;  %v3735_v4 = vpop.f32.mrf.mxu3 }
 0x480   : > { %v3119_v16 = vrot.slane %v2707_v3, 1  ;;  %v4147_v46 = vrot.slane %v3735_v4, 2  ;;  %v7462_v59 = vpop.f32.mrf.mxu0  ;;  %v7464_v29 = vpop.f32.mrf.mxu1 }
 0x481   : > { %v4818_v48 = vsel %vm4554_vm1, %v4422_v41, %v4686_v44  ;;  %v2101_v20 = vrot.slane %v7464_v29, 1 }
 0x482   : > { %4951 = vst.msk [vmem:[%s5856_s6 + $0x3b8] sm:$0xff] %vm4831_vm4, %v4818_v48  ;;  %v3120_v42 = vsel %vm1849_vm2, %v3117_v17, %v3119_v16  ;;  %v4148_v22 = vsel %vm860_vm0, %v4145_v31, %v4147_v46 }
 0x483   : > { %v3395_v24 = vadd.f32 %v3120_v42, %v2367_v18  ;;  %v2371_v18 = vadd.f32 %v2100_v1, %v7436_v62  ;;  %v2102_v6 = vsel %vm1849_vm2, %v2099_v23, %v2101_v20 }
 0x485   : > { %v4423_v5 = vadd.f32 %v4148_v22, %v3395_v24 }
 0x487   : > { %vm4555_vm15 = vcmp.ge.f32.partialorder %v4423_v5, 0.0  ;;  %v4687_v7 = vmul.f32 0.2, %v4423_v5  ;;  %v2710_v8 = vpop.f32.mrf.mxu2  ;;  %v3738_v52 = vpop.f32.mrf.mxu3 }
 0x488   : > { %v3121_v2 = vrot.slane %v2710_v8, 1  ;;  %v4149_v45 = vrot.slane %v3738_v52, 2  ;;  %v7473_v54 = vpop.f32.mrf.mxu0  ;;  %v7475_v27 = vpop.f32.mrf.mxu1 }
 0x489   : > { %v4819_v56 = vsel %vm4555_vm15, %v4423_v5, %v4687_v7  ;;  %v2103_v25 = vrot.slane %v7475_v27, 1 }
 0x48a   : > { %4952 = vst.msk [vmem:[%s5856_s6 + $0x3c0] sm:$0xff] %vm4831_vm4, %v4819_v56  ;;  %v3122_v38 = vsel %vm1849_vm2, %v3119_v16, %v3121_v2  ;;  %v4150_v9 = vsel %vm860_vm0, %v4147_v46, %v4149_v45 }
 0x48b   : > { %v3396_v28 = vadd.f32 %v3122_v38, %v2368_v43  ;;  %v2372_v43 = vadd.f32 %v2102_v6, %v7451_v19  ;;  %v2104_v11 = vsel %vm1849_vm2, %v2101_v20, %v2103_v25 }
 0x48c   : > { %v2373_v27 = vadd.f32 %v2104_v11, %v7462_v59 }
 0x48d   : > { %v4424_v30 = vadd.f32 %v4150_v9, %v3396_v28 }
 0x48f   : > { %vm4556_vm3 = vcmp.ge.f32.partialorder %v4424_v30, 0.0  ;;  %v4688_v32 = vmul.f32 0.2, %v4424_v30  ;;  %v2712_v34 = vpop.f32.mrf.mxu2  ;;  %v3740_v13 = vpop.f32.mrf.mxu3 }
 0x490   : > { %v3123_v49 = vrot.slane %v2712_v34, 1  ;;  %v4151_v15 = vrot.slane %v3740_v13, 2  ;;  %v7484_v35 = vpop.f32.mrf.mxu0  ;;  %v7486_v0 = vpop.f32.mrf.mxu1 }
 0x491   : > { %v4820_v53 = vsel %vm4556_vm3, %v4424_v30, %v4688_v32  ;;  %v2105_v10 = vrot.slane %v7486_v0, 1 }
 0x492   : > { %4953 = vst.msk [vmem:[%s5856_s6 + $0x3c8] sm:$0xff] %vm4831_vm4, %v4820_v53  ;;  %v3124_v55 = vsel %vm1849_vm2, %v3121_v2, %v3123_v49  ;;  %v4152_v36 = vsel %vm860_vm0, %v4149_v45, %v4151_v15 }
 0x493   : > { %v3397_v57 = vadd.f32 %v3124_v55, %v2369_v26  ;;  %v2106_v37 = vsel %vm1849_vm2, %v2103_v25, %v2105_v10 }
 0x494   : > { %v2374_v0 = vadd.f32 %v2106_v37, %v7473_v54 }
 0x495   : > { %v4425_v12 = vadd.f32 %v4152_v36, %v3397_v57 }
 0x497   : > { %vm4557_vm5 = vcmp.ge.f32.partialorder %v4425_v12, 0.0  ;;  %v4689_v60 = vmul.f32 0.2, %v4425_v12  ;;  %v2715_v39 = vpop.f32.mrf.mxu2  ;;  %v3743_v40 = vpop.f32.mrf.mxu3 }
 0x498   : > { %v3125_v17 = vrot.slane %v2715_v39, 1  ;;  %v4153_v14 = vrot.slane %v3743_v40, 2  ;;  %v7495_v31 = vpop.f32.mrf.mxu0  ;;  %v7497_v51 = vpop.f32.mrf.mxu1 }
 0x499   : > { %v4821_v58 = vsel %vm4557_vm5, %v4425_v12, %v4689_v60  ;;  %v2107_v23 = vrot.slane %v7497_v51, 1 }
 0x49a   : > { %4954 = vst.msk [vmem:[%s5856_s6 + $0x3d0] sm:$0xff] %vm4831_vm4, %v4821_v58  ;;  %v3126_v61 = vsel %vm1849_vm2, %v3123_v49, %v3125_v17  ;;  %v4154_v63 = vsel %vm860_vm0, %v4151_v15, %v4153_v14 }
 0x49b   : > { %v3398_v47 = vadd.f32 %v3126_v61, %v2370_v21  ;;  %v2108_v1 = vsel %vm1849_vm2, %v2105_v10, %v2107_v23 }
 0x49c   : > { %v2375_v51 = vadd.f32 %v2108_v1, %v7484_v35 }
 0x49d   : > { %v4426_v41 = vadd.f32 %v4154_v63, %v3398_v47 }
 0x49f   : > { %vm4558_vm6 = vcmp.ge.f32.partialorder %v4426_v41, 0.0  ;;  %v4690_v44 = vmul.f32 0.2, %v4426_v41  ;;  %v2717_v3 = vpop.f32.mrf.mxu2  ;;  %v3745_v4 = vpop.f32.mrf.mxu3 }
 0x4a0   : > { %v3127_v16 = vrot.slane %v2717_v3, 1  ;;  %v4155_v50 = vrot.slane %v3745_v4, 2  ;;  %v7506_v46 = vpop.f32.mrf.mxu0  ;;  %v7508_v33 = vpop.f32.mrf.mxu1 }
 0x4a1   : > { %v4822_v48 = vsel %vm4558_vm6, %v4426_v41, %v4690_v44  ;;  %v2109_v20 = vrot.slane %v7508_v33, 1 }
 0x4a2   : > { %4955 = vst.msk [vmem:[%s5856_s6 + $0x3d8] sm:$0xff] %vm4831_vm4, %v4822_v48  ;;  %v3128_v42 = vsel %vm1849_vm2, %v3125_v17, %v3127_v16  ;;  %v4156_v22 = vsel %vm860_vm0, %v4153_v14, %v4155_v50 }
 0x4a3   : > { %v3399_v24 = vadd.f32 %v3128_v42, %v2371_v18  ;;  %v2110_v6 = vsel %vm1849_vm2, %v2107_v23, %v2109_v20 }
 0x4a4   : > { %v2376_v33 = vadd.f32 %v2110_v6, %v7495_v31 }
 0x4a5   : > { %v4427_v5 = vadd.f32 %v4156_v22, %v3399_v24 }
 0x4a7   : > { %vm4559_vm7 = vcmp.ge.f32.partialorder %v4427_v5, 0.0  ;;  %v4691_v7 = vmul.f32 0.2, %v4427_v5  ;;  %v2720_v8 = vpop.f32.mrf.mxu2  ;;  %v3748_v52 = vpop.f32.mrf.mxu3 }
 0x4a8   : > { %v3129_v2 = vrot.slane %v2720_v8, 1  ;;  %v4157_v62 = vrot.slane %v3748_v52, 2  ;;  %v7517_v45 = vpop.f32.mrf.mxu0  ;;  %v7519_v29 = vpop.f32.mrf.mxu1 }
 0x4a9   : > { %v4823_v56 = vsel %vm4559_vm7, %v4427_v5, %v4691_v7  ;;  %v2111_v25 = vrot.slane %v7519_v29, 1 }
 0x4aa   : > { %4956 = vst.msk [vmem:[%s5856_s6 + $0x3e0] sm:$0xff] %vm4831_vm4, %v4823_v56  ;;  %v3130_v38 = vsel %vm1849_vm2, %v3127_v16, %v3129_v2  ;;  %v4158_v9 = vsel %vm860_vm0, %v4155_v50, %v4157_v62 }
 0x4ab   : > { %v3400_v28 = vadd.f32 %v3130_v38, %v2372_v43  ;;  %v2112_v11 = vsel %vm1849_vm2, %v2109_v20, %v2111_v25 }
 0x4ac   : > { %v2377_v29 = vadd.f32 %v2112_v11, %v7506_v46 }
 0x4ad   : > { %v4428_v30 = vadd.f32 %v4158_v9, %v3400_v28 }
 0x4af   : > { %vm4560_vm8 = vcmp.ge.f32.partialorder %v4428_v30, 0.0  ;;  %v4692_v32 = vmul.f32 0.2, %v4428_v30  ;;  %v2722_v34 = vpop.f32.mrf.mxu2  ;;  %v3750_v13 = vpop.f32.mrf.mxu3 }
 0x4b0   : > { %v3131_v49 = vrot.slane %v2722_v34, 1  ;;  %v4159_v19 = vrot.slane %v3750_v13, 2  ;;  %v1203_v15 = vpop.f32.mrf.mxu0  ;;  %v7528_v26 = vpop.f32.mrf.mxu1 }
 0x4b1   : > { %v4824_v53 = vsel %vm4560_vm8, %v4428_v30, %v4692_v32 }
 0x4b2   : > { %4957 = vst.msk [vmem:[%s5856_s6 + $0x3e8] sm:$0xff] %vm4831_vm4, %v4824_v53  ;;  %v3132_v55 = vsel %vm1849_vm2, %v3129_v2, %v3131_v49  ;;  %v4160_v36 = vsel %vm860_vm0, %v4157_v62, %v4159_v19  ;;  %v2113_v53 = vrot.slane %v7528_v26, 1 }
 0x4b3   : > { %v3401_v57 = vadd.f32 %v3132_v55, %v2373_v27 }
 0x4b5   : > { %v4429_v12 = vadd.f32 %v4160_v36, %v3401_v57 }
 0x4b7   : > { %vm4561_vm9 = vcmp.ge.f32.partialorder %v4429_v12, 0.0  ;;  %v4693_v60 = vmul.f32 0.2, %v4429_v12  ;;  %v2725_v39 = vpop.f32.mrf.mxu2  ;;  %v3753_v40 = vpop.f32.mrf.mxu3 }
 0x4b8   : > { %v3133_v17 = vrot.slane %v2725_v39, 1  ;;  %v4161_v59 = vrot.slane %v3753_v40, 2  ;;  %v1204_v14 = vpop.f32.mrf.mxu0  ;;  %v1702_v21 = vpop.f32.mrf.mxu1 }
 0x4b9   : > { %v4825_v58 = vsel %vm4561_vm9, %v4429_v12, %v4693_v60  ;;  %v2114_v12 = vsel %vm1849_vm2, %v2111_v25, %v2113_v53 }
 0x4ba   : > { %4958 = vst.msk [vmem:[%s5856_s6 + $0x3f0] sm:$0xff] %vm4831_vm4, %v4825_v58  ;;  %v3134_v61 = vsel %vm1849_vm2, %v3131_v49, %v3133_v17  ;;  %v4162_v63 = vsel %vm860_vm0, %v4159_v19, %v4161_v59 }
 0x4bb   : > { %v3402_v47 = vadd.f32 %v3134_v61, %v2374_v0 }
 0x4bd   : > { %v4430_v41 = vadd.f32 %v4162_v63, %v3402_v47 }
 0x4bf   : > { %vm4562_vm10 = vcmp.ge.f32.partialorder %v4430_v41, 0.0  ;;  %v4694_v44 = vmul.f32 0.2, %v4430_v41  ;;  %v2727_v3 = vpop.f32.mrf.mxu2  ;;  %v3755_v4 = vpop.f32.mrf.mxu3 }
 0x4c0   : > { %v3135_v16 = vrot.slane %v2727_v3, 1  ;;  %v4163_v54 = vrot.slane %v3755_v4, 2  ;;  %v1206_v50 = vpop.f32.mrf.mxu0  ;;  %v1704_v18 = vpop.f32.mrf.mxu1 }
 0x4c1   : > { %v4826_v48 = vsel %vm4562_vm10, %v4430_v41, %v4694_v44 }
 0x4c2   : > { %4959 = vst.msk [vmem:[%s5856_s6 + $0x3f8] sm:$0xff] %vm4831_vm4, %v4826_v48  ;;  %v3136_v42 = vsel %vm1849_vm2, %v3133_v17, %v3135_v16  ;;  %v4164_v22 = vsel %vm860_vm0, %v4161_v59, %v4163_v54  ;;  %v2378_v59 = vadd.f32 %v2114_v12, %v7517_v45 }
 0x4c3   : > { %v3403_v24 = vadd.f32 %v3136_v42, %v2375_v51 }
 0x4c5   : > { %v4431_v5 = vadd.f32 %v4164_v22, %v3403_v24 }
 0x4c7   : > { %vm4563_vm11 = vcmp.ge.f32.partialorder %v4431_v5, 0.0  ;;  %v4695_v7 = vmul.f32 0.2, %v4431_v5  ;;  %v2730_v8 = vpop.f32.mrf.mxu2  ;;  %v3758_v52 = vpop.f32.mrf.mxu3 }
 0x4c8   : > { %v3137_v2 = vrot.slane %v2730_v8, 1  ;;  %v4165_v35 = vrot.slane %v3758_v52, 2  ;;  %v1207_v62 = vpop.f32.mrf.mxu0  ;;  %v1705_v43 = vpop.f32.mrf.mxu1 }
 0x4c9   : > { %v4827_v56 = vsel %vm4563_vm11, %v4431_v5, %v4695_v7 }
 0x4ca   : > { %4960 = vst.msk [vmem:[%s5856_s6 + $0x400] sm:$0xff] %vm4831_vm4, %v4827_v56  ;;  %v3138_v38 = vsel %vm1849_vm2, %v3135_v16, %v3137_v2  ;;  %v4166_v9 = vsel %vm860_vm0, %v4163_v54, %v4165_v35 }
 0x4cb   : > { %v3404_v28 = vadd.f32 %v3138_v38, %v2376_v33 }
 0x4cd   : > { %v4432_v30 = vadd.f32 %v4166_v9, %v3404_v28 }
 0x4cf   : > { %vm4564_vm12 = vcmp.ge.f32.partialorder %v4432_v30, 0.0  ;;  %v4696_v32 = vmul.f32 0.2, %v4432_v30  ;;  %v2732_v34 = vpop.f32.mrf.mxu2  ;;  %v3760_v13 = vpop.f32.mrf.mxu3 }
 0x4d0   : > { %v3139_v49 = vrot.slane %v2732_v34, 1  ;;  %v4167_v31 = vrot.slane %v3760_v13, 2  ;;  %v1209_v19 = vpop.f32.mrf.mxu0  ;;  %v1707_v15 = vpop.f32.mrf.mxu1 }
 0x4d1   : > { %v4828_v27 = vsel %vm4564_vm12, %v4432_v30, %v4696_v32 }
 0x4d2   : > { %4961 = vst.msk [vmem:[%s5856_s6 + $0x408] sm:$0xff] %vm4831_vm4, %v4828_v27  ;;  %v3140_v10 = vsel %vm1849_vm2, %v3137_v2, %v3139_v49  ;;  %v4168_v57 = vsel %vm860_vm0, %v4165_v35, %v4167_v31 }
 0x4d3   : > { %v3405_v55 = vadd.f32 %v3140_v10, %v2377_v29 }
 0x4d5   : > { %v4433_v36 = vadd.f32 %v4168_v57, %v3405_v55 }
 0x4d7   : > { %vm4565_vm13 = vcmp.ge.f32.partialorder %v4433_v36, 0.0  ;;  %v4697_v37 = vmul.f32 0.2, %v4433_v36  ;;  %v2735_v60 = vpop.f32.mrf.mxu2  ;;  %v3763_v39 = vpop.f32.mrf.mxu3 }
 0x4d8   : > { %v3141_v40 = vrot.slane %v2735_v60, 1  ;;  %v4169_v46 = vrot.slane %v3763_v39, 2  ;;  %v1210_v17 = vpop.f32.mrf.mxu0  ;;  %v1708_v26 = vpop.f32.mrf.mxu1 }
 0x4d9   : > { %v4829_v14 = vsel %vm4565_vm13, %v4433_v36, %v4697_v37 }
 0x4da   : > { %4962 = vst.msk [vmem:[%s5856_s6 + $0x410] sm:$0xff] %vm4831_vm4, %v4829_v14  ;;  %v3142_v21 = vsel %vm1849_vm2, %v3139_v49, %v3141_v40  ;;  %v4170_v58 = vsel %vm860_vm0, %v4167_v31, %v4169_v46 }
 0x4db   : > { %v3406_v0 = vadd.f32 %v3142_v21, %v2378_v59 }
 0x4dd   : > { %v4434_v23 = vadd.f32 %v4170_v58, %v3406_v0 }
 0x4df   : > { %vm4566_vm14 = vcmp.ge.f32.partialorder %v4434_v23, 0.0  ;;  %v4698_v61 = vmul.f32 0.2, %v4434_v23  ;;  %v2737_v47 = vpop.f32.mrf.mxu2  ;;  %v3765_v63 = vpop.f32.mrf.mxu3 }
 0x4e0   : > { %v1212_v41 = vpop.f32.mrf.mxu0  ;;  %v1710_v1 = vpop.f32.mrf.mxu1 }
 0x4e1   : > { %v4830_v44 = vsel %vm4566_vm14, %v4434_v23, %v4698_v61 }
 0x4e2   : > { %4963 = vst.msk [vmem:[%s5856_s6 + $0x418] sm:$0xff] %vm4831_vm4, %v4830_v44 }
 0x4e7   : > { %v2739_v3 = vpop.f32.mrf.mxu2  ;;  %v3767_v45 = vpop.f32.mrf.mxu3 }
 0x4e8   : > { %v1213_v4 = vpop.f32.mrf.mxu0  ;;  %v1711_v16 = vpop.f32.mrf.mxu1 }
 0x4ef   : > { %v2740_v54 = vpop.f32.mrf.mxu2  ;;  %v3768_v50 = vpop.f32.mrf.mxu3 }
 0x4f0   : > { %v1215_v18 = vpop.f32.mrf.mxu0  ;;  %v1713_v51 = vpop.f32.mrf.mxu1 }
 0x4f7   : > { %v2742_v48 = vpop.f32.mrf.mxu2  ;;  %v3770_v20 = vpop.f32.mrf.mxu3 }
 0x4f8   : > { %v1216_v42 = vpop.f32.mrf.mxu0  ;;  %v1714_v24 = vpop.f32.mrf.mxu1 }
 0x4ff   : > { %v2743_v22 = vpop.f32.mrf.mxu2  ;;  %v3771_v5 = vpop.f32.mrf.mxu3 }
 0x500 PF: > { %s12_s9 = sadd.s32 1, %s5704_s9  }
 0x501   : > { %p9_p4 = scmp.ge.s32.totalorder %s12_s9, 4  }
 0x503   :  { %11 = sbr.rel (!%p9_p4) target bundleno = 1 (0x1), region = 61 }

// kernel: d_forward.6
= control target key start
LH: loop header
LB: loop body
LE: loop exit
PB: predicated region body
PF: predicated region fallthrough
CT: control target
= control target key end

     0   :  { %s2441_s18 = smov 0   ;;  %s3167_s0 = inlined_call_operand.vmem [shape: bf16[2,306,64], index: 0, kind: input, shape index: {}]   ;;  %s3168_s1 = inlined_call_operand.vmem [shape: bf16[4,64,32], index: 1, kind: input, shape index: {}]   ;;  %s3169_s2 = inlined_call_operand.vmem [shape: f32[272,1], index: 2, kind: input, shape index: {}]   ;;  %s3170_s3 = inlined_call_operand.vmem [shape: f32[2,272,32], index: 3, kind: output, shape index: {0}]   ;;  %s3171_s4 = inlined_call_operand.vmem [shape: f32[2,1,32], index: 4, kind: output, shape index: {1}]   ;;  %s3172_s5 = inlined_call_operand.vmem [shape: f32[2,1,32], index: 5, kind: output, shape index: {2}]  }
   0x1 LB: > { %s2100_s19 = sadd.s32 4294967295, %s2408_s18   ;;  %p2104_p0 = scmp.ge.s32.totalorder %s2408_s18, 1  ;;  %s2408_s18 = sphi %s2441_s18, %s16_s18  }
   0x2   : > { %p192_p1 = scmp.lt.s32.totalorder %s2408_s18, 3 }
   0x4   : > { %p193_p2 = pnand %p2104_p0, %p192_p1 }
   0x5   : > { %p226_p3 = scmp.lt.s32.totalorder (!%p193_p2), %s2100_s19, 1 }
   0x6   : > { %196 = sbr.rel (%p193_p2) target bundleno = 475 (0x1db), region = 32 }
   0xb   : > { %v2379_v0 = vld [vmem:[%s3168_s1 + $0x38] sm:$0xff]  ;;  %v2378_v4 = vld [vmem:[%s3168_s1 + $0x30] sm:$0xff]  ;;  %s3174_s19 = smov (!%p226_p3, %s2100_s19), 1  ;;  %v2377_v8 = vld [vmem:[%s3168_s1 + $0x28] sm:$0xff]  ;;  %vm412_vm0 = vcmask 523264   ;;  %v2410_v18 = vmov 0  }
   0xc   : > { %v2383_v1 = vld [vmem:[%s3168_s1 + $0x58] sm:$0xff]  ;;  %647 = vmatpush.bf16.msra.mxu1 %v2379_v0  ;;  %v2382_v5 = vld [vmem:[%s3168_s1 + $0x50] sm:$0xff]  ;;  %v2381_v9 = vld [vmem:[%s3168_s1 + $0x48] sm:$0xff]  ;;  %s2388_s15 = smul.u32 156, %s3174_s19  ;;  %2399 = vset.pattern.permute.xlu0 %v2410_v18  ;;  %vm782_vm1 = vcmask 1046528   ;;  %vm1401_vm2 = vcmask 1045504   ;;  %s241_s20 = scalar_lea.vmem %s3172_s5, %s3174_s19 }
   0xd   : > { %v2387_v2 = vld [vmem:[%s3168_s1 + $0x78] sm:$0xff]  ;;  %957 = vmatpush.bf16.msra.mxu2 %v2383_v1  ;;  %v2386_v6 = vld [vmem:[%s3168_s1 + $0x70] sm:$0xff]  ;;  %v2385_v10 = vld [vmem:[%s3168_s1 + $0x68] sm:$0xff]  ;;  %2400 = vset.pattern.permute.xlu1 %v2410_v18  ;;  %s2389_s24 = smul.u32 272, %s3174_s19  ;;  %vm1539_vm3 = vcmask 261120   ;;  %vm1885_vm4 = vcmask 253952  }
   0xe   : > { %v2375_v3 = vld [vmem:[%s3168_s1 + $0x18] sm:$0xff]  ;;  %1266 = vmatpush.bf16.msra.mxu3 %v2387_v2  ;;  %v2374_v7 = vld [vmem:[%s3168_s1 + $0x10] sm:$0xff]  ;;  %v2373_v11 = vld [vmem:[%s3168_s1 + $0x8] sm:$0xff]  ;;  %s2497_s28 = scalar_lea.vmem %s3167_s0, %s2388_s15  ;;  %2401 = vset.pattern.permute.xlu2 %v2410_v18  ;;  %s238_s15 = scalar_lea.vmem %s3171_s4, %s3174_s19 }
   0xf   : > { %477 = vmatpush.bf16.msra.mxu0 %v2375_v3  ;;  %v2376_v12 = vld [vmem:[%s3168_s1 + $0x20] sm:$0xff]  ;;  %v2354_v19 = vld [vmem:[%s2497_s28 + $0x8] sm:$0xff]  ;;  %v1576_v21 = vld [vmem:[%s3169_s2 + $0x10] sm:$0xff]  ;;  %s2631_s27 = scalar_lea.vmem %s3170_s3, %s2389_s24 }
  0x10   : > { %648 = vmatpush.bf16.msra.mxu1 %v2378_v4  ;;  %v2380_v13 = vld [vmem:[%s3168_s1 + $0x40] sm:$0xff]  ;;  %v1575_v20 = vld [vmem:[%s3169_s2 + $0x8] sm:$0xff]  ;;  %1620 = vperm.xlu1 %2400, %v1576_v21   ;;  %v2355_v22 = vld [vmem:[%s2497_s28 + $0x10] sm:$0xff] }
  0x11   : > { %958 = vmatpush.bf16.msra.mxu2 %v2382_v5  ;;  %v2384_v14 = vld [vmem:[%s3168_s1 + $0x60] sm:$0xff]  ;;  %v1577_v23 = vld [vmem:[%s3169_s2 + $0x18] sm:$0xff]  ;;  %v1580_v25 = vld [vmem:[%s3169_s2 + $0x30] sm:$0xff] }
  0x12   : > { %1267 = vmatpush.bf16.msra.mxu3 %v2386_v6  ;;  %v2372_v15 = vld [vmem:[%s3168_s1] sm:$0xff]  ;;  %v2356_v24 = vld [vmem:[%s2497_s28 + $0x18] sm:$0xff]  ;;  %v1579_v29 = vld [vmem:[%s3169_s2 + $0x28] sm:$0xff] }
  0x13   : > { %478 = vmatpush.bf16.msra.mxu0 %v2374_v7  ;;  %v2353_v16 = vld [vmem:[%s2497_s28] sm:$0xff]  ;;  %v1581_v28 = vld [vmem:[%s3169_s2 + $0x38] sm:$0xff]  ;;  %v2358_v30 = vld [vmem:[%s2497_s28 + $0x28] sm:$0xff] }
  0x14   : > { %649 = vmatpush.bf16.msra.mxu1 %v2377_v8  ;;  %v1574_v17 = vld [vmem:[%s3169_s2] sm:$0xff]  ;;  %v1583_v31 = vld [vmem:[%s3169_s2 + $0x48] sm:$0xff]  ;;  %v2359_v32 = vld [vmem:[%s2497_s28 + $0x30] sm:$0xff] }
  0x15   : > { %959 = vmatpush.bf16.msra.mxu2 %v2381_v9  ;;  %1610 = vperm.xlu0 %2399, %v1574_v17   ;;  %v2357_v26 = vld [vmem:[%s2497_s28 + $0x20] sm:$0xff]  ;;  %v1584_v33 = vld [vmem:[%s3169_s2 + $0x50] sm:$0xff]  ;;  %v2360_v35 = vld [vmem:[%s2497_s28 + $0x38] sm:$0xff] }
  0x16   : > { %1268 = vmatpush.bf16.msra.mxu3 %v2385_v10  ;;  %v1578_v27 = vld [vmem:[%s3169_s2 + $0x20] sm:$0xff]  ;;  %v1587_v37 = vld [vmem:[%s3169_s2 + $0x68] sm:$0xff]  ;;  %v1585_v41 = vld [vmem:[%s3169_s2 + $0x58] sm:$0xff] }
  0x17   : > { %479 = vmatpush.bf16.msra.mxu0 %v2373_v11  ;;  %1630 = vperm.xlu2 %2401, %v1578_v27   ;;  %v1582_v34 = vld [vmem:[%s3169_s2 + $0x40] sm:$0xff]  ;;  %v1589_v46 = vld [vmem:[%s3169_s2 + $0x78] sm:$0xff]  ;;  %v2362_v49 = vld [vmem:[%s2497_s28 + $0x48] sm:$0xff] }
  0x18   : > { %650 = vmatpush.bf16.msra.mxu1 %v2376_v12  ;;  %1625 = vperm.xlu1 %2400, %v1577_v23   ;;  %v1586_v36 = vld [vmem:[%s3169_s2 + $0x60] sm:$0xff]  ;;  %v1588_v59 = vld [vmem:[%s3169_s2 + $0x70] sm:$0xff] }
  0x19   : > { %960 = vmatpush.bf16.msra.mxu2 %v2380_v13  ;;  %v2361_v38 = vld [vmem:[%s2497_s28 + $0x40] sm:$0xff]  ;;  %v1592_v60 = vld [vmem:[%s3169_s2 + $0x90] sm:$0xff]  ;;  %v1595_v13 = vld [vmem:[%s3169_s2 + $0xa8] sm:$0xff] }
  0x1a   : > { %1269 = vmatpush.bf16.msra.mxu3 %v2384_v14  ;;  %v1590_v52 = vld [vmem:[%s3169_s2 + $0x80] sm:$0xff]  ;;  %v2363_v2 = vld [vmem:[%s2497_s28 + $0x50] sm:$0xff] }
  0x1b   : > { %480 = vmatpush.bf16.msra.mxu0 %v2372_v15  ;;  %2243 = vmatmul.msk.bf16.vlgmr.msra.gmra.mxu1 %vm412_vm0, %v2353_v16 }
  0x1c   : > { %2287 = vmatmul.msk.bf16.vlgmr.msra.gmra.mxu2 %vm412_vm0, %v2353_v16 }
  0x1d   : > { %2331 = vmatmul.msk.bf16.vlgmr.msra.gmra.mxu3 %vm412_vm0, %v2353_v16  ;;  %1615 = vperm.xlu0 %2399, %v1575_v20  }
  0x1e   : > { %2199 = vmatmul.msk.bf16.vlgmr.msra.gmra.mxu0 %vm412_vm0, %v2353_v16 }
  0x1f   : > { %1635 = vperm.xlu2 %2401, %v1579_v29  }
  0x20   : > { %1645 = vperm.xlu1 %2400, %v1581_v28  }
  0x25   : > { %1640 = vperm.xlu0 %2399, %v1580_v25  }
  0x27   : > { %1650 = vperm.xlu2 %2401, %v1582_v34  }
  0x28   : > { %1660 = vperm.xlu1 %2400, %v1584_v33  }
  0x2b   : > { %2244 = vmatmul.msk.bf16.gmra.mxu1 %vm412_vm0, %v2354_v19 }
  0x2c   : > { %2288 = vmatmul.msk.bf16.gmra.mxu2 %vm412_vm0, %v2354_v19 }
  0x2d   : > { %2332 = vmatmul.msk.bf16.gmra.mxu3 %vm412_vm0, %v2354_v19  ;;  %1655 = vperm.xlu0 %2399, %v1583_v31  }
  0x2e   : > { %2200 = vmatmul.msk.bf16.gmra.mxu0 %vm412_vm0, %v2354_v19  ;;  %v1593_v19 = vld [vmem:[%s3169_s2 + $0x98] sm:$0xff] }
  0x2f   : > { %1665 = vperm.xlu2 %2401, %v1585_v41  }
  0x30   : > { %1675 = vperm.xlu1 %2400, %v1587_v37  }
  0x35   : > { %1670 = vperm.xlu0 %2399, %v1586_v36  }
  0x37   : > { %1680 = vperm.xlu2 %2401, %v1588_v59  }
  0x38   : > { %1690 = vperm.xlu1 %2400, %v1590_v52  }
  0x3b   : > { %2245 = vmatmul.msk.bf16.gmra.mxu1 %vm412_vm0, %v2355_v22 }
  0x3c   : > { %2289 = vmatmul.msk.bf16.gmra.mxu2 %vm412_vm0, %v2355_v22 }
  0x3d   : > { %2333 = vmatmul.msk.bf16.gmra.mxu3 %vm412_vm0, %v2355_v22  ;;  %1685 = vperm.xlu0 %2399, %v1589_v46  }
  0x3e   : > { %2201 = vmatmul.msk.bf16.gmra.mxu0 %vm412_vm0, %v2355_v22 }
  0x40   : > { %1705 = vperm.xlu1 %2400, %v1593_v19  }
  0x45   : > { %1700 = vperm.xlu0 %2399, %v1592_v60  }
  0x4b   : > { %2246 = vmatmul.msk.bf16.gmra.mxu1 %vm412_vm0, %v2356_v24 }
  0x4c   : > { %2290 = vmatmul.msk.bf16.gmra.mxu2 %vm412_vm0, %v2356_v24 }
  0x4d   : > { %2334 = vmatmul.msk.bf16.gmra.mxu3 %vm412_vm0, %v2356_v24  ;;  %1715 = vperm.xlu0 %2399, %v1595_v13  }
  0x4e   : > { %2202 = vmatmul.msk.bf16.gmra.mxu0 %vm412_vm0, %v2356_v24 }
  0x5b   : > { %2247 = vmatmul.msk.bf16.gmra.mxu1 %vm412_vm0, %v2357_v26 }
  0x5c   : > { %2291 = vmatmul.msk.bf16.gmra.mxu2 %vm412_vm0, %v2357_v26 }
  0x5d   : > { %2335 = vmatmul.msk.bf16.gmra.mxu3 %vm412_vm0, %v2357_v26 }
  0x5e   : > { %2203 = vmatmul.msk.bf16.gmra.mxu0 %vm412_vm0, %v2357_v26 }
  0x6b   : > { %2248 = vmatmul.msk.bf16.gmra.mxu1 %vm412_vm0, %v2358_v30 }
  0x6c   : > { %2292 = vmatmul.msk.bf16.gmra.mxu2 %vm412_vm0, %v2358_v30 }
  0x6d   : > { %2336 = vmatmul.msk.bf16.gmra.mxu3 %vm412_vm0, %v2358_v30 }
  0x6e   : > { %2204 = vmatmul.msk.bf16.gmra.mxu0 %vm412_vm0, %v2358_v30  ;;  %v1598_v30 = vld [vmem:[%s3169_s2 + $0xc0] sm:$0xff] }
  0x6f   : > { %1730 = vperm.xlu0 %2399, %v1598_v30  }
  0x7b   : > { %2249 = vmatmul.msk.bf16.gmra.mxu1 %vm412_vm0, %v2359_v32 }
  0x7c   : > { %2293 = vmatmul.msk.bf16.gmra.mxu2 %vm412_vm0, %v2359_v32 }
  0x7d   : > { %2337 = vmatmul.msk.bf16.gmra.mxu3 %vm412_vm0, %v2359_v32 }
  0x7e   : > { %2205 = vmatmul.msk.bf16.gmra.mxu0 %vm412_vm0, %v2359_v32 }
  0x87   : > { %v1611_v10 = vpop.permute.xlu0 %1610 }
  0x8b   : > { %2250 = vmatmul.msk.bf16.gmra.mxu1 %vm412_vm0, %v2360_v35 }
  0x8c   : > { %2294 = vmatmul.msk.bf16.gmra.mxu2 %vm412_vm0, %v2360_v35 }
  0x8d   : > { %2338 = vmatmul.msk.bf16.gmra.mxu3 %vm412_vm0, %v2360_v35 }
  0x8e   : > { %2206 = vmatmul.msk.bf16.gmra.mxu0 %vm412_vm0, %v2360_v35 }
  0x8f   : > { %v1616_v29 = vpop.permute.xlu0 %1615 }
  0x98   : > { %v652_v39 = vpop.f32.mrf.mxu1 }
  0x99   : > { %v783_v56 = vrot.slane %v652_v39, 1  ;;  %v2364_v39 = vld [vmem:[%s2497_s28 + $0x58] sm:$0xff] }
  0x9b   : > { %v482_v40 = vpop.f32.mrf.mxu0  ;;  %2251 = vmatmul.msk.bf16.gmra.mxu1 %vm412_vm0, %v2361_v38 }
  0x9c   : > { %2295 = vmatmul.msk.bf16.gmra.mxu2 %vm412_vm0, %v2361_v38 }
  0x9d   : > { %2339 = vmatmul.msk.bf16.gmra.mxu3 %vm412_vm0, %v2361_v38 }
  0x9e   : > { %2207 = vmatmul.msk.bf16.gmra.mxu0 %vm412_vm0, %v2361_v38 }
  0x9f   : > { %v962_v42 = vpop.f32.mrf.mxu2 }
  0xa0   : > { %v1271_v43 = vpop.f32.mrf.mxu3  ;;  %v654_v44 = vpop.f32.mrf.mxu1 }
  0xa1   : > { %v784_v57 = vrot.slane %v654_v44, 1 }
  0xa3   : > { %v484_v45 = vpop.f32.mrf.mxu0  ;;  %v785_v61 = vsel %vm782_vm1, %v783_v56, %v784_v57  ;;  %v1591_v56 = vld [vmem:[%s3169_s2 + $0x88] sm:$0xff] }
  0xa4   : > { %v886_v3 = vadd.f32 %v785_v61, %v482_v40  ;;  %v1596_v40 = vld [vmem:[%s3169_s2 + $0xb0] sm:$0xff]  ;;  %1695 = vperm.xlu2 %2401, %v1591_v56  }
  0xa5   : > { %1720 = vperm.xlu1 %2400, %v1596_v40   ;;  %v1607_v40 = vld [vmem:[%s3169_s2 + $0x108] sm:$0xff] }
  0xa7   : > { %v963_v47 = vpop.f32.mrf.mxu2 }
  0xa8   : > { %v1272_v48 = vpop.f32.mrf.mxu3  ;;  %v2596_v50 = vpop.f32.mrf.mxu1 }
  0xa9   : > { %v786_v6 = vrot.slane %v2596_v50, 1  ;;  %v1621_v50 = vpop.permute.xlu1 %1620 }
  0xab   : > { %v2598_v51 = vpop.f32.mrf.mxu0  ;;  %2252 = vmatmul.msk.bf16.gmra.mxu1 %vm412_vm0, %v2362_v49  ;;  %v787_v15 = vsel %vm782_vm1, %v784_v57, %v786_v6  ;;  %v1601_v57 = vld [vmem:[%s3169_s2 + $0xd8] sm:$0xff] }
  0xac   : > { %2296 = vmatmul.msk.bf16.gmra.mxu2 %vm412_vm0, %v2362_v49  ;;  %v887_v20 = vadd.f32 %v787_v15, %v484_v45  ;;  %1745 = vperm.xlu0 %2399, %v1601_v57  }
  0xad   : > { %2340 = vmatmul.msk.bf16.gmra.mxu3 %vm412_vm0, %v2362_v49 }
  0xae   : > { %2208 = vmatmul.msk.bf16.gmra.mxu0 %vm412_vm0, %v2362_v49 }
  0xaf   : > { %v965_v53 = vpop.f32.mrf.mxu2 }
  0xb0   : > { %v1274_v54 = vpop.f32.mrf.mxu3  ;;  %v2607_v55 = vpop.f32.mrf.mxu1  ;;  %v1092_v63 = vrot.slane %v965_v53, 1 }
  0xb1   : > { %v1402_v7 = vrot.slane %v1274_v54, 2  ;;  %v788_v21 = vrot.slane %v2607_v55, 1  ;;  %v1626_v15 = vpop.permute.xlu1 %1625 }
  0xb3   : > { %v2609_v58 = vpop.f32.mrf.mxu0  ;;  %v789_v31 = vsel %vm782_vm1, %v786_v6, %v788_v21 }
  0xb4   : > { %v888_v36 = vadd.f32 %v789_v31, %v2598_v51 }
  0xb7   : > { %v967_v62 = vpop.f32.mrf.mxu2 }
  0xb8   : > { %v1093_v0 = vrot.slane %v967_v62, 1  ;;  %v1276_v1 = vpop.f32.mrf.mxu3  ;;  %v2620_v5 = vpop.f32.mrf.mxu1 }
  0xb9   : > { %v1403_v4 = vrot.slane %v1276_v1, 2  ;;  %v790_v46 = vrot.slane %v2620_v5, 1  ;;  %v1599_v1 = vld [vmem:[%s3169_s2 + $0xc8] sm:$0xff] }
  0xba   : > { %v1094_v8 = vsel %vm782_vm1, %v1092_v63, %v1093_v0  ;;  %1735 = vperm.xlu1 %2400, %v1599_v1  }
  0xbb   : > { %v2624_v9 = vpop.f32.mrf.mxu0  ;;  %v1195_v11 = vadd.f32 %v1094_v8, %v886_v3  ;;  %2253 = vmatmul.msk.bf16.gmra.mxu1 %vm412_vm0, %v2363_v2  ;;  %v1404_v12 = vsel %vm1401_vm2, %v1402_v7, %v1403_v4  ;;  %v791_v60 = vsel %vm782_vm1, %v788_v21, %v790_v46 }
  0xbc   : > { %2297 = vmatmul.msk.bf16.gmra.mxu2 %vm412_vm0, %v2363_v2 }
  0xbd   : > { %2341 = vmatmul.msk.bf16.gmra.mxu3 %vm412_vm0, %v2363_v2  ;;  %v1505_v14 = vadd.f32 %v1404_v12, %v1195_v11 }
  0xbe   : > { %2209 = vmatmul.msk.bf16.gmra.mxu0 %vm412_vm0, %v2363_v2  ;;  %v889_v2 = vadd.f32 %v791_v60, %v2609_v58 }
  0xbf   : > { %1540 = vst.msk [vmem:[%s2631_s27] sm:$0xff] %vm1539_vm3, %v1505_v14  ;;  %v970_v16 = vpop.f32.mrf.mxu2  ;;  %v1778_v26 = vmul.f32 %v1611_v10, %v1505_v14 }
  0xc0   : > { %v1095_v17 = vrot.slane %v970_v16, 1  ;;  %v1279_v18 = vpop.f32.mrf.mxu3  ;;  %v2646_v23 = vpop.f32.mrf.mxu1  ;;  %v1604_v16 = vld [vmem:[%s3169_s2 + $0xf0] sm:$0xff] }
  0xc1   : > { %v1405_v22 = vrot.slane %v1279_v18, 2  ;;  %v1887_v33 = vmul.f32 %v1778_v26, %v1505_v14  ;;  %v1812_v41 = vsel %vm1539_vm3, %v1778_v26, 0.0  ;;  %v792_v7 = vrot.slane %v2646_v23, 1  ;;  %1760 = vperm.xlu0 %2399, %v1604_v16   ;;  %v2365_v23 = vld [vmem:[%s2497_s28 + $0x60] sm:$0xff] }
  0xc2   : > { %v1096_v24 = vsel %vm782_vm1, %v1093_v0, %v1095_v17 }
  0xc3   : > { %v2649_v25 = vpop.f32.mrf.mxu0  ;;  %v1196_v27 = vadd.f32 %v1096_v24, %v887_v20  ;;  %v1406_v28 = vsel %vm1401_vm2, %v1403_v4, %v1405_v22  ;;  %v1921_v51 = vsel %vm1539_vm3, %v1887_v33, 0.0  ;;  %v793_v18 = vsel %vm782_vm1, %v790_v46, %v792_v7  ;;  %v1602_v24 = vld [vmem:[%s3169_s2 + $0xe0] sm:$0xff] }
  0xc4   : > { %v890_v26 = vadd.f32 %v793_v18, %v2624_v9  ;;  %1750 = vperm.xlu1 %2400, %v1602_v24   ;;  %v1594_v9 = vld [vmem:[%s3169_s2 + $0xa0] sm:$0xff] }
  0xc5   : > { %v1506_v32 = vadd.f32 %v1406_v28, %v1196_v27  ;;  %1710 = vperm.xlu2 %2401, %v1594_v9  }
  0xc7   : > { %1541 = vst.msk [vmem:[%s2631_s27 + $0x8] sm:$0xff] %vm1539_vm3, %v1506_v32  ;;  %v1779_v34 = vmul.f32 %v1616_v29, %v1506_v32  ;;  %v972_v35 = vpop.f32.mrf.mxu2 }
  0xc8   : > { %v1097_v37 = vrot.slane %v972_v35, 1  ;;  %v1281_v38 = vpop.f32.mrf.mxu3  ;;  %v2665_v45 = vpop.f32.mrf.mxu1 }
  0xc9   : > { %v1813_v42 = vsel %vm1539_vm3, %v1779_v34, 0.0  ;;  %v1888_v43 = vmul.f32 %v1779_v34, %v1506_v32  ;;  %v1407_v44 = vrot.slane %v1281_v38, 2  ;;  %v794_v31 = vrot.slane %v2665_v45, 1  ;;  %v1631_v35 = vpop.permute.xlu2 %1630  ;;  %1775 = vperm.xlu0 %2399, %v1607_v40  }
  0xca   : > { %v1814_v47 = vadd.f32 %v1813_v42, %v1812_v41  ;;  %v1098_v48 = vsel %vm782_vm1, %v1095_v17, %v1097_v37 }
  0xcb   : > { %v2669_v49 = vpop.f32.mrf.mxu0  ;;  %v1922_v52 = vsel %vm1539_vm3, %v1888_v43, 0.0  ;;  %v1197_v53 = vadd.f32 %v1098_v48, %v888_v36  ;;  %2254 = vmatmul.msk.bf16.gmra.mxu1 %vm412_vm0, %v2364_v39  ;;  %v1408_v55 = vsel %vm1401_vm2, %v1405_v22, %v1407_v44  ;;  %v795_v42 = vsel %vm782_vm1, %v792_v7, %v794_v31 }
  0xcc   : > { %v1923_v54 = vadd.f32 %v1922_v52, %v1921_v51  ;;  %2298 = vmatmul.msk.bf16.gmra.mxu2 %vm412_vm0, %v2364_v39  ;;  %v891_v48 = vadd.f32 %v795_v42, %v2649_v25  ;;  %v1597_v25 = vld [vmem:[%s3169_s2 + $0xb8] sm:$0xff]  ;;  %v1646_v42 = vpop.permute.xlu1 %1645 }
  0xcd   : > { %2342 = vmatmul.msk.bf16.gmra.mxu3 %vm412_vm0, %v2364_v39  ;;  %v1507_v59 = vadd.f32 %v1408_v55, %v1197_v53  ;;  %1725 = vperm.xlu2 %2401, %v1597_v25  }
  0xce   : > { %2210 = vmatmul.msk.bf16.gmra.mxu0 %vm412_vm0, %v2364_v39 }
  0xcf   : > { %1542 = vst.msk [vmem:[%s2631_s27 + $0x10] sm:$0xff] %vm1539_vm3, %v1507_v59  ;;  %v1780_v61 = vmul.f32 %v1621_v50, %v1507_v59  ;;  %v975_v62 = vpop.f32.mrf.mxu2 }
  0xd0   : > { %v1099_v63 = vrot.slane %v975_v62, 1  ;;  %v1284_v0 = vpop.f32.mrf.mxu3  ;;  %v2692_v6 = vpop.f32.mrf.mxu1 }
  0xd1   : > { %v1815_v3 = vsel %vm1539_vm3, %v1780_v61, 0.0  ;;  %v1889_v4 = vmul.f32 %v1780_v61, %v1507_v59  ;;  %v1409_v5 = vrot.slane %v1284_v0, 2 }
  0xd2   : > { %v1816_v8 = vadd.f32 %v1815_v3, %v1814_v47  ;;  %v1100_v10 = vsel %vm782_vm1, %v1097_v37, %v1099_v63  ;;  %v1605_v47 = vld [vmem:[%s3169_s2 + $0xf8] sm:$0xff] }
  0xd3   : > { %v2696_v11 = vpop.f32.mrf.mxu0  ;;  %v1924_v12 = vsel %vm1539_vm3, %v1889_v4, 0.0  ;;  %v1198_v13 = vadd.f32 %v1100_v10, %v889_v2  ;;  %v1410_v14 = vsel %vm1401_vm2, %v1407_v44, %v1409_v5  ;;  %1765 = vperm.xlu1 %2400, %v1605_v47  }
  0xd4   : > { %v1925_v58 = vadd.f32 %v1924_v12, %v1923_v54  ;;  %v796_v54 = vrot.slane %v2692_v6, 1  ;;  %v2366_v6 = vld [vmem:[%s2497_s28 + $0x68] sm:$0xff] }
  0xd5   : > { %v1508_v17 = vadd.f32 %v1410_v14, %v1198_v13 }
  0xd6   : > { %v797_v1 = vsel %vm782_vm1, %v794_v31, %v796_v54 }
  0xd7   : > { %1543 = vst.msk [vmem:[%s2631_s27 + $0x18] sm:$0xff] %vm1539_vm3, %v1508_v17  ;;  %v1781_v19 = vmul.f32 %v1626_v15, %v1508_v17  ;;  %v977_v20 = vpop.f32.mrf.mxu2  ;;  %v892_v7 = vadd.f32 %v797_v1, %v2669_v49 }
  0xd8   : > { %v1101_v21 = vrot.slane %v977_v20, 1  ;;  %v1286_v22 = vpop.f32.mrf.mxu3  ;;  %v2712_v30 = vpop.f32.mrf.mxu1 }
  0xd9   : > { %v1817_v27 = vsel %vm1539_vm3, %v1781_v19, 0.0  ;;  %v1890_v28 = vmul.f32 %v1781_v19, %v1508_v17  ;;  %v1411_v29 = vrot.slane %v1286_v22, 2  ;;  %v1600_v17 = vld [vmem:[%s3169_s2 + $0xd0] sm:$0xff]  ;;  %v1641_v20 = vpop.permute.xlu0 %1640 }
  0xda   : > { %v1818_v32 = vadd.f32 %v1817_v27, %v1816_v8  ;;  %v1102_v33 = vsel %vm782_vm1, %v1099_v63, %v1101_v21  ;;  %v1636_v63 = vpop.permute.xlu2 %1635  ;;  %1740 = vperm.xlu2 %2401, %v1600_v17  }
  0xdb   : > { %v2716_v34 = vpop.f32.mrf.mxu0  ;;  %v1926_v36 = vsel %vm1539_vm3, %v1890_v28, 0.0  ;;  %v1199_v37 = vadd.f32 %v1102_v33, %v890_v26  ;;  %2255 = vmatmul.msk.bf16.gmra.mxu1 %vm412_vm0, %v2365_v23  ;;  %v1412_v39 = vsel %vm1401_vm2, %v1409_v5, %v1411_v29 }
  0xdc   : > { %v1927_v38 = vadd.f32 %v1926_v36, %v1925_v58  ;;  %2299 = vmatmul.msk.bf16.gmra.mxu2 %vm412_vm0, %v2365_v23  ;;  %v798_v58 = vrot.slane %v2712_v30, 1 }
  0xdd   : > { %2343 = vmatmul.msk.bf16.gmra.mxu3 %vm412_vm0, %v2365_v23  ;;  %v1509_v41 = vadd.f32 %v1412_v39, %v1199_v37 }
  0xde   : > { %2211 = vmatmul.msk.bf16.gmra.mxu0 %vm412_vm0, %v2365_v23  ;;  %v799_v23 = vsel %vm782_vm1, %v796_v54, %v798_v58 }
  0xdf   : > { %1544 = vst.msk [vmem:[%s2631_s27 + $0x20] sm:$0xff] %vm1539_vm3, %v1509_v41  ;;  %v1782_v43 = vmul.f32 %v1631_v35, %v1509_v41  ;;  %v980_v44 = vpop.f32.mrf.mxu2 }
  0xe0   : > { %v1103_v45 = vrot.slane %v980_v44, 1  ;;  %v1289_v46 = vpop.f32.mrf.mxu3  ;;  %v2738_v53 = vpop.f32.mrf.mxu1 }
  0xe1   : > { %v1819_v50 = vsel %vm1539_vm3, %v1782_v43, 0.0  ;;  %v1891_v51 = vmul.f32 %v1782_v43, %v1509_v41  ;;  %v1413_v52 = vrot.slane %v1289_v46, 2  ;;  %v800_v35 = vrot.slane %v2738_v53, 1 }
  0xe2   : > { %v1820_v55 = vadd.f32 %v1819_v50, %v1818_v32  ;;  %v1104_v56 = vsel %vm782_vm1, %v1101_v21, %v1103_v45  ;;  %v2367_v50 = vld [vmem:[%s2497_s28 + $0x70] sm:$0xff] }
  0xe3   : > { %v2742_v57 = vpop.f32.mrf.mxu0  ;;  %v1928_v59 = vsel %vm1539_vm3, %v1891_v51, 0.0  ;;  %v1200_v60 = vadd.f32 %v1104_v56, %v891_v48  ;;  %v1414_v62 = vsel %vm1401_vm2, %v1411_v29, %v1413_v52  ;;  %v893_v29 = vadd.f32 %v799_v23, %v2696_v11 }
  0xe4   : > { %v1929_v61 = vadd.f32 %v1928_v59, %v1927_v38  ;;  %v1603_v38 = vld [vmem:[%s3169_s2 + $0xe8] sm:$0xff]  ;;  %v801_v44 = vsel %vm782_vm1, %v798_v58, %v800_v35 }
  0xe5   : > { %v1510_v0 = vadd.f32 %v1414_v62, %v1200_v60  ;;  %1755 = vperm.xlu2 %2401, %v1603_v38   ;;  %v894_v51 = vadd.f32 %v801_v44, %v2716_v34 }
  0xe7   : > { %1545 = vst.msk [vmem:[%s2631_s27 + $0x28] sm:$0xff] %vm1539_vm3, %v1510_v0  ;;  %v1783_v2 = vmul.f32 %v1636_v63, %v1510_v0  ;;  %v982_v3 = vpop.f32.mrf.mxu2 }
  0xe8   : > { %v1105_v4 = vrot.slane %v982_v3, 1  ;;  %v1291_v5 = vpop.f32.mrf.mxu3  ;;  %v2755_v13 = vpop.f32.mrf.mxu1 }
  0xe9   : > { %v1821_v8 = vsel %vm1539_vm3, %v1783_v2, 0.0  ;;  %v1892_v10 = vmul.f32 %v1783_v2, %v1510_v0  ;;  %v1415_v12 = vrot.slane %v1291_v5, 2  ;;  %v802_v56 = vrot.slane %v2755_v13, 1  ;;  %v1651_v0 = vpop.permute.xlu2 %1650 }
  0xea   : > { %v1822_v14 = vadd.f32 %v1821_v8, %v1820_v55  ;;  %v1106_v15 = vsel %vm782_vm1, %v1103_v45, %v1105_v4 }
  0xeb   : > { %v2759_v16 = vpop.f32.mrf.mxu0  ;;  %v1930_v49 = vsel %vm1539_vm3, %v1892_v10, 0.0  ;;  %v1201_v18 = vadd.f32 %v1106_v15, %v892_v7  ;;  %2256 = vmatmul.msk.bf16.gmra.mxu1 %vm412_vm0, %v2366_v6  ;;  %v1416_v21 = vsel %vm1401_vm2, %v1413_v52, %v1415_v12  ;;  %v803_v3 = vsel %vm782_vm1, %v800_v35, %v802_v56 }
  0xec   : > { %v1931_v19 = vadd.f32 %v1930_v49, %v1929_v61  ;;  %2300 = vmatmul.msk.bf16.gmra.mxu2 %vm412_vm0, %v2366_v6  ;;  %v1606_v61 = vld [vmem:[%s3169_s2 + $0x100] sm:$0xff]  ;;  %v895_v8 = vadd.f32 %v803_v3, %v2742_v57 }
  0xed   : > { %2344 = vmatmul.msk.bf16.gmra.mxu3 %vm412_vm0, %v2366_v6  ;;  %v1511_v22 = vadd.f32 %v1416_v21, %v1201_v18  ;;  %1770 = vperm.xlu2 %2401, %v1606_v61   ;;  %v1656_v21 = vpop.permute.xlu0 %1655 }
  0xee   : > { %2212 = vmatmul.msk.bf16.gmra.mxu0 %vm412_vm0, %v2366_v6 }
  0xef   : > { %1546 = vst.msk [vmem:[%s2631_s27 + $0x30] sm:$0xff] %vm1539_vm3, %v1511_v22  ;;  %v1784_v24 = vmul.f32 %v1641_v20, %v1511_v22  ;;  %v985_v26 = vpop.f32.mrf.mxu2 }
  0xf0   : > { %v1107_v27 = vrot.slane %v985_v26, 1  ;;  %v1294_v28 = vpop.f32.mrf.mxu3  ;;  %v2775_v33 = vpop.f32.mrf.mxu1 }
  0xf1   : > { %v1823_v30 = vsel %vm1539_vm3, %v1784_v24, 0.0  ;;  %v1893_v31 = vmul.f32 %v1784_v24, %v1511_v22  ;;  %v1417_v32 = vrot.slane %v1294_v28, 2 }
  0xf2   : > { %v1824_v9 = vadd.f32 %v1823_v30, %v1822_v14  ;;  %v1108_v36 = vsel %vm782_vm1, %v1105_v4, %v1107_v27  ;;  %v804_v14 = vrot.slane %v2775_v33, 1 }
  0xf3   : > { %v2779_v37 = vpop.f32.mrf.mxu0  ;;  %v1932_v11 = vsel %vm1539_vm3, %v1893_v31, 0.0  ;;  %v1202_v39 = vadd.f32 %v1108_v36, %v893_v29  ;;  %v1418_v41 = vsel %vm1401_vm2, %v1415_v12, %v1417_v32  ;;  %v2368_v29 = vld [vmem:[%s2497_s28 + $0x78] sm:$0xff] }
  0xf4   : > { %v1933_v40 = vadd.f32 %v1932_v11, %v1931_v19  ;;  %v805_v23 = vsel %vm782_vm1, %v802_v56, %v804_v14 }
  0xf5   : > { %v1512_v43 = vadd.f32 %v1418_v41, %v1202_v39  ;;  %v896_v30 = vadd.f32 %v805_v23, %v2759_v16  ;;  %v1661_v16 = vpop.permute.xlu1 %1660 }
  0xf7   : > { %1547 = vst.msk [vmem:[%s2631_s27 + $0x38] sm:$0xff] %vm1539_vm3, %v1512_v43  ;;  %v1785_v45 = vmul.f32 %v1646_v42, %v1512_v43  ;;  %v987_v46 = vpop.f32.mrf.mxu2 }
  0xf8   : > { %v1109_v47 = vrot.slane %v987_v46, 1  ;;  %v1296_v48 = vpop.f32.mrf.mxu3  ;;  %v2792_v55 = vpop.f32.mrf.mxu1 }
  0xf9   : > { %v1825_v52 = vsel %vm1539_vm3, %v1785_v45, 0.0  ;;  %v1894_v53 = vmul.f32 %v1785_v45, %v1512_v43  ;;  %v1419_v54 = vrot.slane %v1296_v48, 2 }
  0xfa   : > { %v1826_v25 = vadd.f32 %v1825_v52, %v1824_v9  ;;  %v1110_v59 = vsel %vm782_vm1, %v1107_v27, %v1109_v47  ;;  %v806_v9 = vrot.slane %v2792_v55, 1 }
  0xfb   : > { %v2796_v60 = vpop.f32.mrf.mxu0  ;;  %v1934_v34 = vsel %vm1539_vm3, %v1894_v53, 0.0  ;;  %v1203_v62 = vadd.f32 %v1110_v59, %v894_v51  ;;  %2257 = vmatmul.msk.bf16.gmra.mxu1 %vm412_vm0, %v2367_v50  ;;  %v1420_v1 = vsel %vm1401_vm2, %v1417_v32, %v1419_v54 }
  0xfc   : > { %v1935_v63 = vadd.f32 %v1934_v34, %v1933_v40  ;;  %2301 = vmatmul.msk.bf16.gmra.mxu2 %vm412_vm0, %v2367_v50  ;;  %v807_v44 = vsel %vm782_vm1, %v804_v14, %v806_v9 }
  0xfd   : > { %2345 = vmatmul.msk.bf16.gmra.mxu3 %vm412_vm0, %v2367_v50  ;;  %v1513_v2 = vadd.f32 %v1420_v1, %v1203_v62 }
  0xfe   : > { %2213 = vmatmul.msk.bf16.gmra.mxu0 %vm412_vm0, %v2367_v50  ;;  %v897_v50 = vadd.f32 %v807_v44, %v2779_v37 }
  0xff   : > { %1548 = vst.msk [vmem:[%s2631_s27 + $0x40] sm:$0xff] %vm1539_vm3, %v1513_v2  ;;  %v1786_v4 = vmul.f32 %v1651_v0, %v1513_v2  ;;  %v990_v5 = vpop.f32.mrf.mxu2 }
 0x100   : > { %v1111_v6 = vrot.slane %v990_v5, 1  ;;  %v1299_v7 = vpop.f32.mrf.mxu3  ;;  %v2812_v58 = vpop.f32.mrf.mxu1 }
 0x101   : > { %v1827_v10 = vsel %vm1539_vm3, %v1786_v4, 0.0  ;;  %v1895_v12 = vmul.f32 %v1786_v4, %v1513_v2  ;;  %v1421_v13 = vrot.slane %v1299_v7, 2  ;;  %v808_v55 = vrot.slane %v2812_v58, 1 }
 0x102   : > { %v1828_v15 = vadd.f32 %v1827_v10, %v1826_v25  ;;  %v1112_v17 = vsel %vm782_vm1, %v1109_v47, %v1111_v6 }
 0x103   : > { %v2816_v49 = vpop.f32.mrf.mxu0  ;;  %v1936_v18 = vsel %vm1539_vm3, %v1895_v12, 0.0  ;;  %v1204_v19 = vadd.f32 %v1112_v17, %v895_v8  ;;  %v1422_v57 = vsel %vm1401_vm2, %v1419_v54, %v1421_v13  ;;  %v809_v1 = vsel %vm782_vm1, %v806_v9, %v808_v55 }
 0x104   : > { %v1937_v20 = vadd.f32 %v1936_v18, %v1935_v63  ;;  %v1666_v63 = vpop.permute.xlu2 %1665  ;;  %v898_v7 = vadd.f32 %v809_v1, %v2796_v60  ;;  %v1671_v60 = vpop.permute.xlu0 %1670 }
 0x105   : > { %v1514_v22 = vadd.f32 %v1422_v57, %v1204_v19 }
 0x107   : > { %1549 = vst.msk [vmem:[%s2631_s27 + $0x48] sm:$0xff] %vm1539_vm3, %v1514_v22  ;;  %v1787_v24 = vmul.f32 %v1656_v21, %v1514_v22  ;;  %v992_v26 = vpop.f32.mrf.mxu2 }
 0x108   : > { %v1113_v27 = vrot.slane %v992_v26, 1  ;;  %v1301_v28 = vpop.f32.mrf.mxu3  ;;  %v2826_v35 = vpop.f32.mrf.mxu1 }
 0x109   : > { %v1829_v31 = vsel %vm1539_vm3, %v1787_v24, 0.0  ;;  %v1896_v32 = vmul.f32 %v1787_v24, %v1514_v22  ;;  %v1423_v33 = vrot.slane %v1301_v28, 2  ;;  %v810_v58 = vrot.slane %v2826_v35, 1 }
 0x10a   : > { %v1830_v36 = vadd.f32 %v1829_v31, %v1828_v15  ;;  %v1114_v38 = vsel %vm782_vm1, %v1111_v6, %v1113_v27  ;;  %v2369_v6 = vld [vmem:[%s2497_s28 + $0x80] sm:$0xff] }
 0x10b   : > { %v2830_v11 = vpop.f32.mrf.mxu0  ;;  %v1938_v39 = vsel %vm1539_vm3, %v1896_v32, 0.0  ;;  %v1205_v40 = vadd.f32 %v1114_v38, %v896_v30  ;;  %2258 = vmatmul.msk.bf16.gmra.mxu1 %vm412_vm0, %v2368_v29  ;;  %v1424_v42 = vsel %vm1401_vm2, %v1421_v13, %v1423_v33  ;;  %v811_v22 = vsel %vm782_vm1, %v808_v55, %v810_v58 }
 0x10c   : > { %v1939_v41 = vadd.f32 %v1938_v39, %v1937_v20  ;;  %2302 = vmatmul.msk.bf16.gmra.mxu2 %vm412_vm0, %v2368_v29  ;;  %v899_v28 = vadd.f32 %v811_v22, %v2816_v49 }
 0x10d   : > { %2346 = vmatmul.msk.bf16.gmra.mxu3 %vm412_vm0, %v2368_v29  ;;  %v1515_v43 = vadd.f32 %v1424_v42, %v1205_v40 }
 0x10e   : > { %2214 = vmatmul.msk.bf16.gmra.mxu0 %vm412_vm0, %v2368_v29 }
 0x10f   : > { %1550 = vst.msk [vmem:[%s2631_s27 + $0x50] sm:$0xff] %vm1539_vm3, %v1515_v43  ;;  %v1788_v45 = vmul.f32 %v1661_v16, %v1515_v43  ;;  %v995_v46 = vpop.f32.mrf.mxu2 }
 0x110   : > { %v1115_v47 = vrot.slane %v995_v46, 1  ;;  %v1304_v48 = vpop.f32.mrf.mxu3  ;;  %v2843_v54 = vpop.f32.mrf.mxu1 }
 0x111   : > { %v1831_v51 = vsel %vm1539_vm3, %v1788_v45, 0.0  ;;  %v1897_v52 = vmul.f32 %v1788_v45, %v1515_v43  ;;  %v1425_v53 = vrot.slane %v1304_v48, 2 }
 0x112   : > { %v1832_v56 = vadd.f32 %v1831_v51, %v1830_v36  ;;  %v1116_v25 = vsel %vm782_vm1, %v1113_v27, %v1115_v47 }
 0x113   : > { %v2847_v59 = vpop.f32.mrf.mxu0  ;;  %v1940_v61 = vsel %vm1539_vm3, %v1897_v52, 0.0  ;;  %v1206_v34 = vadd.f32 %v1116_v25, %v897_v50  ;;  %v1426_v37 = vsel %vm1401_vm2, %v1423_v33, %v1425_v53  ;;  %v812_v33 = vrot.slane %v2843_v54, 1 }
 0x114   : > { %v1941_v62 = vadd.f32 %v1940_v61, %v1939_v41  ;;  %v1676_v41 = vpop.permute.xlu1 %1675 }
 0x115   : > { %v1516_v0 = vadd.f32 %v1426_v37, %v1206_v34  ;;  %v813_v42 = vsel %vm782_vm1, %v810_v58, %v812_v33  ;;  %v1681_v37 = vpop.permute.xlu2 %1680 }
 0x116   : > { %v900_v48 = vadd.f32 %v813_v42, %v2830_v11 }
 0x117   : > { %1551 = vst.msk [vmem:[%s2631_s27 + $0x58] sm:$0xff] %vm1539_vm3, %v1516_v0  ;;  %v1789_v2 = vmul.f32 %v1666_v63, %v1516_v0  ;;  %v997_v3 = vpop.f32.mrf.mxu2 }
 0x118   : > { %v1117_v4 = vrot.slane %v997_v3, 1  ;;  %v1306_v5 = vpop.f32.mrf.mxu3  ;;  %v2857_v13 = vpop.f32.mrf.mxu1 }
 0x119   : > { %v1833_v8 = vsel %vm1539_vm3, %v1789_v2, 0.0  ;;  %v1898_v10 = vmul.f32 %v1789_v2, %v1516_v0  ;;  %v1427_v12 = vrot.slane %v1306_v5, 2  ;;  %v814_v54 = vrot.slane %v2857_v13, 1 }
 0x11a   : > { %v1834_v14 = vadd.f32 %v1833_v8, %v1832_v56  ;;  %v1118_v15 = vsel %vm782_vm1, %v1115_v47, %v1117_v4  ;;  %v2370_v47 = vld [vmem:[%s2497_s28 + $0x88] sm:$0xff] }
 0x11b   : > { %v2861_v17 = vpop.f32.mrf.mxu0  ;;  %v1942_v18 = vsel %vm1539_vm3, %v1898_v10, 0.0  ;;  %v1207_v19 = vadd.f32 %v1118_v15, %v898_v7  ;;  %2259 = vmatmul.msk.bf16.gmra.mxu1 %vm412_vm0, %v2369_v6  ;;  %v1428_v57 = vsel %vm1401_vm2, %v1425_v53, %v1427_v12  ;;  %v815_v0 = vsel %vm782_vm1, %v812_v33, %v814_v54 }
 0x11c   : > { %v1943_v20 = vadd.f32 %v1942_v18, %v1941_v62  ;;  %2303 = vmatmul.msk.bf16.gmra.mxu2 %vm412_vm0, %v2369_v6  ;;  %v901_v5 = vadd.f32 %v815_v0, %v2847_v59 }
 0x11d   : > { %2347 = vmatmul.msk.bf16.gmra.mxu3 %vm412_vm0, %v2369_v6  ;;  %v1517_v21 = vadd.f32 %v1428_v57, %v1207_v19 }
 0x11e   : > { %2215 = vmatmul.msk.bf16.gmra.mxu0 %vm412_vm0, %v2369_v6 }
 0x11f   : > { %1552 = vst.msk [vmem:[%s2631_s27 + $0x60] sm:$0xff] %vm1539_vm3, %v1517_v21  ;;  %v1790_v23 = vmul.f32 %v1671_v60, %v1517_v21  ;;  %v1000_v24 = vpop.f32.mrf.mxu2 }
 0x120   : > { %v1119_v26 = vrot.slane %v1000_v24, 1  ;;  %v1309_v27 = vpop.f32.mrf.mxu3  ;;  %v2874_v32 = vpop.f32.mrf.mxu1 }
 0x121   : > { %v1835_v29 = vsel %vm1539_vm3, %v1790_v23, 0.0  ;;  %v1899_v30 = vmul.f32 %v1790_v23, %v1517_v21  ;;  %v1429_v31 = vrot.slane %v1309_v27, 2 }
 0x122   : > { %v1836_v35 = vadd.f32 %v1835_v29, %v1834_v14  ;;  %v1120_v9 = vsel %vm782_vm1, %v1117_v4, %v1119_v26 }
 0x123   : > { %v2878_v36 = vpop.f32.mrf.mxu0  ;;  %v1944_v38 = vsel %vm1539_vm3, %v1899_v30, 0.0  ;;  %v1208_v39 = vadd.f32 %v1120_v9, %v899_v28  ;;  %v1430_v49 = vsel %vm1401_vm2, %v1427_v12, %v1429_v31  ;;  %v816_v12 = vrot.slane %v2874_v32, 1 }
 0x124   : > { %v1945_v40 = vadd.f32 %v1944_v38, %v1943_v20  ;;  %v1686_v20 = vpop.permute.xlu0 %1685 }
 0x125   : > { %v1518_v16 = vadd.f32 %v1430_v49, %v1208_v39  ;;  %v817_v57 = vsel %vm782_vm1, %v814_v54, %v816_v12  ;;  %v1691_v49 = vpop.permute.xlu1 %1690 }
 0x126   : > { %v902_v27 = vadd.f32 %v817_v57, %v2861_v17 }
 0x127   : > { %1553 = vst.msk [vmem:[%s2631_s27 + $0x68] sm:$0xff] %vm1539_vm3, %v1518_v16  ;;  %v1791_v43 = vmul.f32 %v1676_v41, %v1518_v16  ;;  %v1002_v44 = vpop.f32.mrf.mxu2 }
 0x128   : > { %v1121_v45 = vrot.slane %v1002_v44, 1  ;;  %v1311_v46 = vpop.f32.mrf.mxu3  ;;  %v2888_v53 = vpop.f32.mrf.mxu1 }
 0x129   : > { %v1837_v50 = vsel %vm1539_vm3, %v1791_v43, 0.0  ;;  %v1900_v51 = vmul.f32 %v1791_v43, %v1518_v16  ;;  %v1431_v52 = vrot.slane %v1311_v46, 2  ;;  %v818_v32 = vrot.slane %v2888_v53, 1 }
 0x12a   : > { %v1838_v55 = vadd.f32 %v1837_v50, %v1836_v35  ;;  %v1122_v56 = vsel %vm782_vm1, %v1119_v26, %v1121_v45  ;;  %v2371_v26 = vld [vmem:[%s2497_s28 + $0x90] sm:$0xff] }
 0x12b   : > { %v2892_v25 = vpop.f32.mrf.mxu0  ;;  %v1946_v61 = vsel %vm1539_vm3, %v1900_v51, 0.0  ;;  %v1209_v34 = vadd.f32 %v1122_v56, %v900_v48  ;;  %v1432_v11 = vsel %vm1401_vm2, %v1429_v31, %v1431_v52  ;;  %2260 = vmatmul.msk.bf16.gmra.mxu1 %vm412_vm0, %v2370_v47  ;;  %v819_v16 = vsel %vm782_vm1, %v816_v12, %v818_v32 }
 0x12c   : > { %v1947_v62 = vadd.f32 %v1946_v61, %v1945_v40  ;;  %2304 = vmatmul.msk.bf16.gmra.mxu2 %vm412_vm0, %v2370_v47  ;;  %v903_v46 = vadd.f32 %v819_v16, %v2878_v36 }
 0x12d   : > { %2348 = vmatmul.msk.bf16.gmra.mxu3 %vm412_vm0, %v2370_v47  ;;  %v1519_v63 = vadd.f32 %v1432_v11, %v1209_v34  ;;  %v1696_v11 = vpop.permute.xlu2 %1695  ;;  %v1706_v16 = vpop.permute.xlu1 %1705 }
 0x12e   : > { %2216 = vmatmul.msk.bf16.gmra.mxu0 %vm412_vm0, %v2370_v47 }
 0x12f   : > { %1554 = vst.msk [vmem:[%s2631_s27 + $0x70] sm:$0xff] %vm1539_vm3, %v1519_v63  ;;  %v1792_v1 = vmul.f32 %v1681_v37, %v1519_v63  ;;  %v1005_v2 = vpop.f32.mrf.mxu2 }
 0x130   : > { %v1123_v3 = vrot.slane %v1005_v2, 1  ;;  %v1314_v4 = vpop.f32.mrf.mxu3  ;;  %v2905_v10 = vpop.f32.mrf.mxu1 }
 0x131   : > { %v1839_v6 = vsel %vm1539_vm3, %v1792_v1, 0.0  ;;  %v1901_v7 = vmul.f32 %v1792_v1, %v1519_v63  ;;  %v1433_v8 = vrot.slane %v1314_v4, 2  ;;  %v820_v53 = vrot.slane %v2905_v10, 1 }
 0x132   : > { %v1840_v13 = vadd.f32 %v1839_v6, %v1838_v55  ;;  %v1124_v58 = vsel %vm782_vm1, %v1121_v45, %v1123_v3 }
 0x133   : > { %v2909_v14 = vpop.f32.mrf.mxu0  ;;  %v1948_v15 = vsel %vm1539_vm3, %v1901_v7, 0.0  ;;  %v1210_v18 = vadd.f32 %v1124_v58, %v901_v5  ;;  %v1434_v59 = vsel %vm1401_vm2, %v1431_v52, %v1433_v8  ;;  %v281_v52 = vld [vmem:[%s2497_s28 + $0x98] sm:$0x1]  ;;  %v821_v0 = vsel %vm782_vm1, %v818_v32, %v820_v53 }
 0x134   : > { %v1949_v19 = vadd.f32 %v1948_v15, %v1947_v62  ;;  %v367_v37 = vunpack.c.l.b16 %v281_v52  ;;  %v904_v6 = vadd.f32 %v821_v0, %v2892_v25 }
 0x135   : > { %v1520_v60 = vadd.f32 %v1434_v59, %v1210_v18 }
 0x136   : > { %v387_v5 = vpack.c.b16 %v367_v37, %v367_v37  ;;  %v1711_v37 = vpop.permute.xlu2 %1710 }
 0x137   : > { %1555 = vst.msk [vmem:[%s2631_s27 + $0x78] sm:$0xff] %vm1539_vm3, %v1520_v60  ;;  %v1793_v21 = vmul.f32 %v1686_v20, %v1520_v60  ;;  %v1007_v22 = vpop.f32.mrf.mxu2 }
 0x138   : > { %v1125_v23 = vrot.slane %v1007_v22, 1  ;;  %v1316_v24 = vpop.f32.mrf.mxu3  ;;  %v2919_v31 = vpop.f32.mrf.mxu1 }
 0x139   : > { %v1841_v28 = vsel %vm1539_vm3, %v1793_v21, 0.0  ;;  %v1902_v29 = vmul.f32 %v1793_v21, %v1520_v60  ;;  %v1435_v30 = vrot.slane %v1316_v24, 2  ;;  %v1701_v21 = vpop.permute.xlu0 %1700 }
 0x13a   : > { %v1842_v33 = vadd.f32 %v1841_v28, %v1840_v13  ;;  %v1126_v35 = vsel %vm782_vm1, %v1123_v3, %v1125_v23  ;;  %v822_v13 = vrot.slane %v2919_v31, 1 }
 0x13b   : > { %v2923_v9 = vpop.f32.mrf.mxu0  ;;  %v1950_v38 = vsel %vm1539_vm3, %v1902_v29, 0.0  ;;  %v1211_v39 = vadd.f32 %v1126_v35, %v902_v27  ;;  %v1436_v17 = vsel %vm1401_vm2, %v1433_v8, %v1435_v30  ;;  %2261 = vmatmul.msk.bf16.gmra.mxu1 %vm412_vm0, %v2371_v26 }
 0x13c   : > { %v1951_v40 = vadd.f32 %v1950_v38, %v1949_v19  ;;  %2305 = vmatmul.msk.bf16.gmra.mxu2 %vm412_vm0, %v2371_v26  ;;  %v823_v57 = vsel %vm782_vm1, %v820_v53, %v822_v13 }
 0x13d   : > { %2349 = vmatmul.msk.bf16.gmra.mxu3 %vm412_vm0, %v2371_v26  ;;  %v1521_v41 = vadd.f32 %v1436_v17, %v1211_v39  ;;  %v905_v27 = vadd.f32 %v823_v57, %v2909_v14 }
 0x13e   : > { %2217 = vmatmul.msk.bf16.gmra.mxu0 %vm412_vm0, %v2371_v26 }
 0x13f   : > { %1556 = vst.msk [vmem:[%s2631_s27 + $0x80] sm:$0xff] %vm1539_vm3, %v1521_v41  ;;  %v1794_v42 = vmul.f32 %v1691_v49, %v1521_v41  ;;  %v1010_v43 = vpop.f32.mrf.mxu2 }
 0x140   : > { %v1127_v44 = vrot.slane %v1010_v43, 1  ;;  %v1319_v45 = vpop.f32.mrf.mxu3  ;;  %v2936_v51 = vpop.f32.mrf.mxu1 }
 0x141   : > { %v1843_v47 = vsel %vm1539_vm3, %v1794_v42, 0.0  ;;  %v1903_v48 = vmul.f32 %v1794_v42, %v1521_v41  ;;  %v1437_v50 = vrot.slane %v1319_v45, 2  ;;  %v824_v32 = vrot.slane %v2936_v51, 1 }
 0x142   : > { %v1844_v54 = vadd.f32 %v1843_v47, %v1842_v33  ;;  %v1128_v55 = vsel %vm782_vm1, %v1125_v23, %v1127_v44 }
 0x143   : > { %v2941_v56 = vpop.f32.mrf.mxu0  ;;  %v1952_v61 = vsel %vm1539_vm3, %v1903_v48, 0.0  ;;  %v1212_v34 = vadd.f32 %v1128_v55, %v903_v46  ;;  %v1438_v36 = vsel %vm1401_vm2, %v1435_v30, %v1437_v50  ;;  %v825_v41 = vsel %vm782_vm1, %v822_v13, %v824_v32 }
 0x144   : > { %v1953_v62 = vadd.f32 %v1952_v61, %v1951_v40  ;;  %v906_v46 = vadd.f32 %v825_v41, %v2923_v9 }
 0x145   : > { %v1522_v63 = vadd.f32 %v1438_v36, %v1212_v34 }
 0x147   : > { %1557 = vst.msk [vmem:[%s2631_s27 + $0x88] sm:$0xff] %vm1539_vm3, %v1522_v63  ;;  %v1795_v1 = vmul.f32 %v1696_v11, %v1522_v63  ;;  %v1012_v2 = vpop.f32.mrf.mxu2 }
 0x148   : > { %v1129_v3 = vrot.slane %v1012_v2, 1  ;;  %v1321_v4 = vpop.f32.mrf.mxu3  ;;  %v2950_v12 = vpop.f32.mrf.mxu1 }
 0x149   : > { %v1845_v7 = vsel %vm1539_vm3, %v1795_v1, 0.0  ;;  %v1904_v8 = vmul.f32 %v1795_v1, %v1522_v63  ;;  %v1439_v10 = vrot.slane %v1321_v4, 2  ;;  %v826_v52 = vrot.slane %v2950_v12, 1 }
 0x14a   : > { %v1846_v58 = vadd.f32 %v1845_v7, %v1844_v54  ;;  %v1130_v15 = vsel %vm782_vm1, %v1127_v44, %v1129_v3 }
 0x14b   : > { %v2954_v18 = vpop.f32.mrf.mxu0  ;;  %v1954_v19 = vsel %vm1539_vm3, %v1904_v8, 0.0  ;;  %v1213_v59 = vadd.f32 %v1130_v15, %v904_v6  ;;  %v1440_v25 = vsel %vm1401_vm2, %v1437_v50, %v1439_v10  ;;  %2262 = vmatmul.msk.bf16.gmra.mxu1 %vm412_vm0, %v387_v5  ;;  %v827_v11 = vsel %vm782_vm1, %v824_v32, %v826_v52 }
 0x14c   : > { %v1955_v20 = vadd.f32 %v1954_v19, %v1953_v62  ;;  %2306 = vmatmul.msk.bf16.gmra.mxu2 %vm412_vm0, %v387_v5 }
 0x14d   : > { %v1523_v60 = vadd.f32 %v1440_v25, %v1213_v59  ;;  %2350 = vmatmul.msk.bf16.gmra.mxu3 %vm412_vm0, %v387_v5 }
 0x14e   : > { %2218 = vmatmul.msk.bf16.gmra.mxu0 %vm412_vm0, %v387_v5 }
 0x14f   : > { %1558 = vst.msk [vmem:[%s2631_s27 + $0x90] sm:$0xff] %vm1539_vm3, %v1523_v60  ;;  %v1015_v22 = vpop.f32.mrf.mxu2  ;;  %v1796_v23 = vmul.f32 %v1701_v21, %v1523_v60 }
 0x150   : > { %v1131_v24 = vrot.slane %v1015_v22, 1  ;;  %v1324_v26 = vpop.f32.mrf.mxu3  ;;  %v2966_v29 = vpop.f32.mrf.mxu1 }
 0x151   : > { %v1441_v28 = vrot.slane %v1324_v26, 2  ;;  %v1847_v30 = vsel %vm1539_vm3, %v1796_v23, 0.0  ;;  %v1905_v31 = vmul.f32 %v1796_v23, %v1523_v60  ;;  %v828_v8 = vrot.slane %v2966_v29, 1 }
 0x152   : > { %v1132_v33 = vsel %vm782_vm1, %v1129_v3, %v1131_v24  ;;  %v1848_v35 = vadd.f32 %v1847_v30, %v1846_v58  ;;  %v907_v3 = vadd.f32 %v827_v11, %v2941_v56 }
 0x153   : > { %v2971_v38 = vpop.f32.mrf.mxu0  ;;  %v1214_v39 = vadd.f32 %v1132_v33, %v905_v27  ;;  %v1956_v40 = vsel %vm1539_vm3, %v1905_v31, 0.0  ;;  %v1442_v17 = vsel %vm1401_vm2, %v1439_v10, %v1441_v28  ;;  %v829_v25 = vsel %vm782_vm1, %v826_v52, %v828_v8 }
 0x154   : > { %v1957_v14 = vadd.f32 %v1956_v40, %v1955_v20  ;;  %v1716_v20 = vpop.permute.xlu0 %1715  ;;  %v908_v23 = vadd.f32 %v829_v25, %v2954_v18 }
 0x155   : > { %v1524_v49 = vadd.f32 %v1442_v17, %v1214_v39 }
 0x157   : > { %1559 = vst.msk [vmem:[%s2631_s27 + $0x98] sm:$0xff] %vm1539_vm3, %v1524_v49  ;;  %v1797_v42 = vmul.f32 %v1706_v16, %v1524_v49  ;;  %v1017_v43 = vpop.f32.mrf.mxu2 }
 0x158   : > { %v1133_v44 = vrot.slane %v1017_v43, 1  ;;  %v1326_v45 = vpop.f32.mrf.mxu3  ;;  %v2980_v51 = vpop.f32.mrf.mxu1 }
 0x159   : > { %v1849_v47 = vsel %vm1539_vm3, %v1797_v42, 0.0  ;;  %v1906_v48 = vmul.f32 %v1797_v42, %v1524_v49  ;;  %v1443_v50 = vrot.slane %v1326_v45, 2  ;;  %v830_v29 = vrot.slane %v2980_v51, 1 }
 0x15a   : > { %v1850_v53 = vadd.f32 %v1849_v47, %v1848_v35  ;;  %v1134_v54 = vsel %vm782_vm1, %v1131_v24, %v1133_v44 }
 0x15b   : > { %v2984_v55 = vpop.f32.mrf.mxu0  ;;  %v1958_v61 = vsel %vm1539_vm3, %v1906_v48, 0.0  ;;  %v1215_v34 = vadd.f32 %v1134_v54, %v906_v46  ;;  %v1444_v9 = vsel %vm1401_vm2, %v1441_v28, %v1443_v50  ;;  %v831_v18 = vsel %vm782_vm1, %v828_v8, %v830_v29 }
 0x15c   : > { %v1959_v62 = vadd.f32 %v1958_v61, %v1957_v14  ;;  %v1721_v14 = vpop.permute.xlu1 %1720  ;;  %v909_v43 = vadd.f32 %v831_v18, %v2971_v38 }
 0x15d   : > { %v1525_v36 = vadd.f32 %v1444_v9, %v1215_v34 }
 0x15f   : > { %1560 = vst.msk [vmem:[%s2631_s27 + $0xa0] sm:$0xff] %vm1539_vm3, %v1525_v36  ;;  %v1798_v63 = vmul.f32 %v1711_v37, %v1525_v36  ;;  %v1020_v0 = vpop.f32.mrf.mxu2 }
 0x160   : > { %v1135_v1 = vrot.slane %v1020_v0, 1  ;;  %v1329_v2 = vpop.f32.mrf.mxu3  ;;  %v2993_v7 = vpop.f32.mrf.mxu1 }
 0x161   : > { %v1851_v4 = vsel %vm1539_vm3, %v1798_v63, 0.0  ;;  %v1907_v5 = vmul.f32 %v1798_v63, %v1525_v36  ;;  %v1445_v6 = vrot.slane %v1329_v2, 2  ;;  %v832_v48 = vrot.slane %v2993_v7, 1 }
 0x162   : > { %v1852_v10 = vadd.f32 %v1851_v4, %v1850_v53  ;;  %v1136_v12 = vsel %vm782_vm1, %v1133_v44, %v1135_v1 }
 0x163   : > { %v2997_v13 = vpop.f32.mrf.mxu0  ;;  %v1960_v58 = vsel %vm1539_vm3, %v1907_v5, 0.0  ;;  %v1216_v15 = vadd.f32 %v1136_v12, %v907_v3  ;;  %v1446_v56 = vsel %vm1401_vm2, %v1443_v50, %v1445_v6 }
 0x164   : > { %v1961_v19 = vadd.f32 %v1960_v58, %v1959_v62  ;;  %v833_v62 = vsel %vm782_vm1, %v830_v29, %v832_v48 }
 0x165   : > { %v1526_v59 = vadd.f32 %v1446_v56, %v1216_v15  ;;  %v910_v37 = vadd.f32 %v833_v62, %v2984_v55 }
 0x167   : > { %1561 = vst.msk [vmem:[%s2631_s27 + $0xa8] sm:$0xff] %vm1539_vm3, %v1526_v59  ;;  %v1799_v60 = vmul.f32 %v1716_v20, %v1526_v59  ;;  %v1022_v57 = vpop.f32.mrf.mxu2 }
 0x168   : > { %v1137_v21 = vrot.slane %v1022_v57, 1  ;;  %v1331_v22 = vpop.f32.mrf.mxu3  ;;  %v717_v28 = vpop.f32.mrf.mxu1 }
 0x169   : > { %v1853_v24 = vsel %vm1539_vm3, %v1799_v60, 0.0  ;;  %v1908_v26 = vmul.f32 %v1799_v60, %v1526_v59  ;;  %v1447_v27 = vrot.slane %v1331_v22, 2 }
 0x16a   : > { %v1854_v30 = vadd.f32 %v1853_v24, %v1852_v10  ;;  %v1138_v31 = vsel %vm782_vm1, %v1135_v1, %v1137_v21  ;;  %v834_v1 = vrot.slane %v717_v28, 1 }
 0x16b   : > { %v547_v32 = vpop.f32.mrf.mxu0  ;;  %v1962_v33 = vsel %vm1539_vm3, %v1908_v26, 0.0  ;;  %v1217_v35 = vadd.f32 %v1138_v31, %v908_v23  ;;  %v1448_v40 = vsel %vm1401_vm2, %v1445_v6, %v1447_v27 }
 0x16c   : > { %v1963_v39 = vadd.f32 %v1962_v33, %v1961_v19  ;;  %v835_v7 = vsel %vm782_vm1, %v832_v48, %v834_v1 }
 0x16d   : > { %v1527_v17 = vadd.f32 %v1448_v40, %v1217_v35  ;;  %v911_v12 = vadd.f32 %v835_v7, %v2997_v13 }
 0x16f   : > { %1562 = vst.msk [vmem:[%s2631_s27 + $0xb0] sm:$0xff] %vm1539_vm3, %v1527_v17  ;;  %v1800_v49 = vmul.f32 %v1721_v14, %v1527_v17  ;;  %v1025_v41 = vpop.f32.mrf.mxu2 }
 0x170   : > { %v1139_v16 = vrot.slane %v1025_v41, 1  ;;  %v1334_v42 = vpop.f32.mrf.mxu3  ;;  %v719_v47 = vpop.f32.mrf.mxu1 }
 0x171   : > { %v1855_v44 = vsel %vm1539_vm3, %v1800_v49, 0.0  ;;  %v1909_v45 = vmul.f32 %v1800_v49, %v1527_v17  ;;  %v1449_v46 = vrot.slane %v1334_v42, 2  ;;  %v836_v19 = vrot.slane %v719_v47, 1 }
 0x172   : > { %v3016_v50 = vadd.f32 %v1855_v44, %v1854_v30  ;;  %v1140_v51 = vsel %vm782_vm1, %v1137_v21, %v1139_v16 }
 0x173   : > { %v549_v52 = vpop.f32.mrf.mxu0  ;;  %v1964_v53 = vsel %vm1539_vm3, %v1909_v45, 0.0  ;;  %v1218_v54 = vadd.f32 %v1140_v51, %v909_v43  ;;  %v1450_v34 = vsel %vm1401_vm2, %v1447_v27, %v1449_v46  ;;  %v837_v57 = vsel %vm782_vm1, %v834_v1, %v836_v19 }
 0x174   : > { %v3020_v61 = vadd.f32 %v1964_v53, %v1963_v39  ;;  %v912_v23 = vadd.f32 %v837_v57, %v547_v32 }
 0x175   : > { %v3023_v38 = vadd.f32 %v1450_v34, %v1218_v54 }
 0x177   : > { %1563 = vst.msk [vmem:[%s2631_s27 + $0xb8] sm:$0xff] %vm1539_vm3, %v3023_v38  ;;  %v1027_v9 = vpop.f32.mrf.mxu2 }
 0x178   : > { %v1141_v36 = vrot.slane %v1027_v9, 1  ;;  %v1336_v11 = vpop.f32.mrf.mxu3  ;;  %v722_v0 = vpop.f32.mrf.mxu1 }
 0x179   : > { %v1451_v63 = vrot.slane %v1336_v11, 2  ;;  %v838_v27 = vrot.slane %v722_v0, 1  ;;  %v1726_v0 = vpop.permute.xlu2 %1725 }
 0x17a   : > { %v1142_v2 = vsel %vm782_vm1, %v1139_v16, %v1141_v36 }
 0x17b   : > { %v552_v3 = vpop.f32.mrf.mxu0  ;;  %v1219_v4 = vadd.f32 %v1142_v2, %v910_v37  ;;  %v1452_v5 = vsel %vm1401_vm2, %v1449_v46, %v1451_v63  ;;  %v839_v35 = vsel %vm782_vm1, %v836_v19, %v838_v27 }
 0x17c   : > { %v913_v17 = vadd.f32 %v839_v35, %v549_v52 }
 0x17d   : > { %v3032_v6 = vadd.f32 %v1452_v5, %v1219_v4 }
 0x17f   : > { %1564 = vst.msk [vmem:[%s2631_s27 + $0xc0] sm:$0xff] %vm1539_vm3, %v3032_v6  ;;  %v1030_v8 = vpop.f32.mrf.mxu2 }
 0x180   : > { %v1143_v10 = vrot.slane %v1030_v8, 1  ;;  %v1339_v55 = vpop.f32.mrf.mxu3  ;;  %v724_v15 = vpop.f32.mrf.mxu1 }
 0x181   : > { %v1453_v58 = vrot.slane %v1339_v55, 2  ;;  %v840_v49 = vrot.slane %v724_v15, 1  ;;  %v1731_v15 = vpop.permute.xlu0 %1730 }
 0x182   : > { %v1144_v56 = vsel %vm782_vm1, %v1141_v36, %v1143_v10 }
 0x183   : > { %v554_v59 = vpop.f32.mrf.mxu0  ;;  %v1220_v20 = vadd.f32 %v1144_v56, %v911_v12  ;;  %v1454_v25 = vsel %vm1401_vm2, %v1451_v63, %v1453_v58  ;;  %v841_v45 = vsel %vm782_vm1, %v838_v27, %v840_v49  ;;  %v1801_v27 = vmul.f32 %v1726_v0, %v3023_v38 }
 0x184   : > { %v914_v51 = vadd.f32 %v841_v45, %v552_v3 }
 0x185   : > { %v3041_v60 = vadd.f32 %v1454_v25, %v1220_v20 }
 0x187   : > { %1565 = vst.msk [vmem:[%s2631_s27 + $0xc8] sm:$0xff] %vm1539_vm3, %v3041_v60  ;;  %v1032_v21 = vpop.f32.mrf.mxu2 }
 0x188   : > { %v1145_v22 = vrot.slane %v1032_v21, 1  ;;  %v1341_v13 = vpop.f32.mrf.mxu3  ;;  %v727_v26 = vpop.f32.mrf.mxu1 }
 0x189   : > { %v1455_v24 = vrot.slane %v1341_v13, 2  ;;  %v842_v54 = vrot.slane %v727_v26, 1  ;;  %v1741_v13 = vpop.permute.xlu2 %1740 }
 0x18a   : > { %v1146_v28 = vsel %vm782_vm1, %v1143_v10, %v1145_v22 }
 0x18b   : > { %v557_v29 = vpop.f32.mrf.mxu0  ;;  %v1221_v30 = vadd.f32 %v1146_v28, %v912_v23  ;;  %v1456_v31 = vsel %vm1401_vm2, %v1453_v58, %v1455_v24  ;;  %v843_v37 = vsel %vm782_vm1, %v840_v49, %v842_v54 }
 0x18c   : > { %v915_v3 = vadd.f32 %v843_v37, %v554_v59  ;;  %v1736_v59 = vpop.permute.xlu1 %1735 }
 0x18d   : > { %v3049_v33 = vadd.f32 %v1456_v31, %v1221_v30  ;;  %v1802_v31 = vmul.f32 %v1731_v15, %v3032_v6 }
 0x18f   : > { %1566 = vst.msk [vmem:[%s2631_s27 + $0xd0] sm:$0xff] %vm1539_vm3, %v3049_v33  ;;  %v1035_v39 = vpop.f32.mrf.mxu2  ;;  %v1911_v49 = vmul.f32 %v1802_v31, %v3032_v6  ;;  %v1859_v6 = vsel %vm1539_vm3, %v1802_v31, 0.0 }
 0x190   : > { %v1147_v40 = vrot.slane %v1035_v39, 1  ;;  %v1344_v32 = vpop.f32.mrf.mxu3  ;;  %v729_v14 = vpop.f32.mrf.mxu1  ;;  %v1910_v39 = vmul.f32 %v1801_v27, %v3023_v38 }
 0x191   : > { %v1457_v18 = vrot.slane %v1344_v32, 2  ;;  %v844_v7 = vrot.slane %v729_v14, 1  ;;  %v1746_v32 = vpop.permute.xlu0 %1745 }
 0x192   : > { %v1148_v41 = vsel %vm782_vm1, %v1145_v22, %v1147_v40 }
 0x193   : > { %v559_v16 = vpop.f32.mrf.mxu0  ;;  %v1222_v42 = vadd.f32 %v1148_v41, %v913_v17  ;;  %v1458_v43 = vsel %vm1401_vm2, %v1455_v24, %v1457_v18  ;;  %v845_v19 = vsel %vm782_vm1, %v842_v54, %v844_v7  ;;  %v1803_v17 = vmul.f32 %v1736_v59, %v3041_v60  ;;  %v1756_v54 = vpop.permute.xlu2 %1755 }
 0x194   : > { %v916_v57 = vadd.f32 %v845_v19, %v557_v29  ;;  %v1751_v45 = vpop.permute.xlu1 %1750 }
 0x195   : > { %v3057_v44 = vadd.f32 %v1458_v43, %v1222_v42 }
 0x197   : > { %1567 = vst.msk [vmem:[%s2631_s27 + $0xd8] sm:$0xff] %vm1539_vm3, %v3057_v44  ;;  %v1037_v46 = vpop.f32.mrf.mxu2  ;;  %v1805_v37 = vmul.f32 %v1746_v32, %v3057_v44 }
 0x198   : > { %v1149_v47 = vrot.slane %v1037_v46, 1  ;;  %v1346_v48 = vpop.f32.mrf.mxu3  ;;  %v3063_v53 = vpop.f32.mrf.mxu1  ;;  %v1857_v46 = vsel %vm1539_vm3, %v1801_v27, 0.0 }
 0x199   : > { %v1459_v52 = vrot.slane %v1346_v48, 2  ;;  %v846_v23 = vrot.slane %v3063_v53, 1  ;;  %v1761_v59 = vpop.permute.xlu0 %1760 }
 0x19a   : > { %v1150_v34 = vsel %vm782_vm1, %v1147_v40, %v1149_v47 }
 0x19b   : > { %v3066_v62 = vpop.f32.mrf.mxu0  ;;  %v1223_v9 = vadd.f32 %v1150_v34, %v914_v51  ;;  %v1460_v36 = vsel %vm1401_vm2, %v1457_v18, %v1459_v52  ;;  %v847_v29 = vsel %vm782_vm1, %v844_v7, %v846_v23  ;;  %v1771_v32 = vpop.permute.xlu2 %1770 }
 0x19c   : > { %v917_v41 = vadd.f32 %v847_v29, %v559_v16  ;;  %v1912_v16 = vmul.f32 %v1803_v17, %v3041_v60  ;;  %v1766_v27 = vpop.permute.xlu1 %1765 }
 0x19d   : > { %v3069_v11 = vadd.f32 %v1460_v36, %v1223_v9  ;;  %v1858_v9 = vadd.f32 %v1857_v46, %v3016_v50  ;;  %v1968_v36 = vsel %vm1539_vm3, %v1911_v49, 0.0 }
 0x19e   : > { %v1970_v7 = vsel %vm1539_vm3, %v1912_v16, 0.0 }
 0x19f   : > { %1568 = vst.msk [vmem:[%s2631_s27 + $0xe0] sm:$0xff] %vm1539_vm3, %v3069_v11  ;;  %v1040_v63 = vpop.f32.mrf.mxu2  ;;  %v1806_v60 = vmul.f32 %v1751_v45, %v3069_v11 }
 0x1a0   : > { %v1151_v1 = vrot.slane %v1040_v63, 1  ;;  %v1349_v2 = vpop.f32.mrf.mxu3  ;;  %v3075_v5 = vpop.f32.mrf.mxu1 }
 0x1a1   : > { %v1461_v4 = vrot.slane %v1349_v2, 2  ;;  %v848_v38 = vrot.slane %v3075_v5, 1  ;;  %v1867_v29 = vsel %vm1539_vm3, %v1806_v60, 0.0 }
 0x1a2   : > { %v1152_v8 = vsel %vm782_vm1, %v1149_v47, %v1151_v1  ;;  %v1804_v47 = vmul.f32 %v1741_v13, %v3049_v33 }
 0x1a3   : > { %v3078_v10 = vpop.f32.mrf.mxu0  ;;  %v1224_v55 = vadd.f32 %v1152_v8, %v915_v3  ;;  %v1462_v12 = vsel %vm1401_vm2, %v1459_v52, %v1461_v4  ;;  %v1966_v52 = vsel %vm1539_vm3, %v1910_v39, 0.0  ;;  %v849_v2 = vsel %vm782_vm1, %v846_v23, %v848_v38 }
 0x1a4   : > { %v1967_v0 = vadd.f32 %v1966_v52, %v3020_v61  ;;  %v1860_v3 = vadd.f32 %v1859_v6, %v1858_v9  ;;  %v1863_v61 = vsel %vm1539_vm3, %v1804_v47, 0.0  ;;  %v918_v15 = vadd.f32 %v849_v2, %v3066_v62 }
 0x1a5   : > { %v3081_v58 = vadd.f32 %v1462_v12, %v1224_v55  ;;  %v1865_v23 = vsel %vm1539_vm3, %v1805_v37, 0.0 }
 0x1a6   : > { %v1969_v50 = vadd.f32 %v1968_v36, %v1967_v0 }
 0x1a7   : > { %1569 = vst.msk [vmem:[%s2631_s27 + $0xe8] sm:$0xff] %vm1539_vm3, %v3081_v58  ;;  %v1042_v56 = vpop.f32.mrf.mxu2  ;;  %v1807_v8 = vmul.f32 %v1756_v54, %v3081_v58 }
 0x1a8   : > { %v1153_v20 = vrot.slane %v1042_v56, 1  ;;  %v1351_v25 = vpop.f32.mrf.mxu3  ;;  %v3087_v22 = vpop.f32.mrf.mxu1  ;;  %v1971_v62 = vadd.f32 %v1970_v7, %v1969_v50 }
 0x1a9   : > { %v1463_v21 = vrot.slane %v1351_v25, 2  ;;  %v1869_v49 = vsel %vm1539_vm3, %v1807_v8, 0.0 }
 0x1aa   : > { %v1154_v24 = vsel %vm782_vm1, %v1151_v1, %v1153_v20  ;;  %v1913_v1 = vmul.f32 %v1804_v47, %v3049_v33  ;;  %v1914_v33 = vmul.f32 %v1805_v37, %v3057_v44 }
 0x1ab   : > { %v567_v26 = vpop.f32.mrf.mxu0  ;;  %v1225_v28 = vadd.f32 %v1154_v24, %v916_v57  ;;  %v1464_v30 = vsel %vm1401_vm2, %v1461_v4, %v1463_v21  ;;  %v1861_v4 = vsel %vm1539_vm3, %v1803_v17, 0.0  ;;  %v850_v57 = vrot.slane %v3087_v22, 1 }
 0x1ac   : > { %v1972_v25 = vsel %vm1539_vm3, %v1913_v1, 0.0  ;;  %v1915_v24 = vmul.f32 %v1806_v60, %v3069_v11  ;;  %v1974_v22 = vsel %vm1539_vm3, %v1914_v33, 0.0  ;;  %v1776_v60 = vpop.permute.xlu0 %1775 }
 0x1ad   : > { %v3094_v35 = vadd.f32 %v1464_v30, %v1225_v28  ;;  %v1916_v30 = vmul.f32 %v1807_v8, %v3081_v58  ;;  %v1973_v17 = vadd.f32 %v1972_v25, %v1971_v62 }
 0x1af   : > { %1570 = vst.msk [vmem:[%s2631_s27 + $0xf0] sm:$0xff] %vm1539_vm3, %v3094_v35  ;;  %v1045_v40 = vpop.f32.mrf.mxu2  ;;  %v1808_v26 = vmul.f32 %v1761_v59, %v3094_v35  ;;  %v1978_v46 = vsel %vm1539_vm3, %v1916_v30, 0.0 }
 0x1b0   : > { %v1155_v18 = vrot.slane %v1045_v40, 1  ;;  %v1354_v14 = vpop.f32.mrf.mxu3  ;;  %v739_v43 = vpop.f32.mrf.mxu1 }
 0x1b1   : > { %v1465_v42 = vrot.slane %v1354_v14, 2  ;;  %v1976_v14 = vsel %vm1539_vm3, %v1915_v24, 0.0  ;;  %v1975_v43 = vadd.f32 %v1974_v22, %v1973_v17 }
 0x1b2   : > { %v1156_v48 = vsel %vm782_vm1, %v1153_v20, %v1155_v18  ;;  %v1862_v20 = vadd.f32 %v1861_v4, %v1860_v3 }
 0x1b3   : > { %v568_v51 = vpop.f32.mrf.mxu0  ;;  %v1226_v53 = vadd.f32 %v1156_v48, %v917_v41  ;;  %v1466_v34 = vsel %vm1401_vm2, %v1463_v21, %v1465_v42  ;;  %v1917_v41 = vmul.f32 %v1808_v26, %v3094_v35  ;;  %v1977_v6 = vadd.f32 %v1976_v14, %v1975_v43 }
 0x1b4   : > { %v1864_v28 = vadd.f32 %v1863_v61, %v1862_v20  ;;  %v1871_v51 = vsel %vm1539_vm3, %v1808_v26, 0.0 }
 0x1b5   : > { %v1536_v63 = vadd.f32 %v1466_v34, %v1226_v53  ;;  %v1980_v9 = vsel %vm1539_vm3, %v1917_v41, 0.0  ;;  %v1979_v1 = vadd.f32 %v1978_v46, %v1977_v6 }
 0x1b6   : > { %v1866_v11 = vadd.f32 %v1865_v23, %v1864_v28 }
 0x1b7   : > { %1571 = vst.msk [vmem:[%s2631_s27 + $0xf8] sm:$0xff] %vm1539_vm3, %v1536_v63  ;;  %v1047_v5 = vpop.f32.mrf.mxu2  ;;  %v1809_v39 = vmul.f32 %v1766_v27, %v1536_v63 }
 0x1b8   : > { %v1157_v55 = vrot.slane %v1047_v5, 1  ;;  %v1356_v12 = vpop.f32.mrf.mxu3  ;;  %v741_v56 = vpop.f32.mrf.mxu1  ;;  %v1868_v45 = vadd.f32 %v1867_v29, %v1866_v11  ;;  %v1981_v5 = vadd.f32 %v1980_v9, %v1979_v1 }
 0x1b9   : > { %v1467_v19 = vrot.slane %v1356_v12, 2  ;;  %v1918_v52 = vmul.f32 %v1809_v39, %v1536_v63  ;;  %v1873_v36 = vsel %vm1539_vm3, %v1809_v39, 0.0 }
 0x1ba   : > { %v1158_v21 = vsel %vm782_vm1, %v1155_v18, %v1157_v55  ;;  %v851_v18 = vsel %vm782_vm1, %v848_v38, %v850_v57  ;;  %v1870_v16 = vadd.f32 %v1869_v49, %v1868_v45 }
 0x1bb   : > { %v570_v13 = vpop.f32.mrf.mxu0  ;;  %v1227_v44 = vadd.f32 %v1158_v21, %v918_v15  ;;  %v1468_v31 = vsel %vm1401_vm2, %v1465_v42, %v1467_v19  ;;  %v919_v38 = vadd.f32 %v851_v18, %v3078_v10  ;;  %v1982_v10 = vsel %vm1539_vm3, %v1918_v52, 0.0 }
 0x1bc   : > { %v1872_v2 = vadd.f32 %v1871_v51, %v1870_v16  ;;  %v1983_v12 = vadd.f32 %v1982_v10, %v1981_v5 }
 0x1bd   : > { %v1537_v40 = vadd.f32 %v1468_v31, %v1227_v44 }
 0x1be   : > { %v1874_v50 = vadd.f32 %v1873_v36, %v1872_v2 }
 0x1bf   : > { %1572 = vst.msk [vmem:[%s2631_s27 + $0x100] sm:$0xff] %vm1539_vm3, %v1537_v40  ;;  %v1810_v58 = vmul.f32 %v1771_v32, %v1537_v40  ;;  %v1050_v42 = vpop.f32.mrf.mxu2 }
 0x1c0   : > { %v1159_v47 = vrot.slane %v1050_v42, 1  ;;  %v1359_v48 = vpop.f32.mrf.mxu3  ;;  %v742_v54 = vpop.f32.mrf.mxu1 }
 0x1c1   : > { %v1469_v53 = vrot.slane %v1359_v48, 2  ;;  %v1919_v37 = vmul.f32 %v1810_v58, %v1537_v40  ;;  %v1875_v63 = vsel %vm1539_vm3, %v1810_v58, 0.0 }
 0x1c2   : > { %v1160_v35 = vsel %vm782_vm1, %v1157_v55, %v1159_v47  ;;  %v1876_v61 = vadd.f32 %v1875_v63, %v1874_v50 }
 0x1c3   : > { %v571_v34 = vpop.f32.mrf.mxu0  ;;  %v1228_v0 = vadd.f32 %v1160_v35, %v919_v38  ;;  %v1470_v3 = vsel %vm1401_vm2, %v1467_v19, %v1469_v53  ;;  %v1984_v7 = vsel %vm1539_vm3, %v1919_v37, 0.0 }
 0x1c4   : > { %v1985_v59 = vadd.f32 %v1984_v7, %v1983_v12 }
 0x1c5   : > { %v1538_v4 = vadd.f32 %v1470_v3, %v1228_v0 }
 0x1c7   : > { %1573 = vst.msk [vmem:[%s2631_s27 + $0x108] sm:$0xff] %vm1539_vm3, %v1538_v4  ;;  %v1811_v8 = vmul.f32 %v1776_v60, %v1538_v4  ;;  %v1052_v55 = vpop.f32.mrf.mxu2 }
 0x1c8   : > { %v1361_v33 = vpop.f32.mrf.mxu3  ;;  %v744_v56 = vpop.f32.mrf.mxu1 }
 0x1c9   : > { %v1877_v15 = vsel %vm1539_vm3, %v1811_v8, 0.0  ;;  %v1920_v19 = vmul.f32 %v1811_v8, %v1538_v4 }
 0x1ca   : > { %v1878_v20 = vadd.f32 %v1877_v15, %v1876_v61 }
 0x1cb   : > { %v573_v25 = vpop.f32.mrf.mxu0  ;;  %v1986_v57 = vsel %vm1539_vm3, %v1920_v19, 0.0 }
 0x1cc   : > { %v1879_v21 = vrot.slane %v1878_v20, 4  ;;  %v1987_v13 = vadd.f32 %v1986_v57, %v1985_v59 }
 0x1ce   : > { %v1880_v23 = vadd.f32 %v1879_v21, %v1878_v20  ;;  %v1988_v24 = vrot.slane %v1987_v13, 4 }
 0x1cf   : > { %v1054_v26 = vpop.f32.mrf.mxu2 }
 0x1d0   : > { %v1881_v44 = vrot.slane %v1880_v23, 2  ;;  %v1989_v27 = vadd.f32 %v1988_v24, %v1987_v13  ;;  %v1363_v62 = vpop.f32.mrf.mxu3  ;;  %v745_v28 = vpop.f32.mrf.mxu1 }
 0x1d2   : > { %v1882_v30 = vadd.f32 %v1881_v44, %v1880_v23  ;;  %v1990_v31 = vrot.slane %v1989_v27, 2 }
 0x1d3   : > { %v574_v22 = vpop.f32.mrf.mxu0 }
 0x1d4   : > { %v1883_v29 = vrot.slane %v1882_v30, 1  ;;  %v1991_v39 = vadd.f32 %v1990_v31, %v1989_v27 }
 0x1d6   : > { %v1884_v40 = vadd.f32 %v1883_v29, %v1882_v30  ;;  %v1992_v32 = vrot.slane %v1991_v39, 1 }
 0x1d7   : > { %v1055_v17 = vpop.f32.mrf.mxu2 }
 0x1d8   : > { %1886 = vst.msk [vmem:[%s238_s15] sm:$0x1] %vm1885_vm4, %v1884_v40  ;;  %v1993_v11 = vadd.f32 %v1992_v32, %v1991_v39  ;;  %v1364_v18 = vpop.f32.mrf.mxu3 }
 0x1da   : > { %1994 = vst.msk [vmem:[%s241_s20] sm:$0x1] %vm1885_vm4, %v1993_v11 }
 0x1db PF: > { %s16_s18 = sadd.s32 1, %s2408_s18  }
 0x1dc   : > { %p13_p4 = scmp.ge.s32.totalorder %s16_s18, 4  }
 0x1de   :  { %15 = sbr.rel (!%p13_p4) target bundleno = 1 (0x1), region = 89 }

// kernel: d_forward.7
= control target key start
LH: loop header
LB: loop body
LE: loop exit
PB: predicated region body
PF: predicated region fallthrough
CT: control target
= control target key end

     0   :  { %s1384_s18 = smov 0   ;;  %s1640_s0 = inlined_call_operand.vmem [shape: bf16[2,90,128], index: 0, kind: input, shape index: {}]   ;;  %s1641_s1 = inlined_call_operand.vmem [shape: bf16[4,128,64], index: 1, kind: input, shape index: {}]   ;;  %s1642_s2 = inlined_call_operand.vmem [shape: f32[72,1], index: 2, kind: input, shape index: {}]   ;;  %s1643_s3 = inlined_call_operand.vmem [shape: f32[2,72,64], index: 3, kind: output, shape index: {0}]   ;;  %s1644_s4 = inlined_call_operand.vmem [shape: f32[2,1,64], index: 4, kind: output, shape index: {1}]   ;;  %s1645_s5 = inlined_call_operand.vmem [shape: f32[2,1,64], index: 5, kind: output, shape index: {2}]  }
   0x1 LB: > { %s1084_s19 = sadd.s32 4294967295, %s1351_s18   ;;  %p1088_p0 = scmp.ge.s32.totalorder %s1351_s18, 1  ;;  %s1351_s18 = sphi %s1384_s18, %s16_s18  }
   0x2   : > { %p192_p1 = scmp.lt.s32.totalorder %s1351_s18, 3 }
   0x4   : > { %p193_p2 = pnand %p1088_p0, %p192_p1 }
   0x5   : > { %p226_p3 = scmp.lt.s32.totalorder (!%p193_p2), %s1084_s19, 1 }
   0x6   : > { %196 = sbr.rel (%p193_p2) target bundleno = 283 (0x11b), region = 32 }
   0xb   : > { %v1314_v0 = vld [vmem:[%s1641_s1 + $0x78] sm:$0xff]  ;;  %v1313_v3 = vld [vmem:[%s1641_s1 + $0x70] sm:$0xff]  ;;  %v1312_v8 = vld [vmem:[%s1641_s1 + $0x68] sm:$0xff]  ;;  %s1647_s19 = smov (!%p226_p3, %s1084_s19), 1  ;;  %v1353_v34 = vmov 0   ;;  %vm511_vm0 = vcmask 1046528  }
   0xc   : > { %v1322_v1 = vld [vmem:[%s1641_s1 + $0xb8] sm:$0xff]  ;;  %464 = vmatpush.bf16.msra.mxu1 %v1314_v0  ;;  %v1321_v4 = vld [vmem:[%s1641_s1 + $0xb0] sm:$0xff]  ;;  %v1320_v9 = vld [vmem:[%s1641_s1 + $0xa8] sm:$0xff]  ;;  %s1331_s26 = smul.u32 48, %s1647_s19  ;;  %1342 = vset.pattern.permute.xlu0 %v1353_v34  ;;  %vm810_vm1 = vcmask 1045504   ;;  %vm848_vm2 = vcmask 523264   ;;  %s238_s20 = scalar_lea.vmem %s1644_s4, %s1647_s19 }
   0xd   : > { %v1330_v2 = vld [vmem:[%s1641_s1 + $0xf8] sm:$0xff]  ;;  %614 = vmatpush.bf16.msra.mxu2 %v1322_v1  ;;  %v1329_v5 = vld [vmem:[%s1641_s1 + $0xf0] sm:$0xff]  ;;  %v1328_v10 = vld [vmem:[%s1641_s1 + $0xe8] sm:$0xff]  ;;  %1343 = vset.pattern.permute.xlu1 %v1353_v34  ;;  %vm944_vm3 = vcmask 516096   ;;  %s241_s23 = scalar_lea.vmem %s1645_s5, %s1647_s19 }
   0xe   : > { %763 = vmatpush.bf16.msra.mxu3 %v1330_v2  ;;  %v1306_v6 = vld [vmem:[%s1641_s1 + $0x38] sm:$0xff]  ;;  %v1305_v7 = vld [vmem:[%s1641_s1 + $0x30] sm:$0xff]  ;;  %v1304_v11 = vld [vmem:[%s1641_s1 + $0x28] sm:$0xff]  ;;  %s1492_s12 = scalar_lea.vmem %s1640_s0, %s1331_s26  ;;  %1344 = vset.pattern.permute.xlu2 %v1353_v34 }
   0xf   : > { %354 = vmatpush.bf16.msra.mxu0 %v1306_v6  ;;  %v1311_v12 = vld [vmem:[%s1641_s1 + $0x60] sm:$0xff]  ;;  %v1310_v16 = vld [vmem:[%s1641_s1 + $0x58] sm:$0xff]  ;;  %v1309_v20 = vld [vmem:[%s1641_s1 + $0x50] sm:$0xff] }
  0x10   : > { %465 = vmatpush.bf16.msra.mxu1 %v1313_v3  ;;  %v1319_v13 = vld [vmem:[%s1641_s1 + $0xa0] sm:$0xff]  ;;  %v1318_v17 = vld [vmem:[%s1641_s1 + $0x98] sm:$0xff]  ;;  %v1317_v21 = vld [vmem:[%s1641_s1 + $0x90] sm:$0xff] }
  0x11   : > { %615 = vmatpush.bf16.msra.mxu2 %v1321_v4  ;;  %v1327_v14 = vld [vmem:[%s1641_s1 + $0xe0] sm:$0xff]  ;;  %v1326_v18 = vld [vmem:[%s1641_s1 + $0xd8] sm:$0xff]  ;;  %v1325_v22 = vld [vmem:[%s1641_s1 + $0xd0] sm:$0xff] }
  0x12   : > { %764 = vmatpush.bf16.msra.mxu3 %v1329_v5  ;;  %v1303_v15 = vld [vmem:[%s1641_s1 + $0x20] sm:$0xff]  ;;  %v1302_v19 = vld [vmem:[%s1641_s1 + $0x18] sm:$0xff]  ;;  %v1301_v23 = vld [vmem:[%s1641_s1 + $0x10] sm:$0xff] }
  0x13   : > { %355 = vmatpush.bf16.msra.mxu0 %v1305_v7  ;;  %v1308_v24 = vld [vmem:[%s1641_s1 + $0x48] sm:$0xff]  ;;  %v1307_v28 = vld [vmem:[%s1641_s1 + $0x40] sm:$0xff]  ;;  %v860_v37 = vld [vmem:[%s1642_s2 + $0x10] sm:$0xff] }
  0x14   : > { %466 = vmatpush.bf16.msra.mxu1 %v1312_v8  ;;  %v1316_v25 = vld [vmem:[%s1641_s1 + $0x88] sm:$0xff]  ;;  %v1315_v29 = vld [vmem:[%s1641_s1 + $0x80] sm:$0xff]  ;;  %879 = vperm.xlu1 %1343, %v860_v37   ;;  %v861_v38 = vld [vmem:[%s1642_s2 + $0x18] sm:$0xff] }
  0x15   : > { %616 = vmatpush.bf16.msra.mxu2 %v1320_v9  ;;  %v1324_v26 = vld [vmem:[%s1641_s1 + $0xc8] sm:$0xff]  ;;  %v1323_v30 = vld [vmem:[%s1641_s1 + $0xc0] sm:$0xff]  ;;  %v1295_v39 = vld [vmem:[%s1492_s12 + $0x10] sm:$0xff] }
  0x16   : > { %765 = vmatpush.bf16.msra.mxu3 %v1328_v10  ;;  %v1300_v27 = vld [vmem:[%s1641_s1 + $0x8] sm:$0xff]  ;;  %v1293_v31 = vld [vmem:[%s1492_s12] sm:$0xff]  ;;  %v1296_v40 = vld [vmem:[%s1492_s12 + $0x18] sm:$0xff] }
  0x17   : > { %356 = vmatpush.bf16.msra.mxu0 %v1304_v11  ;;  %v1299_v32 = vld [vmem:[%s1641_s1] sm:$0xff]  ;;  %v859_v35 = vld [vmem:[%s1642_s2 + $0x8] sm:$0xff]  ;;  %v864_v41 = vld [vmem:[%s1642_s2 + $0x30] sm:$0xff] }
  0x18   : > { %467 = vmatpush.bf16.msra.mxu1 %v1311_v12  ;;  %v858_v33 = vld [vmem:[%s1642_s2] sm:$0xff]  ;;  %v1294_v36 = vld [vmem:[%s1492_s12 + $0x8] sm:$0xff]  ;;  %v865_v42 = vld [vmem:[%s1642_s2 + $0x38] sm:$0xff] }
  0x19   : > { %617 = vmatpush.bf16.msra.mxu2 %v1319_v13  ;;  %869 = vperm.xlu0 %1342, %v858_v33   ;;  %v862_v43 = vld [vmem:[%s1642_s2 + $0x20] sm:$0xff]  ;;  %v863_v44 = vld [vmem:[%s1642_s2 + $0x28] sm:$0xff] }
  0x1a   : > { %766 = vmatpush.bf16.msra.mxu3 %v1327_v14  ;;  %889 = vperm.xlu2 %1344, %v862_v43   ;;  %v1297_v45 = vld [vmem:[%s1492_s12 + $0x20] sm:$0xff]  ;;  %v1113_v47 = vld [vmem:[%s1492_s12 + $0x28] sm:$0xf]  ;;  %v1298_v48 = vld [vmem:[%s1492_s12 + $0x28] sm:$0x10]  ;;  %s1332_s12 = smul.u32 72, %s1647_s19 }
  0x1b   : > { %357 = vmatpush.bf16.msra.mxu0 %v1303_v15  ;;  %v866_v46 = vld [vmem:[%s1642_s2 + $0x40] sm:$0xff]  ;;  %v1114_v49 = vor.u32 %v1298_v48, %v1113_v47 }
  0x1c   : > { %468 = vmatpush.bf16.msra.mxu1 %v1310_v16  ;;  %884 = vperm.xlu1 %1343, %v861_v38   ;;  %s1541_s15 = scalar_lea.vmem %s1643_s3, %s1332_s12 }
  0x1d   : > { %618 = vmatpush.bf16.msra.mxu2 %v1318_v17 }
  0x1e   : > { %767 = vmatpush.bf16.msra.mxu3 %v1326_v18 }
  0x1f   : > { %358 = vmatpush.bf16.msra.mxu0 %v1302_v19 }
  0x20   : > { %469 = vmatpush.bf16.msra.mxu1 %v1309_v20 }
  0x21   : > { %619 = vmatpush.bf16.msra.mxu2 %v1317_v21  ;;  %874 = vperm.xlu0 %1342, %v859_v35  }
  0x22   : > { %768 = vmatpush.bf16.msra.mxu3 %v1325_v22  ;;  %894 = vperm.xlu2 %1344, %v863_v44  }
  0x23   : > { %359 = vmatpush.bf16.msra.mxu0 %v1301_v23 }
  0x24   : > { %470 = vmatpush.bf16.msra.mxu1 %v1308_v24  ;;  %904 = vperm.xlu1 %1343, %v865_v42  }
  0x25   : > { %620 = vmatpush.bf16.msra.mxu2 %v1316_v25 }
  0x26   : > { %769 = vmatpush.bf16.msra.mxu3 %v1324_v26 }
  0x27   : > { %360 = vmatpush.bf16.msra.mxu0 %v1300_v27 }
  0x28   : > { %471 = vmatpush.bf16.msra.mxu1 %v1307_v28 }
  0x29   : > { %621 = vmatpush.bf16.msra.mxu2 %v1315_v29  ;;  %899 = vperm.xlu0 %1342, %v864_v41  }
  0x2a   : > { %770 = vmatpush.bf16.msra.mxu3 %v1323_v30  ;;  %909 = vperm.xlu2 %1344, %v866_v46  }
  0x2b   : > { %472 = vmatmul.bf16.vlgmr.msra.gmra.mxu1 %v1293_v31  ;;  %361 = vmatpush.bf16.msra.mxu0 %v1299_v32 }
  0x2c   : > { %622 = vmatmul.bf16.vlgmr.msra.gmra.mxu2 %v1293_v31 }
  0x2d   : > { %771 = vmatmul.bf16.vlgmr.msra.gmra.mxu3 %v1293_v31 }
  0x2e   : > { %362 = vmatmul.bf16.vlgmr.msra.gmra.mxu0 %v1293_v31 }
  0x3b   : > { %477 = vmatmul.bf16.gmra.mxu1 %v1294_v36 }
  0x3c   : > { %626 = vmatmul.bf16.gmra.mxu2 %v1294_v36 }
  0x3d   : > { %775 = vmatmul.bf16.gmra.mxu3 %v1294_v36 }
  0x3e   : > { %367 = vmatmul.bf16.gmra.mxu0 %v1294_v36 }
  0x4b   : > { %482 = vmatmul.bf16.gmra.mxu1 %v1295_v39 }
  0x4c   : > { %631 = vmatmul.bf16.gmra.mxu2 %v1295_v39 }
  0x4d   : > { %780 = vmatmul.bf16.gmra.mxu3 %v1295_v39 }
  0x4e   : > { %372 = vmatmul.bf16.gmra.mxu0 %v1295_v39 }
  0x5b   : > { %487 = vmatmul.bf16.gmra.mxu1 %v1296_v40 }
  0x5c   : > { %636 = vmatmul.bf16.gmra.mxu2 %v1296_v40 }
  0x5d   : > { %785 = vmatmul.bf16.gmra.mxu3 %v1296_v40 }
  0x5e   : > { %377 = vmatmul.bf16.gmra.mxu0 %v1296_v40 }
  0x6b   : > { %492 = vmatmul.bf16.gmra.mxu1 %v1297_v45 }
  0x6c   : > { %641 = vmatmul.bf16.gmra.mxu2 %v1297_v45 }
  0x6d   : > { %790 = vmatmul.bf16.gmra.mxu3 %v1297_v45 }
  0x6e   : > { %382 = vmatmul.bf16.gmra.mxu0 %v1297_v45 }
  0x7b   : > { %497 = vmatmul.bf16.gmra.mxu1 %v1114_v49 }
  0x7c   : > { %646 = vmatmul.bf16.gmra.mxu2 %v1114_v49 }
  0x7d   : > { %795 = vmatmul.bf16.gmra.mxu3 %v1114_v49 }
  0x7e   : > { %386 = vmatmul.bf16.gmra.mxu0 %v1114_v49 }
  0xa8   : > { %v473_v50 = vpop.f32.mrf.mxu1 }
  0xa9   : > { %v512_v59 = vrot.slane %v473_v50, 1 }
  0xab   : > { %v363_v51 = vpop.f32.mrf.mxu0 }
  0xaf   : > { %v623_v52 = vpop.f32.mrf.mxu2 }
  0xb0   : > { %v772_v53 = vpop.f32.mrf.mxu3  ;;  %v475_v54 = vpop.f32.mrf.mxu1 }
  0xb1   : > { %v513_v60 = vrot.slane %v475_v54, 1 }
  0xb3   : > { %v365_v55 = vpop.f32.mrf.mxu0  ;;  %v514_v62 = vsel %vm511_vm0, %v512_v59, %v513_v60 }
  0xb4   : > { %v540_v3 = vadd.f32 %v514_v62, %v363_v51 }
  0xb7   : > { %v624_v56 = vpop.f32.mrf.mxu2 }
  0xb8   : > { %v773_v57 = vpop.f32.mrf.mxu3  ;;  %v478_v58 = vpop.f32.mrf.mxu1  ;;  %v661_v0 = vrot.slane %v624_v56, 1 }
  0xb9   : > { %v811_v6 = vrot.slane %v773_v57, 2  ;;  %v515_v7 = vrot.slane %v478_v58, 1 }
  0xbb   : > { %v368_v61 = vpop.f32.mrf.mxu0  ;;  %v516_v13 = vsel %vm511_vm0, %v513_v60, %v515_v7 }
  0xbc   : > { %v541_v17 = vadd.f32 %v516_v13, %v365_v55 }
  0xbf   : > { %v627_v63 = vpop.f32.mrf.mxu2 }
  0xc0   : > { %v662_v1 = vrot.slane %v627_v63, 1  ;;  %v776_v2 = vpop.f32.mrf.mxu3  ;;  %v480_v5 = vpop.f32.mrf.mxu1 }
  0xc1   : > { %v812_v4 = vrot.slane %v776_v2, 2  ;;  %v517_v20 = vrot.slane %v480_v5, 1  ;;  %v870_v63 = vpop.permute.xlu0 %869 }
  0xc2   : > { %v663_v8 = vsel %vm511_vm0, %v661_v0, %v662_v1 }
  0xc3   : > { %v689_v9 = vadd.f32 %v663_v8, %v540_v3  ;;  %v813_v10 = vsel %vm810_vm1, %v811_v6, %v812_v4  ;;  %v370_v12 = vpop.f32.mrf.mxu0  ;;  %v518_v26 = vsel %vm511_vm0, %v515_v7, %v517_v20 }
  0xc4   : > { %v542_v30 = vadd.f32 %v518_v26, %v368_v61 }
  0xc5   : > { %v1543_v11 = vadd.f32 %v813_v10, %v689_v9  ;;  %v880_v9 = vpop.permute.xlu1 %879 }
  0xc7   : > { %849 = vst.msk [vmem:[%s1541_s15] sm:$0xff] %vm848_vm2, %v1543_v11  ;;  %v629_v14 = vpop.f32.mrf.mxu2 }
  0xc8   : > { %v664_v15 = vrot.slane %v629_v14, 1  ;;  %v778_v16 = vpop.f32.mrf.mxu3  ;;  %v483_v19 = vpop.f32.mrf.mxu1 }
  0xc9   : > { %v814_v18 = vrot.slane %v778_v16, 2  ;;  %v519_v33 = vrot.slane %v483_v19, 1  ;;  %v875_v19 = vpop.permute.xlu0 %874 }
  0xca   : > { %v665_v21 = vsel %vm511_vm0, %v662_v1, %v664_v15 }
  0xcb   : > { %v690_v22 = vadd.f32 %v665_v21, %v541_v17  ;;  %v815_v23 = vsel %vm810_vm1, %v812_v4, %v814_v18  ;;  %v373_v25 = vpop.f32.mrf.mxu0  ;;  %v520_v39 = vsel %vm511_vm0, %v517_v20, %v519_v33 }
  0xcc   : > { %v543_v43 = vadd.f32 %v520_v39, %v370_v12 }
  0xcd   : > { %v1551_v24 = vadd.f32 %v815_v23, %v690_v22 }
  0xcf   : > { %850 = vst.msk [vmem:[%s1541_s15 + $0x8] sm:$0xff] %vm848_vm2, %v1551_v24  ;;  %v632_v27 = vpop.f32.mrf.mxu2 }
  0xd0   : > { %v666_v28 = vrot.slane %v632_v27, 1  ;;  %v781_v29 = vpop.f32.mrf.mxu3  ;;  %v485_v32 = vpop.f32.mrf.mxu1  ;;  %v913_v27 = vmul.f32 %v875_v19, %v1551_v24 }
  0xd1   : > { %v816_v31 = vrot.slane %v781_v29, 2  ;;  %v521_v46 = vrot.slane %v485_v32, 1  ;;  %v885_v32 = vpop.permute.xlu1 %884 }
  0xd2   : > { %v667_v34 = vsel %vm511_vm0, %v664_v15, %v666_v28 }
  0xd3   : > { %v691_v35 = vadd.f32 %v667_v34, %v542_v30  ;;  %v817_v36 = vsel %vm810_vm1, %v814_v18, %v816_v31  ;;  %v375_v38 = vpop.f32.mrf.mxu0  ;;  %v522_v52 = vsel %vm511_vm0, %v519_v33, %v521_v46  ;;  %v890_v18 = vpop.permute.xlu2 %889 }
  0xd4   : > { %v544_v56 = vadd.f32 %v522_v52, %v373_v25 }
  0xd5   : > { %v1559_v37 = vadd.f32 %v817_v36, %v691_v35 }
  0xd7   : > { %851 = vst.msk [vmem:[%s1541_s15 + $0x10] sm:$0xff] %vm848_vm2, %v1559_v37  ;;  %v634_v40 = vpop.f32.mrf.mxu2  ;;  %v914_v34 = vmul.f32 %v880_v9, %v1559_v37 }
  0xd8   : > { %v668_v41 = vrot.slane %v634_v40, 1  ;;  %v783_v42 = vpop.f32.mrf.mxu3  ;;  %v488_v45 = vpop.f32.mrf.mxu1 }
  0xd9   : > { %v818_v44 = vrot.slane %v783_v42, 2  ;;  %v523_v59 = vrot.slane %v488_v45, 1 }
  0xda   : > { %v669_v47 = vsel %vm511_vm0, %v666_v28, %v668_v41 }
  0xdb   : > { %v692_v48 = vadd.f32 %v669_v47, %v543_v43  ;;  %v819_v49 = vsel %vm810_vm1, %v816_v31, %v818_v44  ;;  %v378_v51 = vpop.f32.mrf.mxu0  ;;  %v524_v2 = vsel %vm511_vm0, %v521_v46, %v523_v59  ;;  %v912_v31 = vmul.f32 %v870_v63, %v1543_v11 }
  0xdc   : > { %v545_v6 = vadd.f32 %v524_v2, %v375_v38  ;;  %v947_v38 = vmul.f32 %v913_v27, %v1551_v24  ;;  %v922_v47 = vsel %vm848_vm2, %v913_v27, 0.0 }
  0xdd   : > { %v1567_v50 = vadd.f32 %v819_v49, %v692_v48  ;;  %v946_v42 = vmul.f32 %v912_v31, %v1543_v11  ;;  %v948_v48 = vmul.f32 %v914_v34, %v1559_v37  ;;  %v921_v52 = vsel %vm848_vm2, %v912_v31, 0.0 }
  0xde   : > { %v924_v11 = vsel %vm848_vm2, %v914_v34, 0.0 }
  0xdf   : > { %852 = vst.msk [vmem:[%s1541_s15 + $0x18] sm:$0xff] %vm848_vm2, %v1567_v50  ;;  %v637_v53 = vpop.f32.mrf.mxu2  ;;  %v915_v40 = vmul.f32 %v885_v32, %v1567_v50  ;;  %v958_v63 = vsel %vm848_vm2, %v948_v48, 0.0 }
  0xe0   : > { %v670_v54 = vrot.slane %v637_v53, 1  ;;  %v786_v55 = vpop.f32.mrf.mxu3  ;;  %v490_v58 = vpop.f32.mrf.mxu1  ;;  %v956_v53 = vsel %vm848_vm2, %v947_v38, 0.0 }
  0xe1   : > { %v820_v57 = vrot.slane %v786_v55, 2  ;;  %v525_v10 = vrot.slane %v490_v58, 1 }
  0xe2   : > { %v671_v60 = vsel %vm511_vm0, %v668_v41, %v670_v54 }
  0xe3   : > { %v693_v61 = vadd.f32 %v671_v60, %v544_v56  ;;  %v821_v62 = vsel %vm810_vm1, %v818_v44, %v820_v57  ;;  %v380_v1 = vpop.f32.mrf.mxu0  ;;  %v526_v17 = vsel %vm511_vm0, %v523_v59, %v525_v10  ;;  %v895_v44 = vpop.permute.xlu2 %894  ;;  %v949_v56 = vmul.f32 %v915_v40, %v1567_v50 }
  0xe4   : > { %v546_v23 = vadd.f32 %v526_v17, %v378_v51  ;;  %v955_v59 = vsel %vm848_vm2, %v946_v42, 0.0  ;;  %v923_v60 = vadd.f32 %v922_v47, %v921_v52  ;;  %v905_v50 = vpop.permute.xlu1 %904 }
  0xe5   : > { %v843_v0 = vadd.f32 %v821_v62, %v693_v61  ;;  %v900_v61 = vpop.permute.xlu0 %899 }
  0xe7   : > { %853 = vst.msk [vmem:[%s1541_s15 + $0x20] sm:$0xff] %vm848_vm2, %v843_v0  ;;  %v639_v3 = vpop.f32.mrf.mxu2  ;;  %v916_v43 = vmul.f32 %v890_v18, %v843_v0 }
  0xe8   : > { %v672_v4 = vrot.slane %v639_v3, 1  ;;  %v788_v5 = vpop.f32.mrf.mxu3  ;;  %v1578_v8 = vpop.f32.mrf.mxu1 }
  0xe9   : > { %v822_v7 = vrot.slane %v788_v5, 2  ;;  %v527_v28 = vrot.slane %v1578_v8, 1  ;;  %v950_v37 = vmul.f32 %v916_v43, %v843_v0  ;;  %v957_v5 = vadd.f32 %v956_v53, %v955_v59 }
  0xea   : > { %v673_v12 = vsel %vm511_vm0, %v670_v54, %v672_v4  ;;  %v960_v8 = vsel %vm848_vm2, %v949_v56, 0.0  ;;  %v928_v9 = vsel %vm848_vm2, %v916_v43, 0.0 }
  0xeb   : > { %v694_v13 = vadd.f32 %v673_v12, %v545_v6  ;;  %v823_v14 = vsel %vm810_vm1, %v820_v57, %v822_v7  ;;  %v1582_v16 = vpop.f32.mrf.mxu0  ;;  %v528_v39 = vsel %vm511_vm0, %v525_v10, %v527_v28  ;;  %v925_v6 = vadd.f32 %v924_v11, %v923_v60 }
  0xec   : > { %v547_v49 = vadd.f32 %v528_v39, %v380_v1  ;;  %v926_v1 = vsel %vm848_vm2, %v915_v40, 0.0  ;;  %v962_v17 = vsel %vm848_vm2, %v950_v37, 0.0 }
  0xed   : > { %v844_v15 = vadd.f32 %v823_v14, %v694_v13  ;;  %v959_v13 = vadd.f32 %v958_v63, %v957_v5  ;;  %v927_v14 = vadd.f32 %v926_v1, %v925_v6 }
  0xef   : > { %854 = vst.msk [vmem:[%s1541_s15 + $0x28] sm:$0xff] %vm848_vm2, %v844_v15  ;;  %v642_v20 = vpop.f32.mrf.mxu2  ;;  %v917_v57 = vmul.f32 %v895_v44, %v844_v15  ;;  %v929_v27 = vadd.f32 %v928_v9, %v927_v14 }
  0xf0   : > { %v674_v21 = vrot.slane %v642_v20, 1  ;;  %v791_v22 = vpop.f32.mrf.mxu3  ;;  %v495_v26 = vpop.f32.mrf.mxu1 }
  0xf1   : > { %v824_v25 = vrot.slane %v791_v22, 2  ;;  %v529_v54 = vrot.slane %v495_v26, 1  ;;  %v951_v0 = vmul.f32 %v917_v57, %v844_v15  ;;  %v930_v20 = vsel %vm848_vm2, %v917_v57, 0.0 }
  0xf2   : > { %v675_v29 = vsel %vm511_vm0, %v672_v4, %v674_v21  ;;  %v961_v26 = vadd.f32 %v960_v8, %v959_v13 }
  0xf3   : > { %v695_v30 = vadd.f32 %v675_v29, %v546_v23  ;;  %v825_v33 = vsel %vm810_vm1, %v822_v7, %v824_v25  ;;  %v385_v36 = vpop.f32.mrf.mxu0  ;;  %v530_v7 = vsel %vm511_vm0, %v527_v28, %v529_v54  ;;  %v964_v28 = vsel %vm848_vm2, %v951_v0, 0.0 }
  0xf4   : > { %v548_v22 = vadd.f32 %v530_v7, %v1582_v16  ;;  %v963_v32 = vadd.f32 %v962_v17, %v961_v26 }
  0xf5   : > { %v845_v35 = vadd.f32 %v825_v33, %v695_v30  ;;  %v931_v33 = vadd.f32 %v930_v20, %v929_v27 }
  0xf6   : > { %v965_v39 = vadd.f32 %v964_v28, %v963_v32 }
  0xf7   : > { %855 = vst.msk [vmem:[%s1541_s15 + $0x30] sm:$0xff] %vm848_vm2, %v845_v35  ;;  %v644_v41 = vpop.f32.mrf.mxu2  ;;  %v918_v2 = vmul.f32 %v900_v61, %v845_v35 }
  0xf8   : > { %v676_v45 = vrot.slane %v644_v41, 1  ;;  %v793_v46 = vpop.f32.mrf.mxu3  ;;  %v498_v24 = vpop.f32.mrf.mxu1 }
  0xf9   : > { %v826_v51 = vrot.slane %v793_v46, 2  ;;  %v932_v29 = vsel %vm848_vm2, %v918_v2, 0.0  ;;  %v910_v41 = vpop.permute.xlu2 %909 }
  0xfa   : > { %v677_v55 = vsel %vm511_vm0, %v674_v21, %v676_v45  ;;  %v952_v21 = vmul.f32 %v918_v2, %v845_v35  ;;  %v933_v40 = vadd.f32 %v932_v29, %v931_v33 }
  0xfb   : > { %v696_v58 = vadd.f32 %v677_v55, %v547_v49  ;;  %v827_v62 = vsel %vm810_vm1, %v824_v25, %v826_v51  ;;  %v387_v4 = vpop.f32.mrf.mxu0 }
  0xfc   : > { %v966_v35 = vsel %vm848_vm2, %v952_v21, 0.0 }
  0xfd   : > { %v846_v3 = vadd.f32 %v827_v62, %v696_v58 }
  0xff   : > { %856 = vst.msk [vmem:[%s1541_s15 + $0x38] sm:$0xff] %vm848_vm2, %v846_v3  ;;  %v919_v10 = vmul.f32 %v905_v50, %v846_v3  ;;  %v647_v12 = vpop.f32.mrf.mxu2 }
 0x100   : > { %v678_v18 = vrot.slane %v647_v12, 1  ;;  %v796_v19 = vpop.f32.mrf.mxu3  ;;  %v499_v25 = vpop.f32.mrf.mxu1 }
 0x101   : > { %v828_v23 = vrot.slane %v796_v19, 2  ;;  %v953_v30 = vmul.f32 %v919_v10, %v846_v3  ;;  %v934_v16 = vsel %vm848_vm2, %v919_v10, 0.0 }
 0x102   : > { %v679_v15 = vsel %vm511_vm0, %v676_v45, %v678_v18  ;;  %v967_v45 = vadd.f32 %v966_v35, %v965_v39  ;;  %v935_v46 = vadd.f32 %v934_v16, %v933_v40 }
 0x103   : > { %v697_v31 = vadd.f32 %v679_v15, %v548_v22  ;;  %v829_v34 = vsel %vm810_vm1, %v826_v51, %v828_v23  ;;  %v388_v38 = vpop.f32.mrf.mxu0  ;;  %v968_v42 = vsel %vm848_vm2, %v953_v30, 0.0 }
 0x104   : > { %v969_v51 = vadd.f32 %v968_v42, %v967_v45 }
 0x105   : > { %v847_v36 = vadd.f32 %v829_v34, %v697_v31 }
 0x107   : > { %857 = vst.msk [vmem:[%s1541_s15 + $0x40] sm:$0xff] %vm848_vm2, %v847_v36  ;;  %v920_v43 = vmul.f32 %v910_v41, %v847_v36  ;;  %v649_v44 = vpop.f32.mrf.mxu2 }
 0x108   : > { %v798_v47 = vpop.f32.mrf.mxu3 }
 0x109   : > { %v936_v48 = vsel %vm848_vm2, %v920_v43, 0.0  ;;  %v954_v49 = vmul.f32 %v920_v43, %v847_v36 }
 0x10a   : > { %v937_v24 = vadd.f32 %v936_v48, %v935_v46 }
 0x10b   : > { %v970_v52 = vsel %vm848_vm2, %v954_v49, 0.0 }
 0x10c   : > { %v938_v53 = vrot.slane %v937_v24, 4  ;;  %v971_v54 = vadd.f32 %v970_v52, %v969_v51 }
 0x10e   : > { %v939_v55 = vadd.f32 %v938_v53, %v937_v24  ;;  %v972_v11 = vrot.slane %v971_v54, 4 }
 0x110   : > { %v940_v56 = vrot.slane %v939_v55, 2  ;;  %v973_v57 = vadd.f32 %v972_v11, %v971_v54 }
 0x112   : > { %v941_v58 = vadd.f32 %v940_v56, %v939_v55  ;;  %v974_v59 = vrot.slane %v973_v57, 2 }
 0x114   : > { %v942_v60 = vrot.slane %v941_v58, 1  ;;  %v975_v37 = vadd.f32 %v974_v59, %v973_v57 }
 0x116   : > { %v943_v61 = vadd.f32 %v942_v60, %v941_v58  ;;  %v976_v62 = vrot.slane %v975_v37, 1 }
 0x118   : > { %945 = vst.msk [vmem:[%s238_s20] sm:$0x1] %vm944_vm3, %v943_v61  ;;  %v977_v63 = vadd.f32 %v976_v62, %v975_v37 }
 0x11a   : > { %978 = vst.msk [vmem:[%s241_s23] sm:$0x1] %vm944_vm3, %v977_v63 }
 0x11b PF: > { %s16_s18 = sadd.s32 1, %s1351_s18  }
 0x11c   : > { %p13_p4 = scmp.ge.s32.totalorder %s16_s18, 4  }
 0x11e   :  { %15 = sbr.rel (!%p13_p4) target bundleno = 1 (0x1), region = 89 }

// kernel: d_forward.8
= control target key start
LH: loop header
LB: loop body
LE: loop exit
PB: predicated region body
PF: predicated region fallthrough
CT: control target
= control target key end

     0   :  { %s1634_s18 = smov 0   ;;  %s1909_s0 = inlined_call_operand.vmem [shape: bf16[2,30,256], index: 0, kind: input, shape index: {}]   ;;  %s1910_s1 = inlined_call_operand.vmem [shape: bf16[4,256,128], index: 1, kind: input, shape index: {}]   ;;  %s1911_s2 = inlined_call_operand.vmem [shape: f32[20,1], index: 2, kind: input, shape index: {}]   ;;  %s1912_s3 = inlined_call_operand.vmem [shape: f32[2,20,128], index: 3, kind: output, shape index: {0}]   ;;  %s1913_s4 = inlined_call_operand.vmem [shape: f32[2,1,128], index: 4, kind: output, shape index: {1}]   ;;  %s1914_s5 = inlined_call_operand.vmem [shape: f32[2,1,128], index: 5, kind: output, shape index: {2}]  }
   0x1 LB: > { %s1136_s19 = sadd.s32 4294967295, %s1601_s18   ;;  %p1140_p0 = scmp.ge.s32.totalorder %s1601_s18, 1  ;;  %s1601_s18 = sphi %s1634_s18, %s16_s18  }
   0x2   : > { %p192_p1 = scmp.lt.s32.totalorder %s1601_s18, 3 }
   0x4   : > { %p193_p2 = pnand %p1140_p0, %p192_p1 }
   0x5   : > { %p226_p3 = scmp.lt.s32.totalorder (!%p193_p2), %s1136_s19, 1 }
   0x6   : > { %196 = sbr.rel (%p193_p2) target bundleno = 261 (0x105), region = 32 }
   0xb   : > { %v1526_v0 = vld [vmem:[%s1910_s1 + $0x38] sm:$0xff]  ;;  %v1525_v4 = vld [vmem:[%s1910_s1 + $0x30] sm:$0xff]  ;;  %v1524_v8 = vld [vmem:[%s1910_s1 + $0x28] sm:$0xff]  ;;  %s1916_s19 = smov (!%p226_p3, %s1136_s19), 1  ;;  %vm601_vm0 = vcmask 1046528   ;;  %vm784_vm1 = vcmask 1042432  }
   0xc   : > { %v1534_v1 = vld [vmem:[%s1910_s1 + $0x78] sm:$0xff]  ;;  %394 = vmatpush.bf16.msra.mxu0 %v1526_v0  ;;  %v1533_v5 = vld [vmem:[%s1910_s1 + $0x70] sm:$0xff]  ;;  %v1532_v9 = vld [vmem:[%s1910_s1 + $0x68] sm:$0xff]  ;;  %s1514_s22 = sshll.u32 %s1916_s19, 5  ;;  %s1583_s21 = smul.u32 24, %s1916_s19  ;;  %vm969_vm2 = vcmask 1041408  }
   0xd   : > { %v1542_v2 = vld [vmem:[%s1910_s1 + $0xb8] sm:$0xff]  ;;  %412 = vmatpush.bf16.msra.mxu1 %v1534_v1  ;;  %v1541_v6 = vld [vmem:[%s1910_s1 + $0xb0] sm:$0xff]  ;;  %v1540_v10 = vld [vmem:[%s1910_s1 + $0xa8] sm:$0xff]  ;;  %s1730_s29 = scalar_lea.vmem %s1909_s0, %s1514_s22  ;;  %vm1008_vm3 = vcmask 1043456   ;;  %s238_s27 = scalar_lea.vmem %s1913_s4, %s1916_s19 }
   0xe   : > { %v1550_v3 = vld [vmem:[%s1910_s1 + $0xf8] sm:$0xff]  ;;  %562 = vmatpush.bf16.msra.mxu2 %v1542_v2  ;;  %v1549_v7 = vld [vmem:[%s1910_s1 + $0xf0] sm:$0xff]  ;;  %v1548_v11 = vld [vmem:[%s1910_s1 + $0xe8] sm:$0xff]  ;;  %s1886_s24 = scalar_lea.vmem %s1912_s3, %s1583_s21  ;;  %s241_s6 = scalar_lea.vmem %s1914_s5, %s1916_s19 }
   0xf   : > { %580 = vmatpush.bf16.msra.mxu3 %v1550_v3  ;;  %v1523_v12 = vld [vmem:[%s1910_s1 + $0x20] sm:$0xff]  ;;  %v1522_v16 = vld [vmem:[%s1910_s1 + $0x18] sm:$0xff]  ;;  %v1521_v20 = vld [vmem:[%s1910_s1 + $0x10] sm:$0xff] }
  0x10   : > { %395 = vmatpush.bf16.msra.mxu0 %v1525_v4  ;;  %v1531_v13 = vld [vmem:[%s1910_s1 + $0x60] sm:$0xff]  ;;  %v1530_v17 = vld [vmem:[%s1910_s1 + $0x58] sm:$0xff]  ;;  %v1529_v21 = vld [vmem:[%s1910_s1 + $0x50] sm:$0xff] }
  0x11   : > { %413 = vmatpush.bf16.msra.mxu1 %v1533_v5  ;;  %v1539_v14 = vld [vmem:[%s1910_s1 + $0xa0] sm:$0xff]  ;;  %v1538_v18 = vld [vmem:[%s1910_s1 + $0x98] sm:$0xff]  ;;  %v1537_v22 = vld [vmem:[%s1910_s1 + $0x90] sm:$0xff] }
  0x12   : > { %563 = vmatpush.bf16.msra.mxu2 %v1541_v6  ;;  %v1547_v15 = vld [vmem:[%s1910_s1 + $0xe0] sm:$0xff]  ;;  %v1546_v19 = vld [vmem:[%s1910_s1 + $0xd8] sm:$0xff]  ;;  %v1545_v23 = vld [vmem:[%s1910_s1 + $0xd0] sm:$0xff] }
  0x13   : > { %581 = vmatpush.bf16.msra.mxu3 %v1549_v7  ;;  %v1520_v24 = vld [vmem:[%s1910_s1 + $0x8] sm:$0xff]  ;;  %v1519_v28 = vld [vmem:[%s1910_s1] sm:$0xff]  ;;  %v1574_v36 = vld [vmem:[%s1910_s1 + $0x1b8] sm:$0xff] }
  0x14   : > { %396 = vmatpush.bf16.msra.mxu0 %v1524_v8  ;;  %v1528_v25 = vld [vmem:[%s1910_s1 + $0x48] sm:$0xff]  ;;  %v1527_v29 = vld [vmem:[%s1910_s1 + $0x40] sm:$0xff]  ;;  %v1582_v37 = vld [vmem:[%s1910_s1 + $0x1f8] sm:$0xff]  ;;  %v1603_v8 = vmov 0  }
  0x15   : > { %414 = vmatpush.bf16.msra.mxu1 %v1532_v9  ;;  %v1536_v26 = vld [vmem:[%s1910_s1 + $0x88] sm:$0xff]  ;;  %v1146_v30 = vld [vmem:[%s1730_s29] sm:$0xf]  ;;  %v1515_v32 = vld [vmem:[%s1730_s29 + $0x4] sm:$0xf]  ;;  %1593 = vset.pattern.permute.xlu0 %v1603_v8 }
  0x16   : > { %564 = vmatpush.bf16.msra.mxu2 %v1540_v10  ;;  %v1544_v27 = vld [vmem:[%s1910_s1 + $0xc8] sm:$0xff]  ;;  %v1535_v34 = vld [vmem:[%s1910_s1 + $0x80] sm:$0xff]  ;;  %v1558_v40 = vld [vmem:[%s1910_s1 + $0x138] sm:$0xff]  ;;  %1594 = vset.pattern.permute.xlu1 %v1603_v8 }
  0x17   : > { %582 = vmatpush.bf16.msra.mxu3 %v1548_v11  ;;  %v1516_v31 = vld [vmem:[%s1730_s29 + $0x4] sm:$0xf0]  ;;  %v1148_v33 = vld [vmem:[%s1730_s29 + $0x8] sm:$0xf0]  ;;  %v1543_v35 = vld [vmem:[%s1910_s1 + $0xc0] sm:$0xff] }
  0x18   : > { %397 = vmatpush.bf16.msra.mxu0 %v1523_v12  ;;  %v1760_v38 = vor.u32 %v1516_v31, %v1146_v30  ;;  %v1762_v39 = vor.u32 %v1515_v32, %v1148_v33  ;;  %v1566_v41 = vld [vmem:[%s1910_s1 + $0x178] sm:$0xff]  ;;  %v1573_v42 = vld [vmem:[%s1910_s1 + $0x1b0] sm:$0xff]  ;;  %v1572_v46 = vld [vmem:[%s1910_s1 + $0x1a8] sm:$0xff] }
  0x19   : > { %415 = vmatpush.bf16.msra.mxu1 %v1531_v13  ;;  %v1581_v43 = vld [vmem:[%s1910_s1 + $0x1f0] sm:$0xff]  ;;  %v1580_v47 = vld [vmem:[%s1910_s1 + $0x1e8] sm:$0xff]  ;;  %v1571_v50 = vld [vmem:[%s1910_s1 + $0x1a0] sm:$0xff] }
  0x1a   : > { %565 = vmatpush.bf16.msra.mxu2 %v1539_v14  ;;  %v1557_v44 = vld [vmem:[%s1910_s1 + $0x130] sm:$0xff]  ;;  %v1556_v48 = vld [vmem:[%s1910_s1 + $0x128] sm:$0xff]  ;;  %v1579_v51 = vld [vmem:[%s1910_s1 + $0x1e0] sm:$0xff] }
  0x1b   : > { %583 = vmatpush.bf16.msra.mxu3 %v1547_v15  ;;  %v1565_v45 = vld [vmem:[%s1910_s1 + $0x170] sm:$0xff]  ;;  %v1564_v49 = vld [vmem:[%s1910_s1 + $0x168] sm:$0xff]  ;;  %v1518_v53 = vld [vmem:[%s1730_s29 + $0x14] sm:$0x70] }
  0x1c   : > { %398 = vmatpush.bf16.msra.mxu0 %v1522_v16  ;;  %v1154_v52 = vld [vmem:[%s1730_s29 + $0x10] sm:$0xf]  ;;  %v1517_v54 = vld [vmem:[%s1730_s29 + $0x14] sm:$0xf]  ;;  %v1156_v55 = vld [vmem:[%s1730_s29 + $0x18] sm:$0x70] }
  0x1d   : > { %416 = vmatpush.bf16.msra.mxu1 %v1530_v17  ;;  %v1555_v56 = vld [vmem:[%s1910_s1 + $0x120] sm:$0xff]  ;;  %v1570_v58 = vld [vmem:[%s1910_s1 + $0x198] sm:$0xff]  ;;  %v1155_v60 = vor.u32 %v1518_v53, %v1154_v52  ;;  %v1159_v61 = vor.u32 %v1517_v54, %v1156_v55  ;;  %v1569_v0 = vld [vmem:[%s1910_s1 + $0x190] sm:$0xff] }
  0x1e   : > { %566 = vmatpush.bf16.msra.mxu2 %v1538_v18  ;;  %v1563_v57 = vld [vmem:[%s1910_s1 + $0x160] sm:$0xff]  ;;  %v1578_v59 = vld [vmem:[%s1910_s1 + $0x1d8] sm:$0xff]  ;;  %v1577_v1 = vld [vmem:[%s1910_s1 + $0x1d0] sm:$0xff] }
  0x1f   : > { %584 = vmatpush.bf16.msra.mxu3 %v1546_v19  ;;  %v1554_v62 = vld [vmem:[%s1910_s1 + $0x118] sm:$0xff]  ;;  %v1553_v2 = vld [vmem:[%s1910_s1 + $0x110] sm:$0xff]  ;;  %v986_v4 = vld [vmem:[%s1911_s2] sm:$0xff] }
  0x20   : > { %399 = vmatpush.bf16.msra.mxu0 %v1521_v20  ;;  %v1562_v63 = vld [vmem:[%s1910_s1 + $0x158] sm:$0xff]  ;;  %v1561_v3 = vld [vmem:[%s1910_s1 + $0x150] sm:$0xff]  ;;  %v1568_v6 = vld [vmem:[%s1910_s1 + $0x188] sm:$0xff]  ;;  %991 = vperm.xlu0 %1593, %v986_v4  }
  0x21   : > { %417 = vmatpush.bf16.msra.mxu1 %v1529_v21  ;;  %v988_v5 = vld [vmem:[%s1911_s2 + $0x10] sm:$0xf]  ;;  %v1576_v7 = vld [vmem:[%s1910_s1 + $0x1c8] sm:$0xff]  ;;  %v1567_v11 = vld [vmem:[%s1910_s1 + $0x180] sm:$0xff] }
  0x22   : > { %567 = vmatpush.bf16.msra.mxu2 %v1537_v22  ;;  %1001 = vperm.xlu1 %1594, %v988_v5   ;;  %v1552_v9 = vld [vmem:[%s1910_s1 + $0x108] sm:$0xff]  ;;  %v1575_v12 = vld [vmem:[%s1910_s1 + $0x1c0] sm:$0xff] }
  0x23   : > { %585 = vmatpush.bf16.msra.mxu3 %v1545_v23  ;;  %v1560_v10 = vld [vmem:[%s1910_s1 + $0x148] sm:$0xff]  ;;  %v1551_v13 = vld [vmem:[%s1910_s1 + $0x100] sm:$0xff] }
  0x24   : > { %400 = vmatpush.bf16.msra.mxu0 %v1520_v24  ;;  %v1559_v14 = vld [vmem:[%s1910_s1 + $0x140] sm:$0xff]  ;;  %v987_v15 = vld [vmem:[%s1911_s2 + $0x8] sm:$0xff] }
  0x25   : > { %418 = vmatpush.bf16.msra.mxu1 %v1528_v25 }
  0x26   : > { %568 = vmatpush.bf16.msra.mxu2 %v1536_v26 }
  0x27   : > { %586 = vmatpush.bf16.msra.mxu3 %v1544_v27 }
  0x28   : > { %401 = vmatpush.bf16.msra.mxu0 %v1519_v28  ;;  %996 = vperm.xlu0 %1593, %v987_v15  }
  0x29   : > { %419 = vmatpush.bf16.msra.mxu1 %v1527_v29 }
  0x2a   : > { %569 = vmatpush.bf16.msra.mxu2 %v1535_v34 }
  0x2b   : > { %587 = vmatpush.bf16.msra.mxu3 %v1543_v35  ;;  %402 = vmatmul.bf16.vlgmr.msra.gmra.mxu0 %v1760_v38 }
  0x2c   : > { %420 = vmatmul.bf16.vlgmr.msra.gmra.mxu1 %v1762_v39  ;;  %742 = vmatpush.bf16.msrb.mxu0 %v1558_v40 }
  0x2d   : > { %570 = vmatmul.bf16.vlgmr.msra.gmra.mxu2 %v1760_v38  ;;  %761 = vmatpush.bf16.msrb.mxu1 %v1566_v41 }
  0x2e   : > { %927 = vmatpush.bf16.msrb.mxu2 %v1574_v36  ;;  %588 = vmatmul.bf16.vlgmr.msra.gmra.mxu3 %v1762_v39 }
  0x2f   : > { %946 = vmatpush.bf16.msrb.mxu3 %v1582_v37 }
  0x30   : > { %743 = vmatpush.bf16.msrb.mxu0 %v1557_v44 }
  0x31   : > { %762 = vmatpush.bf16.msrb.mxu1 %v1565_v45 }
  0x32   : > { %928 = vmatpush.bf16.msrb.mxu2 %v1573_v42 }
  0x33   : > { %947 = vmatpush.bf16.msrb.mxu3 %v1581_v43 }
  0x34   : > { %744 = vmatpush.bf16.msrb.mxu0 %v1556_v48 }
  0x35   : > { %763 = vmatpush.bf16.msrb.mxu1 %v1564_v49 }
  0x36   : > { %929 = vmatpush.bf16.msrb.mxu2 %v1572_v46 }
  0x37   : > { %948 = vmatpush.bf16.msrb.mxu3 %v1580_v47 }
  0x38   : > { %745 = vmatpush.bf16.msrb.mxu0 %v1555_v56 }
  0x39   : > { %764 = vmatpush.bf16.msrb.mxu1 %v1563_v57 }
  0x3a   : > { %930 = vmatpush.bf16.msrb.mxu2 %v1571_v50 }
  0x3b   : > { %949 = vmatpush.bf16.msrb.mxu3 %v1579_v51  ;;  %407 = vmatmul.bf16.gmra.mxu0 %v1155_v60 }
  0x3c   : > { %425 = vmatmul.bf16.gmra.mxu1 %v1159_v61  ;;  %746 = vmatpush.bf16.msrb.mxu0 %v1554_v62 }
  0x3d   : > { %575 = vmatmul.bf16.gmra.mxu2 %v1155_v60  ;;  %765 = vmatpush.bf16.msrb.mxu1 %v1562_v63 }
  0x3e   : > { %931 = vmatpush.bf16.msrb.mxu2 %v1570_v58  ;;  %593 = vmatmul.bf16.gmra.mxu3 %v1159_v61 }
  0x3f   : > { %950 = vmatpush.bf16.msrb.mxu3 %v1578_v59 }
  0x40   : > { %747 = vmatpush.bf16.msrb.mxu0 %v1553_v2 }
  0x41   : > { %766 = vmatpush.bf16.msrb.mxu1 %v1561_v3 }
  0x42   : > { %932 = vmatpush.bf16.msrb.mxu2 %v1569_v0 }
  0x43   : > { %951 = vmatpush.bf16.msrb.mxu3 %v1577_v1 }
  0x44   : > { %748 = vmatpush.bf16.msrb.mxu0 %v1552_v9 }
  0x45   : > { %767 = vmatpush.bf16.msrb.mxu1 %v1560_v10 }
  0x46   : > { %933 = vmatpush.bf16.msrb.mxu2 %v1568_v6 }
  0x47   : > { %952 = vmatpush.bf16.msrb.mxu3 %v1576_v7 }
  0x48   : > { %749 = vmatpush.bf16.msrb.mxu0 %v1551_v13 }
  0x49   : > { %768 = vmatpush.bf16.msrb.mxu1 %v1559_v14 }
  0x4a   : > { %934 = vmatpush.bf16.msrb.mxu2 %v1567_v11 }
  0x4b   : > { %953 = vmatpush.bf16.msrb.mxu3 %v1575_v12  ;;  %750 = vmatmul.bf16.vlgmr.msrb.gmra.mxu0 %v1760_v38 }
  0x4c   : > { %769 = vmatmul.bf16.vlgmr.msrb.gmra.mxu1 %v1762_v39 }
  0x4d   : > { %935 = vmatmul.bf16.vlgmr.msrb.gmra.mxu2 %v1760_v38 }
  0x4e   : > { %954 = vmatmul.bf16.vlgmr.msrb.gmra.mxu3 %v1762_v39 }
  0x5b   : > { %755 = vmatmul.bf16.gmra.mxu0 %v1155_v60 }
  0x5c   : > { %774 = vmatmul.bf16.gmra.mxu1 %v1159_v61 }
  0x5d   : > { %940 = vmatmul.bf16.gmra.mxu2 %v1155_v60 }
  0x5e   : > { %959 = vmatmul.bf16.gmra.mxu3 %v1159_v61 }
  0x92   : > { %v992_v0 = vpop.permute.xlu0 %991 }
  0xa8   : > { %v403_v16 = vpop.f32.mrf.mxu0 }
  0xa9   : > { %v421_v17 = vpop.f32.mrf.mxu1 }
  0xaa   : > { %v422_v49 = vadd.f32 %v421_v17, %v403_v16  ;;  %v997_v17 = vpop.permute.xlu0 %996 }
  0xb0   : > { %v571_v18 = vpop.f32.mrf.mxu2  ;;  %v405_v20 = vpop.f32.mrf.mxu0 }
  0xb1   : > { %v589_v19 = vpop.f32.mrf.mxu3  ;;  %v423_v21 = vpop.f32.mrf.mxu1 }
  0xb2   : > { %v590_v37 = vadd.f32 %v589_v19, %v571_v18  ;;  %v424_v3 = vadd.f32 %v423_v21, %v405_v20 }
  0xb4   : > { %v602_v43 = vrot.slane %v590_v37, 1 }
  0xb8   : > { %v573_v22 = vpop.f32.mrf.mxu2  ;;  %v1875_v24 = vpop.f32.mrf.mxu0 }
  0xb9   : > { %v591_v23 = vpop.f32.mrf.mxu3  ;;  %v1877_v25 = vpop.f32.mrf.mxu1 }
  0xba   : > { %v592_v34 = vadd.f32 %v591_v23, %v573_v22  ;;  %v427_v18 = vadd.f32 %v1877_v25, %v1875_v24 }
  0xbc   : > { %v603_v41 = vrot.slane %v592_v34, 1 }
  0xbe   : > { %v604_v45 = vsel %vm601_vm0, %v602_v43, %v603_v41 }
  0xbf   : > { %v610_v56 = vadd.f32 %v604_v45, %v422_v49 }
  0xc0   : > { %v576_v26 = vpop.f32.mrf.mxu2  ;;  %v410_v28 = vpop.f32.mrf.mxu0 }
  0xc1   : > { %v594_v27 = vpop.f32.mrf.mxu3  ;;  %v428_v29 = vpop.f32.mrf.mxu1 }
  0xc2   : > { %v595_v46 = vadd.f32 %v594_v27, %v576_v26 }
  0xc4   : > { %v605_v58 = vrot.slane %v595_v46, 1 }
  0xc6   : > { %v606_v2 = vsel %vm601_vm0, %v603_v41, %v605_v58  ;;  %v612_v23 = vadd.f32 %v605_v58, %v427_v18 }
  0xc7   : > { %v611_v10 = vadd.f32 %v606_v2, %v424_v3 }
  0xc8   : > { %v578_v30 = vpop.f32.mrf.mxu2  ;;  %v751_v32 = vpop.f32.mrf.mxu0 }
  0xc9   : > { %v596_v31 = vpop.f32.mrf.mxu3  ;;  %v770_v33 = vpop.f32.mrf.mxu1 }
  0xca   : > { %v771_v42 = vadd.f32 %v770_v33, %v751_v32  ;;  %v1002_v31 = vpop.permute.xlu1 %1001 }
  0xcc   : > { %v785_v47 = vrot.slane %v771_v42, 5 }
  0xd0   : > { %v936_v35 = vpop.f32.mrf.mxu2  ;;  %v753_v38 = vpop.f32.mrf.mxu0 }
  0xd1   : > { %v955_v36 = vpop.f32.mrf.mxu3  ;;  %v772_v39 = vpop.f32.mrf.mxu1 }
  0xd2   : > { %v773_v40 = vadd.f32 %v772_v39, %v753_v38  ;;  %v956_v48 = vadd.f32 %v955_v36, %v936_v35 }
  0xd4   : > { %v786_v44 = vrot.slane %v773_v40, 5  ;;  %v970_v59 = vrot.slane %v956_v48, 6 }
  0xd6   : > { %v787_v52 = vsel %vm784_vm1, %v785_v47, %v786_v44 }
  0xd7   : > { %v795_v61 = vadd.f32 %v787_v52, %v610_v56 }
  0xd8   : > { %v938_v50 = vpop.f32.mrf.mxu2  ;;  %v756_v54 = vpop.f32.mrf.mxu0 }
  0xd9   : > { %v957_v51 = vpop.f32.mrf.mxu3  ;;  %v775_v55 = vpop.f32.mrf.mxu1 }
  0xda   : > { %v958_v53 = vadd.f32 %v957_v51, %v938_v50  ;;  %v776_v57 = vadd.f32 %v775_v55, %v756_v54 }
  0xdc   : > { %v971_v60 = vrot.slane %v958_v53, 6  ;;  %v788_v63 = vrot.slane %v776_v57, 5 }
  0xde   : > { %v972_v62 = vsel %vm969_vm2, %v970_v59, %v971_v60  ;;  %v789_v6 = vsel %vm784_vm1, %v786_v44, %v788_v63 }
  0xdf   : > { %v980_v1 = vadd.f32 %v972_v62, %v795_v61  ;;  %v796_v13 = vadd.f32 %v789_v6, %v611_v10 }
  0xe0   : > { %v941_v4 = vpop.f32.mrf.mxu2  ;;  %v758_v8 = vpop.f32.mrf.mxu0 }
  0xe1   : > { %983 = vst [vmem:[%s1886_s24] sm:$0xff] %v980_v1  ;;  %v960_v5 = vpop.f32.mrf.mxu3  ;;  %v777_v9 = vpop.f32.mrf.mxu1  ;;  %v1004_v29 = vmul.f32 %v992_v0, %v980_v1 }
  0xe2   : > { %v961_v7 = vadd.f32 %v960_v5, %v941_v4  ;;  %v778_v11 = vadd.f32 %v777_v9, %v758_v8 }
  0xe3   : > { %v1018_v25 = vmul.f32 %v1004_v29, %v980_v1 }
  0xe4   : > { %v973_v12 = vrot.slane %v961_v7, 6  ;;  %v790_v15 = vrot.slane %v778_v11, 5 }
  0xe6   : > { %v974_v14 = vsel %vm969_vm2, %v971_v60, %v973_v12  ;;  %v791_v21 = vsel %vm784_vm1, %v788_v63, %v790_v15 }
  0xe7   : > { %v981_v16 = vadd.f32 %v974_v14, %v796_v13  ;;  %v797_v28 = vadd.f32 %v791_v21, %v612_v23 }
  0xe8   : > { %v943_v19 = vpop.f32.mrf.mxu2 }
  0xe9   : > { %984 = vst [vmem:[%s1886_s24 + $0x8] sm:$0xff] %v981_v16  ;;  %v962_v20 = vpop.f32.mrf.mxu3  ;;  %v1005_v26 = vmul.f32 %v997_v17, %v981_v16 }
  0xea   : > { %v963_v22 = vadd.f32 %v962_v20, %v943_v19 }
  0xeb   : > { %v1019_v33 = vmul.f32 %v1005_v26, %v981_v16  ;;  %v1007_v34 = vadd.f32 %v1005_v26, %v1004_v29 }
  0xec   : > { %v975_v27 = vrot.slane %v963_v22, 6 }
  0xed   : > { %v1021_v37 = vadd.f32 %v1019_v33, %v1018_v25 }
  0xee   : > { %v976_v30 = vsel %vm969_vm2, %v973_v12, %v975_v27 }
  0xef   : > { %v982_v32 = vadd.f32 %v976_v30, %v797_v28 }
  0xf1   : > { %985 = vst [vmem:[%s1886_s24 + $0x10] sm:$0xf] %v982_v32  ;;  %v1006_v24 = vmul.f32 %v1002_v31, %v982_v32 }
  0xf3   : > { %v1009_v35 = vsel %vm1008_vm3, %v1006_v24, 0.0  ;;  %v1020_v36 = vmul.f32 %v1006_v24, %v982_v32 }
  0xf4   : > { %v1010_v38 = vadd.f32 %v1009_v35, %v1007_v34 }
  0xf5   : > { %v1022_v39 = vsel %vm1008_vm3, %v1020_v36, 0.0 }
  0xf6   : > { %v1011_v40 = vrot.slane %v1010_v38, 4  ;;  %v1023_v41 = vadd.f32 %v1022_v39, %v1021_v37 }
  0xf8   : > { %v1012_v42 = vadd.f32 %v1011_v40, %v1010_v38  ;;  %v1024_v43 = vrot.slane %v1023_v41, 4 }
  0xfa   : > { %v1013_v44 = vrot.slane %v1012_v42, 2  ;;  %v1025_v45 = vadd.f32 %v1024_v43, %v1023_v41 }
  0xfc   : > { %v1014_v46 = vadd.f32 %v1013_v44, %v1012_v42  ;;  %v1026_v47 = vrot.slane %v1025_v45, 2 }
  0xfe   : > { %v1015_v48 = vrot.slane %v1014_v46, 1  ;;  %v1027_v49 = vadd.f32 %v1026_v47, %v1025_v45 }
 0x100   : > { %v1016_v50 = vadd.f32 %v1015_v48, %v1014_v46  ;;  %v1028_v51 = vrot.slane %v1027_v49, 1 }
 0x102   : > { %1017 = vst [vmem:[%s238_s27] sm:$0x1] %v1016_v50  ;;  %v1029_v52 = vadd.f32 %v1028_v51, %v1027_v49 }
 0x104   : > { %1030 = vst [vmem:[%s241_s6] sm:$0x1] %v1029_v52 }
 0x105 PF: > { %s16_s18 = sadd.s32 1, %s1601_s18  }
 0x106   : > { %p13_p4 = scmp.ge.s32.totalorder %s16_s18, 4  }
 0x108   :  { %15 = sbr.rel (!%p13_p4) target bundleno = 1 (0x1), region = 89 }

// kernel: d_forward.9
= control target key start
LH: loop header
LB: loop body
LE: loop exit
PB: predicated region body
PF: predicated region fallthrough
CT: control target
= control target key end

     0   :  { %s2253_s0 = inlined_call_operand.vmem [shape: f32[2,2560], index: 0, kind: input, shape index: {}]   ;;  %s2254_s1 = inlined_call_operand.vmem [shape: f32[1,2560], index: 1, kind: input, shape index: {}]   ;;  %s2255_s2 = inlined_call_operand.vmem [shape: f32[1,2560], index: 2, kind: input, shape index: {}]   ;;  %s2256_s3 = inlined_call_operand.vmem [shape: f32[2560,16], index: 3, kind: input, shape index: {}]   ;;  %s2257_s4 = inlined_call_operand.vmem [shape: f32[16,1], index: 4, kind: input, shape index: {}]   ;;  %s2258_s5 = inlined_call_operand.<no memory space> [shape: f32[1,1], index: 5, kind: input, shape index: {}]   ;;  %s2259_s6 = inlined_call_operand.vmem [shape: f32[16,16], index: 6, kind: input, shape index: {}]   ;;  %s2260_s7 = inlined_call_operand.vmem [shape: f32[1,16], index: 7, kind: input, shape index: {}]   ;;  %s2261_s8 = inlined_call_operand.vmem [shape: f32[2,1], index: 8, kind: output, shape index: {0}]   ;;  %s2262_s9 = inlined_call_operand.hbm [shape: f32[2,16], index: 9, kind: output, shape index: {1}]  }
   0x1   :  { %v15_v0 = vstv %s2258_s5 }
   0x2   :  { %16 = vst [vmem:[#allocation2] sm:$0x1] %v15_v0 }
   0x3   :  { %v204_v1 = vld [vmem:[%s2256_s3 + $0x78] sm:$0xff]  ;;  %v203_v3 = vld [vmem:[%s2256_s3 + $0x70] sm:$0xff]  ;;  %v202_v7 = vld [vmem:[%s2256_s3 + $0x68] sm:$0xff]  ;;  %vm80_vm0 = vcmask 1041408   ;;  %vm82_vm1 = vcmask 1045508   ;;  %vm84_vm2 = vcmask 1043456  }
   0x4   :  { %v236_v2 = vld [vmem:[%s2256_s3 + $0x178] sm:$0xff]  ;;  %560 = vmatpush.msra.mxu0 %v204_v1  ;;  %v235_v5 = vld [vmem:[%s2256_s3 + $0x170] sm:$0xff]  ;;  %v234_v9 = vld [vmem:[%s2256_s3 + $0x168] sm:$0xff] }
   0x5   :  { %600 = vmatpush.msra.mxu2 %v236_v2  ;;  %v220_v4 = vld [vmem:[%s2256_s3 + $0xf8] sm:$0xff]  ;;  %v219_v8 = vld [vmem:[%s2256_s3 + $0xf0] sm:$0xff]  ;;  %v218_v11 = vld [vmem:[%s2256_s3 + $0xe8] sm:$0xff] }
   0x6   :  { %v252_v6 = vld [vmem:[%s2256_s3 + $0x1f8] sm:$0xff]  ;;  %580 = vmatpush.msra.mxu1 %v220_v4  ;;  %561 = vmatpush.msra.mxu0 %v203_v3  ;;  %v251_v10 = vld [vmem:[%s2256_s3 + $0x1f0] sm:$0xff]  ;;  %v201_v12 = vld [vmem:[%s2256_s3 + $0x60] sm:$0xff] }
   0x7   :  { %620 = vmatpush.msra.mxu3 %v252_v6  ;;  %601 = vmatpush.msra.mxu2 %v235_v5  ;;  %v233_v13 = vld [vmem:[%s2256_s3 + $0x160] sm:$0xff]  ;;  %v250_v14 = vld [vmem:[%s2256_s3 + $0x1e8] sm:$0xff]  ;;  %v200_v17 = vld [vmem:[%s2256_s3 + $0x58] sm:$0xff] }
   0x8   :  { %581 = vmatpush.msra.mxu1 %v219_v8  ;;  %562 = vmatpush.msra.mxu0 %v202_v7  ;;  %v217_v15 = vld [vmem:[%s2256_s3 + $0xe0] sm:$0xff]  ;;  %v232_v18 = vld [vmem:[%s2256_s3 + $0x158] sm:$0xff]  ;;  %v199_v21 = vld [vmem:[%s2256_s3 + $0x50] sm:$0xff] }
   0x9   :  { %621 = vmatpush.msra.mxu3 %v251_v10  ;;  %602 = vmatpush.msra.mxu2 %v234_v9  ;;  %v249_v16 = vld [vmem:[%s2256_s3 + $0x1e0] sm:$0xff]  ;;  %v216_v19 = vld [vmem:[%s2256_s3 + $0xd8] sm:$0xff]  ;;  %v231_v22 = vld [vmem:[%s2256_s3 + $0x150] sm:$0xff] }
   0xa   :  { %582 = vmatpush.msra.mxu1 %v218_v11  ;;  %563 = vmatpush.msra.mxu0 %v201_v12  ;;  %v248_v20 = vld [vmem:[%s2256_s3 + $0x1d8] sm:$0xff]  ;;  %v215_v23 = vld [vmem:[%s2256_s3 + $0xd0] sm:$0xff]  ;;  %v198_v25 = vld [vmem:[%s2256_s3 + $0x48] sm:$0xff] }
   0xb   :  { %622 = vmatpush.msra.mxu3 %v250_v14  ;;  %603 = vmatpush.msra.mxu2 %v233_v13  ;;  %v247_v24 = vld [vmem:[%s2256_s3 + $0x1d0] sm:$0xff]  ;;  %v230_v26 = vld [vmem:[%s2256_s3 + $0x148] sm:$0xff]  ;;  %v197_v29 = vld [vmem:[%s2256_s3 + $0x40] sm:$0xff] }
   0xc   :  { %583 = vmatpush.msra.mxu1 %v217_v15  ;;  %564 = vmatpush.msra.mxu0 %v200_v17  ;;  %v214_v27 = vld [vmem:[%s2256_s3 + $0xc8] sm:$0xff]  ;;  %v229_v30 = vld [vmem:[%s2256_s3 + $0x140] sm:$0xff]  ;;  %v196_v33 = vld [vmem:[%s2256_s3 + $0x38] sm:$0xff] }
   0xd   :  { %623 = vmatpush.msra.mxu3 %v249_v16  ;;  %604 = vmatpush.msra.mxu2 %v232_v18  ;;  %v246_v28 = vld [vmem:[%s2256_s3 + $0x1c8] sm:$0xff]  ;;  %v213_v31 = vld [vmem:[%s2256_s3 + $0xc0] sm:$0xff]  ;;  %v228_v34 = vld [vmem:[%s2256_s3 + $0x138] sm:$0xff] }
   0xe   :  { %584 = vmatpush.msra.mxu1 %v216_v19  ;;  %565 = vmatpush.msra.mxu0 %v199_v21  ;;  %v245_v32 = vld [vmem:[%s2256_s3 + $0x1c0] sm:$0xff]  ;;  %v212_v35 = vld [vmem:[%s2256_s3 + $0xb8] sm:$0xff]  ;;  %v195_v37 = vld [vmem:[%s2256_s3 + $0x30] sm:$0xff] }
   0xf   :  { %624 = vmatpush.msra.mxu3 %v248_v20  ;;  %605 = vmatpush.msra.mxu2 %v231_v22  ;;  %v244_v36 = vld [vmem:[%s2256_s3 + $0x1b8] sm:$0xff]  ;;  %v227_v38 = vld [vmem:[%s2256_s3 + $0x130] sm:$0xff]  ;;  %v194_v41 = vld [vmem:[%s2256_s3 + $0x28] sm:$0xff] }
  0x10   :  { %585 = vmatpush.msra.mxu1 %v215_v23  ;;  %566 = vmatpush.msra.mxu0 %v198_v25  ;;  %v211_v39 = vld [vmem:[%s2256_s3 + $0xb0] sm:$0xff]  ;;  %v226_v42 = vld [vmem:[%s2256_s3 + $0x128] sm:$0xff]  ;;  %v193_v45 = vld [vmem:[%s2256_s3 + $0x20] sm:$0xff] }
  0x11   :  { %625 = vmatpush.msra.mxu3 %v247_v24  ;;  %606 = vmatpush.msra.mxu2 %v230_v26  ;;  %v243_v40 = vld [vmem:[%s2256_s3 + $0x1b0] sm:$0xff]  ;;  %v210_v43 = vld [vmem:[%s2256_s3 + $0xa8] sm:$0xff]  ;;  %v225_v46 = vld [vmem:[%s2256_s3 + $0x120] sm:$0xff] }
  0x12   :  { %586 = vmatpush.msra.mxu1 %v214_v27  ;;  %567 = vmatpush.msra.mxu0 %v197_v29  ;;  %v242_v44 = vld [vmem:[%s2256_s3 + $0x1a8] sm:$0xff]  ;;  %v209_v47 = vld [vmem:[%s2256_s3 + $0xa0] sm:$0xff]  ;;  %v192_v49 = vld [vmem:[%s2256_s3 + $0x18] sm:$0xff] }
  0x13   :  { %626 = vmatpush.msra.mxu3 %v246_v28  ;;  %607 = vmatpush.msra.mxu2 %v229_v30  ;;  %v241_v48 = vld [vmem:[%s2256_s3 + $0x1a0] sm:$0xff]  ;;  %v224_v50 = vld [vmem:[%s2256_s3 + $0x118] sm:$0xff]  ;;  %v191_v53 = vld [vmem:[%s2256_s3 + $0x10] sm:$0xff] }
  0x14   :  { %587 = vmatpush.msra.mxu1 %v213_v31  ;;  %568 = vmatpush.msra.mxu0 %v196_v33  ;;  %v208_v51 = vld [vmem:[%s2256_s3 + $0x98] sm:$0xff]  ;;  %v223_v54 = vld [vmem:[%s2256_s3 + $0x110] sm:$0xff]  ;;  %v190_v57 = vld [vmem:[%s2256_s3 + $0x8] sm:$0xff] }
  0x15   :  { %627 = vmatpush.msra.mxu3 %v245_v32  ;;  %608 = vmatpush.msra.mxu2 %v228_v34  ;;  %v240_v52 = vld [vmem:[%s2256_s3 + $0x198] sm:$0xff]  ;;  %v207_v55 = vld [vmem:[%s2256_s3 + $0x90] sm:$0xff]  ;;  %v222_v58 = vld [vmem:[%s2256_s3 + $0x108] sm:$0xff] }
  0x16   :  { %588 = vmatpush.msra.mxu1 %v212_v35  ;;  %569 = vmatpush.msra.mxu0 %v195_v37  ;;  %v239_v56 = vld [vmem:[%s2256_s3 + $0x190] sm:$0xff]  ;;  %v206_v59 = vld [vmem:[%s2256_s3 + $0x88] sm:$0xff]  ;;  %v189_v61 = vld [vmem:[%s2256_s3] sm:$0xff] }
  0x17   :  { %628 = vmatpush.msra.mxu3 %v244_v36  ;;  %609 = vmatpush.msra.mxu2 %v227_v38  ;;  %v238_v60 = vld [vmem:[%s2256_s3 + $0x188] sm:$0xff]  ;;  %v221_v62 = vld [vmem:[%s2256_s3 + $0x100] sm:$0xff]  ;;  %v268_v63 = vld [vmem:[%s2256_s3 + $0x278] sm:$0xff] }
  0x18   :  { %589 = vmatpush.msra.mxu1 %v211_v39  ;;  %570 = vmatpush.msra.mxu0 %v194_v41  ;;  %v300_v0 = vld [vmem:[%s2256_s3 + $0x378] sm:$0xff]  ;;  %v205_v1 = vld [vmem:[%s2256_s3 + $0x80] sm:$0xff]  ;;  %v267_v3 = vld [vmem:[%s2256_s3 + $0x270] sm:$0xff] }
  0x19   :  { %629 = vmatpush.msra.mxu3 %v243_v40  ;;  %610 = vmatpush.msra.mxu2 %v226_v42  ;;  %v237_v2 = vld [vmem:[%s2256_s3 + $0x180] sm:$0xff]  ;;  %v284_v4 = vld [vmem:[%s2256_s3 + $0x2f8] sm:$0xff]  ;;  %v299_v5 = vld [vmem:[%s2256_s3 + $0x370] sm:$0xff] }
  0x1a   :  { %590 = vmatpush.msra.mxu1 %v210_v43  ;;  %571 = vmatpush.msra.mxu0 %v193_v45  ;;  %v316_v6 = vld [vmem:[%s2256_s3 + $0x3f8] sm:$0xff]  ;;  %v266_v7 = vld [vmem:[%s2256_s3 + $0x268] sm:$0xff]  ;;  %v283_v8 = vld [vmem:[%s2256_s3 + $0x2f0] sm:$0xff] }
  0x1b   :  { %630 = vmatpush.msra.mxu3 %v242_v44  ;;  %611 = vmatpush.msra.mxu2 %v225_v46  ;;  %v298_v9 = vld [vmem:[%s2256_s3 + $0x368] sm:$0xff]  ;;  %v315_v10 = vld [vmem:[%s2256_s3 + $0x3f0] sm:$0xff]  ;;  %v265_v11 = vld [vmem:[%s2256_s3 + $0x260] sm:$0xff] }
  0x1c   :  { %591 = vmatpush.msra.mxu1 %v209_v47  ;;  %572 = vmatpush.msra.mxu0 %v192_v49  ;;  %v282_v12 = vld [vmem:[%s2256_s3 + $0x2e8] sm:$0xff]  ;;  %v297_v13 = vld [vmem:[%s2256_s3 + $0x360] sm:$0xff]  ;;  %v264_v15 = vld [vmem:[%s2256_s3 + $0x258] sm:$0xff] }
  0x1d   :  { %631 = vmatpush.msra.mxu3 %v241_v48  ;;  %612 = vmatpush.msra.mxu2 %v224_v50  ;;  %v314_v14 = vld [vmem:[%s2256_s3 + $0x3e8] sm:$0xff]  ;;  %v281_v16 = vld [vmem:[%s2256_s3 + $0x2e0] sm:$0xff]  ;;  %v296_v17 = vld [vmem:[%s2256_s3 + $0x358] sm:$0xff] }
  0x1e   :  { %592 = vmatpush.msra.mxu1 %v208_v51  ;;  %573 = vmatpush.msra.mxu0 %v191_v53  ;;  %v313_v18 = vld [vmem:[%s2256_s3 + $0x3e0] sm:$0xff]  ;;  %v263_v19 = vld [vmem:[%s2256_s3 + $0x250] sm:$0xff]  ;;  %v280_v20 = vld [vmem:[%s2256_s3 + $0x2d8] sm:$0xff] }
  0x1f   :  { %632 = vmatpush.msra.mxu3 %v240_v52  ;;  %613 = vmatpush.msra.mxu2 %v223_v54  ;;  %v295_v21 = vld [vmem:[%s2256_s3 + $0x350] sm:$0xff]  ;;  %v312_v22 = vld [vmem:[%s2256_s3 + $0x3d8] sm:$0xff]  ;;  %v262_v23 = vld [vmem:[%s2256_s3 + $0x248] sm:$0xff] }
  0x20   :  { %593 = vmatpush.msra.mxu1 %v207_v55  ;;  %574 = vmatpush.msra.mxu0 %v190_v57  ;;  %v279_v24 = vld [vmem:[%s2256_s3 + $0x2d0] sm:$0xff]  ;;  %v1431_v25 = vld [vmem:[%s2254_s1] sm:$0xff]  ;;  %v294_v27 = vld [vmem:[%s2256_s3 + $0x348] sm:$0xff] }
  0x21   :  { %633 = vmatpush.msra.mxu3 %v239_v56  ;;  %614 = vmatpush.msra.mxu2 %v222_v58  ;;  %v1436_v26 = vld [vmem:[%s2255_s2] sm:$0xff]  ;;  %v311_v28 = vld [vmem:[%s2256_s3 + $0x3d0] sm:$0xff]  ;;  %v45_v29 = vperm.slane %v1431_v25, 0  ;;  %v46_v30 = vperm.slane %v1431_v25, 1  ;;  %v47_v31 = vperm.slane %v1431_v25, 2  ;;  %v48_v32 = vperm.slane %v1431_v25, 3 }
  0x22   :  { %594 = vmatpush.msra.mxu1 %v206_v59  ;;  %575 = vmatpush.msra.mxu0 %v189_v61  ;;  %v261_v33 = vld [vmem:[%s2256_s3 + $0x240] sm:$0xff]  ;;  %v278_v34 = vld [vmem:[%s2256_s3 + $0x2c8] sm:$0xff]  ;;  %v114_v35 = vperm.slane %v1436_v26, 0  ;;  %v115_v36 = vperm.slane %v1436_v26, 1  ;;  %v116_v37 = vperm.slane %v1436_v26, 2  ;;  %v117_v38 = vperm.slane %v1436_v26, 3 }
  0x23   :  { %634 = vmatpush.msra.mxu3 %v238_v60  ;;  %615 = vmatpush.msra.mxu2 %v221_v62  ;;  %v293_v39 = vld [vmem:[%s2256_s3 + $0x340] sm:$0xff]  ;;  %v310_v40 = vld [vmem:[%s2256_s3 + $0x3c8] sm:$0xff]  ;;  %v260_v41 = vld [vmem:[%s2256_s3 + $0x238] sm:$0xff]  ;;  %v65_v42 = vrot.slane %v46_v30, 6  ;;  %v66_v43 = vrot.slane %v47_v31, 4  ;;  %v67_v44 = vrot.slane %v48_v32, 2 }
  0x24   :  { %640 = vmatpush.msrb.mxu0 %v268_v63  ;;  %595 = vmatpush.msra.mxu1 %v205_v1  ;;  %v277_v45 = vld [vmem:[%s2256_s3 + $0x2c0] sm:$0xff]  ;;  %v134_v47 = vrot.slane %v115_v36, 6  ;;  %v135_v48 = vrot.slane %v116_v37, 4  ;;  %v136_v49 = vrot.slane %v117_v38, 2  ;;  %v1476_v50 = vld [vmem:[%s2254_s1 + $0x8] sm:$0xff]  ;;  %v292_v51 = vld [vmem:[%s2256_s3 + $0x338] sm:$0xff] }
  0x25   :  { %680 = vmatpush.msrb.mxu2 %v300_v0  ;;  %635 = vmatpush.msra.mxu3 %v237_v2  ;;  %v34_v46 = vld [vmem:[%s2253_s0] sm:$0xff]  ;;  %v81_v53 = vsel %vm80_vm0, %v45_v29, %v65_v42  ;;  %v83_v54 = vsel %vm82_vm1, %v66_v43, %v67_v44  ;;  %v53_v55 = vperm.slane %v1476_v50, 0  ;;  %v54_v56 = vperm.slane %v1476_v50, 1  ;;  %v1491_v57 = vld [vmem:[%s2255_s2 + $0x8] sm:$0xff]  ;;  %v259_v58 = vld [vmem:[%s2256_s3 + $0x230] sm:$0xff] }
  0x26   :  { %641 = vmatpush.msrb.mxu0 %v267_v3  ;;  %660 = vmatpush.msrb.mxu1 %v284_v4  ;;  %v309_v52 = vld [vmem:[%s2256_s3 + $0x3c0] sm:$0xff]  ;;  %v276_v59 = vld [vmem:[%s2256_s3 + $0x2b8] sm:$0xff]  ;;  %v85_v60 = vsel %vm84_vm2, %v81_v53, %v83_v54  ;;  %v149_v61 = vsel %vm80_vm0, %v114_v35, %v134_v47  ;;  %v150_v62 = vsel %vm82_vm1, %v135_v48, %v136_v49  ;;  %v55_v63 = vperm.slane %v1476_v50, 2  ;;  %v291_v0 = vld [vmem:[%s2256_s3 + $0x330] sm:$0xff] }
  0x27   :  { %681 = vmatpush.msrb.mxu2 %v299_v5  ;;  %700 = vmatpush.msrb.mxu3 %v316_v6  ;;  %v308_v1 = vld [vmem:[%s2256_s3 + $0x3b8] sm:$0xff]  ;;  %v103_v2 = vmul.f32 %v85_v60, %v34_v46  ;;  %v151_v3 = vsel %vm84_vm2, %v149_v61, %v150_v62  ;;  %v56_v4 = vperm.slane %v1476_v50, 3  ;;  %v71_v5 = vrot.slane %v54_v56, 6  ;;  %v258_v6 = vld [vmem:[%s2256_s3 + $0x228] sm:$0xff]  ;;  %v287_v49 = vld [vmem:[%s2256_s3 + $0x310] sm:$0xff] }
  0x28   :  { %642 = vmatpush.msrb.mxu0 %v266_v7  ;;  %661 = vmatpush.msrb.mxu1 %v283_v8  ;;  %v275_v7 = vld [vmem:[%s2256_s3 + $0x2b0] sm:$0xff]  ;;  %v72_v8 = vrot.slane %v55_v63, 4  ;;  %v256_v32 = vld [vmem:[%s2256_s3 + $0x218] sm:$0xff]  ;;  %v51_v36 = vperm.slane %v1431_v25, 6  ;;  %v52_v37 = vperm.slane %v1431_v25, 7  ;;  %v118_v48 = vperm.slane %v1436_v26, 4 }
  0x29   :  { %682 = vmatpush.msrb.mxu2 %v298_v9  ;;  %701 = vmatpush.msrb.mxu3 %v315_v10  ;;  %v122_v9 = vperm.slane %v1491_v57, 0  ;;  %v123_v10 = vperm.slane %v1491_v57, 1  ;;  %v288_v38 = vld [vmem:[%s2256_s3 + $0x318] sm:$0xff]  ;;  %v35_v53 = vld [vmem:[%s2253_s0 + $0x8] sm:$0xff]  ;;  %v120_v56 = vperm.slane %v1436_v26, 6  ;;  %v121_v61 = vperm.slane %v1436_v26, 7 }
  0x2a   :  { %643 = vmatpush.msrb.mxu0 %v265_v11  ;;  %662 = vmatpush.msrb.mxu1 %v282_v12  ;;  %v124_v11 = vperm.slane %v1491_v57, 2  ;;  %v290_v12 = vld [vmem:[%s2256_s3 + $0x328] sm:$0xff]  ;;  %v272_v44 = vld [vmem:[%s2256_s3 + $0x298] sm:$0xff]  ;;  %v69_v46 = vrot.slane %v51_v36, 4  ;;  %v70_v47 = vrot.slane %v52_v37, 2  ;;  %v57_v62 = vperm.slane %v1476_v50, 4 }
  0x2b   :  { %683 = vmatpush.msrb.mxu2 %v297_v13  ;;  %702 = vmatpush.msrb.mxu3 %v314_v14  ;;  %v307_v13 = vld [vmem:[%s2256_s3 + $0x3b0] sm:$0xff]  ;;  %v257_v14 = vld [vmem:[%s2256_s3 + $0x220] sm:$0xff]  ;;  %v58_v63 = vperm.slane %v1476_v50, 5  ;;  %v348_v37 = vld [vmem:[%s2256_s3 + $0x4f8] sm:$0xff] }
  0x2c   :  { %644 = vmatpush.msrb.mxu0 %v264_v15  ;;  %663 = vmatpush.msrb.mxu1 %v281_v16  ;;  %v169_v15 = vadd.f32 %v151_v3, %v103_v2  ;;  %v73_v16 = vrot.slane %v56_v4, 2  ;;  %v87_v60 = vsel %vm82_vm1, %v69_v46, %v70_v47  ;;  %v331_v36 = vld [vmem:[%s2256_s3 + $0x470] sm:$0xff] }
  0x2d   :  { %684 = vmatpush.msrb.mxu2 %v296_v17  ;;  %703 = vmatpush.msrb.mxu3 %v313_v18  ;;  %v89_v17 = vsel %vm80_vm0, %v53_v55, %v71_v5  ;;  %v125_v18 = vperm.slane %v1491_v57, 3  ;;  %v119_v55 = vperm.slane %v1436_v26, 5  ;;  %v253_v26 = vld [vmem:[%s2256_s3 + $0x200] sm:$0xff]  ;;  %v270_v5 = vld [vmem:[%s2256_s3 + $0x288] sm:$0xff] }
  0x2e   :  { %645 = vmatpush.msrb.mxu0 %v263_v19  ;;  %664 = vmatpush.msrb.mxu1 %v280_v20  ;;  %v274_v19 = vld [vmem:[%s2256_s3 + $0x2a8] sm:$0xff]  ;;  %v36_v20 = vld [vmem:[%s2253_s0 + $0x10] sm:$0xff]  ;;  %vm174_vm3 = vcmp.ge.f32.partialorder %v169_v15, 0.0  ;;  %v179_v29 = vmul.f32 0.2, %v169_v15  ;;  %v90_v30 = vsel %vm82_vm1, %v72_v8, %v73_v16  ;;  %v139_v8 = vrot.slane %v121_v61, 2 }
  0x2f   :  { %685 = vmatpush.msrb.mxu2 %v295_v21  ;;  %704 = vmatpush.msrb.mxu3 %v312_v22  ;;  %v140_v21 = vrot.slane %v123_v10, 6  ;;  %v141_v22 = vrot.slane %v124_v11, 4  ;;  %v142_v31 = vrot.slane %v125_v18, 2  ;;  %v137_v4 = vrot.slane %v119_v55, 6  ;;  %v285_v10 = vld [vmem:[%s2256_s3 + $0x300] sm:$0xff]  ;;  %v302_v11 = vld [vmem:[%s2256_s3 + $0x388] sm:$0xff] }
  0x30   :  { %646 = vmatpush.msrb.mxu0 %v262_v23  ;;  %665 = vmatpush.msrb.mxu1 %v279_v24  ;;  %v49_v23 = vperm.slane %v1431_v25, 4  ;;  %v50_v24 = vperm.slane %v1431_v25, 5  ;;  %v332_v16 = vld [vmem:[%s2256_s3 + $0x478] sm:$0xff]  ;;  %v269_v18 = vld [vmem:[%s2256_s3 + $0x280] sm:$0xff] }
  0x31   :  { %686 = vmatpush.msrb.mxu2 %v294_v27  ;;  %705 = vmatpush.msrb.mxu3 %v311_v28  ;;  %v289_v27 = vld [vmem:[%s2256_s3 + $0x320] sm:$0xff]  ;;  %v306_v28 = vld [vmem:[%s2256_s3 + $0x3a8] sm:$0xff]  ;;  %v155_v35 = vsel %vm80_vm0, %v122_v9, %v140_v21  ;;  %v156_v43 = vsel %vm82_vm1, %v141_v22, %v142_v31  ;;  %v59_v9 = vperm.slane %v1476_v50, 6  ;;  %v127_v21 = vperm.slane %v1491_v57, 5 }
  0x32   :  { %647 = vmatpush.msrb.mxu0 %v261_v33  ;;  %666 = vmatpush.msrb.mxu1 %v278_v34  ;;  %v273_v33 = vld [vmem:[%s2256_s3 + $0x2a0] sm:$0xff]  ;;  %v91_v34 = vsel %vm84_vm2, %v89_v17, %v90_v30  ;;  %v68_v25 = vrot.slane %v50_v24, 6  ;;  %v364_v17 = vld [vmem:[%s2256_s3 + $0x578] sm:$0xff] }
  0x33   :  { %687 = vmatpush.msrb.mxu2 %v293_v39  ;;  %706 = vmatpush.msrb.mxu3 %v310_v40  ;;  %v305_v39 = vld [vmem:[%s2256_s3 + $0x3a0] sm:$0xff]  ;;  %v255_v40 = vld [vmem:[%s2256_s3 + $0x210] sm:$0xff]  ;;  %v105_v42 = vmul.f32 %v91_v34, %v36_v20  ;;  %v75_v20 = vrot.slane %v59_v9, 4  ;;  %v129_v34 = vperm.slane %v1491_v57, 7 }
  0x34   :  { %648 = vmatpush.msrb.mxu0 %v260_v41  ;;  %667 = vmatpush.msrb.mxu1 %v277_v45  ;;  %v184_v41 = vsel %vm174_vm3, %v169_v15, %v179_v29  ;;  %v157_v45 = vsel %vm84_vm2, %v155_v35, %v156_v43  ;;  %v86_v54 = vsel %vm80_vm0, %v49_v23, %v68_v25  ;;  %v74_v15 = vrot.slane %v58_v63, 6  ;;  %v301_v24 = vld [vmem:[%s2256_s3 + $0x380] sm:$0xff] }
  0x35   :  { %688 = vmatpush.msrb.mxu2 %v292_v51  ;;  %707 = vmatpush.msrb.mxu3 %v309_v52  ;;  %514 = vst [vmem:[#allocation1] ss:$4 sm:$0xff] %v184_v41  ;;  %v304_v51 = vld [vmem:[%s2256_s3 + $0x398] sm:$0xff]  ;;  %v171_v52 = vadd.f32 %v157_v45, %v105_v42  ;;  %v88_v3 = vsel %vm84_vm2, %v86_v54, %v87_v60  ;;  %v143_v35 = vrot.slane %v127_v21, 6  ;;  %v145_v43 = vrot.slane %v129_v34, 2  ;;  %v347_v45 = vld [vmem:[%s2256_s3 + $0x4f0] sm:$0xff] }
  0x36   :  { %649 = vmatpush.msrb.mxu0 %v259_v58  ;;  %668 = vmatpush.msrb.mxu1 %v276_v59  ;;  %v254_v58 = vld [vmem:[%s2256_s3 + $0x208] sm:$0xff]  ;;  %v271_v59 = vld [vmem:[%s2256_s3 + $0x290] sm:$0xff]  ;;  %v92_v31 = vsel %vm80_vm0, %v57_v62, %v74_v15  ;;  %v328_v60 = vld [vmem:[%s2256_s3 + $0x458] sm:$0xff] }
  0x37   :  { %689 = vmatpush.msrb.mxu2 %v291_v0  ;;  %708 = vmatpush.msrb.mxu3 %v308_v1  ;;  %v286_v0 = vld [vmem:[%s2256_s3 + $0x308] sm:$0xff]  ;;  %v303_v1 = vld [vmem:[%s2256_s3 + $0x390] sm:$0xff]  ;;  %vm176_vm4 = vcmp.ge.f32.partialorder %v171_v52, 0.0  ;;  %v181_v2 = vmul.f32 0.2, %v171_v52  ;;  %v345_v61 = vld [vmem:[%s2256_s3 + $0x4e0] sm:$0xff] }
  0x38   :  { %650 = vmatpush.msrb.mxu0 %v258_v6  ;;  %669 = vmatpush.msrb.mxu1 %v275_v7  ;;  %v104_v6 = vmul.f32 %v88_v3, %v35_v53  ;;  %v138_v7 = vrot.slane %v120_v56, 4  ;;  %v329_v53 = vld [vmem:[%s2256_s3 + $0x460] sm:$0xff]  ;;  %v346_v54 = vld [vmem:[%s2256_s3 + $0x4e8] sm:$0xff]  ;;  %v360_v62 = vld [vmem:[%s2256_s3 + $0x558] sm:$0xff] }
  0x39   :  { %690 = vmatpush.msrb.mxu2 %v290_v12  ;;  %709 = vmatpush.msrb.mxu3 %v307_v13  ;;  %v186_v12 = vsel %vm176_vm4, %v171_v52, %v181_v2  ;;  %v152_v13 = vsel %vm80_vm0, %v118_v48, %v137_v4  ;;  %v362_v48 = vld [vmem:[%s2256_s3 + $0x568] sm:$0xff]  ;;  %v361_v56 = vld [vmem:[%s2256_s3 + $0x560] sm:$0xff]  ;;  %v344_v3 = vld [vmem:[%s2256_s3 + $0x4d8] sm:$0xff] }
  0x3a   :  { %651 = vmatpush.msrb.mxu0 %v257_v14  ;;  %670 = vmatpush.msrb.mxu1 %v274_v19  ;;  %v60_v14 = vperm.slane %v1476_v50, 7  ;;  %v153_v19 = vsel %vm82_vm1, %v138_v7, %v139_v8  ;;  %v126_v50 = vperm.slane %v1491_v57, 4  ;;  %v377_v63 = vld [vmem:[%s2256_s3 + $0x5e0] sm:$0xff]  ;;  %v359_v4 = vld [vmem:[%s2256_s3 + $0x550] sm:$0xff]  ;;  %v326_v7 = vld [vmem:[%s2256_s3 + $0x448] sm:$0xff] }
  0x3b   :  { %691 = vmatpush.msrb.mxu2 %v289_v27  ;;  %710 = vmatpush.msrb.mxu3 %v306_v28  ;;  %v154_v27 = vsel %vm84_vm2, %v152_v13, %v153_v19  ;;  %v343_v8 = vld [vmem:[%s2256_s3 + $0x4d0] sm:$0xff]  ;;  %v358_v13 = vld [vmem:[%s2256_s3 + $0x548] sm:$0xff]  ;;  %v325_v19 = vld [vmem:[%s2256_s3 + $0x440] sm:$0xff] }
  0x3c   :  { %652 = vmatpush.msrb.mxu0 %v256_v32  ;;  %671 = vmatpush.msrb.mxu1 %v273_v33  ;;  %v519_v22 = vld.sshfl [vmem:[#allocation1 + $0x10] sm:$0xff pattern:$0x73625140]  ;;  %v517_v23 = vld.sshfl [vmem:[#allocation1] sm:$0xff pattern:$0x73625140]  ;;  %v170_v30 = vadd.f32 %v154_v27, %v104_v6  ;;  %v158_v25 = vsel %vm80_vm0, %v126_v50, %v143_v35 }
  0x3d   :  { %692 = vmatpush.msrb.mxu2 %v288_v38  ;;  %711 = vmatpush.msrb.mxu3 %v305_v39  ;;  %v520_v28 = vld.sshfl [vmem:[#allocation1 + $0x18] sm:$0xff pattern:$0x73625140]  ;;  %v518_v29 = vld.sshfl [vmem:[#allocation1 + $0x8] sm:$0xff pattern:$0x73625140] }
  0x3e   :  { %653 = vmatpush.msrb.mxu0 %v255_v40  ;;  %672 = vmatpush.msrb.mxu1 %v272_v44  ;;  %525 = vst [vmem:[#allocation1] ss:$4 sm:$0xff] %v186_v12  ;;  %v76_v32 = vrot.slane %v60_v14, 2  ;;  %v128_v33 = vperm.slane %v1491_v57, 6  ;;  %vm175_vm5 = vcmp.ge.f32.partialorder %v170_v30, 0.0  ;;  %v37_v39 = vld [vmem:[%s2253_s0 + $0x18] sm:$0xff] }
  0x3f   :  { %693 = vmatpush.msrb.mxu2 %v287_v49  ;;  %712 = vmatpush.msrb.mxu3 %v304_v51  ;;  %v180_v38 = vmul.f32 0.2, %v170_v30  ;;  %v363_v57 = vld [vmem:[%s2256_s3 + $0x570] sm:$0xff]  ;;  %v380_v40 = vld [vmem:[%s2256_s3 + $0x5f8] sm:$0xff]  ;;  %v330_v44 = vld [vmem:[%s2256_s3 + $0x468] sm:$0xff] }
  0x40   :  { %654 = vmatpush.msrb.mxu0 %v254_v58  ;;  %673 = vmatpush.msrb.mxu1 %v271_v59  ;;  %v93_v41 = vsel %vm82_vm1, %v75_v20, %v76_v32  ;;  %v144_v42 = vrot.slane %v128_v33, 4  ;;  %v379_v49 = vld [vmem:[%s2256_s3 + $0x5f0] sm:$0xff]  ;;  %v378_v58 = vld [vmem:[%s2256_s3 + $0x5e8] sm:$0xff]  ;;  %v341_v32 = vld [vmem:[%s2256_s3 + $0x4c0] sm:$0xff] }
  0x41   :  { %694 = vmatpush.msrb.mxu2 %v286_v0  ;;  %713 = vmatpush.msrb.mxu3 %v303_v1  ;;  %v185_v46 = vsel %vm175_vm5, %v170_v30, %v180_v38  ;;  %v94_v47 = vsel %vm84_vm2, %v92_v31, %v93_v41  ;;  %v327_v1 = vld [vmem:[%s2256_s3 + $0x450] sm:$0xff]  ;;  %v342_v20 = vld [vmem:[%s2256_s3 + $0x4c8] sm:$0xff]  ;;  %v324_v31 = vld [vmem:[%s2256_s3 + $0x438] sm:$0xff] }
  0x42   :  { %655 = vmatpush.msrb.mxu0 %v253_v26  ;;  %674 = vmatpush.msrb.mxu1 %v270_v5  ;;  %516 = vst [vmem:[#allocation1 + $0x20] ss:$4 sm:$0xff] %v185_v46  ;;  %v106_v51 = vmul.f32 %v94_v47, %v37_v39  ;;  %v159_v52 = vsel %vm82_vm1, %v144_v42, %v145_v43  ;;  %v376_v26 = vld [vmem:[%s2256_s3 + $0x5d8] sm:$0xff]  ;;  %v110_v12 = vld [vmem:[%s2255_s2 + $0x10] sm:$0xf]  ;;  %v374_v27 = vld [vmem:[%s2256_s3 + $0x5c8] sm:$0xff] }
  0x43   :  { %616 = vmatmul.f32.vlgmr.msra.gmra.mxu2 %v519_v22  ;;  %714 = vmatpush.msrb.mxu3 %v302_v11  ;;  %v160_v55 = vsel %vm84_vm2, %v158_v25, %v159_v52  ;;  %v41_v11 = vld [vmem:[%s2254_s1 + $0x10] sm:$0xf]  ;;  %v130_v50 = vperm.slane %v110_v12, 0  ;;  %v131_v21 = vperm.slane %v110_v12, 1  ;;  %v132_v22 = vperm.slane %v110_v12, 2  ;;  %v38_v33 = vld [vmem:[%s2253_s0 + $0x20] sm:$0xff] }
  0x44   :  { %695 = vmatpush.msrb.mxu2 %v285_v10  ;;  %576 = vmatmul.f32.vlgmr.msra.gmra.mxu0 %v517_v23  ;;  %v172_v59 = vadd.f32 %v160_v55, %v106_v51  ;;  %v375_v14 = vld [vmem:[%s2256_s3 + $0x5d0] sm:$0xff]  ;;  %v61_v15 = vperm.slane %v41_v11, 0  ;;  %v133_v23 = vperm.slane %v110_v12, 3  ;;  %v373_v38 = vld [vmem:[%s2256_s3 + $0x5c0] sm:$0xff]  ;;  %v340_v41 = vld [vmem:[%s2256_s3 + $0x4b8] sm:$0xff] }
  0x45   :  { %636 = vmatmul.f32.vlgmr.msra.gmra.mxu3 %v520_v28  ;;  %720 = vmatpush.msra.mxu0 %v332_v16  ;;  %v62_v16 = vperm.slane %v41_v11, 1  ;;  %v146_v34 = vrot.slane %v131_v21, 6  ;;  %v147_v35 = vrot.slane %v132_v22, 4  ;;  %v354_v51 = vld [vmem:[%s2256_s3 + $0x528] sm:$0xff]  ;;  %v371_v52 = vld [vmem:[%s2256_s3 + $0x5b0] sm:$0xff]  ;;  %v317_v12 = vld [vmem:[%s2256_s3 + $0x400] sm:$0xff] }
  0x46   :  { %760 = vmatpush.msra.mxu2 %v364_v17  ;;  %675 = vmatpush.msrb.mxu1 %v269_v18  ;;  %vm177_vm6 = vcmp.ge.f32.partialorder %v172_v59, 0.0  ;;  %v182_v0 = vmul.f32 0.2, %v172_v59  ;;  %v63_v17 = vperm.slane %v41_v11, 2  ;;  %v64_v18 = vperm.slane %v41_v11, 3  ;;  %v367_v11 = vld [vmem:[%s2256_s3 + $0x590] sm:$0xff] }
  0x47   :  { %715 = vmatpush.msrb.mxu3 %v301_v24  ;;  %596 = vmatmul.f32.vlgmr.msra.gmra.mxu1 %v518_v29  ;;  %v357_v24 = vld [vmem:[%s2256_s3 + $0x540] sm:$0xff]  ;;  %v77_v28 = vrot.slane %v62_v16, 6  ;;  %v161_v43 = vsel %vm80_vm0, %v130_v50, %v146_v34  ;;  %v396_v16 = vld [vmem:[%s2256_s3 + $0x678] sm:$0xff] }
  0x48   :  { %721 = vmatpush.msra.mxu0 %v331_v36  ;;  %740 = vmatpush.msra.mxu1 %v348_v37  ;;  %v187_v2 = vsel %vm177_vm6, %v172_v59, %v182_v0  ;;  %v78_v29 = vrot.slane %v63_v17, 4  ;;  %v79_v30 = vrot.slane %v64_v18, 2  ;;  %v148_v36 = vrot.slane %v133_v23, 2  ;;  %v356_v37 = vld [vmem:[%s2256_s3 + $0x538] sm:$0xff]  ;;  %v333_v18 = vld [vmem:[%s2256_s3 + $0x480] sm:$0xff] }
  0x49   :  { %761 = vmatpush.msra.mxu2 %v363_v57  ;;  %780 = vmatpush.msra.mxu3 %v380_v40  ;;  %v523_v5 = vld.sshfl [vmem:[#allocation1 + $0x30] sm:$0xff pattern:$0x73625140]  ;;  %v521_v6 = vld.sshfl [vmem:[#allocation1 + $0x20] sm:$0xff pattern:$0x73625140]  ;;  %v95_v39 = vsel %vm80_vm0, %v61_v15, %v77_v28 }
  0x4a   :  { %722 = vmatpush.msra.mxu0 %v330_v44  ;;  %741 = vmatpush.msra.mxu1 %v347_v45  ;;  %v524_v9 = vld.sshfl [vmem:[#allocation1 + $0x38] sm:$0xff pattern:$0x73625140]  ;;  %v522_v10 = vld.sshfl [vmem:[#allocation1 + $0x28] sm:$0xff pattern:$0x73625140]  ;;  %v96_v57 = vsel %vm82_vm1, %v78_v29, %v79_v30  ;;  %v162_v25 = vsel %vm82_vm1, %v147_v35, %v148_v36 }
  0x4b   :  { %762 = vmatpush.msra.mxu2 %v362_v48  ;;  %781 = vmatpush.msra.mxu3 %v379_v49  ;;  %526 = vst [vmem:[#allocation1 + $0x20] ss:$4 sm:$0xff] %v187_v2  ;;  %v323_v40 = vld [vmem:[%s2256_s3 + $0x430] sm:$0xff]  ;;  %v97_v42 = vsel %vm84_vm2, %v95_v39, %v96_v57  ;;  %v372_v45 = vld [vmem:[%s2256_s3 + $0x5b8] sm:$0xff]  ;;  %v163_v47 = vsel %vm84_vm2, %v161_v43, %v162_v25  ;;  %v322_v48 = vld [vmem:[%s2256_s3 + $0x428] sm:$0xff] }
  0x4c   :  { %723 = vmatpush.msra.mxu0 %v329_v53  ;;  %742 = vmatpush.msra.mxu1 %v346_v54  ;;  %v355_v44 = vld [vmem:[%s2256_s3 + $0x530] sm:$0xff]  ;;  %v107_v46 = vmul.f32 %v97_v42, %v38_v33  ;;  %v321_v53 = vld [vmem:[%s2256_s3 + $0x420] sm:$0xff]  ;;  %v338_v54 = vld [vmem:[%s2256_s3 + $0x4a8] sm:$0xff] }
  0x4d   :  { %763 = vmatpush.msra.mxu2 %v361_v56  ;;  %782 = vmatpush.msra.mxu3 %v378_v58  ;;  %v339_v49 = vld [vmem:[%s2256_s3 + $0x4b0] sm:$0xff]  ;;  %v353_v56 = vld [vmem:[%s2256_s3 + $0x520] sm:$0xff]  ;;  %v370_v58 = vld [vmem:[%s2256_s3 + $0x5a8] sm:$0xff] }
  0x4e   :  { %724 = vmatpush.msra.mxu0 %v328_v60  ;;  %743 = vmatpush.msra.mxu1 %v345_v61  ;;  %v173_v55 = vadd.f32 %v163_v47, %v107_v46  ;;  %v320_v59 = vld [vmem:[%s2256_s3 + $0x418] sm:$0xff]  ;;  %v337_v60 = vld [vmem:[%s2256_s3 + $0x4a0] sm:$0xff]  ;;  %v528_v2 = vld.sshfl [vmem:[#allocation1 + $0x8] sm:$0xff pattern:$0x73625140] }
  0x4f   :  { %764 = vmatpush.msra.mxu2 %v360_v62  ;;  %783 = vmatpush.msra.mxu3 %v377_v63  ;;  %v352_v61 = vld [vmem:[%s2256_s3 + $0x518] sm:$0xff]  ;;  %v369_v62 = vld [vmem:[%s2256_s3 + $0x5a0] sm:$0xff]  ;;  %v366_v15 = vld [vmem:[%s2256_s3 + $0x588] sm:$0xff] }
  0x50   :  { %696 = vmatmul.f32.vlgmr.msrb.gmra.mxu2 %v523_v5  ;;  %656 = vmatmul.f32.vlgmr.msrb.gmra.mxu0 %v521_v6  ;;  %vm178_vm7 = vcmp.ge.f32.partialorder %v173_v55, 0.0  ;;  %v183_v63 = vmul.f32 0.2, %v173_v55  ;;  %v527_v0 = vld.sshfl [vmem:[#allocation1] sm:$0xff pattern:$0x73625140] }
  0x51   :  { %716 = vmatmul.f32.vlgmr.msrb.gmra.mxu3 %v524_v9  ;;  %676 = vmatmul.f32.vlgmr.msrb.gmra.mxu1 %v522_v10  ;;  %v336_v5 = vld [vmem:[%s2256_s3 + $0x498] sm:$0xff]  ;;  %v351_v6 = vld [vmem:[%s2256_s3 + $0x510] sm:$0xff]  ;;  %v350_v10 = vld [vmem:[%s2256_s3 + $0x508] sm:$0xff] }
  0x52   :  { %725 = vmatpush.msra.mxu0 %v327_v1  ;;  %744 = vmatpush.msra.mxu1 %v344_v3  ;;  %v529_v1 = vld.sshfl [vmem:[#allocation1 + $0x10] sm:$0xff pattern:$0x73625140]  ;;  %v188_v3 = vsel %vm178_vm7, %v173_v55, %v183_v63  ;;  %v428_v17 = vld [vmem:[%s2256_s3 + $0x778] sm:$0xff] }
  0x53   :  { %765 = vmatpush.msra.mxu2 %v359_v4  ;;  %784 = vmatpush.msra.mxu3 %v376_v26  ;;  %v530_v4 = vld.sshfl [vmem:[#allocation1 + $0x18] sm:$0xff pattern:$0x73625140]  ;;  %v319_v26 = vld [vmem:[%s2256_s3 + $0x410] sm:$0xff] }
  0x54   :  { %726 = vmatpush.msra.mxu0 %v326_v7  ;;  %745 = vmatpush.msra.mxu1 %v343_v8  ;;  %535 = vst [vmem:[#allocation1] ss:$4 sm:$0xff] %v188_v3  ;;  %v368_v7 = vld [vmem:[%s2256_s3 + $0x598] sm:$0xff]  ;;  %v318_v8 = vld [vmem:[%s2256_s3 + $0x408] sm:$0xff]  ;;  %v335_v9 = vld [vmem:[%s2256_s3 + $0x490] sm:$0xff] }
  0x55   :  { %766 = vmatpush.msra.mxu2 %v358_v13  ;;  %785 = vmatpush.msra.mxu3 %v375_v14  ;;  %v334_v13 = vld [vmem:[%s2256_s3 + $0x488] sm:$0xff]  ;;  %v349_v14 = vld [vmem:[%s2256_s3 + $0x500] sm:$0xff] }
  0x56   :  { %727 = vmatpush.msra.mxu0 %v325_v19  ;;  %746 = vmatpush.msra.mxu1 %v342_v20  ;;  %v365_v19 = vld [vmem:[%s2256_s3 + $0x580] sm:$0xff] }
  0x57   :  { %767 = vmatpush.msra.mxu2 %v357_v24  ;;  %786 = vmatpush.msra.mxu3 %v374_v27 }
  0x58   :  { %728 = vmatpush.msra.mxu0 %v324_v31  ;;  %747 = vmatpush.msra.mxu1 %v341_v32 }
  0x59   :  { %768 = vmatpush.msra.mxu2 %v356_v37  ;;  %787 = vmatpush.msra.mxu3 %v373_v38 }
  0x5a   :  { %729 = vmatpush.msra.mxu0 %v323_v40  ;;  %748 = vmatpush.msra.mxu1 %v340_v41 }
  0x5b   :  { %769 = vmatpush.msra.mxu2 %v355_v44  ;;  %788 = vmatpush.msra.mxu3 %v372_v45 }
  0x5c   :  { %730 = vmatpush.msra.mxu0 %v322_v48  ;;  %749 = vmatpush.msra.mxu1 %v339_v49 }
  0x5d   :  { %770 = vmatpush.msra.mxu2 %v354_v51  ;;  %789 = vmatpush.msra.mxu3 %v371_v52 }
  0x5e   :  { %731 = vmatpush.msra.mxu0 %v321_v53  ;;  %750 = vmatpush.msra.mxu1 %v338_v54 }
  0x5f   :  { %771 = vmatpush.msra.mxu2 %v353_v56  ;;  %790 = vmatpush.msra.mxu3 %v370_v58 }
  0x60   :  { %732 = vmatpush.msra.mxu0 %v320_v59  ;;  %751 = vmatpush.msra.mxu1 %v337_v60 }
  0x61   :  { %772 = vmatpush.msra.mxu2 %v352_v61  ;;  %791 = vmatpush.msra.mxu3 %v369_v62 }
  0x62   :  { %733 = vmatpush.msra.mxu0 %v319_v26  ;;  %752 = vmatpush.msra.mxu1 %v336_v5 }
  0x63   :  { %773 = vmatpush.msra.mxu2 %v351_v6  ;;  %792 = vmatpush.msra.mxu3 %v368_v7 }
  0x64   :  { %734 = vmatpush.msra.mxu0 %v318_v8  ;;  %753 = vmatpush.msra.mxu1 %v335_v9 }
  0x65   :  { %774 = vmatpush.msra.mxu2 %v350_v10  ;;  %793 = vmatpush.msra.mxu3 %v367_v11 }
  0x66   :  { %735 = vmatpush.msra.mxu0 %v317_v12  ;;  %754 = vmatpush.msra.mxu1 %v334_v13 }
  0x67   :  { %775 = vmatpush.msra.mxu2 %v349_v14  ;;  %794 = vmatpush.msra.mxu3 %v366_v15 }
  0x68   :  { %17 = vsyncpa [#allocation4], 0  ;;  %736 = vmatmul.f32.vlgmr.msra.gmra.mxu0 %v527_v0  ;;  %776 = vmatmul.f32.vlgmr.msra.gmra.mxu2 %v529_v1  ;;  %v395_v20 = vld [vmem:[%s2256_s3 + $0x670] sm:$0xff]  ;;  %v412_v50 = vld [vmem:[%s2256_s3 + $0x6f8] sm:$0xff]  ;;  %vm966_vm8 = vcmask 130048   ;;  %vm1037_vm9 = vcmask 123904  }
  0x69   :  { %800 = vmatpush.msrb.mxu0 %v396_v16  ;;  %840 = vmatpush.msrb.mxu2 %v428_v17  ;;  %v427_v21 = vld [vmem:[%s2256_s3 + $0x770] sm:$0xff]  ;;  %v444_v22 = vld [vmem:[%s2256_s3 + $0x7f8] sm:$0xff]  ;;  %v394_v23 = vld [vmem:[%s2256_s3 + $0x668] sm:$0xff]  ;;  %vm1009_vm13 = vcmask 1024   ;;  %s1110_s23 = smov [#allocation3]   ;;  %s1060_s26 = sshll.u32 %s2262_s9, 4  ;;  %s1061_s26 = int_to_ptr.hbm [resolvable:$true] %s1060_s26 }
  0x6a   :  { %755 = vmatpush.msra.mxu1 %v333_v18  ;;  %795 = vmatpush.msra.mxu3 %v365_v19  ;;  %v411_v24 = vld [vmem:[%s2256_s3 + $0x6f0] sm:$0xff]  ;;  %v426_v27 = vld [vmem:[%s2256_s3 + $0x768] sm:$0xff]  ;;  %v393_v29 = vld [vmem:[%s2256_s3 + $0x660] sm:$0xff]  ;;  %s1058_s0 = sshll.u32 %s1110_s23, 4  ;;  %s1059_s0 = int_to_ptr.vmem [resolvable:$true] %s1058_s0 }
  0x6b   :  { %756 = vmatmul.f32.vlgmr.msra.gmra.mxu1 %v528_v2  ;;  %796 = vmatmul.f32.vlgmr.msra.gmra.mxu3 %v530_v4  ;;  %v443_v28 = vld [vmem:[%s2256_s3 + $0x7f0] sm:$0xff]  ;;  %v410_v30 = vld [vmem:[%s2256_s3 + $0x6e8] sm:$0xff]  ;;  %v425_v31 = vld [vmem:[%s2256_s3 + $0x760] sm:$0xff] }
  0x6c   :  { %801 = vmatpush.msrb.mxu0 %v395_v20  ;;  %820 = vmatpush.msrb.mxu1 %v412_v50  ;;  %v442_v32 = vld [vmem:[%s2256_s3 + $0x7e8] sm:$0xff]  ;;  %v392_v33 = vld [vmem:[%s2256_s3 + $0x658] sm:$0xff]  ;;  %v409_v34 = vld [vmem:[%s2256_s3 + $0x6e0] sm:$0xff] }
  0x6d   :  { %841 = vmatpush.msrb.mxu2 %v427_v21  ;;  %860 = vmatpush.msrb.mxu3 %v444_v22  ;;  %v424_v35 = vld [vmem:[%s2256_s3 + $0x758] sm:$0xff]  ;;  %v441_v36 = vld [vmem:[%s2256_s3 + $0x7e0] sm:$0xff]  ;;  %v391_v37 = vld [vmem:[%s2256_s3 + $0x650] sm:$0xff] }
  0x6e   :  { %802 = vmatpush.msrb.mxu0 %v394_v23  ;;  %821 = vmatpush.msrb.mxu1 %v411_v24  ;;  %v408_v38 = vld [vmem:[%s2256_s3 + $0x6d8] sm:$0xff]  ;;  %v423_v39 = vld [vmem:[%s2256_s3 + $0x750] sm:$0xff]  ;;  %v390_v40 = vld [vmem:[%s2256_s3 + $0x648] sm:$0xff] }
  0x6f   :  { %842 = vmatpush.msrb.mxu2 %v426_v27  ;;  %861 = vmatpush.msrb.mxu3 %v443_v28  ;;  %v440_v57 = vld [vmem:[%s2256_s3 + $0x7d8] sm:$0xff]  ;;  %v407_v41 = vld [vmem:[%s2256_s3 + $0x6d0] sm:$0xff]  ;;  %v422_v42 = vld [vmem:[%s2256_s3 + $0x748] sm:$0xff] }
  0x70   :  { %803 = vmatpush.msrb.mxu0 %v393_v29  ;;  %822 = vmatpush.msrb.mxu1 %v410_v30  ;;  %v439_v43 = vld [vmem:[%s2256_s3 + $0x7d0] sm:$0xff]  ;;  %v389_v25 = vld [vmem:[%s2256_s3 + $0x640] sm:$0xff]  ;;  %v406_v44 = vld [vmem:[%s2256_s3 + $0x6c8] sm:$0xff] }
  0x71   :  { %843 = vmatpush.msrb.mxu2 %v425_v31  ;;  %862 = vmatpush.msrb.mxu3 %v442_v32  ;;  %v421_v45 = vld [vmem:[%s2256_s3 + $0x740] sm:$0xff]  ;;  %v438_v46 = vld [vmem:[%s2256_s3 + $0x7c8] sm:$0xff]  ;;  %v388_v47 = vld [vmem:[%s2256_s3 + $0x638] sm:$0xff] }
  0x72   :  { %804 = vmatpush.msrb.mxu0 %v392_v33  ;;  %823 = vmatpush.msrb.mxu1 %v409_v34  ;;  %v405_v48 = vld [vmem:[%s2256_s3 + $0x6c0] sm:$0xff]  ;;  %v420_v49 = vld [vmem:[%s2256_s3 + $0x738] sm:$0xff]  ;;  %v387_v52 = vld [vmem:[%s2256_s3 + $0x630] sm:$0xff] }
  0x73   :  { %844 = vmatpush.msrb.mxu2 %v424_v35  ;;  %863 = vmatpush.msrb.mxu3 %v441_v36  ;;  %v437_v51 = vld [vmem:[%s2256_s3 + $0x7c0] sm:$0xff]  ;;  %v404_v53 = vld [vmem:[%s2256_s3 + $0x6b8] sm:$0xff]  ;;  %v419_v54 = vld [vmem:[%s2256_s3 + $0x730] sm:$0xff] }
  0x74   :  { %805 = vmatpush.msrb.mxu0 %v391_v37  ;;  %824 = vmatpush.msrb.mxu1 %v408_v38  ;;  %v436_v55 = vld [vmem:[%s2256_s3 + $0x7b8] sm:$0xff]  ;;  %v386_v56 = vld [vmem:[%s2256_s3 + $0x628] sm:$0xff]  ;;  %v403_v58 = vld [vmem:[%s2256_s3 + $0x6b0] sm:$0xff] }
  0x75   :  { %845 = vmatpush.msrb.mxu2 %v423_v39  ;;  %864 = vmatpush.msrb.mxu3 %v440_v57  ;;  %v418_v59 = vld [vmem:[%s2256_s3 + $0x728] sm:$0xff]  ;;  %v435_v60 = vld [vmem:[%s2256_s3 + $0x7b0] sm:$0xff]  ;;  %v385_v61 = vld [vmem:[%s2256_s3 + $0x620] sm:$0xff] }
  0x76   :  { %806 = vmatpush.msrb.mxu0 %v390_v40  ;;  %825 = vmatpush.msrb.mxu1 %v407_v41  ;;  %v402_v62 = vld [vmem:[%s2256_s3 + $0x6a8] sm:$0xff]  ;;  %v417_v63 = vld [vmem:[%s2256_s3 + $0x720] sm:$0xff]  ;;  %v384_v1 = vld [vmem:[%s2256_s3 + $0x618] sm:$0xff] }
  0x77   :  { %846 = vmatpush.msrb.mxu2 %v422_v42  ;;  %865 = vmatpush.msrb.mxu3 %v439_v43  ;;  %v434_v0 = vld [vmem:[%s2256_s3 + $0x7a8] sm:$0xff]  ;;  %v401_v2 = vld [vmem:[%s2256_s3 + $0x6a0] sm:$0xff]  ;;  %v416_v3 = vld [vmem:[%s2256_s3 + $0x718] sm:$0xff] }
  0x78   :  { %807 = vmatpush.msrb.mxu0 %v389_v25  ;;  %826 = vmatpush.msrb.mxu1 %v406_v44  ;;  %v433_v4 = vld [vmem:[%s2256_s3 + $0x7a0] sm:$0xff]  ;;  %v383_v26 = vld [vmem:[%s2256_s3 + $0x610] sm:$0xff]  ;;  %v400_v5 = vld [vmem:[%s2256_s3 + $0x698] sm:$0xff] }
  0x79   :  { %847 = vmatpush.msrb.mxu2 %v421_v45  ;;  %866 = vmatpush.msrb.mxu3 %v438_v46  ;;  %v415_v6 = vld [vmem:[%s2256_s3 + $0x710] sm:$0xff]  ;;  %v432_v7 = vld [vmem:[%s2256_s3 + $0x798] sm:$0xff]  ;;  %v382_v8 = vld [vmem:[%s2256_s3 + $0x608] sm:$0xff] }
  0x7a   :  { %808 = vmatpush.msrb.mxu0 %v388_v47  ;;  %827 = vmatpush.msrb.mxu1 %v405_v48  ;;  %v399_v9 = vld [vmem:[%s2256_s3 + $0x690] sm:$0xff]  ;;  %v414_v10 = vld [vmem:[%s2256_s3 + $0x708] sm:$0xff]  ;;  %v381_v12 = vld [vmem:[%s2256_s3 + $0x600] sm:$0xff] }
  0x7b   :  { %848 = vmatpush.msrb.mxu2 %v420_v49  ;;  %867 = vmatpush.msrb.mxu3 %v437_v51  ;;  %v431_v11 = vld [vmem:[%s2256_s3 + $0x790] sm:$0xff]  ;;  %v398_v13 = vld [vmem:[%s2256_s3 + $0x688] sm:$0xff]  ;;  %v413_v14 = vld [vmem:[%s2256_s3 + $0x700] sm:$0xff] }
  0x7c   :  { %809 = vmatpush.msrb.mxu0 %v387_v52  ;;  %828 = vmatpush.msrb.mxu1 %v404_v53  ;;  %v430_v15 = vld [vmem:[%s2256_s3 + $0x788] sm:$0xff]  ;;  %v531_v16 = vld.sshfl [vmem:[#allocation1 + $0x20] sm:$0xff pattern:$0x73625140]  ;;  %v460_v18 = vld [vmem:[%s2256_s3 + $0x878] sm:$0xff] }
  0x7d   :  { %849 = vmatpush.msrb.mxu2 %v419_v54  ;;  %868 = vmatpush.msrb.mxu3 %v436_v55  ;;  %v533_v17 = vld.sshfl [vmem:[#allocation1 + $0x30] sm:$0xff pattern:$0x73625140]  ;;  %v492_v19 = vld [vmem:[%s2256_s3 + $0x978] sm:$0xff]  ;;  %v397_v20 = vld [vmem:[%s2256_s3 + $0x680] sm:$0xff] }
  0x7e   :  { %810 = vmatpush.msrb.mxu0 %v386_v56  ;;  %829 = vmatpush.msrb.mxu1 %v403_v58  ;;  %v429_v50 = vld [vmem:[%s2256_s3 + $0x780] sm:$0xff]  ;;  %v532_v21 = vld.sshfl [vmem:[#allocation1 + $0x28] sm:$0xff pattern:$0x73625140]  ;;  %v459_v23 = vld [vmem:[%s2256_s3 + $0x870] sm:$0xff] }
  0x7f   :  { %850 = vmatpush.msrb.mxu2 %v418_v59  ;;  %869 = vmatpush.msrb.mxu3 %v435_v60  ;;  %v534_v22 = vld.sshfl [vmem:[#allocation1 + $0x38] sm:$0xff pattern:$0x73625140]  ;;  %v491_v27 = vld [vmem:[%s2256_s3 + $0x970] sm:$0xff]  ;;  %v458_v29 = vld [vmem:[%s2256_s3 + $0x868] sm:$0xff] }
  0x80   :  { %811 = vmatpush.msrb.mxu0 %v385_v61  ;;  %830 = vmatpush.msrb.mxu1 %v402_v62  ;;  %v476_v24 = vld [vmem:[%s2256_s3 + $0x8f8] sm:$0xff]  ;;  %v475_v30 = vld [vmem:[%s2256_s3 + $0x8f0] sm:$0xff]  ;;  %v490_v31 = vld [vmem:[%s2256_s3 + $0x968] sm:$0xff] }
  0x81   :  { %851 = vmatpush.msrb.mxu2 %v417_v63  ;;  %870 = vmatpush.msrb.mxu3 %v434_v0  ;;  %v508_v28 = vld [vmem:[%s2256_s3 + $0x9f8] sm:$0xff]  ;;  %v507_v32 = vld [vmem:[%s2256_s3 + $0x9f0] sm:$0xff]  ;;  %v457_v33 = vld [vmem:[%s2256_s3 + $0x860] sm:$0xff] }
  0x82   :  { %812 = vmatpush.msrb.mxu0 %v384_v1  ;;  %831 = vmatpush.msrb.mxu1 %v401_v2  ;;  %v474_v34 = vld [vmem:[%s2256_s3 + $0x8e8] sm:$0xff]  ;;  %v489_v35 = vld [vmem:[%s2256_s3 + $0x960] sm:$0xff]  ;;  %v456_v37 = vld [vmem:[%s2256_s3 + $0x858] sm:$0xff] }
  0x83   :  { %852 = vmatpush.msrb.mxu2 %v416_v3  ;;  %871 = vmatpush.msrb.mxu3 %v433_v4  ;;  %v506_v36 = vld [vmem:[%s2256_s3 + $0x9e8] sm:$0xff]  ;;  %v473_v38 = vld [vmem:[%s2256_s3 + $0x8e0] sm:$0xff]  ;;  %v488_v39 = vld [vmem:[%s2256_s3 + $0x958] sm:$0xff] }
  0x84   :  { %813 = vmatpush.msrb.mxu0 %v383_v26  ;;  %832 = vmatpush.msrb.mxu1 %v400_v5  ;;  %v505_v57 = vld [vmem:[%s2256_s3 + $0x9e0] sm:$0xff]  ;;  %v455_v40 = vld [vmem:[%s2256_s3 + $0x850] sm:$0xff]  ;;  %v472_v41 = vld [vmem:[%s2256_s3 + $0x8d8] sm:$0xff] }
  0x85   :  { %853 = vmatpush.msrb.mxu2 %v415_v6  ;;  %872 = vmatpush.msrb.mxu3 %v432_v7  ;;  %v487_v42 = vld [vmem:[%s2256_s3 + $0x950] sm:$0xff]  ;;  %v504_v43 = vld [vmem:[%s2256_s3 + $0x9d8] sm:$0xff]  ;;  %v454_v25 = vld [vmem:[%s2256_s3 + $0x848] sm:$0xff] }
  0x86   :  { %814 = vmatpush.msrb.mxu0 %v382_v8  ;;  %833 = vmatpush.msrb.mxu1 %v399_v9  ;;  %v471_v44 = vld [vmem:[%s2256_s3 + $0x8d0] sm:$0xff]  ;;  %v486_v45 = vld [vmem:[%s2256_s3 + $0x948] sm:$0xff]  ;;  %v453_v47 = vld [vmem:[%s2256_s3 + $0x840] sm:$0xff] }
  0x87   :  { %854 = vmatpush.msrb.mxu2 %v414_v10  ;;  %873 = vmatpush.msrb.mxu3 %v431_v11  ;;  %v503_v46 = vld [vmem:[%s2256_s3 + $0x9d0] sm:$0xff]  ;;  %v470_v48 = vld [vmem:[%s2256_s3 + $0x8c8] sm:$0xff]  ;;  %v485_v49 = vld [vmem:[%s2256_s3 + $0x940] sm:$0xff] }
  0x88   :  { %815 = vmatpush.msrb.mxu0 %v381_v12  ;;  %834 = vmatpush.msrb.mxu1 %v398_v13  ;;  %v502_v51 = vld [vmem:[%s2256_s3 + $0x9c8] sm:$0xff]  ;;  %v452_v52 = vld [vmem:[%s2256_s3 + $0x838] sm:$0xff]  ;;  %v469_v53 = vld [vmem:[%s2256_s3 + $0x8c0] sm:$0xff] }
  0x89   :  { %855 = vmatpush.msrb.mxu2 %v413_v14  ;;  %874 = vmatpush.msrb.mxu3 %v430_v15  ;;  %v484_v54 = vld [vmem:[%s2256_s3 + $0x938] sm:$0xff]  ;;  %v501_v55 = vld [vmem:[%s2256_s3 + $0x9c0] sm:$0xff]  ;;  %v451_v56 = vld [vmem:[%s2256_s3 + $0x830] sm:$0xff] }
  0x8a   :  { %816 = vmatmul.f32.vlgmr.msrb.gmra.mxu0 %v531_v16  ;;  %856 = vmatmul.f32.vlgmr.msrb.gmra.mxu2 %v533_v17  ;;  %v468_v58 = vld [vmem:[%s2256_s3 + $0x8b8] sm:$0xff]  ;;  %v483_v59 = vld [vmem:[%s2256_s3 + $0x930] sm:$0xff]  ;;  %v450_v61 = vld [vmem:[%s2256_s3 + $0x828] sm:$0xff] }
  0x8b   :  { %880 = vmatpush.msra.mxu0 %v460_v18  ;;  %920 = vmatpush.msra.mxu2 %v492_v19  ;;  %v500_v60 = vld [vmem:[%s2256_s3 + $0x9b8] sm:$0xff]  ;;  %v467_v62 = vld [vmem:[%s2256_s3 + $0x8b0] sm:$0xff]  ;;  %v482_v63 = vld [vmem:[%s2256_s3 + $0x928] sm:$0xff] }
  0x8c   :  { %835 = vmatpush.msrb.mxu1 %v397_v20  ;;  %875 = vmatpush.msrb.mxu3 %v429_v50  ;;  %v499_v0 = vld [vmem:[%s2256_s3 + $0x9b0] sm:$0xff]  ;;  %v449_v1 = vld [vmem:[%s2256_s3 + $0x820] sm:$0xff]  ;;  %v466_v2 = vld [vmem:[%s2256_s3 + $0x8a8] sm:$0xff] }
  0x8d   :  { %836 = vmatmul.f32.vlgmr.msrb.gmra.mxu1 %v532_v21  ;;  %876 = vmatmul.f32.vlgmr.msrb.gmra.mxu3 %v534_v22  ;;  %v481_v3 = vld [vmem:[%s2256_s3 + $0x920] sm:$0xff]  ;;  %v498_v4 = vld [vmem:[%s2256_s3 + $0x9a8] sm:$0xff]  ;;  %v448_v26 = vld [vmem:[%s2256_s3 + $0x818] sm:$0xff] }
  0x8e   :  { %881 = vmatpush.msra.mxu0 %v459_v23  ;;  %900 = vmatpush.msra.mxu1 %v476_v24  ;;  %v465_v5 = vld [vmem:[%s2256_s3 + $0x8a0] sm:$0xff]  ;;  %v480_v6 = vld [vmem:[%s2256_s3 + $0x918] sm:$0xff]  ;;  %v447_v8 = vld [vmem:[%s2256_s3 + $0x810] sm:$0xff] }
  0x8f   :  { %921 = vmatpush.msra.mxu2 %v491_v27  ;;  %940 = vmatpush.msra.mxu3 %v508_v28  ;;  %v497_v7 = vld [vmem:[%s2256_s3 + $0x9a0] sm:$0xff]  ;;  %v464_v9 = vld [vmem:[%s2256_s3 + $0x898] sm:$0xff]  ;;  %v479_v10 = vld [vmem:[%s2256_s3 + $0x910] sm:$0xff] }
  0x90   :  { %882 = vmatpush.msra.mxu0 %v458_v29  ;;  %901 = vmatpush.msra.mxu1 %v475_v30  ;;  %v496_v11 = vld [vmem:[%s2256_s3 + $0x998] sm:$0xff]  ;;  %v446_v12 = vld [vmem:[%s2256_s3 + $0x808] sm:$0xff]  ;;  %v463_v13 = vld [vmem:[%s2256_s3 + $0x890] sm:$0xff] }
  0x91   :  { %922 = vmatpush.msra.mxu2 %v490_v31  ;;  %941 = vmatpush.msra.mxu3 %v507_v32  ;;  %v478_v14 = vld [vmem:[%s2256_s3 + $0x908] sm:$0xff]  ;;  %v495_v15 = vld [vmem:[%s2256_s3 + $0x990] sm:$0xff]  ;;  %v445_v16 = vld [vmem:[%s2256_s3 + $0x800] sm:$0xff] }
  0x92   :  { %883 = vmatpush.msra.mxu0 %v457_v33  ;;  %902 = vmatpush.msra.mxu1 %v474_v34  ;;  %v462_v17 = vld [vmem:[%s2256_s3 + $0x888] sm:$0xff]  ;;  %v477_v18 = vld [vmem:[%s2256_s3 + $0x900] sm:$0xff]  ;;  %v538_v50 = vld.sshfl [vmem:[#allocation1 + $0x10] sm:$0xff pattern:$0x73625140] }
  0x93   :  { %923 = vmatpush.msra.mxu2 %v489_v35  ;;  %942 = vmatpush.msra.mxu3 %v506_v36  ;;  %v494_v19 = vld [vmem:[%s2256_s3 + $0x988] sm:$0xff]  ;;  %v536_v20 = vld.sshfl [vmem:[#allocation1] sm:$0xff pattern:$0x73625140] }
  0x94   :  { %884 = vmatpush.msra.mxu0 %v456_v37  ;;  %903 = vmatpush.msra.mxu1 %v473_v38  ;;  %v461_v21 = vld [vmem:[%s2256_s3 + $0x880] sm:$0xff]  ;;  %v537_v23 = vld.sshfl [vmem:[#allocation1 + $0x8] sm:$0xff pattern:$0x73625140] }
  0x95   :  { %924 = vmatpush.msra.mxu2 %v488_v39  ;;  %943 = vmatpush.msra.mxu3 %v505_v57  ;;  %v493_v22 = vld [vmem:[%s2256_s3 + $0x980] sm:$0xff]  ;;  %v539_v24 = vld.sshfl [vmem:[#allocation1 + $0x18] sm:$0xff pattern:$0x73625140]  ;;  %v1012_v57 = vld [vmem:[%s2259_s6 + $0x8] sm:$0xff] }
  0x96   :  { %885 = vmatpush.msra.mxu0 %v455_v40  ;;  %904 = vmatpush.msra.mxu1 %v472_v41 }
  0x97   :  { %925 = vmatpush.msra.mxu2 %v487_v42  ;;  %944 = vmatpush.msra.mxu3 %v504_v43  ;;  %v1011_v43 = vld [vmem:[%s2259_s6] sm:$0xff] }
  0x98   :  { %886 = vmatpush.msra.mxu0 %v454_v25  ;;  %905 = vmatpush.msra.mxu1 %v471_v44  ;;  %v961_v25 = vld [vmem:[%s2257_s4 + $0x8] sm:$0xff] }
  0x99   :  { %926 = vmatpush.msra.mxu2 %v486_v45  ;;  %945 = vmatpush.msra.mxu3 %v503_v46  ;;  %v960_v45 = vld [vmem:[%s2257_s4] sm:$0xff] }
  0x9a   :  { %887 = vmatpush.msra.mxu0 %v453_v47  ;;  %906 = vmatpush.msra.mxu1 %v470_v48 }
  0x9b   :  { %927 = vmatpush.msra.mxu2 %v485_v49  ;;  %946 = vmatpush.msra.mxu3 %v502_v51 }
  0x9c   :  { %888 = vmatpush.msra.mxu0 %v452_v52  ;;  %907 = vmatpush.msra.mxu1 %v469_v53 }
  0x9d   :  { %928 = vmatpush.msra.mxu2 %v484_v54  ;;  %947 = vmatpush.msra.mxu3 %v501_v55 }
  0x9e   :  { %889 = vmatpush.msra.mxu0 %v451_v56  ;;  %908 = vmatpush.msra.mxu1 %v468_v58 }
  0x9f   :  { %929 = vmatpush.msra.mxu2 %v483_v59  ;;  %948 = vmatpush.msra.mxu3 %v500_v60 }
  0xa0   :  { %890 = vmatpush.msra.mxu0 %v450_v61  ;;  %909 = vmatpush.msra.mxu1 %v467_v62 }
  0xa1   :  { %930 = vmatpush.msra.mxu2 %v482_v63  ;;  %949 = vmatpush.msra.mxu3 %v499_v0 }
  0xa2   :  { %891 = vmatpush.msra.mxu0 %v449_v1  ;;  %910 = vmatpush.msra.mxu1 %v466_v2 }
  0xa3   :  { %931 = vmatpush.msra.mxu2 %v481_v3  ;;  %950 = vmatpush.msra.mxu3 %v498_v4 }
  0xa4   :  { %892 = vmatpush.msra.mxu0 %v448_v26  ;;  %911 = vmatpush.msra.mxu1 %v465_v5  ;;  %v1074_v5 = vld [vmem:[#allocation2] ss:$0 sm:$0xff] }
  0xa5   :  { %932 = vmatpush.msra.mxu2 %v480_v6  ;;  %951 = vmatpush.msra.mxu3 %v497_v7  ;;  %v1075_v6 = vld [vmem:[%s2260_s7] ss:$0 sm:$0xff] }
  0xa6   :  { %893 = vmatpush.msra.mxu0 %v447_v8  ;;  %912 = vmatpush.msra.mxu1 %v464_v9 }
  0xa7   :  { %933 = vmatpush.msra.mxu2 %v479_v10  ;;  %952 = vmatpush.msra.mxu3 %v496_v11 }
  0xa8   :  { %894 = vmatpush.msra.mxu0 %v446_v12  ;;  %913 = vmatpush.msra.mxu1 %v463_v13 }
  0xa9   :  { %934 = vmatpush.msra.mxu2 %v478_v14  ;;  %953 = vmatpush.msra.mxu3 %v495_v15 }
  0xaa   :  { %895 = vmatpush.msra.mxu0 %v445_v16  ;;  %914 = vmatpush.msra.mxu1 %v462_v17 }
  0xab   :  { %935 = vmatpush.msra.mxu2 %v477_v18  ;;  %954 = vmatpush.msra.mxu3 %v494_v19 }
  0xac   :  { %896 = vmatmul.f32.vlgmr.msra.gmra.mxu0 %v536_v20  ;;  %936 = vmatmul.f32.vlgmr.msra.gmra.mxu2 %v538_v50 }
  0xad   :  { %915 = vmatpush.msra.mxu1 %v461_v21  ;;  %955 = vmatpush.msra.mxu3 %v493_v22 }
  0xae   :  { %916 = vmatmul.f32.vlgmr.msra.gmra.mxu1 %v537_v23  ;;  %956 = vmatmul.f32.vlgmr.msra.gmra.mxu3 %v539_v24 }
  0xaf   :  { %1031 = vmatpush.msrb.mxu1 %v1012_v57  ;;  %984 = vmatpush.msrb.mxu0 %v961_v25 }
  0xb1   :  { %1032 = vmatpush.msrb.mxu1 %v1011_v43  ;;  %985 = vmatpush.msrb.mxu0 %v960_v45 }
  0xc1   :  { %v577_v28 = vpop.f32.mrf.mxu0 }
  0xc4   :  { %v597_v27 = vpop.f32.mrf.mxu1 }
  0xc5   :  { %v598_v29 = vadd.f32 %v597_v27, %v577_v28 }
  0xc6   :  { %v617_v30 = vpop.f32.mrf.mxu2 }
  0xc7   :  { %v618_v31 = vadd.f32 %v617_v30, %v598_v29 }
  0xc8   :  { %v637_v32 = vpop.f32.mrf.mxu3 }
  0xc9   :  { %v638_v33 = vadd.f32 %v637_v32, %v618_v31 }
  0xcd   :  { %v657_v34 = vpop.f32.mrf.mxu0 }
  0xce   :  { %v658_v35 = vadd.f32 %v657_v34, %v638_v33  ;;  %v677_v36 = vpop.f32.mrf.mxu1 }
  0xd0   :  { %v678_v37 = vadd.f32 %v677_v36, %v658_v35 }
  0xd3   :  { %v697_v38 = vpop.f32.mrf.mxu2 }
  0xd4   :  { %v698_v39 = vadd.f32 %v697_v38, %v678_v37  ;;  %v717_v40 = vpop.f32.mrf.mxu3 }
  0xd6   :  { %v718_v42 = vadd.f32 %v717_v40, %v698_v39 }
  0xe5   :  { %v737_v41 = vpop.f32.mrf.mxu0 }
  0xe6   :  { %v738_v44 = vadd.f32 %v737_v41, %v718_v42 }
  0xe8   :  { %v757_v46 = vpop.f32.mrf.mxu1 }
  0xe9   :  { %v758_v48 = vadd.f32 %v757_v46, %v738_v44 }
  0xeb   :  { %v777_v47 = vpop.f32.mrf.mxu2 }
  0xec   :  { %v778_v49 = vadd.f32 %v777_v47, %v758_v48 }
  0xee   :  { %v797_v51 = vpop.f32.mrf.mxu3 }
  0xef   :  { %v798_v53 = vadd.f32 %v797_v51, %v778_v49 }
 0x107   :  { %v817_v52 = vpop.f32.mrf.mxu0 }
 0x108   :  { %v818_v54 = vadd.f32 %v817_v52, %v798_v53 }
 0x10a   :  { %v837_v55 = vpop.f32.mrf.mxu1 }
 0x10b   :  { %v838_v58 = vadd.f32 %v837_v55, %v818_v54 }
 0x10d   :  { %v857_v56 = vpop.f32.mrf.mxu2 }
 0x10e   :  { %v858_v59 = vadd.f32 %v857_v56, %v838_v58 }
 0x110   :  { %v877_v60 = vpop.f32.mrf.mxu3 }
 0x111   :  { %v878_v61 = vadd.f32 %v877_v60, %v858_v59 }
 0x129   :  { %v897_v62 = vpop.f32.mrf.mxu0 }
 0x12a   :  { %v898_v63 = vadd.f32 %v897_v62, %v878_v61 }
 0x12b   :  { %v917_v0 = vpop.f32.mrf.mxu1 }
 0x12c   :  { %v918_v1 = vadd.f32 %v917_v0, %v898_v63 }
 0x12f   :  { %v937_v2 = vpop.f32.mrf.mxu2 }
 0x130   :  { %v938_v3 = vadd.f32 %v937_v2, %v918_v1 }
 0x131   :  { %v957_v4 = vpop.f32.mrf.mxu3 }
 0x132   :  { %v958_v26 = vadd.f32 %v957_v4, %v938_v3 }
 0x134   :  { %1071 = vmatmul.msk.f32.vlgmr.msrb.gmra.mxu0 %vm966_vm8, %v958_v26  ;;  %1072 = vmatmul.msk.f32.vlgmr.msrb.gmra.mxu1 %vm966_vm8, %v958_v26 }
 0x1b1   :  { %v987_v7 = vpop.f32.mrf.mxu0  ;;  %v1034_v8 = vpop.f32.mrf.mxu1 }
 0x1b2   :  { %v988_v9 = vadd.f32 %v1074_v5, %v987_v7  ;;  %v1035_v10 = vadd.f32 %v1075_v6, %v1034_v8 }
 0x1b4   :  { %v990_v11 = vsub.f32 0.0, %v988_v9  ;;  %v1038_v12 = vsel %vm1037_vm9, %v1035_v10, -inf }
 0x1b5   :  { %1039 = vmax.xlane.f32.xlu0 %v1038_v12 }
 0x1b6   :  { %v991_v13 = vmul.f32 1.442695, %v990_v11 }
 0x1b8   :  { %1076 = vpow2.f32 %v991_v13 }
 0x1be   :  { %v1077_v14 = vpop.eup %1076 }
 0x1bf   :  { %v993_v15 = vadd.f32 1.0, %v1077_v14 }
 0x1c1   :  { %1078 = vrcp.f32 %v993_v15  ;;  %v1005_v19 = vand.u32 2147483648, %v993_v15  ;;  %v1003_v50 = vand.u32 2147483647, %v993_v15  ;;  %vm999_vm11 = vweird.f32 %v993_v15 }
 0x1c3   :  { %v1006_v22 = vor.u32 1.1754944e-38, %v1005_v19  ;;  %vm1004_vm14 = vcmp.eq.f32.partialorder %v1003_v50, 8.507059e+37 }
 0x1c7   :  { %v1079_v16 = vpop.eup %1078 }
 0x1c8   :  { %v995_v17 = vmul.f32 %v1079_v16, %v993_v15  ;;  %vm1000_vm10 = vweird.f32 %v1079_v16 }
 0x1c9   :  { %vm1001_vm12 = vmor %vm999_vm11, %vm1000_vm10 }
 0x1ca   :  { %v996_v18 = vsub.f32 1.0, %v995_v17 }
 0x1cc   :  { %v997_v20 = vmul.f32 %v1079_v16, %v996_v18 }
 0x1ce   :  { %v998_v21 = vadd.f32 %v1079_v16, %v997_v20 }
 0x1d0   :  { %v1002_v23 = vsel %vm1001_vm12, %v1079_v16, %v998_v21 }
 0x1d1   :  { %v1007_v24 = vsel %vm1004_vm14, %v1006_v22, %v1002_v23 }
 0x1d2   :  { %1010 = vst.msk [vmem:[%s2261_s8] sm:$0x3] %vm1009_vm13, %v1007_v24 }
 0x228   :  { %v1040_v27 = vpop.xlane.xlu0 %1039 }
 0x229   :  { %v1041_v28 = vsub.f32 %v1035_v10, %v1040_v27 }
 0x22b   :  { %v1042_v29 = vmul.f32 1.442695, %v1041_v28 }
 0x22d   :  { %1080 = vpow2.f32 %v1042_v29 }
 0x233   :  { %v1081_v30 = vpop.eup %1080 }
 0x234   :  { %v1044_v31 = vsel %vm1037_vm9, %v1081_v30, 0.0 }
 0x235   :  { %1045 = vadd.xlane.f32.xlu0 %v1044_v31 }
 0x2a8   :  { %v1046_v32 = vpop.xlane.xlu0 %1045 }
 0x2a9   :  { %1082 = vlog2.f32 %v1046_v32 }
 0x2af   :  { %v1083_v33 = vpop.eup %1082 }
 0x2b0   :  { %v1048_v34 = vmul.f32 0.6931472, %v1083_v33 }
 0x2b2   :  { %v1049_v35 = vsub.f32 %v1041_v28, %v1048_v34 }
 0x2b4   :  { %1050 = vst.msk [vmem:[#allocation3] sm:$0x3] %vm1037_vm9, %v1049_v35 }
 0x2b5   :  { %1063 = dma.vmem_to_hbm [thread:$0]  %s1059_s0, 32, %s1061_s26, [#allocation4]  }
 0x2b6   :  { %1108 = dma.done.wait [#allocation4], 32  }
 0x2b7   :  { %1109 = vsyncadd [#allocation4], 4294967264 }
 0x2b8   :  { %1070 = vsyncpa [#allocation4], 1 }

</bundles_post_ra>
